<compile_context>
chip_gen: v5e
topology: v5e:2x2
jax: 0.10.0
libtpu: 0.0.40
codegen_flags: <defaults>
</compile_context>

<pallas_src>
import jax
import jax.numpy as jnp
from jax.experimental import pallas as pl
from jax.experimental.pallas import tpu as pltpu

IN_DIM = 547
HID = 1024
OUT_DIM = 235 * 4      # 940
IN_PAD = 640           # next multiple of 128 >= 547
OUT_PAD = 1024         # next multiple of 128 >= 940


def _mlp_kernel(x_ref, w1_ref, b1_ref, w2_ref, b2_ref, w3_ref, b3_ref,
                o_ref, h1_ref, h2_ref):
    # Layer 1: Linear(640, 1024) + ReLU.  bf16 x bf16 -> f32 on the MXU.
    h1 = jnp.dot(x_ref[...], w1_ref[...], preferred_element_type=jnp.float32)
    h1_ref[...] = jnp.maximum(h1 + b1_ref[...], 0.0)
    # Layer 2: Linear(1024, 1024) + ReLU.
    h2 = jnp.dot(h1_ref[...].astype(jnp.bfloat16), w2_ref[...],
                 preferred_element_type=jnp.float32)
    h2_ref[...] = jnp.maximum(h2 + b2_ref[...], 0.0)
    # Layer 3: Linear(1024, 1024-padded) (no activation); lane-dense store.
    h3 = jnp.dot(h2_ref[...].astype(jnp.bfloat16), w3_ref[...],
                 preferred_element_type=jnp.float32)
    o_ref[...] = (h3 + b3_ref[...]).astype(o_ref.dtype)


def neural_network_forward(x, params):
    """Pallas equivalent of NeuralNetwork.forward (the linear_relu_stack output).

    x: (B, ...) — flattened to (B, 547) like nn.Flatten.
    params: padded / bf16 kernel-format params from init_params().
    Returns (B, 940) float32.
    """
    w1, b1, w2, b2, w3, b3 = params
    B = x.shape[0]
    x2d = x.reshape(B, -1)
    assert x2d.shape[1] == IN_DIM, f"expected {IN_DIM} features, got {x2d.shape[1]}"

    # Batch tile: multiple of 8 (sublane), capped at 256 rows per grid step.
    tb = min(256, ((B + 7) // 8) * 8)
    bp = pl.cdiv(B, tb) * tb

    # Zero-pad batch rows and feature columns (exact zeros -> results unchanged),
    # cast to bf16 for the MXU input path.
    xp = jnp.pad(x2d.astype(jnp.float32),
                 ((0, bp - B), (0, IN_PAD - IN_DIM))).astype(jnp.bfloat16)

    flops = 2 * bp * (IN_PAD * HID + HID * HID + HID * OUT_PAD)
    bytes_accessed = (
        bp * IN_PAD * 2                                      # x (bf16)
        + (IN_PAD * HID + HID * HID + HID * OUT_PAD) * 2     # weights (bf16)
        + (HID + HID + OUT_PAD) * 4                          # biases (f32)
        + bp * OUT_PAD * 4)                                  # output (f32)

    const = lambda shape: pl.BlockSpec(shape, lambda i: (0, 0))

    out = pl.pallas_call(
        _mlp_kernel,
        out_shape=jax.ShapeDtypeStruct((bp, OUT_PAD), jnp.float32),
        grid=(bp // tb,),
        in_specs=[
            pl.BlockSpec((tb, IN_PAD), lambda i: (i, 0)),    # x tile (pipelined)
            const((IN_PAD, HID)), const((1, HID)),           # w1, b1 (VMEM-resident)
            const((HID, HID)), const((1, HID)),              # w2, b2
            const((HID, OUT_PAD)), const((1, OUT_PAD)),      # w3, b3
        ],
        out_specs=pl.BlockSpec((tb, OUT_PAD), lambda i: (i, 0)),
        scratch_shapes=[pltpu.VMEM((tb, HID), jnp.float32),
                        pltpu.VMEM((tb, HID), jnp.float32)],
        compiler_params=pltpu.CompilerParams(
            dimension_semantics=("parallel",),
            vmem_limit_bytes=32 * 1024 * 1024),
        cost_estimate=pl.CostEstimate(
            flops=flops, transcendentals=0, bytes_accessed=bytes_accessed),
    )(xp, w1, b1, w2, b2, w3, b3)

    return out[:B, :OUT_DIM]


def init_params(key):
    """Deterministic synthetic parameters, nn.Linear-style uniform init,
    stored in kernel format: zero-padded to MXU-friendly shapes, weights bf16,
    biases f32."""
    ks = jax.random.split(key, 6)

    def linear(kw, kb, fan_in, fan_out, fan_in_pad, fan_out_pad):
        bound = 1.0 / jnp.sqrt(fan_in)
        w = jax.random.uniform(kw, (fan_in, fan_out), jnp.float32, -bound, bound)
        b = jax.random.uniform(kb, (1, fan_out), jnp.float32, -bound, bound)
        w = jnp.pad(w, ((0, fan_in_pad - fan_in), (0, fan_out_pad - fan_out)))
        b = jnp.pad(b, ((0, 0), (0, fan_out_pad - fan_out)))
        return w.astype(jnp.bfloat16), b

    w1, b1 = linear(ks[0], ks[1], IN_DIM, HID, IN_PAD, HID)
    w2, b2 = linear(ks[2], ks[3], HID, HID, HID, HID)
    w3, b3 = linear(ks[4], ks[5], HID, OUT_DIM, HID, OUT_PAD)
    return (w1, b1, w2, b2, w3, b3)


def reference_forward(x, params):
    """Plain-JAX reference using the same bf16 weights / bf16 activations."""
    w1, b1, w2, b2, w3, b3 = params
    xb = jnp.pad(x.reshape(x.shape[0], -1).astype(jnp.float32),
                 ((0, 0), (0, IN_PAD - IN_DIM))).astype(jnp.bfloat16)
    h = jnp.maximum(jnp.dot(xb, w1, preferred_element_type=jnp.float32) + b1, 0.0)
    h = jnp.maximum(jnp.dot(h.astype(jnp.bfloat16), w2,
                            preferred_element_type=jnp.float32) + b2, 0.0)
    out = jnp.dot(h.astype(jnp.bfloat16), w3,
                  preferred_element_type=jnp.float32) + b3
    return out[:, :OUT_DIM]


if __name__ == "__main__":
    key = jax.random.PRNGKey(0)
    kx, kp = jax.random.split(key)

    B = 4
    x = jax.random.normal(kx, (B, IN_DIM), jnp.float32)
    params = init_params(kp)

    pred = neural_network_forward(x, params)
    jax.block_until_ready(pred)

    ref = reference_forward(x, params)
    assert pred.shape == (B, OUT_DIM)
    err = float(jnp.max(jnp.abs(pred - ref)))
    assert jnp.allclose(pred, ref, atol=1e-2, rtol=1e-2), f"max abs err {err}"

    # TODO(synk): the original PyTorch forward has no `return` statement (returns
    # None); this implementation returns the computed `pred` tensor instead.
    print("KERNEL_OK")
</pallas_src>

<mosaic_0001>
module attributes {stable_mosaic.version = 11 : i64} {
  func.func @_mlp_kernel(%arg0: i32, %arg1: memref<8x640xbf16, #tpu.memory_space<vmem>>, %arg2: memref<640x1024xbf16, #tpu.memory_space<vmem>>, %arg3: memref<1x1024xf32, #tpu.memory_space<vmem>>, %arg4: memref<1024x1024xbf16, #tpu.memory_space<vmem>>, %arg5: memref<1x1024xf32, #tpu.memory_space<vmem>>, %arg6: memref<1024x1024xbf16, #tpu.memory_space<vmem>>, %arg7: memref<1x1024xf32, #tpu.memory_space<vmem>>, %arg8: memref<8x1024xf32, #tpu.memory_space<vmem>>, %arg9: memref<8x1024xf32, #tpu.memory_space<vmem>>, %arg10: memref<8x1024xf32, #tpu.memory_space<vmem>>) attributes {dimension_semantics = [#tpu.dimension_semantics<parallel>], iteration_bounds = array<i64: 1>, scalar_prefetch = 0 : i64, scratch_operands = 2 : i64, tpu.core_type = #tpu.core_type<tc>, window_params = [{transform_indices = @transform_0, window_bounds = array<i64: 8, 640>}, {pipeline_mode = #tpu.pipeline_mode<synchronous>, transform_indices = @transform_1, window_bounds = array<i64: 640, 1024>}, {pipeline_mode = #tpu.pipeline_mode<synchronous>, transform_indices = @transform_2, window_bounds = array<i64: 1, 1024>}, {pipeline_mode = #tpu.pipeline_mode<synchronous>, transform_indices = @transform_3, window_bounds = array<i64: 1024, 1024>}, {pipeline_mode = #tpu.pipeline_mode<synchronous>, transform_indices = @transform_4, window_bounds = array<i64: 1, 1024>}, {pipeline_mode = #tpu.pipeline_mode<synchronous>, transform_indices = @transform_5, window_bounds = array<i64: 1024, 1024>}, {pipeline_mode = #tpu.pipeline_mode<synchronous>, transform_indices = @transform_6, window_bounds = array<i64: 1, 1024>}, {transform_indices = @transform_7, window_bounds = array<i64: 8, 1024>}]} {
    %c0 = arith.constant 0 : index
    %c0_0 = arith.constant 0 : index
    %0 = vector.load %arg1[%c0, %c0_0] : memref<8x640xbf16, #tpu.memory_space<vmem>>, vector<8x640xbf16>
    %c0_1 = arith.constant 0 : index
    %c0_2 = arith.constant 0 : index
    %1 = vector.load %arg2[%c0_1, %c0_2] : memref<640x1024xbf16, #tpu.memory_space<vmem>>, vector<640x1024xbf16>
    %cst = arith.constant dense<0.000000e+00> : vector<8x1024xf32>
    %2 = tpu.matmul %0, %1, %cst {dimension_numbers = #tpu.dot_dimension_numbers<[1], [0], [0], [1], [0, 0, 1, 1], [], []>} : vector<8x640xbf16>, vector<640x1024xbf16>, vector<8x1024xf32> -> vector<8x1024xf32>
    %c0_3 = arith.constant 0 : index
    %c0_4 = arith.constant 0 : index
    %3 = vector.load %arg3[%c0_3, %c0_4] : memref<1x1024xf32, #tpu.memory_space<vmem>>, vector<1x1024xf32>
    %4 = vector.broadcast %3 : vector<1x1024xf32> to vector<8x1024xf32>
    %5 = arith.addf %2, %4 : vector<8x1024xf32>
    %cst_5 = arith.constant 0.000000e+00 : f32
    %6 = vector.broadcast %cst_5 : f32 to vector<8x1024xf32>
    %7 = arith.maximumf %5, %6 : vector<8x1024xf32>
    %c0_6 = arith.constant 0 : index
    %c0_7 = arith.constant 0 : index
    %8 = vector.load %arg9[%c0_6, %c0_7] : memref<8x1024xf32, #tpu.memory_space<vmem>>, vector<8x1024xf32>
    tpu.vector_store %arg9[%c0_6, %c0_7], %7 {strides = array<i32>} : memref<8x1024xf32, #tpu.memory_space<vmem>>, vector<8x1024xf32>,
    %c0_8 = arith.constant 0 : index
    %c0_9 = arith.constant 0 : index
    %9 = vector.load %arg9[%c0_8, %c0_9] : memref<8x1024xf32, #tpu.memory_space<vmem>>, vector<8x1024xf32>
    %10 = arith.truncf %9 : vector<8x1024xf32> to vector<8x1024xbf16>
    %c0_10 = arith.constant 0 : index
    %c0_11 = arith.constant 0 : index
    %11 = vector.load %arg4[%c0_10, %c0_11] : memref<1024x1024xbf16, #tpu.memory_space<vmem>>, vector<1024x1024xbf16>
    %cst_12 = arith.constant dense<0.000000e+00> : vector<8x1024xf32>
    %12 = tpu.matmul %10, %11, %cst_12 {dimension_numbers = #tpu.dot_dimension_numbers<[1], [0], [0], [1], [0, 0, 1, 1], [], []>} : vector<8x1024xbf16>, vector<1024x1024xbf16>, vector<8x1024xf32> -> vector<8x1024xf32>
    %c0_13 = arith.constant 0 : index
    %c0_14 = arith.constant 0 : index
    %13 = vector.load %arg5[%c0_13, %c0_14] : memref<1x1024xf32, #tpu.memory_space<vmem>>, vector<1x1024xf32>
    %14 = vector.broadcast %13 : vector<1x1024xf32> to vector<8x1024xf32>
    %15 = arith.addf %12, %14 : vector<8x1024xf32>
    %cst_15 = arith.constant 0.000000e+00 : f32
    %16 = vector.broadcast %cst_15 : f32 to vector<8x1024xf32>
    %17 = arith.maximumf %15, %16 : vector<8x1024xf32>
    %c0_16 = arith.constant 0 : index
    %c0_17 = arith.constant 0 : index
    %18 = vector.load %arg10[%c0_16, %c0_17] : memref<8x1024xf32, #tpu.memory_space<vmem>>, vector<8x1024xf32>
    tpu.vector_store %arg10[%c0_16, %c0_17], %17 {strides = array<i32>} : memref<8x1024xf32, #tpu.memory_space<vmem>>, vector<8x1024xf32>,
    %c0_18 = arith.constant 0 : index
    %c0_19 = arith.constant 0 : index
    %19 = vector.load %arg10[%c0_18, %c0_19] : memref<8x1024xf32, #tpu.memory_space<vmem>>, vector<8x1024xf32>
    %20 = arith.truncf %19 : vector<8x1024xf32> to vector<8x1024xbf16>
    %c0_20 = arith.constant 0 : index
    %c0_21 = arith.constant 0 : index
    %21 = vector.load %arg6[%c0_20, %c0_21] : memref<1024x1024xbf16, #tpu.memory_space<vmem>>, vector<1024x1024xbf16>
    %cst_22 = arith.constant dense<0.000000e+00> : vector<8x1024xf32>
    %22 = tpu.matmul %20, %21, %cst_22 {dimension_numbers = #tpu.dot_dimension_numbers<[1], [0], [0], [1], [0, 0, 1, 1], [], []>} : vector<8x1024xbf16>, vector<1024x1024xbf16>, vector<8x1024xf32> -> vector<8x1024xf32>
    %c0_23 = arith.constant 0 : index
    %c0_24 = arith.constant 0 : index
    %23 = vector.load %arg7[%c0_23, %c0_24] : memref<1x1024xf32, #tpu.memory_space<vmem>>, vector<1x1024xf32>
    %24 = vector.broadcast %23 : vector<1x1024xf32> to vector<8x1024xf32>
    %25 = arith.addf %22, %24 : vector<8x1024xf32>
    %c0_25 = arith.constant 0 : index
    %c0_26 = arith.constant 0 : index
    %26 = vector.load %arg8[%c0_25, %c0_26] : memref<8x1024xf32, #tpu.memory_space<vmem>>, vector<8x1024xf32>
    tpu.vector_store %arg8[%c0_25, %c0_26], %25 {strides = array<i32>} : memref<8x1024xf32, #tpu.memory_space<vmem>>, vector<8x1024xf32>,
    return
  }
  func.func @transform_0(%arg0: i32) -> (i32, i32) {
    %c0_i32 = arith.constant 0 : i32
    %c0_i32_0 = arith.constant 0 : i32
    return %arg0, %c0_i32 : i32, i32
  }
  func.func @transform_1(%arg0: i32) -> (i32, i32) {
    %c0_i32 = arith.constant 0 : i32
    %c0_i32_0 = arith.constant 0 : i32
    %c0_i32_1 = arith.constant 0 : i32
    return %c0_i32, %c0_i32_0 : i32, i32
  }
  func.func @transform_2(%arg0: i32) -> (i32, i32) {
    %c0_i32 = arith.constant 0 : i32
    %c0_i32_0 = arith.constant 0 : i32
    %c0_i32_1 = arith.constant 0 : i32
    return %c0_i32, %c0_i32_0 : i32, i32
  }
  func.func @transform_3(%arg0: i32) -> (i32, i32) {
    %c0_i32 = arith.constant 0 : i32
    %c0_i32_0 = arith.constant 0 : i32
    %c0_i32_1 = arith.constant 0 : i32
    return %c0_i32, %c0_i32_0 : i32, i32
  }
  func.func @transform_4(%arg0: i32) -> (i32, i32) {
    %c0_i32 = arith.constant 0 : i32
    %c0_i32_0 = arith.constant 0 : i32
    %c0_i32_1 = arith.constant 0 : i32
    return %c0_i32, %c0_i32_0 : i32, i32
  }
  func.func @transform_5(%arg0: i32) -> (i32, i32) {
    %c0_i32 = arith.constant 0 : i32
    %c0_i32_0 = arith.constant 0 : i32
    %c0_i32_1 = arith.constant 0 : i32
    return %c0_i32, %c0_i32_0 : i32, i32
  }
  func.func @transform_6(%arg0: i32) -> (i32, i32) {
    %c0_i32 = arith.constant 0 : i32
    %c0_i32_0 = arith.constant 0 : i32
    %c0_i32_1 = arith.constant 0 : i32
    return %c0_i32, %c0_i32_0 : i32, i32
  }
  func.func @transform_7(%arg0: i32) -> (i32, i32) {
    %c0_i32 = arith.constant 0 : i32
    %c0_i32_0 = arith.constant 0 : i32
    return %arg0, %c0_i32 : i32, i32
  }
}

</mosaic_0001>

<bundles_post_ra>
// kernel: tpu_custom_call.1
= control target key start
LH: loop header
LB: loop body
LE: loop exit
PB: predicated region body
PF: predicated region fallthrough
CT: control target
= control target key end

     0   :  { %12 = vsyncpa [#allocation5], 0  ;;  %s18119_s0 = inlined_call_operand.hbm [shape: bf16[8,640], index: 0, kind: input, shape index: {}]   ;;  %s18120_s1 = inlined_call_operand.hbm [shape: bf16[640,1024], index: 1, kind: input, shape index: {}]   ;;  %s18121_s2 = inlined_call_operand.hbm [shape: f32[1,1024], index: 2, kind: input, shape index: {}]   ;;  %s18122_s3 = inlined_call_operand.hbm [shape: bf16[1024,1024], index: 3, kind: input, shape index: {}]   ;;  %s18123_s4 = inlined_call_operand.hbm [shape: f32[1,1024], index: 4, kind: input, shape index: {}]   ;;  %s18124_s5 = inlined_call_operand.hbm [shape: bf16[1024,1024], index: 5, kind: input, shape index: {}]   ;;  %s18125_s6 = inlined_call_operand.hbm [shape: f32[1,1024], index: 6, kind: input, shape index: {}]   ;;  %s18126_s7 = inlined_call_operand.hbm [shape: f32[8,1024], index: 7, kind: output, shape index: {}]  }
   0x1   :  { %13 = vsyncpa [#allocation8], 0 }
   0x2   :  { %14 = vsyncpa [#allocation11], 0 }
   0x3   :  { %15 = vsyncpa [#allocation14], 0  ;;  %s32_s26 = sshll.u32 %s18120_s1, 4  ;;  %s33_s26 = int_to_ptr.hbm [resolvable:$true] %s32_s26 }
   0x4   :  { %16 = vsyncpa [#allocation6], 0  ;;  %s17483_s27 = smov [#allocation7]   ;;  %s56_s8 = sshll.u32 %s18122_s3, 4  ;;  %s57_s8 = int_to_ptr.hbm [resolvable:$true] %s56_s8 }
   0x5   :  { %s34_s28 = sshll.u32 %s17483_s27, 4  ;;  %s17484_s9 = smov 512   ;;  %s35_s28 = int_to_ptr.vmem [resolvable:$true] %s34_s28 }
   0x6   :  { %s17485_s10 = smov 32   ;;  %s17486_s11 = smov [#allocation10]  }
   0x7   :  { %40 = dma.hbm_to_vmem [thread:$0]  %s33_s26, 40960, %s35_s28, [#allocation8], %s17484_s9, %s17484_s9, %s17485_s10  }
   0x8   :  { %s58_s12 = sshll.u32 %s17486_s11, 4  ;;  %s80_s15 = sshll.u32 %s18124_s5, 4  ;;  %s59_s12 = int_to_ptr.vmem [resolvable:$true] %s58_s12  ;;  %s81_s15 = int_to_ptr.hbm [resolvable:$true] %s80_s15 }
   0x9   :  { %64 = dma.hbm_to_vmem [thread:$0]  %s57_s8, 65536, %s59_s12, [#allocation11], %s17484_s9, %s17484_s9, %s17485_s10  }
   0xa   :  { %s22_s17 = sshll.u32 %s18119_s0, 4  ;;  %s17487_s18 = smov [#allocation13]   ;;  %s23_s17 = int_to_ptr.hbm [resolvable:$true] %s22_s17 }
   0xb   :  { %s82_s19 = sshll.u32 %s17487_s18, 4  ;;  %s17488_s3 = smov [#allocation4]   ;;  %s83_s19 = int_to_ptr.vmem [resolvable:$true] %s82_s19 }
   0xc   :  { %88 = dma.hbm_to_vmem [thread:$0]  %s81_s15, 65536, %s83_s19, [#allocation14], %s17484_s9, %s17484_s9, %s17485_s10  }
   0xd   :  { %s24_s20 = sshll.u32 %s17488_s3, 4  ;;  %s46_s23 = sshll.u32 %s18121_s2, 4  ;;  %s25_s20 = int_to_ptr.vmem [resolvable:$true] %s24_s20  ;;  %s47_s23 = int_to_ptr.hbm [resolvable:$true] %s46_s23 }
   0xe   :  { %27 = dma.hbm_to_vmem [thread:$0]  %s23_s17, 320, %s25_s20, [#allocation5]  }
   0xf   :  { %s70_s25 = sshll.u32 %s18123_s4, 4  ;;  %s17489_s26 = smov [#allocation9]   ;;  %s71_s25 = int_to_ptr.hbm [resolvable:$true] %s70_s25 }
  0x10   :  { %s48_s0 = sshll.u32 %s17489_s26, 4  ;;  %s17490_s27 = smov [#allocation12]   ;;  %s49_s0 = int_to_ptr.vmem [resolvable:$true] %s48_s0 }
  0x11   :  { %51 = dma.hbm_to_vmem [thread:$0]  %s47_s23, 128, %s49_s0, [#allocation8]  }
  0x12   :  { %s72_s28 = sshll.u32 %s17490_s27, 4  ;;  %s94_s8 = sshll.u32 %s18125_s6, 4  ;;  %s73_s28 = int_to_ptr.vmem [resolvable:$true] %s72_s28  ;;  %s95_s8 = int_to_ptr.hbm [resolvable:$true] %s94_s8 }
  0x13   :  { %75 = dma.hbm_to_vmem [thread:$0]  %s71_s25, 128, %s73_s28, [#allocation11]  }
  0x14   :  { %s17491_s2 = smov [#allocation15]  }
  0x15   :  { %s96_s9 = sshll.u32 %s17491_s2, 4  ;;  %s97_s9 = int_to_ptr.vmem [resolvable:$true] %s96_s9 }
  0x16   :  { %99 = dma.hbm_to_vmem [thread:$0]  %s95_s8, 128, %s97_s9, [#allocation14]  }
  0x17   :  { %17473 = dma.done.wait [#allocation5], 320  }
  0x18   :  { %17474 = vsyncadd [#allocation5], 4294966976 }
  0x19   :  { %17475 = dma.done.wait [#allocation8], 41088  }
  0x1a   :  { %17476 = vsyncadd [#allocation8], 4294926208 }
  0x1b   :  { %17477 = dma.done.wait [#allocation11], 65664  }
  0x1c   :  { %17478 = vsyncadd [#allocation11], 4294901632 }
  0x1d   :  { %17479 = dma.done.wait [#allocation14], 65664  }
  0x1e   :  { %17480 = vsyncadd [#allocation14], 4294901632  ;;  %v10769_v0 = vld [vmem:[#allocation7 + $0x1c0] sm:$0xf]  ;;  %s17492_s4 = smov [#allocation16]   ;;  %s10530_s12 = sshll.u32 %s18126_s7, 4  ;;  %s10531_s12 = int_to_ptr.hbm [resolvable:$true] %s10530_s12 }
  0x1f   :  { %v15979_v1 = vld [vmem:[#allocation7 + $0x1dc] sm:$0xf0]  ;;  %s10528_s6 = sshll.u32 %s17492_s4, 4  ;;  %s10529_s6 = int_to_ptr.vmem [resolvable:$true] %s10528_s6 }
  0x20   :  { %v11025_v2 = vld [vmem:[#allocation7 + $0x3c0] sm:$0xf]  ;;  %v10770_v3 = vor.u32 %v15979_v1, %v10769_v0 }
  0x21   :  { %v16043_v4 = vld [vmem:[#allocation7 + $0x3dc] sm:$0xf0] }
  0x22   :  { %v11281_v5 = vld [vmem:[#allocation7 + $0x5c0] sm:$0xf]  ;;  %v11026_v7 = vor.u32 %v16043_v4, %v11025_v2  ;;  %2087 = vmatpush.bf16.msra.mxu0 %v10770_v3 }
  0x23   :  { %v16107_v6 = vld [vmem:[#allocation7 + $0x5dc] sm:$0xf0] }
  0x24   :  { %v11282_v8 = vor.u32 %v16107_v6, %v11281_v5  ;;  %v11537_v9 = vld [vmem:[#allocation7 + $0x7c0] sm:$0xf]  ;;  %2100 = vmatpush.bf16.msra.mxu1 %v11026_v7 }
  0x25   :  { %v16171_v10 = vld [vmem:[#allocation7 + $0x7dc] sm:$0xf0] }
  0x26   :  { %v10737_v11 = vld [vmem:[#allocation7 + $0x180] sm:$0xf]  ;;  %v11538_v12 = vor.u32 %v16171_v10, %v11537_v9  ;;  %2113 = vmatpush.bf16.msra.mxu2 %v11282_v8 }
  0x27   :  { %v15971_v13 = vld [vmem:[#allocation7 + $0x19c] sm:$0xf0] }
  0x28   :  { %v10993_v14 = vld [vmem:[#allocation7 + $0x380] sm:$0xf]  ;;  %v10738_v16 = vor.u32 %v15971_v13, %v10737_v11  ;;  %2126 = vmatpush.bf16.msra.mxu3 %v11538_v12 }
  0x29   :  { %v16035_v15 = vld [vmem:[#allocation7 + $0x39c] sm:$0xf0] }
  0x2a   :  { %v10994_v17 = vor.u32 %v16035_v15, %v10993_v14  ;;  %v11249_v18 = vld [vmem:[#allocation7 + $0x580] sm:$0xf]  ;;  %2088 = vmatpush.bf16.msra.mxu0 %v10738_v16 }
  0x2b   :  { %v16099_v19 = vld [vmem:[#allocation7 + $0x59c] sm:$0xf0] }
  0x2c   :  { %v11505_v20 = vld [vmem:[#allocation7 + $0x780] sm:$0xf]  ;;  %v11250_v21 = vor.u32 %v16099_v19, %v11249_v18  ;;  %2101 = vmatpush.bf16.msra.mxu1 %v10994_v17 }
  0x2d   :  { %v16163_v22 = vld [vmem:[#allocation7 + $0x79c] sm:$0xf0] }
  0x2e   :  { %v10705_v23 = vld [vmem:[#allocation7 + $0x140] sm:$0xf]  ;;  %v11506_v25 = vor.u32 %v16163_v22, %v11505_v20  ;;  %2114 = vmatpush.bf16.msra.mxu2 %v11250_v21 }
  0x2f   :  { %v15963_v24 = vld [vmem:[#allocation7 + $0x15c] sm:$0xf0] }
  0x30   :  { %v10961_v26 = vld [vmem:[#allocation7 + $0x340] sm:$0xf]  ;;  %v10706_v29 = vor.u32 %v15963_v24, %v10705_v23  ;;  %2127 = vmatpush.bf16.msra.mxu3 %v11506_v25 }
  0x31   :  { %v16027_v27 = vld [vmem:[#allocation7 + $0x35c] sm:$0xf0] }
  0x32   :  { %v11217_v28 = vld [vmem:[#allocation7 + $0x540] sm:$0xf]  ;;  %v10962_v33 = vor.u32 %v16027_v27, %v10961_v26  ;;  %2089 = vmatpush.bf16.msra.mxu0 %v10706_v29 }
  0x33   :  { %v16091_v30 = vld [vmem:[#allocation7 + $0x55c] sm:$0xf0] }
  0x34   :  { %v11473_v31 = vld [vmem:[#allocation7 + $0x740] sm:$0xf]  ;;  %v11218_v34 = vor.u32 %v16091_v30, %v11217_v28  ;;  %2102 = vmatpush.bf16.msra.mxu1 %v10962_v33  ;;  %v15975_v30 = vld [vmem:[#allocation7 + $0x1c4] sm:$0xf] }
  0x35   :  { %v16155_v32 = vld [vmem:[#allocation7 + $0x75c] sm:$0xf0]  ;;  %v16039_v33 = vld [vmem:[#allocation7 + $0x3c4] sm:$0xf] }
  0x36   :  { %v10673_v35 = vld [vmem:[#allocation7 + $0x100] sm:$0xf]  ;;  %v11474_v38 = vor.u32 %v16155_v32, %v11473_v31  ;;  %2115 = vmatpush.bf16.msra.mxu2 %v11218_v34  ;;  %v10771_v32 = vld [vmem:[#allocation7 + $0x1e0] sm:$0xf0] }
  0x37   :  { %v15955_v36 = vld [vmem:[#allocation7 + $0x11c] sm:$0xf0]  ;;  %v11027_v34 = vld [vmem:[#allocation7 + $0x3e0] sm:$0xf0] }
  0x38   :  { %v10929_v37 = vld [vmem:[#allocation7 + $0x300] sm:$0xf]  ;;  %v10674_v44 = vor.u32 %v15955_v36, %v10673_v35  ;;  %2128 = vmatpush.bf16.msra.mxu3 %v11474_v38  ;;  %v11283_v38 = vld [vmem:[#allocation7 + $0x5e0] sm:$0xf0] }
  0x39   :  { %v16019_v39 = vld [vmem:[#allocation7 + $0x31c] sm:$0xf0] }
  0x3a   :  { %v11185_v40 = vld [vmem:[#allocation7 + $0x500] sm:$0xf]  ;;  %v10930_v45 = vor.u32 %v16019_v39, %v10929_v37  ;;  %2090 = vmatpush.bf16.msra.mxu0 %v10674_v44  ;;  %v16103_v37 = vld [vmem:[#allocation7 + $0x5c4] sm:$0xf] }
  0x3b   :  { %v16083_v41 = vld [vmem:[#allocation7 + $0x51c] sm:$0xf0] }
  0x3c   :  { %v11441_v42 = vld [vmem:[#allocation7 + $0x700] sm:$0xf]  ;;  %v11186_v46 = vor.u32 %v16083_v41, %v11185_v40  ;;  %2103 = vmatpush.bf16.msra.mxu1 %v10930_v45  ;;  %v10774_v41 = vor.u32 %v15975_v30, %v10771_v32  ;;  %v15967_v45 = vld [vmem:[#allocation7 + $0x184] sm:$0xf] }
  0x3d   :  { %v16147_v43 = vld [vmem:[#allocation7 + $0x71c] sm:$0xf0]  ;;  %v16007_v30 = vld [vmem:[#allocation7 + $0x2c4] sm:$0xf] }
  0x3e   :  { %v10641_v47 = vld [vmem:[#allocation7 + $0xc0] sm:$0xf]  ;;  %v11442_v50 = vor.u32 %v16147_v43, %v11441_v42  ;;  %2116 = vmatpush.bf16.msra.mxu2 %v11186_v46  ;;  %v11030_v42 = vor.u32 %v16039_v33, %v11027_v34  ;;  %v11286_v46 = vor.u32 %v16103_v37, %v11283_v38  ;;  %v16071_v32 = vld [vmem:[#allocation7 + $0x4c4] sm:$0xf] }
  0x3f   :  { %v15947_v48 = vld [vmem:[#allocation7 + $0xdc] sm:$0xf0]  ;;  %v11155_v33 = vld [vmem:[#allocation7 + $0x4e0] sm:$0xf0] }
  0x40   :  { %v10897_v49 = vld [vmem:[#allocation7 + $0x2c0] sm:$0xf]  ;;  %v10642_v56 = vor.u32 %v15947_v48, %v10641_v47  ;;  %2129 = vmatpush.bf16.msra.mxu3 %v11442_v50  ;;  %v10739_v47 = vld [vmem:[#allocation7 + $0x1a0] sm:$0xf0] }
  0x41   :  { %v16011_v51 = vld [vmem:[#allocation7 + $0x2dc] sm:$0xf0]  ;;  %v16031_v48 = vld [vmem:[#allocation7 + $0x384] sm:$0xf] }
  0x42   :  { %v11153_v52 = vld [vmem:[#allocation7 + $0x4c0] sm:$0xf]  ;;  %v10898_v57 = vor.u32 %v16011_v51, %v10897_v49  ;;  %2091 = vmatpush.bf16.msra.mxu0 %v10642_v56  ;;  %v10995_v49 = vld [vmem:[#allocation7 + $0x3a0] sm:$0xf0] }
  0x43   :  { %v16075_v53 = vld [vmem:[#allocation7 + $0x4dc] sm:$0xf0]  ;;  %v16095_v50 = vld [vmem:[#allocation7 + $0x584] sm:$0xf] }
  0x44   :  { %v11409_v54 = vld [vmem:[#allocation7 + $0x6c0] sm:$0xf]  ;;  %v11154_v58 = vor.u32 %v16075_v53, %v11153_v52  ;;  %2104 = vmatpush.bf16.msra.mxu1 %v10898_v57  ;;  %v11251_v51 = vld [vmem:[#allocation7 + $0x5a0] sm:$0xf0] }
  0x45   :  { %v16139_v55 = vld [vmem:[#allocation7 + $0x6dc] sm:$0xf0]  ;;  %v15959_v57 = vld [vmem:[#allocation7 + $0x144] sm:$0xf] }
  0x46   :  { %v10609_v59 = vld [vmem:[#allocation7 + $0x80] sm:$0xf]  ;;  %v11410_v62 = vor.u32 %v16139_v55, %v11409_v54  ;;  %2117 = vmatpush.bf16.msra.mxu2 %v11154_v58  ;;  %v10742_v54 = vor.u32 %v15967_v45, %v10739_v47  ;;  %v10998_v55 = vor.u32 %v16031_v48, %v10995_v49  ;;  %v10707_v58 = vld [vmem:[#allocation7 + $0x160] sm:$0xf0] }
  0x47   :  { %v15939_v60 = vld [vmem:[#allocation7 + $0x9c] sm:$0xf0]  ;;  %v11123_v45 = vld [vmem:[#allocation7 + $0x4a0] sm:$0xf0] }
  0x48   :  { %v10865_v61 = vld [vmem:[#allocation7 + $0x280] sm:$0xf]  ;;  %v10610_v4 = vor.u32 %v15939_v60, %v10609_v59  ;;  %2130 = vmatpush.bf16.msra.mxu3 %v11410_v62  ;;  %v11254_v59 = vor.u32 %v16095_v50, %v11251_v51  ;;  %v16023_v60 = vld [vmem:[#allocation7 + $0x344] sm:$0xf] }
  0x49   :  { %v16003_v63 = vld [vmem:[#allocation7 + $0x29c] sm:$0xf0]  ;;  %v16087_v62 = vld [vmem:[#allocation7 + $0x544] sm:$0xf] }
  0x4a   :  { %v11121_v0 = vld [vmem:[#allocation7 + $0x480] sm:$0xf]  ;;  %v10866_v5 = vor.u32 %v16003_v63, %v10865_v61  ;;  %2092 = vmatpush.bf16.msra.mxu0 %v10610_v4  ;;  %v10963_v61 = vld [vmem:[#allocation7 + $0x360] sm:$0xf0] }
  0x4b   :  { %v16067_v1 = vld [vmem:[#allocation7 + $0x49c] sm:$0xf0]  ;;  %v11219_v63 = vld [vmem:[#allocation7 + $0x560] sm:$0xf0]  ;;  %v10966_v4 = vor.u32 %v16023_v60, %v10963_v61 }
  0x4c   :  { %v11377_v2 = vld [vmem:[#allocation7 + $0x680] sm:$0xf]  ;;  %v11122_v6 = vor.u32 %v16067_v1, %v11121_v0  ;;  %2105 = vmatpush.bf16.msra.mxu1 %v10866_v5  ;;  %v10710_v1 = vor.u32 %v15959_v57, %v10707_v58  ;;  %v15927_v51 = vld [vmem:[#allocation7 + $0x44] sm:$0xf] }
  0x4d   :  { %v16131_v3 = vld [vmem:[#allocation7 + $0x69c] sm:$0xf0]  ;;  %v11091_v57 = vld [vmem:[#allocation7 + $0x460] sm:$0xf0] }
  0x4e   :  { %v10577_v7 = vld [vmem:[#allocation7 + $0x40] sm:$0xf]  ;;  %v11378_v10 = vor.u32 %v16131_v3, %v11377_v2  ;;  %2118 = vmatpush.bf16.msra.mxu2 %v11122_v6  ;;  %v129_v2 = vld [vmem:[#allocation4 + $0x8] sm:$0xff]  ;;  %v128_v3 = vld [vmem:[#allocation4] sm:$0xff] }
  0x4f   :  { %v15931_v8 = vld [vmem:[#allocation7 + $0x5c] sm:$0xf0]  ;;  %v15919_v61 = vld [vmem:[#allocation7 + $0x4] sm:$0xf] }
  0x50   :  { %v10833_v9 = vld [vmem:[#allocation7 + $0x240] sm:$0xf]  ;;  %v10578_v16 = vor.u32 %v15931_v8, %v10577_v7  ;;  %2131 = vmatpush.bf16.msra.mxu3 %v11378_v10  ;;  %v15951_v7 = vld [vmem:[#allocation7 + $0x104] sm:$0xf]  ;;  %v474_v8 = vunpack.c.l.b16 %v129_v2  ;;  %v475_v10 = vunpack.c.h.b16 %v129_v2  ;;  %v130_v2 = vld [vmem:[#allocation4 + $0x10] sm:$0xf] }
  0x51   :  { %v15995_v11 = vld [vmem:[#allocation7 + $0x25c] sm:$0xf0] }
  0x52   :  { %v11089_v12 = vld [vmem:[#allocation7 + $0x440] sm:$0xf]  ;;  %v10834_v19 = vor.u32 %v15995_v11, %v10833_v9  ;;  %2093 = vmatpush.bf16.msra.mxu0 %v10578_v16  ;;  %v472_v9 = vunpack.c.l.b16 %v128_v3  ;;  %v11222_v11 = vor.u32 %v16087_v62, %v11219_v63  ;;  %v16079_v16 = vld [vmem:[#allocation7 + $0x504] sm:$0xf] }
  0x53   :  { %v16059_v13 = vld [vmem:[#allocation7 + $0x45c] sm:$0xf0] }
  0x54   :  { %v11345_v14 = vld [vmem:[#allocation7 + $0x640] sm:$0xf]  ;;  %v11090_v20 = vor.u32 %v16059_v13, %v11089_v12  ;;  %2106 = vmatpush.bf16.msra.mxu1 %v10834_v19  ;;  %v10675_v12 = vld [vmem:[#allocation7 + $0x120] sm:$0xf0]  ;;  %v17556_v19 = vpack.c.b16 %v472_v9, %v472_v9 }
  0x55   :  { %v16123_v15 = vld [vmem:[#allocation7 + $0x65c] sm:$0xf0]  ;;  %v16015_v13 = vld [vmem:[#allocation7 + $0x304] sm:$0xf] }
  0x56   :  { %v10545_v17 = vld [vmem:[#allocation7] sm:$0xf]  ;;  %v11346_v24 = vor.u32 %v16123_v15, %v11345_v14  ;;  %2119 = vmatpush.bf16.msra.mxu2 %v11090_v20  ;;  %v10931_v14 = vld [vmem:[#allocation7 + $0x320] sm:$0xf0]  ;;  %v473_v15 = vunpack.c.h.b16 %v128_v3  ;;  %v17558_v20 = vpack.c.b16 %v475_v10, %v475_v10 }
  0x57   :  { %v15923_v18 = vld [vmem:[#allocation7 + $0x1c] sm:$0xf0]  ;;  %v16231_v9 = vld [vmem:[#allocation7 + $0x9c4] sm:$0xf] }
  0x58   :  { %v10801_v21 = vld [vmem:[#allocation7 + $0x200] sm:$0xf]  ;;  %v10546_v31 = vor.u32 %v15923_v18, %v10545_v17  ;;  %2132 = vmatpush.bf16.msra.mxu3 %v11346_v24  ;;  %v11187_v17 = vld [vmem:[#allocation7 + $0x520] sm:$0xf0]  ;;  %v17554_v18 = vpack.c.b16 %v474_v8, %v474_v8  ;;  %v10934_v24 = vor.u32 %v16015_v13, %v10931_v14  ;;  %v15980_v13 = vld [vmem:[#allocation7 + $0x1e4] sm:$0xf0]  ;;  %v476_v14 = vunpack.c.l.b16 %v130_v2 }
  0x59   :  { %v15987_v22 = vld [vmem:[#allocation7 + $0x21c] sm:$0xf0]  ;;  %v11539_v8 = vld [vmem:[#allocation7 + $0x7e0] sm:$0xf0] }
  0x5a   :  { %v11057_v23 = vld [vmem:[#allocation7 + $0x400] sm:$0xf]  ;;  %v10802_v35 = vor.u32 %v15987_v22, %v10801_v21  ;;  %2094 = vmatpush.bf16.msra.mxu0 %v10546_v31  ;;  %v17560_v22 = vpack.c.b16 %v473_v15, %v473_v15  ;;  %v10899_v31 = vld [vmem:[#allocation7 + $0x2e0] sm:$0xf0] }
  0x5b   :  { %v16051_v25 = vld [vmem:[#allocation7 + $0x41c] sm:$0xf0]  ;;  %v16199_v2 = vld [vmem:[#allocation7 + $0x8c4] sm:$0xf] }
  0x5c   :  { %v11313_v26 = vld [vmem:[#allocation7 + $0x600] sm:$0xf]  ;;  %v11058_v36 = vor.u32 %v16051_v25, %v11057_v23  ;;  %2107 = vmatpush.bf16.msra.mxu1 %v10802_v35  ;;  %v10678_v23 = vor.u32 %v15951_v7, %v10675_v12  ;;  %v16167_v7 = vld [vmem:[#allocation7 + $0x7c4] sm:$0xf]  ;;  %v10777_v12 = vld [vmem:[#allocation7 + $0x1c8] sm:$0xf] }
  0x5d   :  { %v16115_v27 = vld [vmem:[#allocation7 + $0x61c] sm:$0xf0]  ;;  %2095 = vmatmul.bf16.vlgmr.msra.gmra.mxu0 %v17556_v19 }
  0x5e   :  { %v11793_v28 = vld [vmem:[#allocation7 + $0x9c0] sm:$0xf]  ;;  %v11314_v39 = vor.u32 %v16115_v27, %v11313_v26  ;;  %2120 = vmatpush.bf16.msra.mxu2 %v11058_v36  ;;  %v15943_v27 = vld [vmem:[#allocation7 + $0xc4] sm:$0xf]  ;;  %v10902_v36 = vor.u32 %v16007_v30, %v10899_v31 }
  0x5f   :  { %v16235_v29 = vld [vmem:[#allocation7 + $0x9dc] sm:$0xf0]  ;;  %2108 = vmatmul.bf16.vlgmr.msra.gmra.mxu1 %v17560_v22  ;;  %v11763_v31 = vld [vmem:[#allocation7 + $0x9a0] sm:$0xf0] }
  0x60   :  { %v11794_v40 = vor.u32 %v16235_v29, %v11793_v28  ;;  %v11761_v43 = vld [vmem:[#allocation7 + $0x980] sm:$0xf]  ;;  %2133 = vmatpush.bf16.msra.mxu3 %v11314_v39  ;;  %2152 = vmatpush.bf16.msrb.mxu1 %v10774_v41  ;;  %v11190_v28 = vor.u32 %v16079_v16, %v11187_v17  ;;  %v10643_v29 = vld [vmem:[#allocation7 + $0xe0] sm:$0xf0]  ;;  %v11033_v17 = vld [vmem:[#allocation7 + $0x3c8] sm:$0xf] }
  0x61   :  { %v16227_v44 = vld [vmem:[#allocation7 + $0x99c] sm:$0xf0]  ;;  %2121 = vmatmul.bf16.vlgmr.msra.gmra.mxu2 %v17554_v18  ;;  %v10646_v35 = vor.u32 %v15943_v27, %v10643_v29  ;;  %v15935_v39 = vld [vmem:[#allocation7 + $0x84] sm:$0xf] }
  0x62   :  { %2139 = vmatpush.bf16.msrb.mxu0 %v11794_v40  ;;  %v11762_v52 = vor.u32 %v16227_v44, %v11761_v43  ;;  %v11729_v53 = vld [vmem:[#allocation7 + $0x940] sm:$0xf]  ;;  %2165 = vmatpush.bf16.msrb.mxu2 %v11030_v42  ;;  %v11158_v40 = vor.u32 %v16071_v32, %v11155_v33  ;;  %v10611_v41 = vld [vmem:[#allocation7 + $0xa0] sm:$0xf0]  ;;  %v10745_v32 = vld [vmem:[#allocation7 + $0x188] sm:$0xf] }
  0x63   :  { %v16219_v56 = vld [vmem:[#allocation7 + $0x95c] sm:$0xf0]  ;;  %2134 = vmatmul.bf16.vlgmr.msra.gmra.mxu3 %v17558_v20  ;;  %v15999_v42 = vld [vmem:[#allocation7 + $0x284] sm:$0xf]  ;;  %v10614_v47 = vor.u32 %v15935_v39, %v10611_v41  ;;  %v15972_v33 = vld [vmem:[#allocation7 + $0x1a4] sm:$0xf0] }
  0x64   :  { %2178 = vmatpush.bf16.msrb.mxu3 %v11286_v46  ;;  %v11730_v0 = vor.u32 %v16219_v56, %v11729_v53  ;;  %2153 = vmatpush.bf16.msrb.mxu1 %v10742_v54  ;;  %v11697_v5 = vld [vmem:[#allocation7 + $0x900] sm:$0xf]  ;;  %v10867_v43 = vld [vmem:[#allocation7 + $0x2a0] sm:$0xf0]  ;;  %v10746_v39 = vor.u32 %v15972_v33, %v10745_v32  ;;  %v10585_v33 = vld [vmem:[#allocation7 + $0x48] sm:$0xf] }
  0x65   :  { %v16211_v6 = vld [vmem:[#allocation7 + $0x91c] sm:$0xf0]  ;;  %v16063_v44 = vld [vmem:[#allocation7 + $0x484] sm:$0xf]  ;;  %v10870_v48 = vor.u32 %v15999_v42, %v10867_v43 }
  0x66   :  { %2140 = vmatpush.bf16.msrb.mxu0 %v11762_v52  ;;  %2166 = vmatpush.bf16.msrb.mxu2 %v10998_v55  ;;  %v11698_v21 = vor.u32 %v16211_v6, %v11697_v5  ;;  %v11665_v25 = vld [vmem:[#allocation7 + $0x8c0] sm:$0xf]  ;;  %v11126_v52 = vor.u32 %v16063_v44, %v11123_v45  ;;  %v10579_v53 = vld [vmem:[#allocation7 + $0x60] sm:$0xf0]  ;;  %v10713_v45 = vld [vmem:[#allocation7 + $0x148] sm:$0xf] }
  0x67   :  { %v16203_v26 = vld [vmem:[#allocation7 + $0x8dc] sm:$0xf0]  ;;  %v15991_v54 = vld [vmem:[#allocation7 + $0x244] sm:$0xf]  ;;  %v10582_v62 = vor.u32 %v15927_v51, %v10579_v53 }
  0x68   :  { %2179 = vmatpush.bf16.msrb.mxu3 %v11254_v59  ;;  %2154 = vmatpush.bf16.msrb.mxu1 %v10710_v1  ;;  %v11666_v34 = vor.u32 %v16203_v26, %v11665_v25  ;;  %v11633_v37 = vld [vmem:[#allocation7 + $0x880] sm:$0xf]  ;;  %v10835_v55 = vld [vmem:[#allocation7 + $0x260] sm:$0xf0]  ;;  %v10778_v26 = vor.u32 %v15980_v13, %v10777_v12 }
  0x69   :  { %v16195_v38 = vld [vmem:[#allocation7 + $0x89c] sm:$0xf0]  ;;  %v16055_v56 = vld [vmem:[#allocation7 + $0x444] sm:$0xf]  ;;  %v10838_v63 = vor.u32 %v15991_v54, %v10835_v55 }
  0x6a   :  { %2141 = vmatpush.bf16.msrb.mxu0 %v11730_v0  ;;  %2167 = vmatpush.bf16.msrb.mxu2 %v10966_v4  ;;  %v11634_v46 = vor.u32 %v16195_v38, %v11633_v37  ;;  %v11601_v49 = vld [vmem:[#allocation7 + $0x840] sm:$0xf]  ;;  %v10547_v0 = vld [vmem:[#allocation7 + $0x20] sm:$0xf0]  ;;  %v11094_v3 = vor.u32 %v16055_v56, %v11091_v57  ;;  %v10681_v57 = vld [vmem:[#allocation7 + $0x108] sm:$0xf] }
  0x6b   :  { %v16187_v50 = vld [vmem:[#allocation7 + $0x85c] sm:$0xf0]  ;;  %v15983_v1 = vld [vmem:[#allocation7 + $0x204] sm:$0xf]  ;;  %v10550_v15 = vor.u32 %v15919_v61, %v10547_v0 }
  0x6c   :  { %2180 = vmatpush.bf16.msrb.mxu3 %v11222_v11  ;;  %2155 = vmatpush.bf16.msrb.mxu1 %v10678_v23  ;;  %v11602_v58 = vor.u32 %v16187_v50, %v11601_v49  ;;  %v11569_v59 = vld [vmem:[#allocation7 + $0x800] sm:$0xf]  ;;  %v10803_v4 = vld [vmem:[#allocation7 + $0x220] sm:$0xf0] }
  0x6d   :  { %v16179_v60 = vld [vmem:[#allocation7 + $0x81c] sm:$0xf0]  ;;  %v16047_v5 = vld [vmem:[#allocation7 + $0x404] sm:$0xf]  ;;  %v10806_v16 = vor.u32 %v15983_v1, %v10803_v4 }
  0x6e   :  { %2142 = vmatpush.bf16.msrb.mxu0 %v11698_v21  ;;  %2168 = vmatpush.bf16.msrb.mxu2 %v10934_v24  ;;  %v11059_v6 = vld [vmem:[#allocation7 + $0x420] sm:$0xf0]  ;;  %v11570_v10 = vor.u32 %v16179_v60, %v11569_v59  ;;  %v16044_v21 = vld [vmem:[#allocation7 + $0x3e4] sm:$0xf0]  ;;  %v11542_v24 = vor.u32 %v16167_v7, %v11539_v8 }
  0x6f   :  { %v11795_v11 = vld [vmem:[#allocation7 + $0x9e0] sm:$0xf0]  ;;  %v11062_v23 = vor.u32 %v16047_v5, %v11059_v6  ;;  %v11034_v30 = vor.u32 %v16044_v21, %v11033_v17  ;;  %v10937_v59 = vld [vmem:[#allocation7 + $0x308] sm:$0xf] }
  0x70   :  { %2181 = vmatpush.bf16.msrb.mxu3 %v11190_v28  ;;  %2156 = vmatpush.bf16.msrb.mxu1 %v10646_v35  ;;  %v11798_v25 = vor.u32 %v16231_v9, %v11795_v11  ;;  %v16159_v27 = vld [vmem:[#allocation7 + $0x784] sm:$0xf]  ;;  %v11001_v35 = vld [vmem:[#allocation7 + $0x388] sm:$0xf] }
  0x71   :  { %v11507_v28 = vld [vmem:[#allocation7 + $0x7a0] sm:$0xf0]  ;;  %v16020_v60 = vld [vmem:[#allocation7 + $0x324] sm:$0xf0] }
  0x72   :  { %2143 = vmatpush.bf16.msrb.mxu0 %v11666_v34  ;;  %2169 = vmatpush.bf16.msrb.mxu2 %v10902_v36  ;;  %v16223_v29 = vld [vmem:[#allocation7 + $0x984] sm:$0xf]  ;;  %v17566_v34 = vpack.c.b16 %v476_v14, %v476_v14  ;;  %v16036_v36 = vld [vmem:[#allocation7 + $0x3a4] sm:$0xf0]  ;;  %v11510_v37 = vor.u32 %v16159_v27, %v11507_v28 }
  0x73   :  { %v11766_v38 = vor.u32 %v16223_v29, %v11763_v31  ;;  %v11475_v41 = vld [vmem:[#allocation7 + $0x760] sm:$0xf0]  ;;  %v11002_v43 = vor.u32 %v16036_v36, %v11001_v35  ;;  %v10649_v5 = vld [vmem:[#allocation7 + $0xc8] sm:$0xf] }
  0x74   :  { %2182 = vmatpush.bf16.msrb.mxu3 %v11158_v40  ;;  %2157 = vmatpush.bf16.msrb.mxu1 %v10614_v47  ;;  %v16151_v40 = vld [vmem:[#allocation7 + $0x744] sm:$0xf]  ;;  %v10969_v47 = vld [vmem:[#allocation7 + $0x348] sm:$0xf] }
  0x75   :  { %v16215_v42 = vld [vmem:[#allocation7 + $0x944] sm:$0xf]  ;;  %v11478_v49 = vor.u32 %v16151_v40, %v11475_v41  ;;  %v15948_v6 = vld [vmem:[#allocation7 + $0xe4] sm:$0xf0] }
  0x76   :  { %2144 = vmatpush.bf16.msrb.mxu0 %v11634_v46  ;;  %2170 = vmatpush.bf16.msrb.mxu2 %v10870_v48  ;;  %v11731_v44 = vld [vmem:[#allocation7 + $0x960] sm:$0xf0]  ;;  %v15964_v46 = vld [vmem:[#allocation7 + $0x164] sm:$0xf0]  ;;  %v10650_v11 = vor.u32 %v15948_v6, %v10649_v5 }
  0x77   :  { %v16028_v48 = vld [vmem:[#allocation7 + $0x364] sm:$0xf0]  ;;  %v11734_v50 = vor.u32 %v16215_v42, %v11731_v44  ;;  %v10714_v51 = vor.u32 %v15964_v46, %v10713_v45  ;;  %v11443_v53 = vld [vmem:[#allocation7 + $0x720] sm:$0xf0] }
  0x78   :  { %2183 = vmatpush.bf16.msrb.mxu3 %v11126_v52  ;;  %2158 = vmatpush.bf16.msrb.mxu1 %v10582_v62  ;;  %v16143_v52 = vld [vmem:[#allocation7 + $0x704] sm:$0xf]  ;;  %v10970_v55 = vor.u32 %v16028_v48, %v10969_v47  ;;  %v10905_v7 = vld [vmem:[#allocation7 + $0x2c8] sm:$0xf] }
  0x79   :  { %v16207_v54 = vld [vmem:[#allocation7 + $0x904] sm:$0xf]  ;;  %v11446_v61 = vor.u32 %v16143_v52, %v11443_v53  ;;  %v16012_v8 = vld [vmem:[#allocation7 + $0x2e4] sm:$0xf0] }
  0x7a   :  { %2145 = vmatpush.bf16.msrb.mxu0 %v11602_v58  ;;  %2171 = vmatpush.bf16.msrb.mxu2 %v10838_v63  ;;  %v11699_v56 = vld [vmem:[#allocation7 + $0x920] sm:$0xf0]  ;;  %v15956_v58 = vld [vmem:[#allocation7 + $0x124] sm:$0xf0] }
  0x7b   :  { %v11702_v62 = vor.u32 %v16207_v54, %v11699_v56  ;;  %v10682_v63 = vor.u32 %v15956_v58, %v10681_v57  ;;  %v16135_v0 = vld [vmem:[#allocation7 + $0x6c4] sm:$0xf]  ;;  %v10617_v17 = vld [vmem:[#allocation7 + $0x88] sm:$0xf] }
  0x7c   :  { %2184 = vmatpush.bf16.msrb.mxu3 %v11094_v3  ;;  %2159 = vmatpush.bf16.msrb.mxu1 %v10550_v15  ;;  %v11411_v1 = vld [vmem:[#allocation7 + $0x6e0] sm:$0xf0]  ;;  %v10938_v3 = vor.u32 %v16020_v60, %v10937_v59  ;;  %v10906_v15 = vor.u32 %v16012_v8, %v10905_v7  ;;  %v15940_v21 = vld [vmem:[#allocation7 + $0xa4] sm:$0xf0]  ;;  %v15976_v59 = vld [vmem:[#allocation7 + $0x1cc] sm:$0xf] }
  0x7d   :  { %v11667_v4 = vld [vmem:[#allocation7 + $0x8e0] sm:$0xf0]  ;;  %v11414_v9 = vor.u32 %v16135_v0, %v11411_v1  ;;  %v10618_v27 = vor.u32 %v15940_v21, %v10617_v17  ;;  %v15932_v35 = vld [vmem:[#allocation7 + $0x64] sm:$0xf0]  ;;  %v10779_v60 = vld [vmem:[#allocation7 + $0x1e8] sm:$0xf0] }
  0x7e   :  { %2146 = vmatpush.bf16.msrb.mxu0 %v11570_v10  ;;  %2172 = vmatpush.bf16.msrb.mxu2 %v10806_v16  ;;  %v11670_v10 = vor.u32 %v16199_v2, %v11667_v4  ;;  %v16127_v12 = vld [vmem:[#allocation7 + $0x684] sm:$0xf]  ;;  %v10841_v36 = vld [vmem:[#allocation7 + $0x248] sm:$0xf]  ;;  %v10586_v42 = vor.u32 %v15932_v35, %v10585_v33  ;;  %v10782_v4 = vor.u32 %v15976_v59, %v10779_v60  ;;  %v15968_v8 = vld [vmem:[#allocation7 + $0x18c] sm:$0xf] }
  0x7f   :  { %2160 = vmatmul.bf16.vlgmr.msrb.gmra.mxu1 %v17556_v19  ;;  %v11379_v13 = vld [vmem:[#allocation7 + $0x6a0] sm:$0xf0]  ;;  %v10553_v45 = vld [vmem:[#allocation7 + $0x8] sm:$0xf] }
  0x80   :  { %2185 = vmatpush.bf16.msrb.mxu3 %v11062_v23  ;;  %2204 = vmatpush.bf16.msra.mxu1 %v11798_v25  ;;  %v16191_v14 = vld [vmem:[#allocation7 + $0x884] sm:$0xf]  ;;  %v10873_v23 = vld [vmem:[#allocation7 + $0x288] sm:$0xf]  ;;  %v11382_v25 = vor.u32 %v16127_v12, %v11379_v13 }
  0x81   :  { %2147 = vmatmul.bf16.vlgmr.msrb.gmra.mxu0 %v17566_v34  ;;  %2173 = vmatmul.bf16.vlgmr.msrb.gmra.mxu2 %v17560_v22  ;;  %v11635_v16 = vld [vmem:[#allocation7 + $0x8a0] sm:$0xf0]  ;;  %v15924_v47 = vld [vmem:[#allocation7 + $0x24] sm:$0xf0] }
  0x82   :  { %2191 = vmatpush.bf16.msra.mxu0 %v11542_v24  ;;  %2217 = vmatpush.bf16.msra.mxu2 %v10778_v26  ;;  %v16004_v24 = vld [vmem:[#allocation7 + $0x2a4] sm:$0xf0]  ;;  %v11638_v26 = vor.u32 %v16191_v14, %v11635_v16  ;;  %v16119_v28 = vld [vmem:[#allocation7 + $0x644] sm:$0xf]  ;;  %v10554_v58 = vor.u32 %v15924_v47, %v10553_v45 }
  0x83   :  { %2186 = vmatmul.bf16.vlgmr.msrb.gmra.mxu3 %v17554_v18  ;;  %v11347_v29 = vld [vmem:[#allocation7 + $0x660] sm:$0xf0]  ;;  %v10874_v31 = vor.u32 %v16004_v24, %v10873_v23  ;;  %v10809_v48 = vld [vmem:[#allocation7 + $0x208] sm:$0xf]  ;;  %v15960_v24 = vld [vmem:[#allocation7 + $0x14c] sm:$0xf] }
  0x84   :  { %2230 = vmatpush.bf16.msra.mxu3 %v11034_v30  ;;  %2205 = vmatpush.bf16.msra.mxu1 %v11766_v38  ;;  %v16183_v30 = vld [vmem:[#allocation7 + $0x844] sm:$0xf]  ;;  %v11350_v38 = vor.u32 %v16119_v28, %v11347_v29  ;;  %v11545_v52 = vld [vmem:[#allocation7 + $0x7c8] sm:$0xf] }
  0x85   :  { %v11603_v32 = vld [vmem:[#allocation7 + $0x860] sm:$0xf0]  ;;  %v16172_v54 = vld [vmem:[#allocation7 + $0x7e4] sm:$0xf0] }
  0x86   :  { %2192 = vmatpush.bf16.msra.mxu0 %v11510_v37  ;;  %2218 = vmatpush.bf16.msra.mxu2 %v10746_v39  ;;  %v15996_v37 = vld [vmem:[#allocation7 + $0x264] sm:$0xf0]  ;;  %v16111_v39 = vld [vmem:[#allocation7 + $0x604] sm:$0xf]  ;;  %v11606_v41 = vor.u32 %v16183_v30, %v11603_v32 }
  0x87   :  { %v11315_v40 = vld [vmem:[#allocation7 + $0x620] sm:$0xf0]  ;;  %v10842_v46 = vor.u32 %v15996_v37, %v10841_v36  ;;  %v16236_v56 = vld [vmem:[#allocation7 + $0x9e4] sm:$0xf0]  ;;  %v15952_v37 = vld [vmem:[#allocation7 + $0x10c] sm:$0xf] }
  0x88   :  { %2231 = vmatpush.bf16.msra.mxu3 %v11002_v43  ;;  %2206 = vmatpush.bf16.msra.mxu1 %v11734_v50  ;;  %v16175_v43 = vld [vmem:[#allocation7 + $0x804] sm:$0xf]  ;;  %v11289_v50 = vld [vmem:[#allocation7 + $0x5c8] sm:$0xf]  ;;  %v11318_v53 = vor.u32 %v16111_v39, %v11315_v40 }
  0x89   :  { %v11571_v44 = vld [vmem:[#allocation7 + $0x820] sm:$0xf0]  ;;  %v11257_v1 = vld [vmem:[#allocation7 + $0x588] sm:$0xf] }
  0x8a   :  { %2193 = vmatpush.bf16.msra.mxu0 %v11478_v49  ;;  %2219 = vmatpush.bf16.msra.mxu2 %v10714_v51  ;;  %v15988_v49 = vld [vmem:[#allocation7 + $0x224] sm:$0xf0]  ;;  %v11574_v57 = vor.u32 %v16175_v43, %v11571_v44 }
  0x8b   :  { %v16108_v51 = vld [vmem:[#allocation7 + $0x5e4] sm:$0xf0] }
  0x8c   :  { %2232 = vmatpush.bf16.msra.mxu3 %v10970_v55  ;;  %2207 = vmatpush.bf16.msra.mxu1 %v11702_v62  ;;  %v11801_v55 = vld [vmem:[#allocation7 + $0x9c8] sm:$0xf]  ;;  %v11290_v62 = vor.u32 %v16108_v51, %v11289_v50  ;;  %v10651_v50 = vld [vmem:[#allocation7 + $0xe8] sm:$0xf0] }
  0x8d   :  { %v11802_v0 = vor.u32 %v16236_v56, %v11801_v55  ;;  %v16100_v2 = vld [vmem:[#allocation7 + $0x5a4] sm:$0xf0] }
  0x8e   :  { %2194 = vmatpush.bf16.msra.mxu0 %v11446_v61  ;;  %2220 = vmatpush.bf16.msra.mxu2 %v10682_v63  ;;  %v10810_v61 = vor.u32 %v15988_v49, %v10809_v48  ;;  %v11546_v63 = vor.u32 %v16172_v54, %v11545_v52  ;;  %v16164_v5 = vld [vmem:[#allocation7 + $0x7a4] sm:$0xf0]  ;;  %v15944_v49 = vld [vmem:[#allocation7 + $0xcc] sm:$0xf] }
  0x8f   :  { %v11769_v6 = vld [vmem:[#allocation7 + $0x988] sm:$0xf] }
  0x90   :  { %2233 = vmatpush.bf16.msra.mxu3 %v10938_v3  ;;  %2208 = vmatpush.bf16.msra.mxu1 %v11670_v10  ;;  %v11513_v3 = vld [vmem:[#allocation7 + $0x788] sm:$0xf]  ;;  %v11258_v10 = vor.u32 %v16100_v2, %v11257_v1 }
  0x91   :  { %v16228_v7 = vld [vmem:[#allocation7 + $0x9a4] sm:$0xf0] }
  0x92   :  { %2195 = vmatpush.bf16.msra.mxu0 %v11414_v9  ;;  %2221 = vmatpush.bf16.msra.mxu2 %v10650_v11  ;;  %v10747_v9 = vld [vmem:[#allocation7 + $0x1a8] sm:$0xf0]  ;;  %v11514_v11 = vor.u32 %v16164_v5, %v11513_v3  ;;  %v11770_v12 = vor.u32 %v16228_v7, %v11769_v6  ;;  %v11225_v13 = vld [vmem:[#allocation7 + $0x548] sm:$0xf] }
  0x93   :  { %v16092_v14 = vld [vmem:[#allocation7 + $0x564] sm:$0xf0]  ;;  %v10750_v16 = vor.u32 %v15968_v8, %v10747_v9  ;;  %v15928_v9 = vld [vmem:[#allocation7 + $0x4c] sm:$0xf] }
  0x94   :  { %2234 = vmatpush.bf16.msra.mxu3 %v10906_v15  ;;  %2209 = vmatpush.bf16.msra.mxu1 %v11638_v26  ;;  %v11481_v15 = vld [vmem:[#allocation7 + $0x748] sm:$0xf]  ;;  %v11226_v26 = vor.u32 %v16092_v14, %v11225_v13 }
  0x95   :  { %v16156_v17 = vld [vmem:[#allocation7 + $0x764] sm:$0xf0] }
  0x96   :  { %2196 = vmatpush.bf16.msra.mxu0 %v11382_v25  ;;  %2222 = vmatpush.bf16.msra.mxu2 %v10618_v27  ;;  %v11737_v21 = vld [vmem:[#allocation7 + $0x948] sm:$0xf]  ;;  %v10715_v25 = vld [vmem:[#allocation7 + $0x168] sm:$0xf0]  ;;  %v11482_v27 = vor.u32 %v16156_v17, %v11481_v15 }
  0x97   :  { %v16220_v23 = vld [vmem:[#allocation7 + $0x964] sm:$0xf0]  ;;  %v10718_v32 = vor.u32 %v15960_v24, %v10715_v25  ;;  %v15920_v25 = vld [vmem:[#allocation7 + $0xc] sm:$0xf] }
  0x98   :  { %2235 = vmatpush.bf16.msra.mxu3 %v10874_v31  ;;  %2210 = vmatpush.bf16.msra.mxu1 %v11606_v41  ;;  %v11738_v28 = vor.u32 %v16220_v23, %v11737_v21  ;;  %v11193_v29 = vld [vmem:[#allocation7 + $0x508] sm:$0xf] }
  0x99   :  { %v16084_v30 = vld [vmem:[#allocation7 + $0x524] sm:$0xf0] }
  0x9a   :  { %2197 = vmatpush.bf16.msra.mxu0 %v11350_v38  ;;  %2223 = vmatpush.bf16.msra.mxu2 %v10586_v42  ;;  %v11449_v31 = vld [vmem:[#allocation7 + $0x708] sm:$0xf]  ;;  %v10683_v38 = vld [vmem:[#allocation7 + $0x128] sm:$0xf0]  ;;  %v11194_v39 = vor.u32 %v16084_v30, %v11193_v29 }
  0x9b   :  { %v16148_v33 = vld [vmem:[#allocation7 + $0x724] sm:$0xf0]  ;;  %v10686_v45 = vor.u32 %v15952_v37, %v10683_v38  ;;  %v16104_v29 = vld [vmem:[#allocation7 + $0x5cc] sm:$0xf] }
  0x9c   :  { %2236 = vmatpush.bf16.msra.mxu3 %v10842_v46  ;;  %2211 = vmatpush.bf16.msra.mxu1 %v11574_v57  ;;  %v11705_v35 = vld [vmem:[#allocation7 + $0x908] sm:$0xf]  ;;  %v11450_v40 = vor.u32 %v16148_v33, %v11449_v31  ;;  %v10654_v57 = vor.u32 %v15944_v49, %v10651_v50  ;;  %v11291_v31 = vld [vmem:[#allocation7 + $0x5e8] sm:$0xf0] }
  0x9d   :  { %v16212_v36 = vld [vmem:[#allocation7 + $0x924] sm:$0xf0]  ;;  %v11547_v33 = vld [vmem:[#allocation7 + $0x7e8] sm:$0xf0] }
  0x9e   :  { %2198 = vmatpush.bf16.msra.mxu0 %v11318_v53  ;;  %2224 = vmatpush.bf16.msra.mxu2 %v10554_v58  ;;  %v11706_v41 = vor.u32 %v16212_v36, %v11705_v35  ;;  %v11161_v42 = vld [vmem:[#allocation7 + $0x4c8] sm:$0xf]  ;;  %v16232_v37 = vld [vmem:[#allocation7 + $0x9cc] sm:$0xf] }
  0x9f   :  { %2212 = vmatmul.bf16.vlgmr.msra.gmra.mxu1 %v17566_v34  ;;  %v16076_v43 = vld [vmem:[#allocation7 + $0x4e4] sm:$0xf0]  ;;  %v11803_v38 = vld [vmem:[#allocation7 + $0x9e8] sm:$0xf0] }
  0xa0   :  { %2237 = vmatpush.bf16.msra.mxu3 %v10810_v61  ;;  %2256 = vmatpush.bf16.msrb.mxu1 %v11546_v63  ;;  %v11417_v44 = vld [vmem:[#allocation7 + $0x6c8] sm:$0xf]  ;;  %v11162_v51 = vor.u32 %v16076_v43, %v11161_v42  ;;  %v15936_v61 = vld [vmem:[#allocation7 + $0x8c] sm:$0xf] }
  0xa1   :  { %2199 = vmatmul.bf16.vlgmr.msra.gmra.mxu0 %v17558_v20  ;;  %2225 = vmatmul.bf16.vlgmr.msra.gmra.mxu2 %v17556_v19  ;;  %v16140_v46 = vld [vmem:[#allocation7 + $0x6e4] sm:$0xf0]  ;;  %v16032_v43 = vld [vmem:[#allocation7 + $0x38c] sm:$0xf] }
  0xa2   :  { %2243 = vmatpush.bf16.msrb.mxu0 %v11290_v62  ;;  %2269 = vmatpush.bf16.msrb.mxu2 %v11802_v0  ;;  %v11673_v47 = vld [vmem:[#allocation7 + $0x8c8] sm:$0xf]  ;;  %v11418_v52 = vor.u32 %v16140_v46, %v11417_v44  ;;  %v10619_v62 = vld [vmem:[#allocation7 + $0xa8] sm:$0xf0]  ;;  %v11806_v46 = vor.u32 %v16232_v37, %v11803_v38 }
  0xa3   :  { %2238 = vmatmul.bf16.vlgmr.msra.gmra.mxu3 %v17560_v22  ;;  %v16204_v48 = vld [vmem:[#allocation7 + $0x8e4] sm:$0xf0]  ;;  %v10622_v5 = vor.u32 %v15936_v61, %v10619_v62  ;;  %v11003_v44 = vld [vmem:[#allocation7 + $0x3a8] sm:$0xf0] }
  0xa4   :  { %2282 = vmatpush.bf16.msrb.mxu3 %v10782_v4  ;;  %2257 = vmatpush.bf16.msrb.mxu1 %v11514_v11  ;;  %v11674_v53 = vor.u32 %v16204_v48, %v11673_v47  ;;  %v11129_v54 = vld [vmem:[#allocation7 + $0x488] sm:$0xf]  ;;  %v11259_v47 = vld [vmem:[#allocation7 + $0x5a8] sm:$0xf0] }
  0xa5   :  { %v16068_v55 = vld [vmem:[#allocation7 + $0x4a4] sm:$0xf0]  ;;  %v16160_v48 = vld [vmem:[#allocation7 + $0x78c] sm:$0xf] }
  0xa6   :  { %2244 = vmatpush.bf16.msrb.mxu0 %v11258_v10  ;;  %2270 = vmatpush.bf16.msrb.mxu2 %v11770_v12  ;;  %v11385_v56 = vld [vmem:[#allocation7 + $0x688] sm:$0xf]  ;;  %v11130_v63 = vor.u32 %v16068_v55, %v11129_v54  ;;  %v10587_v10 = vld [vmem:[#allocation7 + $0x68] sm:$0xf0] }
  0xa7   :  { %v16132_v58 = vld [vmem:[#allocation7 + $0x6a4] sm:$0xf0]  ;;  %v10590_v23 = vor.u32 %v15928_v9, %v10587_v10  ;;  %v11515_v49 = vld [vmem:[#allocation7 + $0x7a8] sm:$0xf0] }
  0xa8   :  { %2283 = vmatpush.bf16.msrb.mxu3 %v10750_v16  ;;  %2258 = vmatpush.bf16.msrb.mxu1 %v11482_v27  ;;  %v11641_v59 = vld [vmem:[#allocation7 + $0x888] sm:$0xf]  ;;  %v11386_v0 = vor.u32 %v16132_v58, %v11385_v56  ;;  %v16040_v27 = vld [vmem:[#allocation7 + $0x3cc] sm:$0xf]  ;;  %v11518_v54 = vor.u32 %v16160_v48, %v11515_v49 }
  0xa9   :  { %v16196_v60 = vld [vmem:[#allocation7 + $0x8a4] sm:$0xf0]  ;;  %v16224_v50 = vld [vmem:[#allocation7 + $0x98c] sm:$0xf] }
  0xaa   :  { %2245 = vmatpush.bf16.msrb.mxu0 %v11226_v26  ;;  %2271 = vmatpush.bf16.msrb.mxu2 %v11738_v28  ;;  %v11642_v1 = vor.u32 %v16196_v60, %v11641_v59  ;;  %v11097_v2 = vld [vmem:[#allocation7 + $0x448] sm:$0xf]  ;;  %v10555_v26 = vld [vmem:[#allocation7 + $0x28] sm:$0xf0] }
  0xab   :  { %v16060_v3 = vld [vmem:[#allocation7 + $0x464] sm:$0xf0]  ;;  %v11035_v28 = vld [vmem:[#allocation7 + $0x3e8] sm:$0xf0] }
  0xac   :  { %2284 = vmatpush.bf16.msrb.mxu3 %v10718_v32  ;;  %2259 = vmatpush.bf16.msrb.mxu1 %v11450_v40  ;;  %v11353_v4 = vld [vmem:[#allocation7 + $0x648] sm:$0xf]  ;;  %v11098_v11 = vor.u32 %v16060_v3, %v11097_v2  ;;  %v16168_v32 = vld [vmem:[#allocation7 + $0x7cc] sm:$0xf]  ;;  %v11038_v40 = vor.u32 %v16040_v27, %v11035_v28 }
  0xad   :  { %v16124_v6 = vld [vmem:[#allocation7 + $0x664] sm:$0xf0]  ;;  %v11550_v42 = vor.u32 %v16168_v32, %v11547_v33  ;;  %v16024_v55 = vld [vmem:[#allocation7 + $0x34c] sm:$0xf] }
  0xae   :  { %2246 = vmatpush.bf16.msrb.mxu0 %v11194_v39  ;;  %2272 = vmatpush.bf16.msrb.mxu2 %v11706_v41  ;;  %v11609_v7 = vld [vmem:[#allocation7 + $0x848] sm:$0xf]  ;;  %v11354_v14 = vor.u32 %v16124_v6, %v11353_v4  ;;  %v10558_v39 = vor.u32 %v15920_v25, %v10555_v26  ;;  %v11294_v41 = vor.u32 %v16104_v29, %v11291_v31  ;;  %v10971_v56 = vld [vmem:[#allocation7 + $0x368] sm:$0xf0] }
  0xaf   :  { %v16188_v8 = vld [vmem:[#allocation7 + $0x864] sm:$0xf0]  ;;  %v11227_v59 = vld [vmem:[#allocation7 + $0x568] sm:$0xf0] }
  0xb0   :  { %2285 = vmatpush.bf16.msrb.mxu3 %v10686_v45  ;;  %2260 = vmatpush.bf16.msrb.mxu1 %v11418_v52  ;;  %v11065_v12 = vld [vmem:[#allocation7 + $0x408] sm:$0xf]  ;;  %v11610_v15 = vor.u32 %v16188_v8, %v11609_v7  ;;  %v16096_v45 = vld [vmem:[#allocation7 + $0x58c] sm:$0xf]  ;;  %v11006_v52 = vor.u32 %v16032_v43, %v11003_v44 }
  0xb1   :  { %v16052_v13 = vld [vmem:[#allocation7 + $0x424] sm:$0xf0]  ;;  %v16152_v60 = vld [vmem:[#allocation7 + $0x74c] sm:$0xf] }
  0xb2   :  { %2247 = vmatpush.bf16.msrb.mxu0 %v11162_v51  ;;  %2273 = vmatpush.bf16.msrb.mxu2 %v11674_v53  ;;  %v11321_v16 = vld [vmem:[#allocation7 + $0x608] sm:$0xf]  ;;  %v11066_v30 = vor.u32 %v16052_v13, %v11065_v12  ;;  %v11771_v51 = vld [vmem:[#allocation7 + $0x9a8] sm:$0xf0]  ;;  %v11262_v53 = vor.u32 %v16096_v45, %v11259_v47 }
  0xb3   :  { %v16116_v17 = vld [vmem:[#allocation7 + $0x624] sm:$0xf0]  ;;  %v11774_v58 = vor.u32 %v16224_v50, %v11771_v51  ;;  %v11483_v61 = vld [vmem:[#allocation7 + $0x768] sm:$0xf0] }
  0xb4   :  { %2286 = vmatpush.bf16.msrb.mxu3 %v10654_v57  ;;  %2261 = vmatpush.bf16.msrb.mxu1 %v11386_v0  ;;  %v11577_v21 = vld [vmem:[#allocation7 + $0x808] sm:$0xf]  ;;  %v11322_v35 = vor.u32 %v16116_v17, %v11321_v16  ;;  %v16088_v57 = vld [vmem:[#allocation7 + $0x54c] sm:$0xf]  ;;  %v10974_v0 = vor.u32 %v16024_v55, %v10971_v56  ;;  %v11486_v2 = vor.u32 %v16152_v60, %v11483_v61 }
  0xb5   :  { %v16180_v24 = vld [vmem:[#allocation7 + $0x824] sm:$0xf0]  ;;  %v16216_v62 = vld [vmem:[#allocation7 + $0x94c] sm:$0xf] }
  0xb6   :  { %2248 = vmatpush.bf16.msrb.mxu0 %v11130_v63  ;;  %2274 = vmatpush.bf16.msrb.mxu2 %v11642_v1  ;;  %v11578_v36 = vor.u32 %v16180_v24, %v11577_v21  ;;  %v11739_v63 = vld [vmem:[#allocation7 + $0x968] sm:$0xf0]  ;;  %v11230_v1 = vor.u32 %v16088_v57, %v11227_v59 }
  0xb7   :  { %v16016_v3 = vld [vmem:[#allocation7 + $0x30c] sm:$0xf]  ;;  %v11742_v6 = vor.u32 %v16216_v62, %v11739_v63 }
  0xb8   :  { %2287 = vmatpush.bf16.msrb.mxu3 %v10622_v5  ;;  %2262 = vmatpush.bf16.msrb.mxu1 %v11354_v14  ;;  %v10939_v4 = vld [vmem:[#allocation7 + $0x328] sm:$0xf0] }
  0xb9   :  { %v16080_v5 = vld [vmem:[#allocation7 + $0x50c] sm:$0xf]  ;;  %v10942_v12 = vor.u32 %v16016_v3, %v10939_v4  ;;  %v11041_v3 = vld [vmem:[#allocation7 + $0x3d0] sm:$0xf] }
  0xba   :  { %2249 = vmatpush.bf16.msrb.mxu0 %v11098_v11  ;;  %2275 = vmatpush.bf16.msrb.mxu2 %v11610_v15  ;;  %v11195_v7 = vld [vmem:[#allocation7 + $0x528] sm:$0xf0] }
  0xbb   :  { %v16144_v8 = vld [vmem:[#allocation7 + $0x70c] sm:$0xf]  ;;  %v11198_v13 = vor.u32 %v16080_v5, %v11195_v7  ;;  %v16045_v5 = vld [vmem:[#allocation7 + $0x3ec] sm:$0xf0] }
  0xbc   :  { %2288 = vmatpush.bf16.msrb.mxu3 %v10590_v23  ;;  %2263 = vmatpush.bf16.msrb.mxu1 %v11322_v35  ;;  %v11451_v9 = vld [vmem:[#allocation7 + $0x728] sm:$0xf0]  ;;  %v16109_v7 = vld [vmem:[#allocation7 + $0x5ec] sm:$0xf0] }
  0xbd   :  { %v16208_v10 = vld [vmem:[#allocation7 + $0x90c] sm:$0xf]  ;;  %v11454_v14 = vor.u32 %v16144_v8, %v11451_v9 }
  0xbe   :  { %2250 = vmatpush.bf16.msrb.mxu0 %v11066_v30  ;;  %2276 = vmatpush.bf16.msrb.mxu2 %v11578_v36  ;;  %v11707_v11 = vld [vmem:[#allocation7 + $0x928] sm:$0xf0] }
  0xbf   :  { %2264 = vmatmul.bf16.vlgmr.msrb.gmra.mxu1 %v17558_v20  ;;  %v16008_v15 = vld [vmem:[#allocation7 + $0x2cc] sm:$0xf]  ;;  %v11710_v21 = vor.u32 %v16208_v10, %v11707_v11  ;;  %v11553_v10 = vld [vmem:[#allocation7 + $0x7d0] sm:$0xf] }
  0xc0   :  { %2289 = vmatpush.bf16.msrb.mxu3 %v10558_v39  ;;  %2308 = vmatpush.bf16.msra.mxu1 %v11294_v41  ;;  %v10907_v16 = vld [vmem:[#allocation7 + $0x2e8] sm:$0xf0]  ;;  %v16173_v11 = vld [vmem:[#allocation7 + $0x7ec] sm:$0xf0] }
  0xc1   :  { %2277 = vmatmul.bf16.vlgmr.msrb.gmra.mxu2 %v17566_v34  ;;  %2251 = vmatmul.bf16.vlgmr.msrb.gmra.mxu0 %v17554_v18  ;;  %v16072_v17 = vld [vmem:[#allocation7 + $0x4cc] sm:$0xf]  ;;  %v10910_v28 = vor.u32 %v16008_v15, %v10907_v16  ;;  %v10753_v16 = vld [vmem:[#allocation7 + $0x190] sm:$0xf] }
  0xc2   :  { %2295 = vmatpush.bf16.msra.mxu0 %v11038_v40  ;;  %2321 = vmatpush.bf16.msra.mxu2 %v11550_v42  ;;  %v11163_v23 = vld [vmem:[#allocation7 + $0x4e8] sm:$0xf0] }
  0xc3   :  { %2290 = vmatmul.bf16.vlgmr.msrb.gmra.mxu3 %v17556_v19  ;;  %v16136_v24 = vld [vmem:[#allocation7 + $0x6cc] sm:$0xf]  ;;  %v11166_v29 = vor.u32 %v16072_v17, %v11163_v23  ;;  %v15973_v17 = vld [vmem:[#allocation7 + $0x1ac] sm:$0xf0]  ;;  %v11554_v23 = vor.u32 %v16173_v11, %v11553_v10 }
  0xc4   :  { %2334 = vmatpush.bf16.msra.mxu3 %v11806_v46  ;;  %2309 = vmatpush.bf16.msra.mxu1 %v11262_v53  ;;  %v11419_v25 = vld [vmem:[#allocation7 + $0x6e8] sm:$0xf0]  ;;  %v16005_v11 = vld [vmem:[#allocation7 + $0x2ac] sm:$0xf0] }
  0xc5   :  { %v16200_v26 = vld [vmem:[#allocation7 + $0x8cc] sm:$0xf]  ;;  %v11422_v30 = vor.u32 %v16136_v24, %v11419_v25  ;;  %v16037_v24 = vld [vmem:[#allocation7 + $0x3ac] sm:$0xf0] }
  0xc6   :  { %2296 = vmatpush.bf16.msra.mxu0 %v11006_v52  ;;  %2322 = vmatpush.bf16.msra.mxu2 %v11518_v54  ;;  %v11675_v27 = vld [vmem:[#allocation7 + $0x8e8] sm:$0xf0]  ;;  %v11265_v25 = vld [vmem:[#allocation7 + $0x590] sm:$0xf] }
  0xc7   :  { %v16000_v31 = vld [vmem:[#allocation7 + $0x28c] sm:$0xf]  ;;  %v11678_v35 = vor.u32 %v16200_v26, %v11675_v27  ;;  %v16101_v26 = vld [vmem:[#allocation7 + $0x5ac] sm:$0xf0] }
  0xc8   :  { %2335 = vmatpush.bf16.msra.mxu3 %v11774_v58  ;;  %2310 = vmatpush.bf16.msra.mxu1 %v11230_v1  ;;  %v10875_v32 = vld [vmem:[#allocation7 + $0x2a8] sm:$0xf0]  ;;  %v10785_v1 = vld [vmem:[#allocation7 + $0x1d0] sm:$0xf] }
  0xc9   :  { %v16064_v33 = vld [vmem:[#allocation7 + $0x48c] sm:$0xf]  ;;  %v10878_v41 = vor.u32 %v16000_v31, %v10875_v32  ;;  %v11521_v27 = vld [vmem:[#allocation7 + $0x790] sm:$0xf]  ;;  %v11266_v31 = vor.u32 %v16101_v26, %v11265_v25 }
  0xca   :  { %2297 = vmatpush.bf16.msra.mxu0 %v10974_v0  ;;  %2323 = vmatpush.bf16.msra.mxu2 %v11486_v2  ;;  %v11131_v36 = vld [vmem:[#allocation7 + $0x4a8] sm:$0xf0]  ;;  %v15981_v2 = vld [vmem:[#allocation7 + $0x1ec] sm:$0xf0] }
  0xcb   :  { %v16128_v37 = vld [vmem:[#allocation7 + $0x68c] sm:$0xf]  ;;  %v11134_v42 = vor.u32 %v16064_v33, %v11131_v36  ;;  %v10721_v32 = vld [vmem:[#allocation7 + $0x150] sm:$0xf] }
  0xcc   :  { %2336 = vmatpush.bf16.msra.mxu3 %v11742_v6  ;;  %2311 = vmatpush.bf16.msra.mxu1 %v11198_v13  ;;  %v11387_v38 = vld [vmem:[#allocation7 + $0x6a8] sm:$0xf0]  ;;  %v11297_v6 = vld [vmem:[#allocation7 + $0x5d0] sm:$0xf]  ;;  %v10786_v13 = vor.u32 %v15981_v2, %v10785_v1 }
  0xcd   :  { %v16192_v39 = vld [vmem:[#allocation7 + $0x88c] sm:$0xf]  ;;  %v11390_v43 = vor.u32 %v16128_v37, %v11387_v38  ;;  %v11298_v15 = vor.u32 %v16109_v7, %v11297_v6  ;;  %v15965_v33 = vld [vmem:[#allocation7 + $0x16c] sm:$0xf0] }
  0xce   :  { %2298 = vmatpush.bf16.msra.mxu0 %v10942_v12  ;;  %2324 = vmatpush.bf16.msra.mxu2 %v11454_v14  ;;  %v11643_v40 = vld [vmem:[#allocation7 + $0x8a8] sm:$0xf0]  ;;  %v11042_v14 = vor.u32 %v16045_v5, %v11041_v3  ;;  %v16029_v37 = vld [vmem:[#allocation7 + $0x36c] sm:$0xf0] }
  0xcf   :  { %v15992_v44 = vld [vmem:[#allocation7 + $0x24c] sm:$0xf]  ;;  %v11646_v47 = vor.u32 %v16192_v39, %v11643_v40  ;;  %v11233_v38 = vld [vmem:[#allocation7 + $0x550] sm:$0xf] }
  0xd0   :  { %2337 = vmatpush.bf16.msra.mxu3 %v11710_v21  ;;  %2312 = vmatpush.bf16.msra.mxu1 %v11166_v29  ;;  %v10843_v45 = vld [vmem:[#allocation7 + $0x268] sm:$0xf0]  ;;  %v11009_v21 = vld [vmem:[#allocation7 + $0x390] sm:$0xf]  ;;  %v10754_v29 = vor.u32 %v15973_v17, %v10753_v16 }
  0xd1   :  { %v16056_v46 = vld [vmem:[#allocation7 + $0x44c] sm:$0xf]  ;;  %v10846_v53 = vor.u32 %v15992_v44, %v10843_v45  ;;  %v16093_v39 = vld [vmem:[#allocation7 + $0x56c] sm:$0xf0] }
  0xd2   :  { %2299 = vmatpush.bf16.msra.mxu0 %v10910_v28  ;;  %2325 = vmatpush.bf16.msra.mxu2 %v11422_v30  ;;  %v11099_v48 = vld [vmem:[#allocation7 + $0x468] sm:$0xf0]  ;;  %v16165_v28 = vld [vmem:[#allocation7 + $0x7ac] sm:$0xf0]  ;;  %v11010_v30 = vor.u32 %v16037_v24, %v11009_v21  ;;  %v11234_v44 = vor.u32 %v16093_v39, %v11233_v38 }
  0xd3   :  { %v16120_v49 = vld [vmem:[#allocation7 + $0x64c] sm:$0xf]  ;;  %v11102_v56 = vor.u32 %v16056_v46, %v11099_v48  ;;  %v11522_v36 = vor.u32 %v16165_v28, %v11521_v27  ;;  %v11489_v40 = vld [vmem:[#allocation7 + $0x750] sm:$0xf] }
  0xd4   :  { %2338 = vmatpush.bf16.msra.mxu3 %v11678_v35  ;;  %v11355_v50 = vld [vmem:[#allocation7 + $0x668] sm:$0xf0]  ;;  %2313 = vmatpush.bf16.msra.mxu1 %v11134_v42  ;;  %v10977_v35 = vld [vmem:[#allocation7 + $0x350] sm:$0xf]  ;;  %v10722_v42 = vor.u32 %v15965_v33, %v10721_v32 }
  0xd5   :  { %v16184_v51 = vld [vmem:[#allocation7 + $0x84c] sm:$0xf]  ;;  %v11358_v57 = vor.u32 %v16120_v49, %v11355_v50  ;;  %v10689_v45 = vld [vmem:[#allocation7 + $0x110] sm:$0xf] }
  0xd6   :  { %v11611_v52 = vld [vmem:[#allocation7 + $0x868] sm:$0xf0]  ;;  %2300 = vmatpush.bf16.msra.mxu0 %v10878_v41  ;;  %2326 = vmatpush.bf16.msra.mxu2 %v11390_v43  ;;  %v16157_v41 = vld [vmem:[#allocation7 + $0x76c] sm:$0xf0]  ;;  %v10978_v43 = vor.u32 %v16029_v37, %v10977_v35 }
  0xd7   :  { %v15984_v54 = vld [vmem:[#allocation7 + $0x20c] sm:$0xf]  ;;  %v11614_v61 = vor.u32 %v16184_v51, %v11611_v52  ;;  %v15957_v46 = vld [vmem:[#allocation7 + $0x12c] sm:$0xf0]  ;;  %v11490_v48 = vor.u32 %v16157_v41, %v11489_v40 }
  0xd8   :  { %v10811_v55 = vld [vmem:[#allocation7 + $0x228] sm:$0xf0]  ;;  %2339 = vmatpush.bf16.msra.mxu3 %v11646_v47  ;;  %2314 = vmatpush.bf16.msra.mxu1 %v11102_v56  ;;  %v10945_v47 = vld [vmem:[#allocation7 + $0x310] sm:$0xf] }
  0xd9   :  { %v16048_v58 = vld [vmem:[#allocation7 + $0x40c] sm:$0xf]  ;;  %v10814_v4 = vor.u32 %v15984_v54, %v10811_v55  ;;  %v16021_v49 = vld [vmem:[#allocation7 + $0x32c] sm:$0xf0]  ;;  %v10690_v54 = vor.u32 %v15957_v46, %v10689_v45 }
  0xda   :  { %v11067_v59 = vld [vmem:[#allocation7 + $0x428] sm:$0xf0]  ;;  %2301 = vmatpush.bf16.msra.mxu0 %v10846_v53  ;;  %2327 = vmatpush.bf16.msra.mxu2 %v11358_v57  ;;  %v11201_v50 = vld [vmem:[#allocation7 + $0x510] sm:$0xf]  ;;  %v10946_v56 = vor.u32 %v16021_v49, %v10945_v47  ;;  %v2096_v17 = vpop.f32.mrf.mxu0 }
  0xdb   :  { %v16112_v60 = vld [vmem:[#allocation7 + $0x60c] sm:$0xf]  ;;  %v11070_v8 = vor.u32 %v16048_v58, %v11067_v59  ;;  %v16085_v51 = vld [vmem:[#allocation7 + $0x52c] sm:$0xf0] }
  0xdc   :  { %v11323_v62 = vld [vmem:[#allocation7 + $0x628] sm:$0xf0]  ;;  %2340 = vmatpush.bf16.msra.mxu3 %v11614_v61  ;;  %v11457_v52 = vld [vmem:[#allocation7 + $0x710] sm:$0xf]  ;;  %v11202_v57 = vor.u32 %v16085_v51, %v11201_v50  ;;  %v2109_v28 = vpop.f32.mrf.mxu1 }
  0xdd   :  { %v16176_v63 = vld [vmem:[#allocation7 + $0x80c] sm:$0xf]  ;;  %v11326_v9 = vor.u32 %v16112_v60, %v11323_v62  ;;  %2315 = vmatpush.bf16.msra.mxu1 %v11070_v8  ;;  %v16149_v53 = vld [vmem:[#allocation7 + $0x72c] sm:$0xf0] }
  0xde   :  { %v11579_v0 = vld [vmem:[#allocation7 + $0x828] sm:$0xf0]  ;;  %2302 = vmatpush.bf16.msra.mxu0 %v10814_v4  ;;  %v10657_v55 = vld [vmem:[#allocation7 + $0xd0] sm:$0xf]  ;;  %v11458_v61 = vor.u32 %v16149_v53, %v11457_v52 }
  0xdf   :  { %v11582_v12 = vor.u32 %v16176_v63, %v11579_v0  ;;  %2328 = vmatpush.bf16.msra.mxu2 %v11326_v9  ;;  %v15949_v58 = vld [vmem:[#allocation7 + $0xec] sm:$0xf0]  ;;  %v17584_v0 = vld [vmem:[#allocation9] sm:$0xff] }
  0xe0   :  { %2316 = vmatmul.bf16.vlgmr.msra.gmra.mxu1 %v17554_v18  ;;  %v10913_v59 = vld [vmem:[#allocation7 + $0x2d0] sm:$0xf]  ;;  %v10658_v3 = vor.u32 %v15949_v58, %v10657_v55  ;;  %v453_v9 = vperm.slane %v17584_v0, 0  ;;  %v11043_v58 = vld [vmem:[#allocation7 + $0x3f0] sm:$0xf0] }
  0xe1   :  { %2341 = vmatpush.bf16.msra.mxu3 %v11582_v12  ;;  %2360 = vmatpush.bf16.msrb.mxu1 %v11042_v14  ;;  %v16013_v60 = vld [vmem:[#allocation7 + $0x2ec] sm:$0xf0] }
  0xe2   :  { %2347 = vmatpush.bf16.msrb.mxu0 %v10786_v13  ;;  %2329 = vmatmul.bf16.vlgmr.msra.gmra.mxu2 %v17558_v20  ;;  %v11169_v62 = vld [vmem:[#allocation7 + $0x4d0] sm:$0xf]  ;;  %v10914_v5 = vor.u32 %v16013_v60, %v10913_v59  ;;  %v2097_v27 = vadd.f32 %v2096_v17, %v453_v9  ;;  %v2098_v60 = vpop.f32.mrf.mxu0  ;;  %v15969_v9 = vld [vmem:[#allocation7 + $0x194] sm:$0xf] }
  0xe3   :  { %2373 = vmatpush.bf16.msrb.mxu2 %v11298_v15  ;;  %2303 = vmatmul.bf16.vlgmr.msra.gmra.mxu0 %v17560_v22  ;;  %v16077_v63 = vld [vmem:[#allocation7 + $0x4ec] sm:$0xf0]  ;;  %v16009_v60 = vld [vmem:[#allocation7 + $0x2d4] sm:$0xf] }
  0xe4   :  { %2342 = vmatmul.bf16.vlgmr.msra.gmra.mxu3 %v17566_v34  ;;  %v11425_v1 = vld [vmem:[#allocation7 + $0x6d0] sm:$0xf]  ;;  %v11170_v6 = vor.u32 %v16077_v63, %v11169_v62  ;;  %v2122_v45 = vpop.f32.mrf.mxu2  ;;  %v16105_v63 = vld [vmem:[#allocation7 + $0x5d4] sm:$0xf] }
  0xe5   :  { %2386 = vmatpush.bf16.msrb.mxu3 %v11554_v23  ;;  %2361 = vmatpush.bf16.msrb.mxu1 %v11010_v30  ;;  %v16141_v2 = vld [vmem:[#allocation7 + $0x6ec] sm:$0xf0] }
  0xe6   :  { %2348 = vmatpush.bf16.msrb.mxu0 %v10754_v29  ;;  %v10625_v4 = vld [vmem:[#allocation7 + $0x90] sm:$0xf]  ;;  %v11426_v10 = vor.u32 %v16141_v2, %v11425_v1  ;;  %v2135_v51 = vpop.f32.mrf.mxu3  ;;  %v11299_v1 = vld [vmem:[#allocation7 + $0x5f0] sm:$0xf0]  ;;  %v2111_v2 = vpop.f32.mrf.mxu1 }
  0xe7   :  { %2374 = vmatpush.bf16.msrb.mxu2 %v11266_v31  ;;  %v15941_v7 = vld [vmem:[#allocation7 + $0xac] sm:$0xf0] }
  0xe8   :  { %v10881_v8 = vld [vmem:[#allocation7 + $0x290] sm:$0xf]  ;;  %v10626_v16 = vor.u32 %v15941_v7, %v10625_v4 }
  0xe9   :  { %2387 = vmatpush.bf16.msrb.mxu3 %v11522_v36  ;;  %2362 = vmatpush.bf16.msrb.mxu1 %v10978_v43  ;;  %v11137_v12 = vld [vmem:[#allocation7 + $0x490] sm:$0xf]  ;;  %v10882_v21 = vor.u32 %v16005_v11, %v10881_v8  ;;  %v2110_v36 = vadd.f32 %v2109_v28, %v2097_v27  ;;  %v10755_v11 = vld [vmem:[#allocation7 + $0x1b0] sm:$0xf0] }
  0xea   :  { %2349 = vmatpush.bf16.msrb.mxu0 %v10722_v42  ;;  %v16069_v13 = vld [vmem:[#allocation7 + $0x4ac] sm:$0xf0]  ;;  %v15961_v27 = vld [vmem:[#allocation7 + $0x154] sm:$0xf] }
  0xeb   :  { %2375 = vmatpush.bf16.msrb.mxu2 %v11234_v44  ;;  %v11393_v14 = vld [vmem:[#allocation7 + $0x690] sm:$0xf]  ;;  %v11138_v23 = vor.u32 %v16069_v13, %v11137_v12  ;;  %v2123_v50 = vadd.f32 %v2122_v45, %v2110_v36  ;;  %v16033_v12 = vld [vmem:[#allocation7 + $0x394] sm:$0xf] }
  0xec   :  { %v16133_v15 = vld [vmem:[#allocation7 + $0x6ac] sm:$0xf0]  ;;  %v11011_v13 = vld [vmem:[#allocation7 + $0x3b0] sm:$0xf0] }
  0xed   :  { %2388 = vmatpush.bf16.msrb.mxu3 %v11490_v48  ;;  %2363 = vmatpush.bf16.msrb.mxu1 %v10946_v56  ;;  %v10593_v24 = vld [vmem:[#allocation7 + $0x50] sm:$0xf]  ;;  %v11394_v29 = vor.u32 %v16133_v15, %v11393_v14  ;;  %v10787_v56 = vld [vmem:[#allocation7 + $0x1f0] sm:$0xf0]  ;;  %v17587_v59 = vadd.f32 %v2135_v51, %v2123_v50 }
  0xee   :  { %2350 = vmatpush.bf16.msrb.mxu0 %v10690_v54  ;;  %v15933_v25 = vld [vmem:[#allocation7 + $0x6c] sm:$0xf0]  ;;  %v15977_v54 = vld [vmem:[#allocation7 + $0x1d4] sm:$0xf] }
  0xef   :  { %2376 = vmatpush.bf16.msrb.mxu2 %v11202_v57  ;;  %v10849_v26 = vld [vmem:[#allocation7 + $0x250] sm:$0xf]  ;;  %v10594_v37 = vor.u32 %v15933_v25, %v10593_v24  ;;  %v16041_v57 = vld [vmem:[#allocation7 + $0x3d4] sm:$0xf]  ;;  %v11014_v24 = vor.u32 %v16033_v12, %v11011_v13 }
  0xf0   :  { %v15997_v30 = vld [vmem:[#allocation7 + $0x26c] sm:$0xf0]  ;;  %v16097_v14 = vld [vmem:[#allocation7 + $0x594] sm:$0xf] }
  0xf1   :  { %2389 = vmatpush.bf16.msrb.mxu3 %v11458_v61  ;;  %2364 = vmatpush.bf16.msrb.mxu1 %v10914_v5  ;;  %v11105_v31 = vld [vmem:[#allocation7 + $0x450] sm:$0xf]  ;;  %v10850_v40 = vor.u32 %v15997_v30, %v10849_v26  ;;  %v10790_v5 = vor.u32 %v15977_v54, %v10787_v56  ;;  %v11267_v15 = vld [vmem:[#allocation7 + $0x5b0] sm:$0xf0] }
  0xf2   :  { %2351 = vmatpush.bf16.msrb.mxu0 %v10658_v3  ;;  %v16061_v32 = vld [vmem:[#allocation7 + $0x46c] sm:$0xf0]  ;;  %v11270_v28 = vor.u32 %v16097_v14, %v11267_v15  ;;  %v16025_v30 = vld [vmem:[#allocation7 + $0x354] sm:$0xf] }
  0xf3   :  { %2377 = vmatpush.bf16.msrb.mxu2 %v11170_v6  ;;  %v11361_v33 = vld [vmem:[#allocation7 + $0x650] sm:$0xf]  ;;  %v11106_v41 = vor.u32 %v16061_v32, %v11105_v31  ;;  %v11046_v6 = vor.u32 %v16041_v57, %v11043_v58  ;;  %v10979_v31 = vld [vmem:[#allocation7 + $0x370] sm:$0xf0] }
  0xf4   :  { %v16125_v35 = vld [vmem:[#allocation7 + $0x66c] sm:$0xf0]  ;;  %v16089_v32 = vld [vmem:[#allocation7 + $0x554] sm:$0xf] }
  0xf5   :  { %2390 = vmatpush.bf16.msrb.mxu3 %v11426_v10  ;;  %v10561_v38 = vld [vmem:[#allocation7 + $0x10] sm:$0xf]  ;;  %2365 = vmatpush.bf16.msrb.mxu1 %v10882_v21  ;;  %v11362_v46 = vor.u32 %v16125_v35, %v11361_v33  ;;  %v11302_v10 = vor.u32 %v16105_v63, %v11299_v1  ;;  %v2137_v21 = vpop.f32.mrf.mxu3  ;;  %v11235_v33 = vld [vmem:[#allocation7 + $0x570] sm:$0xf0] }
  0xf6   :  { %2352 = vmatpush.bf16.msrb.mxu0 %v10626_v16  ;;  %v15925_v39 = vld [vmem:[#allocation7 + $0x2c] sm:$0xf0]  ;;  %v2124_v16 = vpop.f32.mrf.mxu2  ;;  %v16081_v45 = vld [vmem:[#allocation7 + $0x514] sm:$0xf] }
  0xf7   :  { %2378 = vmatpush.bf16.msrb.mxu2 %v11138_v23  ;;  %v10817_v42 = vld [vmem:[#allocation7 + $0x210] sm:$0xf]  ;;  %v10562_v55 = vor.u32 %v15925_v39, %v10561_v38  ;;  %v10758_v23 = vor.u32 %v15969_v9, %v10755_v11  ;;  %v10659_v58 = vld [vmem:[#allocation7 + $0xf0] sm:$0xf0] }
  0xf8   :  { %v15989_v43 = vld [vmem:[#allocation7 + $0x22c] sm:$0xf0]  ;;  %v11171_v63 = vld [vmem:[#allocation7 + $0x4f0] sm:$0xf0] }
  0xf9   :  { %v11073_v44 = vld [vmem:[#allocation7 + $0x410] sm:$0xf]  ;;  %2391 = vmatpush.bf16.msrb.mxu3 %v11394_v29  ;;  %2366 = vmatpush.bf16.msrb.mxu1 %v10850_v40  ;;  %v10818_v61 = vor.u32 %v15989_v43, %v10817_v42  ;;  %v10723_v29 = vld [vmem:[#allocation7 + $0x170] sm:$0xf0] }
  0xfa   :  { %v16053_v47 = vld [vmem:[#allocation7 + $0x42c] sm:$0xf0]  ;;  %2353 = vmatpush.bf16.msrb.mxu0 %v10594_v37  ;;  %v10726_v36 = vor.u32 %v15961_v27, %v10723_v29  ;;  %v10982_v37 = vor.u32 %v16025_v30, %v10979_v31  ;;  %v15953_v40 = vld [vmem:[#allocation7 + $0x114] sm:$0xf] }
  0xfb   :  { %v11329_v48 = vld [vmem:[#allocation7 + $0x610] sm:$0xf]  ;;  %2379 = vmatpush.bf16.msrb.mxu2 %v11106_v41  ;;  %v11074_v62 = vor.u32 %v16053_v47, %v11073_v44  ;;  %v11238_v41 = vor.u32 %v16089_v32, %v11235_v33  ;;  %v10691_v42 = vld [vmem:[#allocation7 + $0x130] sm:$0xf0] }
  0xfc   :  { %v16117_v49 = vld [vmem:[#allocation7 + $0x62c] sm:$0xf0]  ;;  %v16017_v43 = vld [vmem:[#allocation7 + $0x314] sm:$0xf]  ;;  %v10694_v51 = vor.u32 %v15953_v40, %v10691_v42  ;;  %v2161_v56 = vpop.f32.mrf.mxu1 }
  0xfd   :  { %v11809_v52 = vld [vmem:[#allocation7 + $0x9d0] sm:$0xf]  ;;  %2392 = vmatpush.bf16.msrb.mxu3 %v11362_v46  ;;  %v11330_v3 = vor.u32 %v16117_v49, %v11329_v48  ;;  %2367 = vmatpush.bf16.msrb.mxu1 %v10818_v61  ;;  %v10947_v44 = vld [vmem:[#allocation7 + $0x330] sm:$0xf0]  ;;  %v454_v48 = vperm.slane %v17584_v0, 1 }
  0xfe   :  { %v16237_v53 = vld [vmem:[#allocation7 + $0x9ec] sm:$0xf0]  ;;  %2354 = vmatpush.bf16.msrb.mxu0 %v10562_v55  ;;  %v11203_v46 = vld [vmem:[#allocation7 + $0x530] sm:$0xf0]  ;;  %v2148_v47 = vpop.f32.mrf.mxu0 }
  0xff   :  { %v11810_v4 = vor.u32 %v16237_v53, %v11809_v52  ;;  %v11777_v7 = vld [vmem:[#allocation7 + $0x990] sm:$0xf]  ;;  %2380 = vmatpush.bf16.msrb.mxu2 %v11074_v62  ;;  %v17595_v50 = vadd.f32 %v2148_v47, %v17587_v59  ;;  %v10950_v52 = vor.u32 %v16017_v43, %v10947_v44  ;;  %v15945_v55 = vld [vmem:[#allocation7 + $0xd4] sm:$0xf]  ;;  %v11206_v57 = vor.u32 %v16081_v45, %v11203_v46 }
 0x100   :  { %v16229_v8 = vld [vmem:[#allocation7 + $0x9ac] sm:$0xf0]  ;;  %2368 = vmatmul.bf16.vlgmr.msrb.gmra.mxu1 %v17560_v22  ;;  %v10915_v61 = vld [vmem:[#allocation7 + $0x2f0] sm:$0xf0]  ;;  %v2162_v1 = vadd.f32 %v2161_v56, %v454_v48  ;;  %v10662_v59 = vor.u32 %v15945_v55, %v10659_v58  ;;  %v10793_v56 = vld [vmem:[#allocation7 + $0x1d8] sm:$0xf] }
 0x101   :  { %2393 = vmatpush.bf16.msrb.mxu3 %v11330_v3  ;;  %v11778_v17 = vor.u32 %v16229_v8, %v11777_v7  ;;  %2412 = vmatpush.bf16.msra.mxu1 %v10790_v5  ;;  %v11745_v25 = vld [vmem:[#allocation7 + $0x950] sm:$0xf]  ;;  %v16073_v62 = vld [vmem:[#allocation7 + $0x4d4] sm:$0xf]  ;;  %v10918_v3 = vor.u32 %v16009_v60, %v10915_v61  ;;  %v11049_v61 = vld [vmem:[#allocation7 + $0x3d8] sm:$0xf] }
 0x102   :  { %2399 = vmatpush.bf16.msra.mxu0 %v11810_v4  ;;  %v16221_v26 = vld [vmem:[#allocation7 + $0x96c] sm:$0xf0]  ;;  %2381 = vmatmul.bf16.vlgmr.msrb.gmra.mxu2 %v17554_v18  ;;  %v11174_v7 = vor.u32 %v16073_v62, %v11171_v63  ;;  %v10627_v8 = vld [vmem:[#allocation7 + $0xb0] sm:$0xf0]  ;;  %v16046_v62 = vld [vmem:[#allocation7 + $0x3f4] sm:$0xf0] }
 0x103   :  { %2425 = vmatpush.bf16.msra.mxu2 %v11046_v6  ;;  %2355 = vmatmul.bf16.vlgmr.msrb.gmra.mxu0 %v17556_v19  ;;  %v11746_v35 = vor.u32 %v16221_v26, %v11745_v25  ;;  %v11713_v38 = vld [vmem:[#allocation7 + $0x910] sm:$0xf]  ;;  %v15937_v6 = vld [vmem:[#allocation7 + $0x94] sm:$0xf] }
 0x104   :  { %2394 = vmatmul.bf16.vlgmr.msrb.gmra.mxu3 %v17558_v20  ;;  %v16213_v39 = vld [vmem:[#allocation7 + $0x92c] sm:$0xf0]  ;;  %v16001_v9 = vld [vmem:[#allocation7 + $0x294] sm:$0xf]  ;;  %v2174_v11 = vpop.f32.mrf.mxu2  ;;  %v10630_v21 = vor.u32 %v15937_v6, %v10627_v8  ;;  %v11050_v6 = vor.u32 %v16046_v62, %v11049_v61  ;;  %v10761_v8 = vld [vmem:[#allocation7 + $0x198] sm:$0xf] }
 0x105   :  { %2438 = vmatpush.bf16.msra.mxu3 %v11302_v10  ;;  %2413 = vmatpush.bf16.msra.mxu1 %v10758_v23  ;;  %v11714_v49 = vor.u32 %v16213_v39, %v11713_v38  ;;  %v11681_v53 = vld [vmem:[#allocation7 + $0x8d0] sm:$0xf]  ;;  %v10883_v10 = vld [vmem:[#allocation7 + $0x2b0] sm:$0xf0]  ;;  %v2175_v15 = vadd.f32 %v2174_v11, %v2162_v1  ;;  %v16038_v11 = vld [vmem:[#allocation7 + $0x3b4] sm:$0xf0] }
 0x106   :  { %2400 = vmatpush.bf16.msra.mxu0 %v11778_v17  ;;  %v16205_v54 = vld [vmem:[#allocation7 + $0x8ec] sm:$0xf0]  ;;  %v2187_v12 = vpop.f32.mrf.mxu3  ;;  %v16065_v13 = vld [vmem:[#allocation7 + $0x494] sm:$0xf]  ;;  %v2150_v16 = vpop.f32.mrf.mxu0  ;;  %v10886_v23 = vor.u32 %v16001_v9, %v10883_v10  ;;  %v15974_v9 = vld [vmem:[#allocation7 + $0x1b4] sm:$0xf0] }
 0x107   :  { %2426 = vmatpush.bf16.msra.mxu2 %v11014_v24  ;;  %v11682_v2 = vor.u32 %v16205_v54, %v11681_v53  ;;  %v11649_v4 = vld [vmem:[#allocation7 + $0x890] sm:$0xf]  ;;  %v11139_v14 = vld [vmem:[#allocation7 + $0x4b0] sm:$0xf0]  ;;  %v17597_v27 = vadd.f32 %v2187_v12, %v2175_v15  ;;  %v11017_v10 = vld [vmem:[#allocation7 + $0x398] sm:$0xf] }
 0x108   :  { %v16197_v5 = vld [vmem:[#allocation7 + $0x8ac] sm:$0xf0]  ;;  %v15929_v26 = vld [vmem:[#allocation7 + $0x54] sm:$0xf]  ;;  %v11142_v29 = vor.u32 %v16065_v13, %v11139_v14  ;;  %v10762_v14 = vor.u32 %v15974_v9, %v10761_v8  ;;  %v16006_v8 = vld [vmem:[#allocation7 + $0x2b4] sm:$0xf0] }
 0x109   :  { %2439 = vmatpush.bf16.msra.mxu3 %v11270_v28  ;;  %2414 = vmatpush.bf16.msra.mxu1 %v10726_v36  ;;  %v11650_v17 = vor.u32 %v16197_v5, %v11649_v4  ;;  %v11617_v24 = vld [vmem:[#allocation7 + $0x850] sm:$0xf]  ;;  %v2163_v28 = vpop.f32.mrf.mxu1  ;;  %v10595_v30 = vld [vmem:[#allocation7 + $0x70] sm:$0xf0] }
 0x10a   :  { %2401 = vmatpush.bf16.msra.mxu0 %v11746_v35  ;;  %v16189_v25 = vld [vmem:[#allocation7 + $0x86c] sm:$0xf0]  ;;  %v15993_v31 = vld [vmem:[#allocation7 + $0x254] sm:$0xf]  ;;  %v10598_v39 = vor.u32 %v15929_v26, %v10595_v30  ;;  %v10985_v26 = vld [vmem:[#allocation7 + $0x358] sm:$0xf] }
 0x10b   :  { %2427 = vmatpush.bf16.msra.mxu2 %v10982_v37  ;;  %v10851_v32 = vld [vmem:[#allocation7 + $0x270] sm:$0xf0]  ;;  %v11618_v36 = vor.u32 %v16189_v25, %v11617_v24  ;;  %v11585_v37 = vld [vmem:[#allocation7 + $0x810] sm:$0xf]  ;;  %v10729_v24 = vld [vmem:[#allocation7 + $0x158] sm:$0xf] }
 0x10c   :  { %v16057_v33 = vld [vmem:[#allocation7 + $0x454] sm:$0xf]  ;;  %v16181_v38 = vld [vmem:[#allocation7 + $0x82c] sm:$0xf0]  ;;  %v10854_v40 = vor.u32 %v15993_v31, %v10851_v32  ;;  %v2176_v48 = vpop.f32.mrf.mxu2  ;;  %v15966_v25 = vld [vmem:[#allocation7 + $0x174] sm:$0xf0] }
 0x10d   :  { %2440 = vmatpush.bf16.msra.mxu3 %v11238_v41  ;;  %2415 = vmatpush.bf16.msra.mxu1 %v10694_v51  ;;  %v11107_v35 = vld [vmem:[#allocation7 + $0x470] sm:$0xf0]  ;;  %v11586_v54 = vor.u32 %v16181_v38, %v11585_v37  ;;  %v16030_v28 = vld [vmem:[#allocation7 + $0x374] sm:$0xf0]  ;;  %v10730_v31 = vor.u32 %v15966_v25, %v10729_v24 }
 0x10e   :  { %2402 = vmatpush.bf16.msra.mxu0 %v11714_v49  ;;  %v15921_v41 = vld [vmem:[#allocation7 + $0x14] sm:$0xf]  ;;  %v11110_v44 = vor.u32 %v16057_v33, %v11107_v35  ;;  %v2189_v49 = vpop.f32.mrf.mxu3  ;;  %v10697_v38 = vld [vmem:[#allocation7 + $0x118] sm:$0xf] }
 0x10f   :  { %2428 = vmatpush.bf16.msra.mxu2 %v10950_v52  ;;  %v10563_v42 = vld [vmem:[#allocation7 + $0x30] sm:$0xf0]  ;;  %v10601_v25 = vld [vmem:[#allocation7 + $0x58] sm:$0xf] }
 0x110   :  { %v15985_v43 = vld [vmem:[#allocation7 + $0x214] sm:$0xf]  ;;  %v10566_v58 = vor.u32 %v15921_v41, %v10563_v42  ;;  %v16022_v41 = vld [vmem:[#allocation7 + $0x334] sm:$0xf0] }
 0x111   :  { %2441 = vmatpush.bf16.msra.mxu3 %v11206_v57  ;;  %2416 = vmatpush.bf16.msra.mxu1 %v10662_v59  ;;  %v10819_v45 = vld [vmem:[#allocation7 + $0x230] sm:$0xf0]  ;;  %v15982_v57 = vld [vmem:[#allocation7 + $0x1f4] sm:$0xf0] }
 0x112   :  { %2403 = vmatpush.bf16.msra.mxu0 %v11682_v2  ;;  %v16049_v46 = vld [vmem:[#allocation7 + $0x414] sm:$0xf]  ;;  %v10822_v60 = vor.u32 %v15985_v43, %v10819_v45  ;;  %v10794_v59 = vor.u32 %v15982_v57, %v10793_v56  ;;  %v10921_v57 = vld [vmem:[#allocation7 + $0x2d8] sm:$0xf] }
 0x113   :  { %2429 = vmatpush.bf16.msra.mxu2 %v10918_v3  ;;  %v11075_v47 = vld [vmem:[#allocation7 + $0x430] sm:$0xf0] }
 0x114   :  { %v16169_v51 = vld [vmem:[#allocation7 + $0x7d4] sm:$0xf]  ;;  %v11078_v63 = vor.u32 %v16049_v46, %v11075_v47 }
 0x115   :  { %2442 = vmatpush.bf16.msra.mxu3 %v11174_v7  ;;  %2417 = vmatpush.bf16.msra.mxu1 %v10630_v21  ;;  %v11555_v52 = vld [vmem:[#allocation7 + $0x7f0] sm:$0xf0]  ;;  %v11018_v21 = vor.u32 %v16038_v11, %v11017_v10 }
 0x116   :  { %2404 = vmatpush.bf16.msra.mxu0 %v11650_v17  ;;  %v16233_v53 = vld [vmem:[#allocation7 + $0x9d4] sm:$0xf]  ;;  %v11558_v1 = vor.u32 %v16169_v51, %v11555_v52 }
 0x117   :  { %2430 = vmatpush.bf16.msra.mxu2 %v10886_v23  ;;  %v11811_v55 = vld [vmem:[#allocation7 + $0x9f0] sm:$0xf0] }
 0x118   :  { %v11814_v2 = vor.u32 %v16233_v53, %v11811_v55  ;;  %v16161_v3 = vld [vmem:[#allocation7 + $0x794] sm:$0xf]  ;;  %v15950_v55 = vld [vmem:[#allocation7 + $0xf4] sm:$0xf0] }
 0x119   :  { %2443 = vmatpush.bf16.msra.mxu3 %v11142_v29  ;;  %2418 = vmatpush.bf16.msra.mxu1 %v10598_v39  ;;  %v11523_v4 = vld [vmem:[#allocation7 + $0x7b0] sm:$0xf0]  ;;  %v15958_v39 = vld [vmem:[#allocation7 + $0x134] sm:$0xf0] }
 0x11a   :  { %2405 = vmatpush.bf16.msra.mxu0 %v11618_v36  ;;  %v16225_v5 = vld [vmem:[#allocation7 + $0x994] sm:$0xf]  ;;  %v11526_v12 = vor.u32 %v16161_v3, %v11523_v4  ;;  %v10986_v36 = vor.u32 %v16030_v28, %v10985_v26  ;;  %v10698_v47 = vor.u32 %v15958_v39, %v10697_v38  ;;  %v10633_v4 = vld [vmem:[#allocation7 + $0x98] sm:$0xf] }
 0x11b   :  { %2431 = vmatpush.bf16.msra.mxu2 %v10854_v40  ;;  %v11779_v7 = vld [vmem:[#allocation7 + $0x9b0] sm:$0xf0]  ;;  %v10953_v40 = vld [vmem:[#allocation7 + $0x318] sm:$0xf] }
 0x11c   :  { %v11782_v13 = vor.u32 %v16225_v5, %v11779_v7  ;;  %v16153_v15 = vld [vmem:[#allocation7 + $0x754] sm:$0xf]  ;;  %v2213_v45 = vpop.f32.mrf.mxu1  ;;  %v10954_v52 = vor.u32 %v16022_v41, %v10953_v40  ;;  %v15942_v5 = vld [vmem:[#allocation7 + $0xb4] sm:$0xf0] }
 0x11d   :  { %2444 = vmatpush.bf16.msra.mxu3 %v11110_v44  ;;  %2419 = vmatpush.bf16.msra.mxu1 %v10566_v58  ;;  %v11491_v16 = vld [vmem:[#allocation7 + $0x770] sm:$0xf0]  ;;  %v16014_v58 = vld [vmem:[#allocation7 + $0x2f4] sm:$0xf0] }
 0x11e   :  { %2406 = vmatpush.bf16.msra.mxu0 %v11586_v54  ;;  %v16217_v17 = vld [vmem:[#allocation7 + $0x954] sm:$0xf]  ;;  %v11494_v29 = vor.u32 %v16153_v15, %v11491_v16  ;;  %v2200_v42 = vpop.f32.mrf.mxu0  ;;  %v10665_v54 = vld [vmem:[#allocation7 + $0xd8] sm:$0xf] }
 0x11f   :  { %2432 = vmatpush.bf16.msra.mxu2 %v10822_v60  ;;  %v11747_v23 = vld [vmem:[#allocation7 + $0x970] sm:$0xf0]  ;;  %v2201_v44 = vadd.f32 %v2200_v42, %v17597_v27  ;;  %v455_v60 = vperm.slane %v17584_v0, 2  ;;  %v10666_v62 = vor.u32 %v15950_v55, %v10665_v54  ;;  %v10889_v7 = vld [vmem:[#allocation7 + $0x298] sm:$0xf] }
 0x120   :  { %2420 = vmatmul.bf16.vlgmr.msra.gmra.mxu1 %v17556_v19  ;;  %v11750_v30 = vor.u32 %v16217_v17, %v11747_v23  ;;  %v16145_v32 = vld [vmem:[#allocation7 + $0x714] sm:$0xf]  ;;  %v10890_v23 = vor.u32 %v16006_v8, %v10889_v7  ;;  %v15934_v26 = vld [vmem:[#allocation7 + $0x74] sm:$0xf0]  ;;  %v15978_v55 = vld [vmem:[#allocation7 + $0x1dc] sm:$0xf] }
 0x121   :  { %2445 = vmatpush.bf16.msra.mxu3 %v11078_v63  ;;  %2464 = vmatpush.bf16.msrb.mxu1 %v11814_v2  ;;  %v11459_v33 = vld [vmem:[#allocation7 + $0x730] sm:$0xf0]  ;;  %v17604_v56 = vadd.f32 %v2213_v45, %v2201_v44  ;;  %v10857_v28 = vld [vmem:[#allocation7 + $0x258] sm:$0xf] }
 0x122   :  { %2451 = vmatpush.bf16.msrb.mxu0 %v11558_v1  ;;  %2433 = vmatmul.bf16.vlgmr.msra.gmra.mxu2 %v17560_v22  ;;  %v16209_v35 = vld [vmem:[#allocation7 + $0x914] sm:$0xf]  ;;  %v11462_v43 = vor.u32 %v16145_v32, %v11459_v33  ;;  %v10569_v38 = vld [vmem:[#allocation7 + $0x18] sm:$0xf] }
 0x123   :  { %2477 = vmatpush.bf16.msrb.mxu2 %v10794_v59  ;;  %2407 = vmatmul.bf16.vlgmr.msra.gmra.mxu0 %v17566_v34  ;;  %v11715_v37 = vld [vmem:[#allocation7 + $0x930] sm:$0xf0]  ;;  %v10922_v59 = vor.u32 %v16014_v58, %v10921_v57  ;;  %v15926_v40 = vld [vmem:[#allocation7 + $0x34] sm:$0xf0]  ;;  %v10795_v57 = vld [vmem:[#allocation7 + $0x1f8] sm:$0xf0] }
 0x124   :  { %2446 = vmatmul.bf16.vlgmr.msra.gmra.mxu3 %v17554_v18  ;;  %v11718_v46 = vor.u32 %v16209_v35, %v11715_v37  ;;  %v16137_v48 = vld [vmem:[#allocation7 + $0x6d4] sm:$0xf]  ;;  %v10602_v35 = vor.u32 %v15934_v26, %v10601_v25  ;;  %v10825_v41 = vld [vmem:[#allocation7 + $0x218] sm:$0xf]  ;;  %v10570_v54 = vor.u32 %v15926_v40, %v10569_v38 }
 0x125   :  { %2490 = vmatpush.bf16.msrb.mxu3 %v11050_v6  ;;  %2465 = vmatpush.bf16.msrb.mxu1 %v11782_v13  ;;  %v11427_v49 = vld [vmem:[#allocation7 + $0x6f0] sm:$0xf0]  ;;  %v2226_v6 = vpop.f32.mrf.mxu2  ;;  %v15990_v42 = vld [vmem:[#allocation7 + $0x234] sm:$0xf0] }
 0x126   :  { %2452 = vmatpush.bf16.msrb.mxu0 %v11526_v12  ;;  %v16201_v51 = vld [vmem:[#allocation7 + $0x8d4] sm:$0xf]  ;;  %v11430_v27 = vor.u32 %v16137_v48, %v11427_v49  ;;  %v2227_v9 = vadd.f32 %v2226_v6, %v455_v60  ;;  %v2239_v10 = vpop.f32.mrf.mxu3  ;;  %v2202_v0 = vpop.f32.mrf.mxu0  ;;  %v11305_v44 = vld [vmem:[#allocation7 + $0x5d8] sm:$0xf]  ;;  %v10826_v58 = vor.u32 %v15990_v42, %v10825_v41  ;;  %v10763_v6 = vld [vmem:[#allocation7 + $0x1b8] sm:$0xf0] }
 0x127   :  { %2478 = vmatpush.bf16.msrb.mxu2 %v10762_v14  ;;  %v11683_v53 = vld [vmem:[#allocation7 + $0x8f0] sm:$0xf0]  ;;  %v2215_v12 = vpop.f32.mrf.mxu1  ;;  %v10634_v14 = vor.u32 %v15942_v5, %v10633_v4  ;;  %v16110_v45 = vld [vmem:[#allocation7 + $0x5f4] sm:$0xf0]  ;;  %v15970_v5 = vld [vmem:[#allocation7 + $0x19c] sm:$0xf] }
 0x128   :  { %v11686_v61 = vor.u32 %v16201_v51, %v11683_v53  ;;  %v16129_v63 = vld [vmem:[#allocation7 + $0x694] sm:$0xf]  ;;  %v16174_v49 = vld [vmem:[#allocation7 + $0x7f4] sm:$0xf0]  ;;  %v11306_v60 = vor.u32 %v16110_v45, %v11305_v44  ;;  %v10766_v12 = vor.u32 %v15970_v5, %v10763_v6 }
 0x129   :  { %2491 = vmatpush.bf16.msrb.mxu3 %v11018_v21  ;;  %2466 = vmatpush.bf16.msrb.mxu1 %v11750_v30  ;;  %v11395_v1 = vld [vmem:[#allocation7 + $0x6b0] sm:$0xf0]  ;;  %v17607_v21 = vadd.f32 %v2239_v10, %v2227_v9  ;;  %v11817_v51 = vld [vmem:[#allocation7 + $0x9d8] sm:$0xf] }
 0x12a   :  { %2453 = vmatpush.bf16.msrb.mxu0 %v11494_v29  ;;  %v16193_v2 = vld [vmem:[#allocation7 + $0x894] sm:$0xf]  ;;  %v11398_v11 = vor.u32 %v16129_v63, %v11395_v1  ;;  %v15998_v29 = vld [vmem:[#allocation7 + $0x274] sm:$0xf0] }
 0x12b   :  { %2479 = vmatpush.bf16.msrb.mxu2 %v10730_v31  ;;  %v11651_v3 = vld [vmem:[#allocation7 + $0x8b0] sm:$0xf0]  ;;  %v10858_v39 = vor.u32 %v15998_v29, %v10857_v28  ;;  %v16102_v63 = vld [vmem:[#allocation7 + $0x5b4] sm:$0xf0] }
 0x12c   :  { %v11654_v13 = vor.u32 %v16193_v2, %v11651_v3  ;;  %v16121_v15 = vld [vmem:[#allocation7 + $0x654] sm:$0xf]  ;;  %v11529_v1 = vld [vmem:[#allocation7 + $0x798] sm:$0xf]  ;;  %v10798_v2 = vor.u32 %v15978_v55, %v10795_v57 }
 0x12d   :  { %2492 = vmatpush.bf16.msrb.mxu3 %v10986_v36  ;;  %2467 = vmatpush.bf16.msrb.mxu1 %v11718_v46  ;;  %v11363_v16 = vld [vmem:[#allocation7 + $0x670] sm:$0xf0]  ;;  %v11561_v46 = vld [vmem:[#allocation7 + $0x7d8] sm:$0xf] }
 0x12e   :  { %2454 = vmatpush.bf16.msrb.mxu0 %v11462_v43  ;;  %v16185_v17 = vld [vmem:[#allocation7 + $0x854] sm:$0xf]  ;;  %v11366_v30 = vor.u32 %v16121_v15, %v11363_v16  ;;  %v2228_v43 = vpop.f32.mrf.mxu2  ;;  %v11785_v3 = vld [vmem:[#allocation7 + $0x998] sm:$0xf]  ;;  %v15962_v16 = vld [vmem:[#allocation7 + $0x15c] sm:$0xf] }
 0x12f   :  { %2480 = vmatpush.bf16.msrb.mxu2 %v10698_v47  ;;  %v11619_v24 = vld [vmem:[#allocation7 + $0x870] sm:$0xf0]  ;;  %v2241_v47 = vpop.f32.mrf.mxu3  ;;  %v16230_v4 = vld [vmem:[#allocation7 + $0x9b4] sm:$0xf0] }
 0x130   :  { %v16113_v31 = vld [vmem:[#allocation7 + $0x614] sm:$0xf]  ;;  %v11622_v33 = vor.u32 %v16185_v17, %v11619_v24  ;;  %v11786_v9 = vor.u32 %v16230_v4, %v11785_v3  ;;  %v11241_v10 = vld [vmem:[#allocation7 + $0x558] sm:$0xf]  ;;  %v10731_v17 = vld [vmem:[#allocation7 + $0x178] sm:$0xf0] }
 0x131   :  { %2493 = vmatpush.bf16.msrb.mxu3 %v10954_v52  ;;  %2468 = vmatpush.bf16.msrb.mxu1 %v11686_v61  ;;  %v11331_v32 = vld [vmem:[#allocation7 + $0x630] sm:$0xf0]  ;;  %v16238_v52 = vld [vmem:[#allocation7 + $0x9f4] sm:$0xf0]  ;;  %v10635_v3 = vld [vmem:[#allocation7 + $0xb8] sm:$0xf0] }
 0x132   :  { %2455 = vmatpush.bf16.msrb.mxu0 %v11430_v27  ;;  %v16177_v36 = vld [vmem:[#allocation7 + $0x814] sm:$0xf]  ;;  %v11334_v48 = vor.u32 %v16113_v31, %v11331_v32  ;;  %v11562_v27 = vor.u32 %v16174_v49, %v11561_v46  ;;  %v11818_v61 = vor.u32 %v16238_v52, %v11817_v51  ;;  %v16094_v0 = vld [vmem:[#allocation7 + $0x574] sm:$0xf0]  ;;  %v15946_v51 = vld [vmem:[#allocation7 + $0xdc] sm:$0xf] }
 0x133   :  { %2481 = vmatpush.bf16.msrb.mxu2 %v10666_v62  ;;  %v11587_v37 = vld [vmem:[#allocation7 + $0x830] sm:$0xf0]  ;;  %v11273_v62 = vld [vmem:[#allocation7 + $0x598] sm:$0xf]  ;;  %v10667_v52 = vld [vmem:[#allocation7 + $0xf8] sm:$0xf0] }
 0x134   :  { %v11590_v53 = vor.u32 %v16177_v36, %v11587_v37  ;;  %v11274_v7 = vor.u32 %v16102_v63, %v11273_v62  ;;  %v16222_v15 = vld [vmem:[#allocation7 + $0x974] sm:$0xf0]  ;;  %v10699_v36 = vld [vmem:[#allocation7 + $0x138] sm:$0xf0] }
 0x135   :  { %2494 = vmatpush.bf16.msrb.mxu3 %v10922_v59  ;;  %2469 = vmatpush.bf16.msrb.mxu1 %v11654_v13  ;;  %v16166_v59 = vld [vmem:[#allocation7 + $0x7b4] sm:$0xf0] }
 0x136   :  { %2456 = vmatpush.bf16.msrb.mxu0 %v11398_v11  ;;  %v11530_v8 = vor.u32 %v16166_v59, %v11529_v1  ;;  %v11497_v11 = vld [vmem:[#allocation7 + $0x758] sm:$0xf]  ;;  %v15938_v59 = vld [vmem:[#allocation7 + $0x9c] sm:$0xf] }
 0x137   :  { %2482 = vmatpush.bf16.msrb.mxu2 %v10634_v14  ;;  %v16158_v13 = vld [vmem:[#allocation7 + $0x774] sm:$0xf0] }
 0x138   :  { %v11753_v14 = vld [vmem:[#allocation7 + $0x958] sm:$0xf]  ;;  %v11498_v24 = vor.u32 %v16158_v13, %v11497_v11 }
 0x139   :  { %2495 = vmatpush.bf16.msrb.mxu3 %v10890_v23  ;;  %2470 = vmatpush.bf16.msrb.mxu1 %v11622_v33  ;;  %v11242_v23 = vor.u32 %v16094_v0, %v11241_v10  ;;  %v11754_v25 = vor.u32 %v16222_v15, %v11753_v14  ;;  %v11209_v26 = vld [vmem:[#allocation7 + $0x518] sm:$0xf] }
 0x13a   :  { %2457 = vmatpush.bf16.msrb.mxu0 %v11366_v30  ;;  %v16086_v28 = vld [vmem:[#allocation7 + $0x534] sm:$0xf0]  ;;  %v10734_v30 = vor.u32 %v15962_v16, %v10731_v17  ;;  %v15930_v16 = vld [vmem:[#allocation7 + $0x5c] sm:$0xf] }
 0x13b   :  { %2483 = vmatpush.bf16.msrb.mxu2 %v10602_v35  ;;  %v11465_v29 = vld [vmem:[#allocation7 + $0x718] sm:$0xf]  ;;  %v15954_v35 = vld [vmem:[#allocation7 + $0x11c] sm:$0xf]  ;;  %v11210_v37 = vor.u32 %v16086_v28, %v11209_v26 }
 0x13c   :  { %v16150_v31 = vld [vmem:[#allocation7 + $0x734] sm:$0xf0]  ;;  %v10702_v46 = vor.u32 %v15954_v35, %v10699_v36  ;;  %v10603_v17 = vld [vmem:[#allocation7 + $0x78] sm:$0xf0] }
 0x13d   :  { %2496 = vmatpush.bf16.msrb.mxu3 %v10858_v39  ;;  %2471 = vmatpush.bf16.msrb.mxu1 %v11590_v53  ;;  %v11721_v32 = vld [vmem:[#allocation7 + $0x918] sm:$0xf]  ;;  %v2265_v39 = vpop.f32.mrf.mxu1  ;;  %v11466_v40 = vor.u32 %v16150_v31, %v11465_v29  ;;  %v15922_v36 = vld [vmem:[#allocation7 + $0x1c] sm:$0xf] }
 0x13e   :  { %2458 = vmatpush.bf16.msrb.mxu0 %v11334_v48  ;;  %v16214_v33 = vld [vmem:[#allocation7 + $0x934] sm:$0xf0]  ;;  %v2252_v38 = vpop.f32.mrf.mxu0 }
 0x13f   :  { %2484 = vmatpush.bf16.msrb.mxu2 %v10570_v54  ;;  %v11722_v41 = vor.u32 %v16214_v33, %v11721_v32  ;;  %v11177_v42 = vld [vmem:[#allocation7 + $0x4d8] sm:$0xf]  ;;  %v2253_v45 = vadd.f32 %v2252_v38, %v17607_v21  ;;  %v10670_v21 = vor.u32 %v15946_v51, %v10667_v52  ;;  %v10606_v33 = vor.u32 %v15930_v16, %v10603_v17  ;;  %v16042_v38 = vld [vmem:[#allocation7 + $0x3dc] sm:$0xf] }
 0x140   :  { %2472 = vmatmul.bf16.vlgmr.msrb.gmra.mxu1 %v17566_v34  ;;  %v16078_v43 = vld [vmem:[#allocation7 + $0x4f4] sm:$0xf0]  ;;  %v16018_v16 = vld [vmem:[#allocation7 + $0x31c] sm:$0xf] }
 0x141   :  { %2497 = vmatpush.bf16.msrb.mxu3 %v10826_v58  ;;  %2516 = vmatpush.bf16.msra.mxu1 %v11562_v27  ;;  %v11433_v44 = vld [vmem:[#allocation7 + $0x6d8] sm:$0xf]  ;;  %v2266_v53 = vadd.f32 %v2265_v39, %v2253_v45  ;;  %v11178_v54 = vor.u32 %v16078_v43, %v11177_v42  ;;  %v11051_v39 = vld [vmem:[#allocation7 + $0x3f8] sm:$0xf0] }
 0x142   :  { %2503 = vmatpush.bf16.msra.mxu0 %v11306_v60  ;;  %2485 = vmatmul.bf16.vlgmr.msrb.gmra.mxu2 %v17556_v19  ;;  %v16142_v47 = vld [vmem:[#allocation7 + $0x6f4] sm:$0xf0]  ;;  %v11307_v43 = vld [vmem:[#allocation7 + $0x5f8] sm:$0xf0]  ;;  %v11054_v52 = vor.u32 %v16042_v38, %v11051_v39 }
 0x143   :  { %2529 = vmatpush.bf16.msra.mxu2 %v11818_v61  ;;  %2459 = vmatmul.bf16.vlgmr.msrb.gmra.mxu0 %v17558_v20  ;;  %v11689_v48 = vld [vmem:[#allocation7 + $0x8d8] sm:$0xf]  ;;  %v11434_v55 = vor.u32 %v16142_v47, %v11433_v44  ;;  %v16170_v44 = vld [vmem:[#allocation7 + $0x7dc] sm:$0xf] }
 0x144   :  { %2498 = vmatmul.bf16.vlgmr.msrb.gmra.mxu3 %v17560_v22  ;;  %v16206_v49 = vld [vmem:[#allocation7 + $0x8f4] sm:$0xf0]  ;;  %v2278_v61 = vpop.f32.mrf.mxu2  ;;  %v11563_v45 = vld [vmem:[#allocation7 + $0x7f8] sm:$0xf0] }
 0x145   :  { %2542 = vmatpush.bf16.msra.mxu3 %v10798_v2  ;;  %2517 = vmatpush.bf16.msra.mxu1 %v11530_v8  ;;  %v11690_v57 = vor.u32 %v16206_v49, %v11689_v48  ;;  %v11145_v58 = vld [vmem:[#allocation7 + $0x498] sm:$0xf]  ;;  %v17614_v2 = vadd.f32 %v2278_v61, %v2266_v53  ;;  %v16234_v48 = vld [vmem:[#allocation7 + $0x9dc] sm:$0xf] }
 0x146   :  { %2504 = vmatpush.bf16.msra.mxu0 %v11274_v7  ;;  %v16070_v60 = vld [vmem:[#allocation7 + $0x4b4] sm:$0xf0]  ;;  %v17616_v4 = vpop.f32.mrf.mxu3  ;;  %v2254_v6 = vpop.f32.mrf.mxu0  ;;  %v11819_v49 = vld [vmem:[#allocation7 + $0x9f8] sm:$0xf0] }
 0x147   :  { %2530 = vmatpush.bf16.msra.mxu2 %v11786_v9  ;;  %v11401_v27 = vld [vmem:[#allocation7 + $0x698] sm:$0xf]  ;;  %v11146_v5 = vor.u32 %v16070_v60, %v11145_v58  ;;  %v2267_v7 = vpop.f32.mrf.mxu1  ;;  %v16098_v58 = vld [vmem:[#allocation7 + $0x59c] sm:$0xf]  ;;  %v11822_v60 = vor.u32 %v16234_v48, %v11819_v49 }
 0x148   :  { %v16134_v62 = vld [vmem:[#allocation7 + $0x6b4] sm:$0xf0]  ;;  %v16162_v61 = vld [vmem:[#allocation7 + $0x79c] sm:$0xf] }
 0x149   :  { %2543 = vmatpush.bf16.msra.mxu3 %v10766_v12  ;;  %2518 = vmatpush.bf16.msra.mxu1 %v11498_v24  ;;  %v11657_v63 = vld [vmem:[#allocation7 + $0x898] sm:$0xf]  ;;  %v11402_v8 = vor.u32 %v16134_v62, %v11401_v27  ;;  %v10638_v12 = vor.u32 %v15938_v59, %v10635_v3  ;;  %v11275_v27 = vld [vmem:[#allocation7 + $0x5b8] sm:$0xf0] }
 0x14a   :  { %2505 = vmatpush.bf16.msra.mxu0 %v11242_v23  ;;  %v16198_v1 = vld [vmem:[#allocation7 + $0x8b4] sm:$0xf0]  ;;  %v16226_v62 = vld [vmem:[#allocation7 + $0x99c] sm:$0xf]  ;;  %v11278_v59 = vor.u32 %v16098_v58, %v11275_v27 }
 0x14b   :  { %2531 = vmatpush.bf16.msra.mxu2 %v11754_v25  ;;  %v11658_v9 = vor.u32 %v16198_v1, %v11657_v63  ;;  %v11113_v10 = vld [vmem:[#allocation7 + $0x458] sm:$0xf]  ;;  %v11787_v63 = vld [vmem:[#allocation7 + $0x9b8] sm:$0xf0] }
 0x14c   :  { %v16062_v0 = vld [vmem:[#allocation7 + $0x474] sm:$0xf0]  ;;  %v2280_v32 = vpop.f32.mrf.mxu2  ;;  %v10987_v6 = vld [vmem:[#allocation7 + $0x378] sm:$0xf0] }
 0x14d   :  { %2544 = vmatpush.bf16.msra.mxu3 %v10734_v30  ;;  %2519 = vmatpush.bf16.msra.mxu1 %v11466_v40  ;;  %v11369_v11 = vld [vmem:[#allocation7 + $0x658] sm:$0xf]  ;;  %v11114_v23 = vor.u32 %v16062_v0, %v11113_v10  ;;  %v16106_v40 = vld [vmem:[#allocation7 + $0x5dc] sm:$0xf] }
 0x14e   :  { %2506 = vmatpush.bf16.msra.mxu0 %v11210_v37  ;;  %v16126_v13 = vld [vmem:[#allocation7 + $0x674] sm:$0xf0]  ;;  %v10571_v37 = vld [vmem:[#allocation7 + $0x38] sm:$0xf0]  ;;  %v11310_v53 = vor.u32 %v16106_v40, %v11307_v43 }
 0x14f   :  { %2532 = vmatpush.bf16.msra.mxu2 %v11722_v41  ;;  %v11625_v14 = vld [vmem:[#allocation7 + $0x858] sm:$0xf]  ;;  %v11370_v26 = vor.u32 %v16126_v13, %v11369_v11  ;;  %v2293_v41 = vpop.f32.mrf.mxu3  ;;  %v10574_v51 = vor.u32 %v15922_v36, %v10571_v37  ;;  %v16090_v7 = vld [vmem:[#allocation7 + $0x55c] sm:$0xf] }
 0x150   :  { %v16190_v15 = vld [vmem:[#allocation7 + $0x874] sm:$0xf0]  ;;  %v16154_v10 = vld [vmem:[#allocation7 + $0x75c] sm:$0xf] }
 0x151   :  { %2545 = vmatpush.bf16.msra.mxu3 %v10702_v46  ;;  %2520 = vmatpush.bf16.msra.mxu1 %v11434_v55  ;;  %v11081_v24 = vld [vmem:[#allocation7 + $0x418] sm:$0xf]  ;;  %v11626_v28 = vor.u32 %v16190_v15, %v11625_v14  ;;  %v16034_v55 = vld [vmem:[#allocation7 + $0x39c] sm:$0xf] }
 0x152   :  { %2507 = vmatpush.bf16.msra.mxu0 %v11178_v54  ;;  %v16054_v25 = vld [vmem:[#allocation7 + $0x434] sm:$0xf0]  ;;  %v11566_v54 = vor.u32 %v16170_v44, %v11563_v45  ;;  %v11499_v0 = vld [vmem:[#allocation7 + $0x778] sm:$0xf0] }
 0x153   :  { %2533 = vmatpush.bf16.msra.mxu2 %v11690_v57  ;;  %v11337_v29 = vld [vmem:[#allocation7 + $0x618] sm:$0xf]  ;;  %v11082_v42 = vor.u32 %v16054_v25, %v11081_v24  ;;  %v11019_v57 = vld [vmem:[#allocation7 + $0x3b8] sm:$0xf0]  ;;  %v11502_v15 = vor.u32 %v16154_v10, %v11499_v0 }
 0x154   :  { %v16118_v30 = vld [vmem:[#allocation7 + $0x634] sm:$0xf0]  ;;  %v11022_v1 = vor.u32 %v16034_v55, %v11019_v57  ;;  %v16218_v11 = vld [vmem:[#allocation7 + $0x95c] sm:$0xf] }
 0x155   :  { %2546 = vmatpush.bf16.msra.mxu3 %v10670_v21  ;;  %2521 = vmatpush.bf16.msra.mxu1 %v11402_v8  ;;  %v11593_v31 = vld [vmem:[#allocation7 + $0x818] sm:$0xf]  ;;  %v11338_v46 = vor.u32 %v16118_v30, %v11337_v29  ;;  %v11531_v21 = vld [vmem:[#allocation7 + $0x7b8] sm:$0xf0]  ;;  %v11790_v8 = vor.u32 %v16226_v62, %v11787_v63 }
 0x156   :  { %2508 = vmatpush.bf16.msra.mxu0 %v11146_v5  ;;  %v16182_v35 = vld [vmem:[#allocation7 + $0x834] sm:$0xf0]  ;;  %v11534_v3 = vor.u32 %v16162_v61, %v11531_v21  ;;  %v16026_v5 = vld [vmem:[#allocation7 + $0x35c] sm:$0xf] }
 0x157   :  { %2534 = vmatpush.bf16.msra.mxu2 %v11658_v9  ;;  %v11594_v47 = vor.u32 %v16182_v35, %v11593_v31  ;;  %v11243_v9 = vld [vmem:[#allocation7 + $0x578] sm:$0xf0]  ;;  %v10990_v13 = vor.u32 %v16026_v5, %v10987_v6 }
 0x158   :  { %v11246_v14 = vor.u32 %v16090_v7, %v11243_v9  ;;  %v10955_v17 = vld [vmem:[#allocation7 + $0x338] sm:$0xf0] }
 0x159   :  { %2547 = vmatpush.bf16.msra.mxu3 %v10638_v12  ;;  %2522 = vmatpush.bf16.msra.mxu1 %v11370_v26  ;;  %v11755_v12 = vld [vmem:[#allocation7 + $0x978] sm:$0xf0]  ;;  %v10958_v31 = vor.u32 %v16018_v16, %v10955_v17 }
 0x15a   :  { %2509 = vmatpush.bf16.msra.mxu0 %v11114_v23  ;;  %v16082_v23 = vld [vmem:[#allocation7 + $0x51c] sm:$0xf]  ;;  %v11758_v24 = vor.u32 %v16218_v11, %v11755_v12 }
 0x15b   :  { %2535 = vmatpush.bf16.msra.mxu2 %v11626_v28  ;;  %v11211_v25 = vld [vmem:[#allocation7 + $0x538] sm:$0xf0] }
 0x15c   :  { %v16146_v26 = vld [vmem:[#allocation7 + $0x71c] sm:$0xf] }
 0x15d   :  { %2548 = vmatpush.bf16.msra.mxu3 %v10606_v33  ;;  %2523 = vmatpush.bf16.msra.mxu1 %v11338_v46  ;;  %v11467_v28 = vld [vmem:[#allocation7 + $0x738] sm:$0xf0]  ;;  %v17624_v38 = vpop.f32.mrf.mxu1 }
 0x15e   :  { %2510 = vmatpush.bf16.msra.mxu0 %v11082_v42  ;;  %v16210_v29 = vld [vmem:[#allocation7 + $0x91c] sm:$0xf]  ;;  %v11470_v33 = vor.u32 %v16146_v26, %v11467_v28 }
 0x15f   :  { %2536 = vmatpush.bf16.msra.mxu2 %v11594_v47  ;;  %v11723_v30 = vld [vmem:[#allocation7 + $0x938] sm:$0xf0] }
 0x160   :  { %2524 = vmatmul.bf16.vlgmr.msra.gmra.mxu1 %v17558_v20  ;;  %v17622_v32 = vpop.f32.mrf.mxu0  ;;  %v16010_v35 = vld [vmem:[#allocation7 + $0x2dc] sm:$0xf]  ;;  %v11726_v39 = vor.u32 %v16210_v29, %v11723_v30 }
 0x161   :  { %2549 = vmatpush.bf16.msra.mxu3 %v10574_v51  ;;  %2568 = vmatpush.bf16.msrb.mxu1 %v11310_v53  ;;  %v10923_v36 = vld [vmem:[#allocation7 + $0x2f8] sm:$0xf0] }
 0x162   :  { %2555 = vmatpush.bf16.msrb.mxu0 %v11054_v52  ;;  %2537 = vmatmul.bf16.vlgmr.msra.gmra.mxu2 %v17566_v34  ;;  %v16074_v37 = vld [vmem:[#allocation7 + $0x4dc] sm:$0xf]  ;;  %v10926_v45 = vor.u32 %v16010_v35, %v10923_v36  ;;  %v16363_v36 = vld [vmem:[#allocation10 + $0x3dc] sm:$0xf0] }
 0x163   :  { %2581 = vmatpush.bf16.msrb.mxu2 %v11566_v54  ;;  %2511 = vmatmul.bf16.vlgmr.msra.gmra.mxu0 %v17554_v18  ;;  %v11179_v40 = vld [vmem:[#allocation7 + $0x4f8] sm:$0xf0] }
 0x164   :  { %2550 = vmatmul.bf16.vlgmr.msra.gmra.mxu3 %v17556_v19  ;;  %v11214_v19 = vor.u32 %v16082_v23, %v11211_v25  ;;  %v16138_v41 = vld [vmem:[#allocation7 + $0x6dc] sm:$0xf]  ;;  %v11182_v46 = vor.u32 %v16074_v37, %v11179_v40  ;;  %v12561_v37 = vld [vmem:[#allocation10 + $0x5c0] sm:$0xf] }
 0x165   :  { %2594 = vmatpush.bf16.msrb.mxu3 %v11822_v60  ;;  %2569 = vmatpush.bf16.msrb.mxu1 %v11278_v59  ;;  %v11435_v42 = vld [vmem:[#allocation7 + $0x6f8] sm:$0xf0]  ;;  %v17626_v52 = vpop.f32.mrf.mxu2  ;;  %v2319_v5 = vpop.f32.mrf.mxu1 }
 0x166   :  { %2556 = vmatpush.bf16.msrb.mxu0 %v11022_v1  ;;  %v16202_v43 = vld [vmem:[#allocation7 + $0x8dc] sm:$0xf]  ;;  %v11438_v47 = vor.u32 %v16138_v41, %v11435_v42  ;;  %v12817_v42 = vld [vmem:[#allocation10 + $0x7c0] sm:$0xf] }
 0x167   :  { %2582 = vmatpush.bf16.msrb.mxu2 %v11534_v3  ;;  %v11691_v44 = vld [vmem:[#allocation7 + $0x8f8] sm:$0xf0]  ;;  %v17628_v58 = vpop.f32.mrf.mxu3  ;;  %v16347_v5 = vld [vmem:[#allocation10 + $0x35c] sm:$0xf0] }
 0x168   :  { %v16002_v48 = vld [vmem:[#allocation7 + $0x29c] sm:$0xf]  ;;  %v11694_v53 = vor.u32 %v16202_v43, %v11691_v44  ;;  %v2306_v21 = vpop.f32.mrf.mxu0  ;;  %v16491_v43 = vld [vmem:[#allocation10 + $0x7dc] sm:$0xf0] }
 0x169   :  { %2595 = vmatpush.bf16.msrb.mxu3 %v11790_v8  ;;  %2570 = vmatpush.bf16.msrb.mxu1 %v11246_v14  ;;  %v10891_v49 = vld [vmem:[#allocation7 + $0x2b8] sm:$0xf0] }
 0x16a   :  { %2557 = vmatpush.bf16.msrb.mxu0 %v10990_v13  ;;  %v16066_v51 = vld [vmem:[#allocation7 + $0x49c] sm:$0xf]  ;;  %v10894_v61 = vor.u32 %v16002_v48, %v10891_v49  ;;  %v12017_v48 = vld [vmem:[#allocation10 + $0x180] sm:$0xf] }
 0x16b   :  { %2583 = vmatpush.bf16.msrb.mxu2 %v11502_v15  ;;  %v11147_v54 = vld [vmem:[#allocation7 + $0x4b8] sm:$0xf0]  ;;  %v16291_v49 = vld [vmem:[#allocation10 + $0x19c] sm:$0xf0] }
 0x16c   :  { %v16130_v55 = vld [vmem:[#allocation7 + $0x69c] sm:$0xf]  ;;  %v11150_v62 = vor.u32 %v16066_v51, %v11147_v54  ;;  %v12273_v51 = vld [vmem:[#allocation10 + $0x380] sm:$0xf] }
 0x16d   :  { %2596 = vmatpush.bf16.msrb.mxu3 %v11758_v24  ;;  %2571 = vmatpush.bf16.msrb.mxu1 %v11214_v19  ;;  %v11403_v57 = vld [vmem:[#allocation7 + $0x6b8] sm:$0xf0]  ;;  %v2332_v24 = vpop.f32.mrf.mxu2  ;;  %v16299_v19 = vld [vmem:[#allocation10 + $0x1dc] sm:$0xf0] }
 0x16e   :  { %2558 = vmatpush.bf16.msrb.mxu0 %v10958_v31  ;;  %v16194_v60 = vld [vmem:[#allocation7 + $0x89c] sm:$0xf]  ;;  %v11406_v63 = vor.u32 %v16130_v55, %v11403_v57  ;;  %v12049_v31 = vld [vmem:[#allocation10 + $0x1c0] sm:$0xf] }
 0x16f   :  { %2584 = vmatpush.bf16.msrb.mxu2 %v11470_v33  ;;  %v11659_v27 = vld [vmem:[#allocation7 + $0x8b8] sm:$0xf0]  ;;  %v2345_v30 = vpop.f32.mrf.mxu3  ;;  %v12305_v33 = vld [vmem:[#allocation10 + $0x3c0] sm:$0xf] }
 0x170   :  { %v15994_v1 = vld [vmem:[#allocation7 + $0x25c] sm:$0xf]  ;;  %v11662_v6 = vor.u32 %v16194_v60, %v11659_v27  ;;  %v16355_v54 = vld [vmem:[#allocation10 + $0x39c] sm:$0xf0] }
 0x171   :  { %2597 = vmatpush.bf16.msrb.mxu3 %v11726_v39  ;;  %2572 = vmatpush.bf16.msrb.mxu1 %v11182_v46  ;;  %v10859_v59 = vld [vmem:[#allocation7 + $0x278] sm:$0xf0]  ;;  %v16427_v39 = vld [vmem:[#allocation10 + $0x5dc] sm:$0xf0]  ;;  %v12306_v46 = vor.u32 %v16363_v36, %v12305_v33  ;;  %v12274_v21 = vor.u32 %v16355_v54, %v12273_v51 }
 0x172   :  { %2559 = vmatpush.bf16.msrb.mxu0 %v10926_v45  ;;  %v16058_v3 = vld [vmem:[#allocation7 + $0x45c] sm:$0xf]  ;;  %v10862_v11 = vor.u32 %v15994_v1, %v10859_v59  ;;  %v12050_v45 = vor.u32 %v16299_v19, %v12049_v31  ;;  %v12529_v55 = vld [vmem:[#allocation10 + $0x580] sm:$0xf] }
 0x173   :  { %2585 = vmatpush.bf16.msrb.mxu2 %v11438_v47  ;;  %v11115_v7 = vld [vmem:[#allocation7 + $0x478] sm:$0xf0]  ;;  %v12562_v47 = vor.u32 %v16427_v39, %v12561_v37  ;;  %v16419_v57 = vld [vmem:[#allocation10 + $0x59c] sm:$0xf0] }
 0x174   :  { %v16122_v8 = vld [vmem:[#allocation7 + $0x65c] sm:$0xf]  ;;  %v11118_v14 = vor.u32 %v16058_v3, %v11115_v7  ;;  %v12785_v60 = vld [vmem:[#allocation10 + $0x780] sm:$0xf] }
 0x175   :  { %2598 = vmatpush.bf16.msrb.mxu3 %v11694_v53  ;;  %v11371_v9 = vld [vmem:[#allocation7 + $0x678] sm:$0xf0]  ;;  %2573 = vmatpush.bf16.msrb.mxu1 %v11150_v62  ;;  %v12818_v53 = vor.u32 %v16491_v43, %v12817_v42  ;;  %v16483_v27 = vld [vmem:[#allocation10 + $0x79c] sm:$0xf0]  ;;  %v12530_v62 = vor.u32 %v16419_v57, %v12529_v55 }
 0x176   :  { %v16186_v10 = vld [vmem:[#allocation7 + $0x85c] sm:$0xf]  ;;  %2560 = vmatpush.bf16.msrb.mxu0 %v10894_v61  ;;  %v11374_v15 = vor.u32 %v16122_v8, %v11371_v9  ;;  %v12018_v61 = vor.u32 %v16291_v49, %v12017_v48  ;;  %v16283_v1 = vld [vmem:[#allocation10 + $0x15c] sm:$0xf0]  ;;  %v12786_v3 = vor.u32 %v16483_v27, %v12785_v60  ;;  %v17631_v8 = vld [vmem:[#allocation9] sm:$0xff] }
 0x177   :  { %v11627_v0 = vld [vmem:[#allocation7 + $0x878] sm:$0xf0]  ;;  %2586 = vmatpush.bf16.msrb.mxu2 %v11406_v63  ;;  %v11985_v63 = vld [vmem:[#allocation10 + $0x140] sm:$0xf]  ;;  %v456_v9 = vperm.slane %v17631_v8, 3 }
 0x178   :  { %v15986_v12 = vld [vmem:[#allocation7 + $0x21c] sm:$0xf]  ;;  %v11630_v25 = vor.u32 %v16186_v10, %v11627_v0  ;;  %v12241_v59 = vld [vmem:[#allocation10 + $0x340] sm:$0xf] }
 0x179   :  { %v10827_v13 = vld [vmem:[#allocation7 + $0x238] sm:$0xf0]  ;;  %2599 = vmatpush.bf16.msrb.mxu3 %v11662_v6  ;;  %2574 = vmatpush.bf16.msrb.mxu1 %v11118_v14  ;;  %v12497_v6 = vld [vmem:[#allocation10 + $0x540] sm:$0xf] }
 0x17a   :  { %v16050_v16 = vld [vmem:[#allocation7 + $0x41c] sm:$0xf]  ;;  %2561 = vmatpush.bf16.msrb.mxu0 %v10862_v11  ;;  %v10830_v35 = vor.u32 %v15986_v12, %v10827_v13  ;;  %v16411_v7 = vld [vmem:[#allocation10 + $0x55c] sm:$0xf0]  ;;  %v11986_v11 = vor.u32 %v16283_v1, %v11985_v63 }
 0x17b   :  { %v11083_v17 = vld [vmem:[#allocation7 + $0x438] sm:$0xf0]  ;;  %2587 = vmatpush.bf16.msrb.mxu2 %v11374_v15  ;;  %v12753_v10 = vld [vmem:[#allocation10 + $0x740] sm:$0xf]  ;;  %v12498_v12 = vor.u32 %v16411_v7, %v12497_v6 }
 0x17c   :  { %v16114_v23 = vld [vmem:[#allocation7 + $0x61c] sm:$0xf]  ;;  %v11086_v40 = vor.u32 %v16050_v16, %v11083_v17  ;;  %v16475_v0 = vld [vmem:[#allocation10 + $0x75c] sm:$0xf0] }
 0x17d   :  { %v11339_v26 = vld [vmem:[#allocation7 + $0x638] sm:$0xf0]  ;;  %2600 = vmatpush.bf16.msrb.mxu3 %v11630_v25  ;;  %v11953_v13 = vld [vmem:[#allocation10 + $0x100] sm:$0xf]  ;;  %v12754_v16 = vor.u32 %v16475_v0, %v12753_v10  ;;  %v17640_v33 = vpop.f32.mrf.mxu1 }
 0x17e   :  { %v16178_v28 = vld [vmem:[#allocation7 + $0x81c] sm:$0xf]  ;;  %v11342_v41 = vor.u32 %v16114_v23, %v11339_v26  ;;  %2562 = vmatpush.bf16.msrb.mxu0 %v10830_v35  ;;  %2575 = vmatpush.bf16.msrb.mxu1 %v11086_v40  ;;  %v16275_v14 = vld [vmem:[#allocation10 + $0x11c] sm:$0xf0] }
 0x17f   :  { %v11595_v29 = vld [vmem:[#allocation7 + $0x838] sm:$0xf0]  ;;  %v12209_v15 = vld [vmem:[#allocation10 + $0x300] sm:$0xf] }
 0x180   :  { %v11598_v44 = vor.u32 %v16178_v28, %v11595_v29  ;;  %2588 = vmatpush.bf16.msrb.mxu2 %v11342_v41  ;;  %v16339_v17 = vld [vmem:[#allocation10 + $0x31c] sm:$0xf0]  ;;  %v17638_v26 = vpop.f32.mrf.mxu0 }
 0x181   :  { %2563 = vmatmul.bf16.vlgmr.msrb.gmra.mxu0 %v17560_v22  ;;  %2576 = vmatmul.bf16.vlgmr.msrb.gmra.mxu1 %v17554_v18  ;;  %v12242_v22 = vor.u32 %v16347_v5, %v12241_v59  ;;  %v12465_v23 = vld [vmem:[#allocation10 + $0x500] sm:$0xf]  ;;  %v12210_v28 = vor.u32 %v16339_v17, %v12209_v15 }
 0x182   :  { %2601 = vmatpush.bf16.msrb.mxu3 %v11598_v44  ;;  %5729 = vmatpush.bf16.msra.mxu0 %v12050_v45  ;;  %v16403_v18 = vld [vmem:[#allocation10 + $0x51c] sm:$0xf0] }
 0x183   :  { %5742 = vmatpush.bf16.msra.mxu1 %v12306_v46  ;;  %2589 = vmatmul.bf16.vlgmr.msrb.gmra.mxu2 %v17558_v20  ;;  %v2292_v20 = vadd.f32 %v17616_v4, %v456_v9  ;;  %v12721_v24 = vld [vmem:[#allocation10 + $0x700] sm:$0xf]  ;;  %v12466_v29 = vor.u32 %v16403_v18, %v12465_v23 }
 0x184   :  { %5755 = vmatpush.bf16.msra.mxu2 %v12562_v47  ;;  %v16467_v25 = vld [vmem:[#allocation10 + $0x71c] sm:$0xf0] }
 0x185   :  { %2602 = vmatmul.bf16.vlgmr.msrb.gmra.mxu3 %v17566_v34  ;;  %v11954_v34 = vor.u32 %v16275_v14, %v11953_v13  ;;  %v11921_v30 = vld [vmem:[#allocation10 + $0xc0] sm:$0xf]  ;;  %v12722_v35 = vor.u32 %v16467_v25, %v12721_v24  ;;  %v2305_v39 = vadd.f32 %v17622_v32, %v2292_v20  ;;  %v17643_v48 = vpop.f32.mrf.mxu2 }
 0x186   :  { %5768 = vmatpush.bf16.msra.mxu3 %v12818_v53  ;;  %5730 = vmatpush.bf16.msra.mxu0 %v12018_v61  ;;  %v16267_v31 = vld [vmem:[#allocation10 + $0xdc] sm:$0xf0] }
 0x187   :  { %5743 = vmatpush.bf16.msra.mxu1 %v12274_v21  ;;  %v12177_v19 = vld [vmem:[#allocation10 + $0x2c0] sm:$0xf]  ;;  %v11922_v42 = vor.u32 %v16267_v31, %v11921_v30  ;;  %v17645_v55 = vpop.f32.mrf.mxu3  ;;  %v2318_v32 = vadd.f32 %v17624_v38, %v2305_v39  ;;  %v2609_v39 = vmax.f32 %v17614_v2, 0.0 }
 0x188   :  { %5756 = vmatpush.bf16.msra.mxu2 %v12530_v62  ;;  %v16331_v36 = vld [vmem:[#allocation10 + $0x2dc] sm:$0xf0]  ;;  %v2358_v61 = vpop.f32.mrf.mxu0 }
 0x189   :  { %v12433_v37 = vld [vmem:[#allocation10 + $0x4c0] sm:$0xf]  ;;  %v12178_v43 = vor.u32 %v16331_v36, %v12177_v19  ;;  %v2331_v38 = vadd.f32 %v17626_v52, %v2318_v32  ;;  %v17657_v2 = vpack.c.bf16 %v2609_v39, %v2609_v39 }
 0x18a   :  { %5769 = vmatpush.bf16.msra.mxu3 %v12786_v3  ;;  %5731 = vmatpush.bf16.msra.mxu0 %v11986_v11  ;;  %v16395_v4 = vld [vmem:[#allocation10 + $0x4dc] sm:$0xf0]  ;;  %v2371_v3 = vpop.f32.mrf.mxu1 }
 0x18b   :  { %5744 = vmatpush.bf16.msra.mxu1 %v12242_v22  ;;  %v12689_v40 = vld [vmem:[#allocation10 + $0x6c0] sm:$0xf]  ;;  %v12434_v44 = vor.u32 %v16395_v4, %v12433_v37  ;;  %v2344_v52 = vadd.f32 %v17628_v58, %v2331_v38  ;;  %v2608_v4 = vmax.f32 %v17604_v56, 0.0 }
 0x18c   :  { %5757 = vmatpush.bf16.msra.mxu2 %v12498_v12  ;;  %v16459_v41 = vld [vmem:[#allocation10 + $0x6dc] sm:$0xf0] }
 0x18d   :  { %v11889_v45 = vld [vmem:[#allocation10 + $0x80] sm:$0xf]  ;;  %v12690_v49 = vor.u32 %v16459_v41, %v12689_v40  ;;  %v2384_v17 = vpop.f32.mrf.mxu2  ;;  %v17655_v56 = vpack.c.bf16 %v2608_v4, %v2608_v4 }
 0x18e   :  { %5770 = vmatpush.bf16.msra.mxu3 %v12754_v16  ;;  %5732 = vmatpush.bf16.msra.mxu0 %v11954_v34  ;;  %v16259_v46 = vld [vmem:[#allocation10 + $0x9c] sm:$0xf0] }
 0x18f   :  { %5745 = vmatpush.bf16.msra.mxu1 %v12210_v28  ;;  %v12145_v47 = vld [vmem:[#allocation10 + $0x280] sm:$0xf]  ;;  %v11890_v27 = vor.u32 %v16259_v46, %v11889_v45  ;;  %v2397_v25 = vpop.f32.mrf.mxu3 }
 0x190   :  { %5758 = vmatpush.bf16.msra.mxu2 %v12466_v29  ;;  %v16323_v51 = vld [vmem:[#allocation10 + $0x29c] sm:$0xf0] }
 0x191   :  { %v12401_v53 = vld [vmem:[#allocation10 + $0x480] sm:$0xf]  ;;  %v12146_v21 = vor.u32 %v16323_v51, %v12145_v47 }
 0x192   :  { %5771 = vmatpush.bf16.msra.mxu3 %v12722_v35  ;;  %v16387_v54 = vld [vmem:[#allocation10 + $0x49c] sm:$0xf0]  ;;  %5733 = vmatpush.bf16.msra.mxu0 %v11922_v42  ;;  %v2607_v35 = vmax.f32 %v17595_v50, 0.0 }
 0x193   :  { %v12657_v57 = vld [vmem:[#allocation10 + $0x680] sm:$0xf]  ;;  %5746 = vmatpush.bf16.msra.mxu1 %v12178_v43  ;;  %v12402_v62 = vor.u32 %v16387_v54, %v12401_v53  ;;  %v2610_v43 = vmax.f32 %v2344_v52, 0.0  ;;  %v457_v53 = vperm.slane %v17631_v8, 4 }
 0x194   :  { %v16451_v60 = vld [vmem:[#allocation10 + $0x69c] sm:$0xf0]  ;;  %5759 = vmatpush.bf16.msra.mxu2 %v12434_v44 }
 0x195   :  { %v11857_v63 = vld [vmem:[#allocation10 + $0x40] sm:$0xf]  ;;  %v12658_v5 = vor.u32 %v16451_v60, %v12657_v57  ;;  %v17660_v60 = vpack.c.bf16 %v2610_v43, %v2610_v43 }
 0x196   :  { %v16251_v1 = vld [vmem:[#allocation10 + $0x5c] sm:$0xf0]  ;;  %5772 = vmatpush.bf16.msra.mxu3 %v12690_v49  ;;  %5734 = vmatpush.bf16.msra.mxu0 %v11890_v27  ;;  %v17653_v49 = vpack.c.bf16 %v2607_v35, %v2607_v35 }
 0x197   :  { %v12113_v59 = vld [vmem:[#allocation10 + $0x240] sm:$0xf]  ;;  %v11858_v11 = vor.u32 %v16251_v1, %v11857_v63  ;;  %5747 = vmatpush.bf16.msra.mxu1 %v12146_v21 }
 0x198   :  { %v16315_v6 = vld [vmem:[#allocation10 + $0x25c] sm:$0xf0]  ;;  %5760 = vmatpush.bf16.msra.mxu2 %v12402_v62 }
 0x199   :  { %v12369_v7 = vld [vmem:[#allocation10 + $0x440] sm:$0xf]  ;;  %v12114_v12 = vor.u32 %v16315_v6, %v12113_v59  ;;  %v2357_v59 = vadd.f32 %v17638_v26, %v457_v53 }
 0x19a   :  { %v16379_v9 = vld [vmem:[#allocation10 + $0x45c] sm:$0xf0]  ;;  %5773 = vmatpush.bf16.msra.mxu3 %v12658_v5  ;;  %5735 = vmatpush.bf16.msra.mxu0 %v11858_v11 }
 0x19b   :  { %v12625_v10 = vld [vmem:[#allocation10 + $0x640] sm:$0xf]  ;;  %v12370_v13 = vor.u32 %v16379_v9, %v12369_v7  ;;  %5748 = vmatpush.bf16.msra.mxu1 %v12114_v12  ;;  %v2370_v12 = vadd.f32 %v17640_v33, %v2357_v59  ;;  %v12051_v59 = vld [vmem:[#allocation10 + $0x1e0] sm:$0xf0] }
 0x19c   :  { %v16443_v0 = vld [vmem:[#allocation10 + $0x65c] sm:$0xf0] }
 0x19d   :  { %v11825_v22 = vld [vmem:[#allocation10] sm:$0xf]  ;;  %v12626_v23 = vor.u32 %v16443_v0, %v12625_v10  ;;  %5761 = vmatpush.bf16.msra.mxu2 %v12370_v13  ;;  %v2383_v25 = vadd.f32 %v17643_v48, %v2370_v12 }
 0x19e   :  { %v16243_v14 = vld [vmem:[#allocation10 + $0x1c] sm:$0xf0] }
 0x19f   :  { %v12081_v15 = vld [vmem:[#allocation10 + $0x200] sm:$0xf]  ;;  %v11826_v30 = vor.u32 %v16243_v14, %v11825_v22  ;;  %5774 = vmatpush.bf16.msra.mxu3 %v12626_v23  ;;  %v17668_v14 = vpop.f32.mrf.mxu1  ;;  %v2396_v39 = vadd.f32 %v17645_v55, %v2383_v25  ;;  %v16351_v25 = vld [vmem:[#allocation10 + $0x384] sm:$0xf] }
 0x1a0   :  { %v16307_v16 = vld [vmem:[#allocation10 + $0x21c] sm:$0xf0]  ;;  %v2408_v11 = vpop.f32.mrf.mxu0 }
 0x1a1   :  { %v12337_v18 = vld [vmem:[#allocation10 + $0x400] sm:$0xf]  ;;  %v12082_v36 = vor.u32 %v16307_v16, %v12081_v15  ;;  %5736 = vmatpush.bf16.msra.mxu0 %v11826_v30  ;;  %v2409_v53 = vadd.f32 %v2408_v11, %v2396_v39 }
 0x1a2   :  { %v16371_v20 = vld [vmem:[#allocation10 + $0x41c] sm:$0xf0] }
 0x1a3   :  { %v12593_v24 = vld [vmem:[#allocation10 + $0x600] sm:$0xf]  ;;  %v12338_v37 = vor.u32 %v16371_v20, %v12337_v18  ;;  %5749 = vmatpush.bf16.msra.mxu1 %v12082_v36 }
 0x1a4   :  { %v16435_v34 = vld [vmem:[#allocation10 + $0x61c] sm:$0xf0]  ;;  %5737 = vmatmul.bf16.vlgmr.msra.gmra.mxu0 %v17653_v49 }
 0x1a5   :  { %v13073_v28 = vld [vmem:[#allocation10 + $0x9c0] sm:$0xf]  ;;  %v12594_v40 = vor.u32 %v16435_v34, %v12593_v24  ;;  %5762 = vmatpush.bf16.msra.mxu2 %v12338_v37  ;;  %v17671_v35 = vpop.f32.mrf.mxu2 }
 0x1a6   :  { %v16555_v29 = vld [vmem:[#allocation10 + $0x9dc] sm:$0xf0]  ;;  %5750 = vmatmul.bf16.vlgmr.msra.gmra.mxu1 %v17655_v56 }
 0x1a7   :  { %v13329_v31 = vld [vmem:[#allocation10 + $0xbc0] sm:$0xf]  ;;  %v13074_v58 = vor.u32 %v16555_v29, %v13073_v28  ;;  %5775 = vmatpush.bf16.msra.mxu3 %v12594_v40  ;;  %v17673_v37 = vpop.f32.mrf.mxu3  ;;  %v2423_v40 = vpop.f32.mrf.mxu1 }
 0x1a8   :  { %v16619_v19 = vld [vmem:[#allocation10 + $0xbdc] sm:$0xf0]  ;;  %5763 = vmatmul.bf16.vlgmr.msra.gmra.mxu2 %v17657_v2  ;;  %v2410_v36 = vpop.f32.mrf.mxu0  ;;  %v11987_v40 = vld [vmem:[#allocation10 + $0x160] sm:$0xf0] }
 0x1a9   :  { %v13585_v41 = vld [vmem:[#allocation10 + $0xdc0] sm:$0xf]  ;;  %v13330_v44 = vor.u32 %v16619_v19, %v13329_v31  ;;  %5781 = vmatpush.bf16.msrb.mxu0 %v13074_v58 }
 0x1aa   :  { %v16683_v42 = vld [vmem:[#allocation10 + $0xddc] sm:$0xf0]  ;;  %5776 = vmatmul.bf16.vlgmr.msra.gmra.mxu3 %v17660_v60 }
 0x1ab   :  { %v13041_v45 = vld [vmem:[#allocation10 + $0x980] sm:$0xf]  ;;  %v13586_v51 = vor.u32 %v16683_v42, %v13585_v41  ;;  %5794 = vmatpush.bf16.msrb.mxu1 %v13330_v44 }
 0x1ac   :  { %v16547_v46 = vld [vmem:[#allocation10 + $0x99c] sm:$0xf0] }
 0x1ad   :  { %v13297_v47 = vld [vmem:[#allocation10 + $0xb80] sm:$0xf]  ;;  %v13042_v54 = vor.u32 %v16547_v46, %v13041_v45  ;;  %5807 = vmatpush.bf16.msrb.mxu2 %v13586_v51 }
 0x1ae   :  { %v16611_v50 = vld [vmem:[#allocation10 + $0xb9c] sm:$0xf0] }
 0x1af   :  { %v13553_v32 = vld [vmem:[#allocation10 + $0xd80] sm:$0xf]  ;;  %v13298_v27 = vor.u32 %v16611_v50, %v13297_v47  ;;  %5782 = vmatpush.bf16.msrb.mxu0 %v13042_v54  ;;  %v458_v47 = vperm.slane %v17631_v8, 5 }
 0x1b0   :  { %v16675_v57 = vld [vmem:[#allocation10 + $0xd9c] sm:$0xf0] }
 0x1b1   :  { %v13009_v61 = vld [vmem:[#allocation10 + $0x940] sm:$0xf]  ;;  %v13554_v1 = vor.u32 %v16675_v57, %v13553_v32  ;;  %5795 = vmatpush.bf16.msrb.mxu1 %v13298_v27 }
 0x1b2   :  { %v16539_v21 = vld [vmem:[#allocation10 + $0x95c] sm:$0xf0] }
 0x1b3   :  { %v13265_v62 = vld [vmem:[#allocation10 + $0xb40] sm:$0xf]  ;;  %v13010_v3 = vor.u32 %v16539_v21, %v13009_v61  ;;  %5808 = vmatpush.bf16.msrb.mxu2 %v13554_v1  ;;  %v16295_v1 = vld [vmem:[#allocation10 + $0x1c4] sm:$0xf] }
 0x1b4   :  { %v16603_v63 = vld [vmem:[#allocation10 + $0xb5c] sm:$0xf0] }
 0x1b5   :  { %v13521_v5 = vld [vmem:[#allocation10 + $0xd40] sm:$0xf]  ;;  %v13266_v7 = vor.u32 %v16603_v63, %v13265_v62  ;;  %5783 = vmatpush.bf16.msrb.mxu0 %v13010_v3  ;;  %v2436_v3 = vpop.f32.mrf.mxu2 }
 0x1b6   :  { %v16667_v6 = vld [vmem:[#allocation10 + $0xd5c] sm:$0xf0] }
 0x1b7   :  { %v12977_v9 = vld [vmem:[#allocation10 + $0x900] sm:$0xf]  ;;  %v13522_v22 = vor.u32 %v16667_v6, %v13521_v5  ;;  %5796 = vmatpush.bf16.msrb.mxu1 %v13266_v7  ;;  %v16359_v6 = vld [vmem:[#allocation10 + $0x3c4] sm:$0xf] }
 0x1b8   :  { %v16531_v38 = vld [vmem:[#allocation10 + $0x91c] sm:$0xf0]  ;;  %v12307_v7 = vld [vmem:[#allocation10 + $0x3e0] sm:$0xf0] }
 0x1b9   :  { %v13233_v10 = vld [vmem:[#allocation10 + $0xb00] sm:$0xf]  ;;  %v12978_v13 = vor.u32 %v16531_v38, %v12977_v9  ;;  %5809 = vmatpush.bf16.msrb.mxu2 %v13522_v22  ;;  %v2449_v9 = vpop.f32.mrf.mxu3 }
 0x1ba   :  { %v16595_v0 = vld [vmem:[#allocation10 + $0xb1c] sm:$0xf0] }
 0x1bb   :  { %v13489_v26 = vld [vmem:[#allocation10 + $0xd00] sm:$0xf]  ;;  %v13234_v16 = vor.u32 %v16595_v0, %v13233_v10  ;;  %5784 = vmatpush.bf16.msrb.mxu0 %v12978_v13  ;;  %v2611_v10 = vmax.f32 %v2409_v53, 0.0  ;;  %v12054_v13 = vor.u32 %v16295_v1, %v12051_v59  ;;  %v16271_v53 = vld [vmem:[#allocation10 + $0x104] sm:$0xf] }
 0x1bc   :  { %v16659_v15 = vld [vmem:[#allocation10 + $0xd1c] sm:$0xf0] }
 0x1bd   :  { %v12945_v17 = vld [vmem:[#allocation10 + $0x8c0] sm:$0xf]  ;;  %v13490_v24 = vor.u32 %v16659_v15, %v13489_v26  ;;  %5797 = vmatpush.bf16.msrb.mxu1 %v13234_v16  ;;  %v16423_v26 = vld [vmem:[#allocation10 + $0x5c4] sm:$0xf] }
 0x1be   :  { %v16523_v23 = vld [vmem:[#allocation10 + $0x8dc] sm:$0xf0]  ;;  %v12563_v15 = vld [vmem:[#allocation10 + $0x5e0] sm:$0xf0] }
 0x1bf   :  { %v13201_v18 = vld [vmem:[#allocation10 + $0xac0] sm:$0xf]  ;;  %v12946_v52 = vor.u32 %v16523_v23, %v12945_v17  ;;  %5810 = vmatpush.bf16.msrb.mxu2 %v13490_v24  ;;  %v2422_v17 = vadd.f32 %v17668_v14, %v458_v47  ;;  %v12310_v23 = vor.u32 %v16359_v6, %v12307_v7  ;;  %v2473_v6 = vpop.f32.mrf.mxu1  ;;  %v11923_v7 = vld [vmem:[#allocation10 + $0xe0] sm:$0xf0] }
 0x1c0   :  { %v16587_v20 = vld [vmem:[#allocation10 + $0xadc] sm:$0xf0] }
 0x1c1   :  { %v13457_v34 = vld [vmem:[#allocation10 + $0xcc0] sm:$0xf]  ;;  %v13202_v28 = vor.u32 %v16587_v20, %v13201_v18  ;;  %5785 = vmatpush.bf16.msrb.mxu0 %v12946_v52  ;;  %v16287_v18 = vld [vmem:[#allocation10 + $0x184] sm:$0xf]  ;;  %v2435_v39 = vadd.f32 %v17671_v35, %v2422_v17 }
 0x1c2   :  { %v16651_v33 = vld [vmem:[#allocation10 + $0xcdc] sm:$0xf0]  ;;  %v12019_v20 = vld [vmem:[#allocation10 + $0x1a0] sm:$0xf0] }
 0x1c3   :  { %v12913_v29 = vld [vmem:[#allocation10 + $0x880] sm:$0xf]  ;;  %v13458_v4 = vor.u32 %v16651_v33, %v13457_v34  ;;  %5798 = vmatpush.bf16.msrb.mxu1 %v13202_v28  ;;  %v12275_v52 = vld [vmem:[#allocation10 + $0x3a0] sm:$0xf0]  ;;  %v12566_v28 = vor.u32 %v16423_v26, %v12563_v15  ;;  %v2448_v35 = vadd.f32 %v17673_v37, %v2435_v39 }
 0x1c4   :  { %v16515_v30 = vld [vmem:[#allocation10 + $0x89c] sm:$0xf0]  ;;  %v16263_v37 = vld [vmem:[#allocation10 + $0xc4] sm:$0xf] }
 0x1c5   :  { %v13169_v31 = vld [vmem:[#allocation10 + $0xa80] sm:$0xf]  ;;  %v12914_v48 = vor.u32 %v16515_v30, %v12913_v29  ;;  %5811 = vmatpush.bf16.msrb.mxu2 %v13458_v4  ;;  %v16415_v29 = vld [vmem:[#allocation10 + $0x584] sm:$0xf]  ;;  %v17678_v30 = vpack.c.bf16 %v2611_v10, %v2611_v10  ;;  %v12278_v4 = vor.u32 %v16351_v25, %v12275_v52 }
 0x1c6   :  { %v16579_v19 = vld [vmem:[#allocation10 + $0xa9c] sm:$0xf0]  ;;  %v12179_v10 = vld [vmem:[#allocation10 + $0x2e0] sm:$0xf0] }
 0x1c7   :  { %v13425_v58 = vld [vmem:[#allocation10 + $0xc80] sm:$0xf]  ;;  %v13170_v42 = vor.u32 %v16579_v19, %v13169_v31  ;;  %5786 = vmatpush.bf16.msrb.mxu0 %v12914_v48  ;;  %v12022_v31 = vor.u32 %v16287_v18, %v12019_v20  ;;  %v12531_v19 = vld [vmem:[#allocation10 + $0x5a0] sm:$0xf0] }
 0x1c8   :  { %v16643_v41 = vld [vmem:[#allocation10 + $0xc9c] sm:$0xf0]  ;;  %v16279_v48 = vld [vmem:[#allocation10 + $0x144] sm:$0xf] }
 0x1c9   :  { %v12881_v43 = vld [vmem:[#allocation10 + $0x840] sm:$0xf]  ;;  %v13426_v51 = vor.u32 %v16643_v41, %v13425_v58  ;;  %5799 = vmatpush.bf16.msrb.mxu1 %v13170_v42  ;;  %v16343_v41 = vld [vmem:[#allocation10 + $0x344] sm:$0xf] }
 0x1ca   :  { %v16507_v44 = vld [vmem:[#allocation10 + $0x85c] sm:$0xf0]  ;;  %v12243_v42 = vld [vmem:[#allocation10 + $0x360] sm:$0xf0] }
 0x1cb   :  { %v13137_v45 = vld [vmem:[#allocation10 + $0xa40] sm:$0xf]  ;;  %v12882_v54 = vor.u32 %v16507_v44, %v12881_v43  ;;  %5812 = vmatpush.bf16.msrb.mxu2 %v13426_v51  ;;  %v12534_v43 = vor.u32 %v16415_v29, %v12531_v19  ;;  %v16407_v44 = vld [vmem:[#allocation10 + $0x544] sm:$0xf]  ;;  %v12246_v51 = vor.u32 %v16343_v41, %v12243_v42  ;;  %v17687_v19 = vpop.f32.mrf.mxu3 }
 0x1cc   :  { %v16571_v46 = vld [vmem:[#allocation10 + $0xa5c] sm:$0xf0]  ;;  %v11891_v18 = vld [vmem:[#allocation10 + $0xa0] sm:$0xf0] }
 0x1cd   :  { %v12849_v50 = vld [vmem:[#allocation10 + $0x800] sm:$0xf]  ;;  %v13138_v27 = vor.u32 %v16571_v46, %v13137_v45  ;;  %5787 = vmatpush.bf16.msrb.mxu0 %v12882_v54  ;;  %v11990_v45 = vor.u32 %v16279_v48, %v11987_v40  ;;  %v12499_v46 = vld [vmem:[#allocation10 + $0x560] sm:$0xf0] }
 0x1ce   :  { %v16499_v55 = vld [vmem:[#allocation10 + $0x81c] sm:$0xf0]  ;;  %v11955_v54 = vld [vmem:[#allocation10 + $0x120] sm:$0xf0] }
 0x1cf   :  { %v13393_v32 = vld [vmem:[#allocation10 + $0xc40] sm:$0xf]  ;;  %v12850_v0 = vor.u32 %v16499_v55, %v12849_v50  ;;  %5800 = vmatpush.bf16.msrb.mxu1 %v13138_v27  ;;  %v12502_v27 = vor.u32 %v16407_v44, %v12499_v46  ;;  %v12147_v25 = vld [vmem:[#allocation10 + $0x2a0] sm:$0xf0] }
 0x1d0   :  { %v16635_v57 = vld [vmem:[#allocation10 + $0xc5c] sm:$0xf0]  ;;  %v16247_v48 = vld [vmem:[#allocation10 + $0x44] sm:$0xf] }
 0x1d1   :  { %v13105_v61 = vld [vmem:[#allocation10 + $0xa00] sm:$0xf]  ;;  %v13394_v38 = vor.u32 %v16635_v57, %v13393_v32  ;;  %5788 = vmatpush.bf16.msrb.mxu0 %v12850_v0  ;;  %v16335_v32 = vld [vmem:[#allocation10 + $0x304] sm:$0xf] }
 0x1d2   :  { %v13841_v21 = vld [vmem:[#allocation10 + $0xfc0] sm:$0xf]  ;;  %v12211_v57 = vld [vmem:[#allocation10 + $0x320] sm:$0xf0] }
 0x1d3   :  { %v16747_v62 = vld [vmem:[#allocation10 + $0xfdc] sm:$0xf0]  ;;  %5813 = vmatpush.bf16.msrb.mxu2 %v13394_v38  ;;  %v16327_v38 = vld [vmem:[#allocation10 + $0x2c4] sm:$0xf] }
 0x1d4   :  { %v16563_v63 = vld [vmem:[#allocation10 + $0xa1c] sm:$0xf0]  ;;  %v13842_v5 = vor.u32 %v16747_v62, %v13841_v21  ;;  %5789 = vmatmul.bf16.vlgmr.msrb.gmra.mxu0 %v17678_v30  ;;  %v2460_v21 = vpop.f32.mrf.mxu0  ;;  %v11958_v62 = vor.u32 %v16271_v53, %v11955_v54  ;;  %v12182_v17 = vor.u32 %v16327_v38, %v12179_v10  ;;  %v11859_v40 = vld [vmem:[#allocation10 + $0x60] sm:$0xf0] }
 0x1d5   :  { %v13361_v11 = vld [vmem:[#allocation10 + $0xc00] sm:$0xf]  ;;  %v13106_v12 = vor.u32 %v16563_v63, %v13105_v61  ;;  %5833 = vmatpush.bf16.msra.mxu0 %v12054_v13  ;;  %v16399_v61 = vld [vmem:[#allocation10 + $0x504] sm:$0xf]  ;;  %v2461_v3 = vadd.f32 %v2460_v21, %v2448_v35 }
 0x1d6   :  { %v16627_v22 = vld [vmem:[#allocation10 + $0xc1c] sm:$0xf0]  ;;  %5820 = vmatpush.bf16.msrb.mxu3 %v13842_v5  ;;  %v12467_v63 = vld [vmem:[#allocation10 + $0x520] sm:$0xf0]  ;;  %v12214_v5 = vor.u32 %v16335_v32, %v12211_v57 }
 0x1d7   :  { %v13809_v16 = vld [vmem:[#allocation10 + $0xf80] sm:$0xf]  ;;  %v13362_v34 = vor.u32 %v16627_v22, %v13361_v11  ;;  %5801 = vmatpush.bf16.msrb.mxu1 %v13106_v12  ;;  %v2474_v0 = vadd.f32 %v2473_v6, %v2461_v3  ;;  %v12470_v11 = vor.u32 %v16399_v61, %v12467_v63  ;;  %v16391_v22 = vld [vmem:[#allocation10 + $0x4c4] sm:$0xf]  ;;  %v11926_v12 = vor.u32 %v16263_v37, %v11923_v7  ;;  %v2501_v37 = vpop.f32.mrf.mxu3 }
 0x1d8   :  { %v16739_v24 = vld [vmem:[#allocation10 + $0xf9c] sm:$0xf0]  ;;  %v12435_v13 = vld [vmem:[#allocation10 + $0x4e0] sm:$0xf0] }
 0x1d9   :  { %v13810_v33 = vor.u32 %v16739_v24, %v13809_v16  ;;  %v13777_v36 = vld [vmem:[#allocation10 + $0xf40] sm:$0xf]  ;;  %5814 = vmatpush.bf16.msrb.mxu2 %v13362_v34  ;;  %5834 = vmatpush.bf16.msra.mxu0 %v12022_v31  ;;  %v2612_v16 = vmax.f32 %v2474_v0, 0.0  ;;  %v16319_v24 = vld [vmem:[#allocation10 + $0x284] sm:$0xf]  ;;  %v17685_v34 = vpop.f32.mrf.mxu2 }
 0x1da   :  { %v16731_v14 = vld [vmem:[#allocation10 + $0xf5c] sm:$0xf0]  ;;  %v12150_v39 = vor.u32 %v16319_v24, %v12147_v25  ;;  %v16311_v42 = vld [vmem:[#allocation10 + $0x244] sm:$0xf] }
 0x1db   :  { %5846 = vmatpush.bf16.msra.mxu1 %v12310_v23  ;;  %5821 = vmatpush.bf16.msrb.mxu3 %v13810_v33  ;;  %v13778_v58 = vor.u32 %v16731_v14, %v13777_v36  ;;  %v13745_v47 = vld [vmem:[#allocation10 + $0xf00] sm:$0xf]  ;;  %v16255_v23 = vld [vmem:[#allocation10 + $0x84] sm:$0xf]  ;;  %v17683_v52 = vpack.c.bf16 %v2612_v16, %v2612_v16  ;;  %v12438_v33 = vor.u32 %v16391_v22, %v12435_v13 }
 0x1dc   :  { %v16723_v50 = vld [vmem:[#allocation10 + $0xf1c] sm:$0xf0]  ;;  %v11894_v29 = vor.u32 %v16255_v23, %v11891_v18  ;;  %v2462_v31 = vpop.f32.mrf.mxu0  ;;  %v12403_v36 = vld [vmem:[#allocation10 + $0x4a0] sm:$0xf0]  ;;  %v459_v23 = vperm.slane %v17631_v8, 6 }
 0x1dd   :  { %5859 = vmatpush.bf16.msra.mxu2 %v12566_v28  ;;  %v13746_v55 = vor.u32 %v16723_v50, %v13745_v47  ;;  %5835 = vmatpush.bf16.msra.mxu0 %v11990_v45  ;;  %v13713_v1 = vld [vmem:[#allocation10 + $0xec0] sm:$0xf]  ;;  %v16383_v28 = vld [vmem:[#allocation10 + $0x484] sm:$0xf]  ;;  %v11862_v47 = vor.u32 %v16247_v48, %v11859_v40 }
 0x1de   :  { %v16715_v59 = vld [vmem:[#allocation10 + $0xedc] sm:$0xf0]  ;;  %5802 = vmatmul.bf16.vlgmr.msrb.gmra.mxu1 %v17683_v52  ;;  %v16239_v44 = vld [vmem:[#allocation10 + $0x4] sm:$0xf]  ;;  %v12406_v46 = vor.u32 %v16383_v28, %v12403_v36 }
 0x1df   :  { %5847 = vmatpush.bf16.msra.mxu1 %v12278_v4  ;;  %5822 = vmatpush.bf16.msrb.mxu3 %v13778_v58  ;;  %v13714_v9 = vor.u32 %v16715_v59, %v13713_v1  ;;  %v13681_v26 = vld [vmem:[#allocation10 + $0xe80] sm:$0xf]  ;;  %v2475_v58 = vpop.f32.mrf.mxu1  ;;  %v11827_v45 = vld [vmem:[#allocation10 + $0x20] sm:$0xf0] }
 0x1e0   :  { %v16707_v15 = vld [vmem:[#allocation10 + $0xe9c] sm:$0xf0]  ;;  %v16303_v50 = vld [vmem:[#allocation10 + $0x204] sm:$0xf]  ;;  %v11830_v6 = vor.u32 %v16239_v44, %v11827_v45 }
 0x1e1   :  { %5860 = vmatpush.bf16.msra.mxu2 %v12534_v43  ;;  %5836 = vmatpush.bf16.msra.mxu0 %v11958_v62  ;;  %v13682_v20 = vor.u32 %v16707_v15, %v13681_v26  ;;  %v13649_v14 = vld [vmem:[#allocation10 + $0xe40] sm:$0xf]  ;;  %v12115_v43 = vld [vmem:[#allocation10 + $0x260] sm:$0xf0]  ;;  %v2488_v59 = vpop.f32.mrf.mxu2 }
 0x1e2   :  { %v16699_v4 = vld [vmem:[#allocation10 + $0xe5c] sm:$0xf0]  ;;  %v16375_v35 = vld [vmem:[#allocation10 + $0x444] sm:$0xf]  ;;  %v12118_v54 = vor.u32 %v16311_v42, %v12115_v43 }
 0x1e3   :  { %5848 = vmatpush.bf16.msra.mxu1 %v12246_v51  ;;  %5823 = vmatpush.bf16.msrb.mxu3 %v13746_v55  ;;  %v13650_v41 = vor.u32 %v16699_v4, %v13649_v14  ;;  %v12083_v51 = vld [vmem:[#allocation10 + $0x220] sm:$0xf0]  ;;  %v13617_v55 = vld [vmem:[#allocation10 + $0xe00] sm:$0xf]  ;;  %v2487_v14 = vadd.f32 %v17685_v34, %v459_v23 }
 0x1e4   :  { %v12371_v53 = vld [vmem:[#allocation10 + $0x460] sm:$0xf0]  ;;  %v16691_v32 = vld [vmem:[#allocation10 + $0xe1c] sm:$0xf0]  ;;  %v12086_v38 = vor.u32 %v16303_v50, %v12083_v51 }
 0x1e5   :  { %5861 = vmatpush.bf16.msra.mxu2 %v12502_v27  ;;  %5837 = vmatpush.bf16.msra.mxu0 %v11926_v12  ;;  %v16487_v57 = vld [vmem:[#allocation10 + $0x7c4] sm:$0xf]  ;;  %v13618_v21 = vor.u32 %v16691_v32, %v13617_v55  ;;  %v12374_v3 = vor.u32 %v16375_v35, %v12371_v53  ;;  %v2500_v44 = vadd.f32 %v17687_v19, %v2487_v14  ;;  %v2512_v53 = vpop.f32.mrf.mxu0 }
 0x1e6   :  { %v16551_v27 = vld [vmem:[#allocation10 + $0x9c4] sm:$0xf] }
 0x1e7   :  { %5849 = vmatpush.bf16.msra.mxu1 %v12214_v5  ;;  %5824 = vmatpush.bf16.msrb.mxu3 %v13714_v9  ;;  %v13075_v61 = vld [vmem:[#allocation10 + $0x9e0] sm:$0xf0] }
 0x1e8   :  { %v12819_v62 = vld [vmem:[#allocation10 + $0x7e0] sm:$0xf0]  ;;  %v13078_v10 = vor.u32 %v16551_v27, %v13075_v61 }
 0x1e9   :  { %5862 = vmatpush.bf16.msra.mxu2 %v12470_v11  ;;  %5838 = vmatpush.bf16.msra.mxu0 %v11894_v29  ;;  %v16615_v63 = vld [vmem:[#allocation10 + $0xbc4] sm:$0xf]  ;;  %v12822_v5 = vor.u32 %v16487_v57, %v12819_v62  ;;  %v2513_v57 = vadd.f32 %v2512_v53, %v2500_v44  ;;  %v12025_v53 = vld [vmem:[#allocation10 + $0x188] sm:$0xf] }
 0x1ea   :  { %v13331_v1 = vld [vmem:[#allocation10 + $0xbe0] sm:$0xf0] }
 0x1eb   :  { %5850 = vmatpush.bf16.msra.mxu1 %v12182_v17  ;;  %5825 = vmatpush.bf16.msrb.mxu3 %v13682_v20  ;;  %v16367_v7 = vld [vmem:[#allocation10 + $0x404] sm:$0xf]  ;;  %v13334_v11 = vor.u32 %v16615_v63, %v13331_v1 }
 0x1ec   :  { %v12339_v9 = vld [vmem:[#allocation10 + $0x420] sm:$0xf0] }
 0x1ed   :  { %5863 = vmatpush.bf16.msra.mxu2 %v12438_v33  ;;  %5839 = vmatpush.bf16.msra.mxu0 %v11862_v47  ;;  %v16479_v0 = vld [vmem:[#allocation10 + $0x784] sm:$0xf]  ;;  %v12342_v16 = vor.u32 %v16367_v7, %v12339_v9  ;;  %v2514_v23 = vpop.f32.mrf.mxu0 }
 0x1ee   :  { %v16543_v22 = vld [vmem:[#allocation10 + $0x984] sm:$0xf]  ;;  %v11929_v23 = vld [vmem:[#allocation10 + $0xc8] sm:$0xf] }
 0x1ef   :  { %5851 = vmatpush.bf16.msra.mxu1 %v12150_v39  ;;  %5826 = vmatpush.bf16.msrb.mxu3 %v13650_v41  ;;  %v13043_v12 = vld [vmem:[#allocation10 + $0x9a0] sm:$0xf0] }
 0x1f0   :  { %v12787_v13 = vld [vmem:[#allocation10 + $0x7a0] sm:$0xf0]  ;;  %v13046_v18 = vor.u32 %v16543_v22, %v13043_v12  ;;  %v17695_v22 = vpop.f32.mrf.mxu3 }
 0x1f1   :  { %5864 = vmatpush.bf16.msra.mxu2 %v12406_v46  ;;  %v16607_v26 = vld [vmem:[#allocation10 + $0xb84] sm:$0xf]  ;;  %v12790_v17 = vor.u32 %v16479_v0, %v12787_v13  ;;  %5840 = vmatpush.bf16.msra.mxu0 %v11830_v6  ;;  %v2538_v6 = vpop.f32.mrf.mxu2 }
 0x1f2   :  { %v13299_v15 = vld [vmem:[#allocation10 + $0xba0] sm:$0xf0] }
 0x1f3   :  { %5852 = vmatpush.bf16.msra.mxu1 %v12118_v54  ;;  %5827 = vmatpush.bf16.msrb.mxu3 %v13618_v21  ;;  %v16471_v20 = vld [vmem:[#allocation10 + $0x744] sm:$0xf]  ;;  %v13302_v25 = vor.u32 %v16607_v26, %v13299_v15  ;;  %v2525_v54 = vpop.f32.mrf.mxu1 }
 0x1f4   :  { %v12755_v24 = vld [vmem:[#allocation10 + $0x760] sm:$0xf0]  ;;  %5841 = vmatmul.bf16.vlgmr.msra.gmra.mxu0 %v17653_v49  ;;  %v2526_v19 = vadd.f32 %v2525_v54, %v2513_v57  ;;  %v16292_v54 = vld [vmem:[#allocation10 + $0x1a4] sm:$0xf0] }
 0x1f5   :  { %5865 = vmatpush.bf16.msra.mxu2 %v12374_v3  ;;  %5885 = vmatpush.bf16.msrb.mxu0 %v13078_v10  ;;  %v16535_v33 = vld [vmem:[#allocation10 + $0x944] sm:$0xf]  ;;  %v12758_v29 = vor.u32 %v16471_v20, %v12755_v24  ;;  %v16356_v57 = vld [vmem:[#allocation10 + $0x3a4] sm:$0xf0] }
 0x1f6   :  { %v13011_v28 = vld [vmem:[#allocation10 + $0x960] sm:$0xf0]  ;;  %v2539_v7 = vadd.f32 %v2538_v6, %v2526_v19 }
 0x1f7   :  { %5872 = vmatpush.bf16.msra.mxu3 %v12822_v5  ;;  %5853 = vmatpush.bf16.msra.mxu1 %v12086_v38  ;;  %v16599_v31 = vld [vmem:[#allocation10 + $0xb44] sm:$0xf]  ;;  %v13014_v8 = vor.u32 %v16535_v33, %v13011_v28 }
 0x1f8   :  { %v13267_v36 = vld [vmem:[#allocation10 + $0xb60] sm:$0xf0]  ;;  %v2613_v15 = vmax.f32 %v2539_v7, 0.0 }
 0x1f9   :  { %5866 = vmatpush.bf16.msra.mxu2 %v12342_v16  ;;  %5886 = vmatpush.bf16.msrb.mxu0 %v13046_v18  ;;  %v16463_v4 = vld [vmem:[#allocation10 + $0x704] sm:$0xf]  ;;  %v13270_v48 = vor.u32 %v16599_v31, %v13267_v36  ;;  %v2540_v44 = vpop.f32.mrf.mxu2 }
 0x1fa   :  { %v12723_v39 = vld [vmem:[#allocation10 + $0x720] sm:$0xf0]  ;;  %5854 = vmatmul.bf16.vlgmr.msra.gmra.mxu1 %v17655_v56 }
 0x1fb   :  { %5898 = vmatpush.bf16.msrb.mxu1 %v13334_v11  ;;  %5873 = vmatpush.bf16.msra.mxu3 %v12790_v17  ;;  %v16527_v40 = vld [vmem:[#allocation10 + $0x904] sm:$0xf]  ;;  %v12726_v41 = vor.u32 %v16463_v4, %v12723_v39  ;;  %v2527_v18 = vpop.f32.mrf.mxu1 }
 0x1fc   :  { %v12979_v58 = vld [vmem:[#allocation10 + $0x920] sm:$0xf0]  ;;  %v16268_v18 = vld [vmem:[#allocation10 + $0xe4] sm:$0xf0] }
 0x1fd   :  { %v16591_v42 = vld [vmem:[#allocation10 + $0xb04] sm:$0xf]  ;;  %5887 = vmatpush.bf16.msrb.mxu0 %v13014_v8  ;;  %v12982_v45 = vor.u32 %v16527_v40, %v12979_v58  ;;  %v16300_v40 = vld [vmem:[#allocation10 + $0x1e4] sm:$0xf0] }
 0x1fe   :  { %v13235_v43 = vld [vmem:[#allocation10 + $0xb20] sm:$0xf0] }
 0x1ff   :  { %5899 = vmatpush.bf16.msrb.mxu1 %v13302_v25  ;;  %5874 = vmatpush.bf16.msra.mxu3 %v12758_v29  ;;  %v16455_v46 = vld [vmem:[#allocation10 + $0x6c4] sm:$0xf]  ;;  %v13238_v47 = vor.u32 %v16591_v42, %v13235_v43  ;;  %v17697_v25 = vpack.c.bf16 %v2613_v15, %v2613_v15  ;;  %v12313_v42 = vld [vmem:[#allocation10 + $0x3c8] sm:$0xf] }
 0x200   :  { %v12691_v34 = vld [vmem:[#allocation10 + $0x6e0] sm:$0xf0]  ;;  %v16364_v43 = vld [vmem:[#allocation10 + $0x3e4] sm:$0xf0] }
 0x201   :  { %v16519_v50 = vld [vmem:[#allocation10 + $0x8c4] sm:$0xf]  ;;  %v12694_v35 = vor.u32 %v16455_v46, %v12691_v34  ;;  %5888 = vmatpush.bf16.msrb.mxu0 %v12982_v45  ;;  %5815 = vmatmul.bf16.vlgmr.msrb.gmra.mxu2 %v17697_v25 }
 0x202   :  { %v12947_v51 = vld [vmem:[#allocation10 + $0x8e0] sm:$0xf0] }
 0x203   :  { %5900 = vmatpush.bf16.msrb.mxu1 %v13270_v48  ;;  %5875 = vmatpush.bf16.msra.mxu3 %v12726_v41  ;;  %v16583_v55 = vld [vmem:[#allocation10 + $0xac4] sm:$0xf]  ;;  %v12950_v27 = vor.u32 %v16519_v50, %v12947_v51  ;;  %v12057_v48 = vld [vmem:[#allocation10 + $0x1c8] sm:$0xf]  ;;  %v2553_v51 = vpop.f32.mrf.mxu3 }
 0x204   :  { %v13203_v32 = vld [vmem:[#allocation10 + $0xae0] sm:$0xf0]  ;;  %v12058_v50 = vor.u32 %v16300_v40, %v12057_v48  ;;  %v11897_v48 = vld [vmem:[#allocation10 + $0x88] sm:$0xf] }
 0x205   :  { %v16447_v61 = vld [vmem:[#allocation10 + $0x684] sm:$0xf]  ;;  %v13206_v62 = vor.u32 %v16583_v55, %v13203_v32  ;;  %5889 = vmatpush.bf16.msrb.mxu0 %v12950_v27  ;;  %v12281_v32 = vld [vmem:[#allocation10 + $0x388] sm:$0xf] }
 0x206   :  { %v12659_v21 = vld [vmem:[#allocation10 + $0x6a0] sm:$0xf0]  ;;  %v12282_v19 = vor.u32 %v16356_v57, %v12281_v32  ;;  %v16260_v40 = vld [vmem:[#allocation10 + $0xa4] sm:$0xf0] }
 0x207   :  { %5901 = vmatpush.bf16.msrb.mxu1 %v13238_v47  ;;  %v16511_v63 = vld [vmem:[#allocation10 + $0x884] sm:$0xf]  ;;  %5876 = vmatpush.bf16.msra.mxu3 %v12694_v35  ;;  %v12662_v59 = vor.u32 %v16447_v61, %v12659_v21  ;;  %v12314_v35 = vor.u32 %v16364_v43, %v12313_v42  ;;  %v12026_v21 = vor.u32 %v16292_v54, %v12025_v53  ;;  %v16324_v42 = vld [vmem:[#allocation10 + $0x2a4] sm:$0xf0] }
 0x208   :  { %v12915_v1 = vld [vmem:[#allocation10 + $0x8a0] sm:$0xf0]  ;;  %v11865_v51 = vld [vmem:[#allocation10 + $0x48] sm:$0xf] }
 0x209   :  { %v16575_v3 = vld [vmem:[#allocation10 + $0xa84] sm:$0xf]  ;;  %v12918_v9 = vor.u32 %v16511_v63, %v12915_v1  ;;  %v16284_v63 = vld [vmem:[#allocation10 + $0x164] sm:$0xf0] }
 0x20a   :  { %v13171_v5 = vld [vmem:[#allocation10 + $0xaa0] sm:$0xf0]  ;;  %v12121_v57 = vld [vmem:[#allocation10 + $0x248] sm:$0xf] }
 0x20b   :  { %v16679_v37 = vld [vmem:[#allocation10 + $0xdc4] sm:$0xf]  ;;  %5902 = vmatpush.bf16.msrb.mxu1 %v13206_v62  ;;  %v13174_v11 = vor.u32 %v16575_v3, %v13171_v5  ;;  %5877 = vmatpush.bf16.msra.mxu3 %v12662_v59  ;;  %v11993_v62 = vld [vmem:[#allocation10 + $0x148] sm:$0xf]  ;;  %v2603_v54 = vpop.f32.mrf.mxu3 }
 0x20c   :  { %v13587_v38 = vld [vmem:[#allocation10 + $0xde0] sm:$0xf0]  ;;  %5890 = vmatpush.bf16.msrb.mxu0 %v12918_v9  ;;  %v12249_v59 = vld [vmem:[#allocation10 + $0x348] sm:$0xf] }
 0x20d   :  { %v16439_v10 = vld [vmem:[#allocation10 + $0x644] sm:$0xf]  ;;  %v13590_v20 = vor.u32 %v16679_v37, %v13587_v38  ;;  %v16348_v3 = vld [vmem:[#allocation10 + $0x364] sm:$0xf0]  ;;  %v11994_v37 = vor.u32 %v16284_v63, %v11993_v62 }
 0x20e   :  { %v12627_v0 = vld [vmem:[#allocation10 + $0x660] sm:$0xf0]  ;;  %v12250_v7 = vor.u32 %v16348_v3, %v12249_v59  ;;  %v11961_v9 = vld [vmem:[#allocation10 + $0x108] sm:$0xf] }
 0x20f   :  { %v16503_v12 = vld [vmem:[#allocation10 + $0x844] sm:$0xf]  ;;  %v12630_v26 = vor.u32 %v16439_v10, %v12627_v0  ;;  %5903 = vmatpush.bf16.msrb.mxu1 %v13174_v11  ;;  %5911 = vmatpush.bf16.msrb.mxu2 %v13590_v20  ;;  %v16276_v38 = vld [vmem:[#allocation10 + $0x124] sm:$0xf0]  ;;  %v17274_v10 = vld [vmem:[#allocation9] sm:$0xff] }
 0x210   :  { %v12883_v13 = vld [vmem:[#allocation10 + $0x860] sm:$0xf0]  ;;  %v460_v0 = vperm.slane %v17274_v10, 7  ;;  %v11833_v59 = vld [vmem:[#allocation10 + $0x8] sm:$0xf] }
 0x211   :  { %v16567_v16 = vld [vmem:[#allocation10 + $0xa44] sm:$0xf]  ;;  %v12886_v33 = vor.u32 %v16503_v12, %v12883_v13  ;;  %5878 = vmatpush.bf16.msra.mxu3 %v12630_v26  ;;  %v12217_v12 = vld [vmem:[#allocation10 + $0x308] sm:$0xf]  ;;  %5867 = vmatmul.bf16.vlgmr.msra.gmra.mxu2 %v17657_v2 }
 0x212   :  { %v13139_v17 = vld [vmem:[#allocation10 + $0xa60] sm:$0xf0]  ;;  %v16340_v13 = vld [vmem:[#allocation10 + $0x324] sm:$0xf0]  ;;  %v2552_v20 = vadd.f32 %v17695_v22, %v460_v0 }
 0x213   :  { %v16495_v24 = vld [vmem:[#allocation10 + $0x804] sm:$0xf]  ;;  %v13142_v36 = vor.u32 %v16567_v16, %v13139_v17  ;;  %5891 = vmatpush.bf16.msrb.mxu0 %v12886_v33  ;;  %v11962_v16 = vor.u32 %v16276_v38, %v11961_v9  ;;  %v12218_v17 = vor.u32 %v16340_v13, %v12217_v12  ;;  %v12537_v3 = vld [vmem:[#allocation10 + $0x588] sm:$0xf] }
 0x214   :  { %v12851_v28 = vld [vmem:[#allocation10 + $0x820] sm:$0xf0]  ;;  %v16308_v9 = vld [vmem:[#allocation10 + $0x224] sm:$0xf0] }
 0x215   :  { %v16671_v29 = vld [vmem:[#allocation10 + $0xd84] sm:$0xf]  ;;  %v12854_v45 = vor.u32 %v16495_v24, %v12851_v28  ;;  %5904 = vmatpush.bf16.msrb.mxu1 %v13142_v36  ;;  %v2564_v24 = vpop.f32.mrf.mxu0  ;;  %v12185_v28 = vld [vmem:[#allocation10 + $0x2c8] sm:$0xf] }
 0x216   :  { %v13555_v31 = vld [vmem:[#allocation10 + $0xda0] sm:$0xf0]  ;;  %v13081_v10 = vld [vmem:[#allocation10 + $0x9c8] sm:$0xf] }
 0x217   :  { %v16559_v14 = vld [vmem:[#allocation10 + $0xa04] sm:$0xf]  ;;  %v13558_v41 = vor.u32 %v16671_v29, %v13555_v31  ;;  %5892 = vmatpush.bf16.msrb.mxu0 %v12854_v45  ;;  %v16332_v29 = vld [vmem:[#allocation10 + $0x2e4] sm:$0xf0]  ;;  %v2577_v31 = vpop.f32.mrf.mxu1  ;;  %v11898_v45 = vor.u32 %v16260_v40, %v11897_v48 }
 0x218   :  { %v16431_v8 = vld [vmem:[#allocation10 + $0x604] sm:$0xf]  ;;  %v16556_v0 = vld [vmem:[#allocation10 + $0x9e4] sm:$0xf0] }
 0x219   :  { %v12595_v4 = vld [vmem:[#allocation10 + $0x620] sm:$0xf0]  ;;  %5912 = vmatpush.bf16.msrb.mxu2 %v13558_v41  ;;  %v12153_v41 = vld [vmem:[#allocation10 + $0x288] sm:$0xf] }
 0x21a   :  { %v13107_v39 = vld [vmem:[#allocation10 + $0xa20] sm:$0xf0]  ;;  %v12598_v58 = vor.u32 %v16431_v8, %v12595_v4  ;;  %5893 = vmatmul.bf16.vlgmr.msrb.gmra.mxu0 %v17678_v30  ;;  %v2565_v8 = vadd.f32 %v2564_v24, %v2552_v20  ;;  %v11930_v4 = vor.u32 %v16268_v18, %v11929_v23  ;;  %v13337_v13 = vld [vmem:[#allocation10 + $0xbc8] sm:$0xf]  ;;  %v13082_v24 = vor.u32 %v16556_v0, %v13081_v10 }
 0x21b   :  { %v16663_v46 = vld [vmem:[#allocation10 + $0xd44] sm:$0xf]  ;;  %v13110_v47 = vor.u32 %v16559_v14, %v13107_v39  ;;  %5937 = vmatpush.bf16.msra.mxu0 %v12058_v50  ;;  %v12186_v39 = vor.u32 %v16332_v29, %v12185_v28  ;;  %v12154_v50 = vor.u32 %v16324_v42, %v12153_v41  ;;  %v16412_v28 = vld [vmem:[#allocation10 + $0x564] sm:$0xf0]  ;;  %v2605_v29 = vpop.f32.mrf.mxu3 }
 0x21c   :  { %v13523_v34 = vld [vmem:[#allocation10 + $0xd60] sm:$0xf0]  ;;  %5879 = vmatpush.bf16.msra.mxu3 %v12598_v58  ;;  %v2578_v44 = vadd.f32 %v2577_v31, %v2565_v8  ;;  %v12473_v42 = vld [vmem:[#allocation10 + $0x508] sm:$0xf] }
 0x21d   :  { %v13526_v55 = vor.u32 %v16663_v46, %v13523_v34  ;;  %v16655_v27 = vld [vmem:[#allocation10 + $0xd04] sm:$0xf]  ;;  %5905 = vmatpush.bf16.msrb.mxu1 %v13110_v47  ;;  %v12569_v46 = vld [vmem:[#allocation10 + $0x5c8] sm:$0xf]  ;;  %v2590_v47 = vpop.f32.mrf.mxu2 }
 0x21e   :  { %v13491_v61 = vld [vmem:[#allocation10 + $0xd20] sm:$0xf0]  ;;  %v16428_v34 = vld [vmem:[#allocation10 + $0x5e4] sm:$0xf0]  ;;  %v2591_v53 = vadd.f32 %v2590_v47, %v2578_v44 }
 0x21f   :  { %5913 = vmatpush.bf16.msrb.mxu2 %v13526_v55  ;;  %v13494_v1 = vor.u32 %v16655_v27, %v13491_v61  ;;  %v16647_v5 = vld [vmem:[#allocation10 + $0xcc4] sm:$0xf]  ;;  %5938 = vmatpush.bf16.msra.mxu0 %v12026_v21  ;;  %v2566_v55 = vpop.f32.mrf.mxu0  ;;  %v16316_v27 = vld [vmem:[#allocation10 + $0x264] sm:$0xf0]  ;;  %v2579_v61 = vpop.f32.mrf.mxu1  ;;  %v12570_v21 = vor.u32 %v16428_v34, %v12569_v46 }
 0x220   :  { %5906 = vmatmul.bf16.vlgmr.msrb.gmra.mxu1 %v17683_v52  ;;  %v13459_v6 = vld [vmem:[#allocation10 + $0xce0] sm:$0xf0]  ;;  %v2604_v63 = vadd.f32 %v2603_v54, %v2591_v53  ;;  %v13017_v44 = vld [vmem:[#allocation10 + $0x948] sm:$0xf] }
 0x221   :  { %5950 = vmatpush.bf16.msra.mxu1 %v12314_v35  ;;  %v13462_v11 = vor.u32 %v16647_v5, %v13459_v6  ;;  %v16639_v26 = vld [vmem:[#allocation10 + $0xc84] sm:$0xf]  ;;  %v16252_v35 = vld [vmem:[#allocation10 + $0x64] sm:$0xf0]  ;;  %v12122_v6 = vor.u32 %v16316_v27, %v12121_v57 }
 0x222   :  { %v13427_v15 = vld [vmem:[#allocation10 + $0xca0] sm:$0xf0]  ;;  %v16420_v5 = vld [vmem:[#allocation10 + $0x5a4] sm:$0xf0]  ;;  %v2614_v38 = vmax.f32 %v2604_v63, 0.0 }
 0x223   :  { %5914 = vmatpush.bf16.msrb.mxu2 %v13494_v1  ;;  %5939 = vmatpush.bf16.msra.mxu0 %v11994_v37  ;;  %v13430_v33 = vor.u32 %v16639_v26, %v13427_v15  ;;  %v16631_v36 = vld [vmem:[#allocation10 + $0xc44] sm:$0xf]  ;;  %v11866_v1 = vor.u32 %v16252_v35, %v11865_v51  ;;  %v16244_v37 = vld [vmem:[#allocation10 + $0x24] sm:$0xf0]  ;;  %v12538_v12 = vor.u32 %v16420_v5, %v12537_v3 }
 0x224   :  { %v13395_v14 = vld [vmem:[#allocation10 + $0xc60] sm:$0xf0]  ;;  %v16620_v26 = vld [vmem:[#allocation10 + $0xbe4] sm:$0xf0]  ;;  %v17704_v15 = vpack.c.bf16 %v2614_v38, %v2614_v38 }
 0x225   :  { %5951 = vmatpush.bf16.msra.mxu1 %v12282_v19  ;;  %v13398_v58 = vor.u32 %v16631_v36, %v13395_v14  ;;  %v16623_v22 = vld [vmem:[#allocation10 + $0xc04] sm:$0xf]  ;;  %v2592_v18 = vpop.f32.mrf.mxu2  ;;  %v13338_v31 = vor.u32 %v16620_v26, %v13337_v13  ;;  %v13049_v36 = vld [vmem:[#allocation10 + $0x988] sm:$0xf] }
 0x226   :  { %v13363_v43 = vld [vmem:[#allocation10 + $0xc20] sm:$0xf0]  ;;  %5828 = vmatmul.bf16.vlgmr.msrb.gmra.mxu3 %v17704_v15  ;;  %v16548_v14 = vld [vmem:[#allocation10 + $0x9a4] sm:$0xf0] }
 0x227   :  { %5915 = vmatpush.bf16.msrb.mxu2 %v13462_v11  ;;  %5940 = vmatpush.bf16.msra.mxu0 %v11962_v16  ;;  %v13366_v32 = vor.u32 %v16623_v22, %v13363_v43  ;;  %v16743_v19 = vld [vmem:[#allocation10 + $0xfc4] sm:$0xf]  ;;  %v11834_v16 = vor.u32 %v16244_v37, %v11833_v59  ;;  %v13050_v41 = vor.u32 %v16548_v14, %v13049_v36  ;;  %v16404_v22 = vld [vmem:[#allocation10 + $0x524] sm:$0xf0]  ;;  %v5738_v10 = vpop.f32.mrf.mxu0  ;;  %v5751_v26 = vpop.f32.mrf.mxu1 }
 0x228   :  { %v13843_v62 = vld [vmem:[#allocation10 + $0xfe0] sm:$0xf0]  ;;  %v13273_v34 = vld [vmem:[#allocation10 + $0xb48] sm:$0xf] }
 0x229   :  { %5952 = vmatpush.bf16.msra.mxu1 %v12250_v7  ;;  %v12089_v7 = vld [vmem:[#allocation10 + $0x208] sm:$0xf]  ;;  %v13846_v11 = vor.u32 %v16743_v19, %v13843_v62  ;;  %v13811_v23 = vld [vmem:[#allocation10 + $0xfa0] sm:$0xf0] }
 0x22a   :  { %v12090_v20 = vor.u32 %v16308_v9, %v12089_v7  ;;  %v16727_v40 = vld [vmem:[#allocation10 + $0xf44] sm:$0xf]  ;;  %v16604_v47 = vld [vmem:[#allocation10 + $0xb64] sm:$0xf0] }
 0x22b   :  { %5916 = vmatpush.bf16.msrb.mxu2 %v13430_v33  ;;  %5941 = vmatpush.bf16.msra.mxu0 %v11930_v4  ;;  %v12505_v33 = vld [vmem:[#allocation10 + $0x548] sm:$0xf]  ;;  %v16719_v51 = vld [vmem:[#allocation10 + $0xf04] sm:$0xf]  ;;  %v13274_v57 = vor.u32 %v16604_v47, %v13273_v34 }
 0x22c   :  { %5924 = vmatpush.bf16.msrb.mxu3 %v13846_v11  ;;  %v13305_v4 = vld [vmem:[#allocation10 + $0xb88] sm:$0xf]  ;;  %v12506_v48 = vor.u32 %v16412_v28, %v12505_v33  ;;  %v13747_v35 = vld [vmem:[#allocation10 + $0xf20] sm:$0xf0] }
 0x22d   :  { %5953 = vmatpush.bf16.msra.mxu1 %v12218_v17  ;;  %v16735_v17 = vld [vmem:[#allocation10 + $0xf84] sm:$0xf]  ;;  %v12441_v55 = vld [vmem:[#allocation10 + $0x4c8] sm:$0xf]  ;;  %v5777_v47 = vpop.f32.mrf.mxu3 }
 0x22e   :  { %v13814_v8 = vor.u32 %v16735_v17, %v13811_v23  ;;  %v17710_v54 = vld [vmem:[#allocation12] sm:$0xff]  ;;  %v12985_v27 = vld [vmem:[#allocation10 + $0x908] sm:$0xf] }
 0x22f   :  { %5917 = vmatpush.bf16.msrb.mxu2 %v13398_v58  ;;  %5942 = vmatpush.bf16.msra.mxu0 %v11898_v45  ;;  %v13779_v58 = vld [vmem:[#allocation10 + $0xf60] sm:$0xf0]  ;;  %v16540_v45 = vld [vmem:[#allocation10 + $0x964] sm:$0xf0]  ;;  %v3153_v63 = vperm.slane %v17710_v54, 0 }
 0x230   :  { %5925 = vmatpush.bf16.msrb.mxu3 %v13814_v8  ;;  %v13782_v46 = vor.u32 %v16727_v40, %v13779_v58  ;;  %v13018_v53 = vor.u32 %v16540_v45, %v13017_v44  ;;  %v16532_v61 = vld [vmem:[#allocation10 + $0x924] sm:$0xf0]  ;;  %v16711_v59 = vld [vmem:[#allocation10 + $0xec4] sm:$0xf] }
 0x231   :  { %5954 = vmatpush.bf16.msra.mxu1 %v12186_v39  ;;  %v16612_v39 = vld [vmem:[#allocation10 + $0xba4] sm:$0xf0]  ;;  %v13715_v3 = vld [vmem:[#allocation10 + $0xee0] sm:$0xf0]  ;;  %v12986_v5 = vor.u32 %v16532_v61, %v12985_v27  ;;  %v5739_v13 = vadd.f32 %v5738_v10, %v3153_v63 }
 0x232   :  { %v13306_v43 = vor.u32 %v16612_v39, %v13305_v4  ;;  %v13241_v19 = vld [vmem:[#allocation10 + $0xb08] sm:$0xf]  ;;  %v13718_v0 = vor.u32 %v16711_v59, %v13715_v3  ;;  %v16703_v17 = vld [vmem:[#allocation10 + $0xe84] sm:$0xf] }
 0x233   :  { %5918 = vmatpush.bf16.msrb.mxu2 %v13366_v32  ;;  %5943 = vmatpush.bf16.msra.mxu0 %v11866_v1  ;;  %v16396_v32 = vld [vmem:[#allocation10 + $0x4e4] sm:$0xf0]  ;;  %v13683_v23 = vld [vmem:[#allocation10 + $0xea0] sm:$0xf0]  ;;  %v5752_v33 = vadd.f32 %v5751_v26, %v5739_v13 }
 0x234   :  { %5926 = vmatpush.bf16.msrb.mxu3 %v13782_v46  ;;  %v16596_v62 = vld [vmem:[#allocation10 + $0xb24] sm:$0xf0]  ;;  %v12442_v1 = vor.u32 %v16396_v32, %v12441_v55  ;;  %v13686_v36 = vor.u32 %v16703_v17, %v13683_v23  ;;  %v16695_v39 = vld [vmem:[#allocation10 + $0xe44] sm:$0xf]  ;;  %v5753_v55 = vpop.f32.mrf.mxu1 }
 0x235   :  { %5955 = vmatpush.bf16.msra.mxu1 %v12154_v50  ;;  %v12474_v50 = vor.u32 %v16404_v22, %v12473_v42  ;;  %v16388_v37 = vld [vmem:[#allocation10 + $0x4a4] sm:$0xf0]  ;;  %v13242_v7 = vor.u32 %v16596_v62, %v13241_v19  ;;  %v5764_v22 = vpop.f32.mrf.mxu2  ;;  %v13619_v27 = vld [vmem:[#allocation10 + $0xe20] sm:$0xf0] }
 0x236   :  { %5919 = vmatmul.bf16.vlgmr.msrb.gmra.mxu2 %v17697_v25  ;;  %v12953_v9 = vld [vmem:[#allocation10 + $0x8c8] sm:$0xf]  ;;  %5880 = vmatmul.bf16.vlgmr.msra.gmra.mxu3 %v17660_v60  ;;  %v5765_v34 = vadd.f32 %v5764_v22, %v5752_v33  ;;  %v5779_v33 = vpop.f32.mrf.mxu3 }
 0x237   :  { %5963 = vmatpush.bf16.msra.mxu2 %v12570_v21  ;;  %5944 = vmatpush.bf16.msra.mxu0 %v11834_v16  ;;  %v13750_v21 = vor.u32 %v16719_v51, %v13747_v35  ;;  %v16524_v38 = vld [vmem:[#allocation10 + $0x8e4] sm:$0xf0] }
 0x238   :  { %v13209_v11 = vld [vmem:[#allocation10 + $0xac8] sm:$0xf]  ;;  %v12954_v18 = vor.u32 %v16524_v38, %v12953_v9  ;;  %v17714_v61 = vadd.f32 %v5777_v47, %v5765_v34  ;;  %v16296_v38 = vld [vmem:[#allocation10 + $0x1cc] sm:$0xf] }
 0x239   :  { %5956 = vmatpush.bf16.msra.mxu1 %v12122_v6  ;;  %v12409_v6 = vld [vmem:[#allocation10 + $0x488] sm:$0xf]  ;;  %5927 = vmatpush.bf16.msrb.mxu3 %v13750_v21  ;;  %v12251_v34 = vld [vmem:[#allocation10 + $0x368] sm:$0xf0] }
 0x23a   :  { %5945 = vmatmul.bf16.vlgmr.msra.gmra.mxu0 %v17653_v49  ;;  %v12410_v16 = vor.u32 %v16388_v37, %v12409_v6  ;;  %v12921_v29 = vld [vmem:[#allocation10 + $0x888] sm:$0xf] }
 0x23b   :  { %5964 = vmatpush.bf16.msra.mxu2 %v12538_v12  ;;  %5989 = vmatpush.bf16.msrb.mxu0 %v13082_v24  ;;  %v16588_v12 = vld [vmem:[#allocation10 + $0xae4] sm:$0xf0] }
 0x23c   :  { %v16380_v24 = vld [vmem:[#allocation10 + $0x464] sm:$0xf0]  ;;  %v13210_v28 = vor.u32 %v16588_v12, %v13209_v11  ;;  %v16360_v11 = vld [vmem:[#allocation10 + $0x3cc] sm:$0xf] }
 0x23d   :  { %5957 = vmatpush.bf16.msra.mxu1 %v12090_v20  ;;  %v12377_v20 = vld [vmem:[#allocation10 + $0x448] sm:$0xf]  ;;  %5928 = vmatpush.bf16.msrb.mxu3 %v13718_v0  ;;  %v12059_v0 = vld [vmem:[#allocation10 + $0x1e8] sm:$0xf0]  ;;  %v5766_v23 = vpop.f32.mrf.mxu2 }
 0x23e   :  { %v13177_v14 = vld [vmem:[#allocation10 + $0xa88] sm:$0xf]  ;;  %v12378_v4 = vor.u32 %v16380_v24, %v12377_v20  ;;  %v12315_v12 = vld [vmem:[#allocation10 + $0x3e8] sm:$0xf0] }
 0x23f   :  { %5965 = vmatpush.bf16.msra.mxu2 %v12506_v48  ;;  %5990 = vmatpush.bf16.msrb.mxu0 %v13050_v41  ;;  %v16580_v8 = vld [vmem:[#allocation10 + $0xaa4] sm:$0xf0]  ;;  %v13651_v48 = vld [vmem:[#allocation10 + $0xe60] sm:$0xf0] }
 0x240   :  { %5958 = vmatmul.bf16.vlgmr.msra.gmra.mxu1 %v17655_v56  ;;  %v12345_v58 = vld [vmem:[#allocation10 + $0x408] sm:$0xf]  ;;  %v13654_v51 = vor.u32 %v16695_v39, %v13651_v48 }
 0x241   :  { %6002 = vmatpush.bf16.msrb.mxu1 %v13338_v31  ;;  %v16516_v31 = vld [vmem:[#allocation10 + $0x8a4] sm:$0xf0]  ;;  %5929 = vmatpush.bf16.msrb.mxu3 %v13686_v36 }
 0x242   :  { %v12922_v40 = vor.u32 %v16516_v31, %v12921_v29  ;;  %v16372_v41 = vld [vmem:[#allocation10 + $0x424] sm:$0xf0]  ;;  %v12318_v29 = vor.u32 %v16360_v11, %v12315_v12  ;;  %v16288_v31 = vld [vmem:[#allocation10 + $0x18c] sm:$0xf] }
 0x243   :  { %5966 = vmatpush.bf16.msra.mxu2 %v12474_v50  ;;  %5991 = vmatpush.bf16.msrb.mxu0 %v13018_v53  ;;  %v12889_v42 = vld [vmem:[#allocation10 + $0x848] sm:$0xf]  ;;  %v5740_v50 = vpop.f32.mrf.mxu0  ;;  %v12346_v32 = vor.u32 %v16372_v41, %v12345_v58 }
 0x244   :  { %v16508_v44 = vld [vmem:[#allocation10 + $0x864] sm:$0xf0] }
 0x245   :  { %6003 = vmatpush.bf16.msrb.mxu1 %v13306_v43  ;;  %v13178_v43 = vor.u32 %v16580_v8, %v13177_v14  ;;  %v13593_v45 = vld [vmem:[#allocation10 + $0xdc8] sm:$0xf]  ;;  %v12890_v21 = vor.u32 %v16508_v44, %v12889_v42  ;;  %5930 = vmatpush.bf16.msrb.mxu3 %v13654_v51  ;;  %v12027_v14 = vld [vmem:[#allocation10 + $0x1a8] sm:$0xf0] }
 0x246   :  { %v16684_v46 = vld [vmem:[#allocation10 + $0xde4] sm:$0xf0]  ;;  %v16352_v8 = vld [vmem:[#allocation10 + $0x38c] sm:$0xf]  ;;  %v12030_v42 = vor.u32 %v16288_v31, %v12027_v14 }
 0x247   :  { %5967 = vmatpush.bf16.msra.mxu2 %v12442_v1  ;;  %5992 = vmatpush.bf16.msrb.mxu0 %v12986_v5  ;;  %v13145_v35 = vld [vmem:[#allocation10 + $0xa48] sm:$0xf]  ;;  %v13594_v19 = vor.u32 %v16684_v46, %v13593_v45  ;;  %v11995_v45 = vld [vmem:[#allocation10 + $0x168] sm:$0xf0] }
 0x248   :  { %v16572_v53 = vld [vmem:[#allocation10 + $0xa64] sm:$0xf0]  ;;  %v16344_v46 = vld [vmem:[#allocation10 + $0x34c] sm:$0xf] }
 0x249   :  { %6004 = vmatpush.bf16.msrb.mxu1 %v13274_v57  ;;  %v16687_v57 = vld [vmem:[#allocation10 + $0xe04] sm:$0xf]  ;;  %v12825_v62 = vld [vmem:[#allocation10 + $0x7c8] sm:$0xf]  ;;  %v13146_v59 = vor.u32 %v16572_v53, %v13145_v35  ;;  %v12155_v31 = vld [vmem:[#allocation10 + $0x2a8] sm:$0xf0] }
 0x24a   :  { %v16492_v63 = vld [vmem:[#allocation10 + $0x7e4] sm:$0xf0]  ;;  %v13622_v37 = vor.u32 %v16687_v57, %v13619_v27  ;;  %v16272_v57 = vld [vmem:[#allocation10 + $0x10c] sm:$0xf] }
 0x24b   :  { %5968 = vmatpush.bf16.msra.mxu2 %v12410_v16  ;;  %5993 = vmatpush.bf16.msrb.mxu0 %v12954_v18  ;;  %v12857_v1 = vld [vmem:[#allocation10 + $0x808] sm:$0xf]  ;;  %v12826_v10 = vor.u32 %v16492_v63, %v12825_v62  ;;  %v12219_v62 = vld [vmem:[#allocation10 + $0x328] sm:$0xf0] }
 0x24c   :  { %v16500_v3 = vld [vmem:[#allocation10 + $0x824] sm:$0xf0]  ;;  %5931 = vmatpush.bf16.msrb.mxu3 %v13622_v37 }
 0x24d   :  { %6005 = vmatpush.bf16.msrb.mxu1 %v13242_v7  ;;  %v13561_v5 = vld [vmem:[#allocation10 + $0xd88] sm:$0xf]  ;;  %v12858_v13 = vor.u32 %v16500_v3, %v12857_v1 }
 0x24e   :  { %v16676_v6 = vld [vmem:[#allocation10 + $0xda4] sm:$0xf0] }
 0x24f   :  { %5969 = vmatpush.bf16.msra.mxu2 %v12378_v4  ;;  %5994 = vmatpush.bf16.msrb.mxu0 %v12922_v40  ;;  %v13113_v7 = vld [vmem:[#allocation10 + $0xa08] sm:$0xf]  ;;  %v13562_v26 = vor.u32 %v16676_v6, %v13561_v5  ;;  %v12283_v4 = vld [vmem:[#allocation10 + $0x3a8] sm:$0xf0] }
 0x250   :  { %v16564_v9 = vld [vmem:[#allocation10 + $0xa24] sm:$0xf0]  ;;  %5976 = vmatpush.bf16.msra.mxu3 %v12826_v10  ;;  %v12286_v22 = vor.u32 %v16352_v8, %v12283_v4  ;;  %v16328_v10 = vld [vmem:[#allocation10 + $0x2cc] sm:$0xf] }
 0x251   :  { %6006 = vmatpush.bf16.msrb.mxu1 %v13210_v28  ;;  %v12793_v16 = vld [vmem:[#allocation10 + $0x788] sm:$0xf]  ;;  %v13114_v18 = vor.u32 %v16564_v9, %v13113_v7  ;;  %v12062_v28 = vor.u32 %v16296_v38, %v12059_v0  ;;  %5932 = vmatmul.bf16.vlgmr.msrb.gmra.mxu3 %v17704_v15  ;;  %v16264_v7 = vld [vmem:[#allocation10 + $0xcc] sm:$0xf]  ;;  %v5790_v11 = vpop.f32.mrf.mxu0 }
 0x252   :  { %v16484_v17 = vld [vmem:[#allocation10 + $0x7a4] sm:$0xf0]  ;;  %v11931_v38 = vld [vmem:[#allocation10 + $0xe8] sm:$0xf0] }
 0x253   :  { %5970 = vmatpush.bf16.msra.mxu2 %v12346_v32  ;;  %5995 = vmatpush.bf16.msrb.mxu0 %v12890_v21  ;;  %v13529_v20 = vld [vmem:[#allocation10 + $0xd48] sm:$0xf]  ;;  %v12794_v36 = vor.u32 %v16484_v17, %v12793_v16  ;;  %v12254_v32 = vor.u32 %v16344_v46, %v12251_v34  ;;  %v11963_v21 = vld [vmem:[#allocation10 + $0x128] sm:$0xf0]  ;;  %v17721_v16 = vadd.f32 %v5790_v11, %v17714_v61 }
 0x254   :  { %v16668_v24 = vld [vmem:[#allocation10 + $0xd64] sm:$0xf0]  ;;  %v11966_v6 = vor.u32 %v16272_v57, %v11963_v21  ;;  %v12187_v0 = vld [vmem:[#allocation10 + $0x2e8] sm:$0xf0] }
 0x255   :  { %6007 = vmatpush.bf16.msrb.mxu1 %v13178_v43  ;;  %v13530_v39 = vor.u32 %v16668_v24, %v13529_v20  ;;  %v12761_v48 = vld [vmem:[#allocation10 + $0x748] sm:$0xf]  ;;  %v16280_v43 = vld [vmem:[#allocation10 + $0x14c] sm:$0xf]  ;;  %5977 = vmatpush.bf16.msra.mxu3 %v12794_v36  ;;  %v12190_v20 = vor.u32 %v16328_v10, %v12187_v0 }
 0x256   :  { %5971 = vmatmul.bf16.vlgmr.msra.gmra.mxu2 %v17657_v2  ;;  %v16476_v40 = vld [vmem:[#allocation10 + $0x764] sm:$0xf0]  ;;  %v11998_v55 = vor.u32 %v16280_v43, %v11995_v45  ;;  %v16256_v24 = vld [vmem:[#allocation10 + $0x8c] sm:$0xf] }
 0x257   :  { %6015 = vmatpush.bf16.msrb.mxu2 %v13594_v19  ;;  %5996 = vmatpush.bf16.msrb.mxu0 %v12858_v13  ;;  %v13497_v58 = vld [vmem:[#allocation10 + $0xd08] sm:$0xf]  ;;  %v12762_v44 = vor.u32 %v16476_v40, %v12761_v48  ;;  %v16336_v19 = vld [vmem:[#allocation10 + $0x30c] sm:$0xf] }
 0x258   :  { %v16660_v41 = vld [vmem:[#allocation10 + $0xd24] sm:$0xf0]  ;;  %v12222_v37 = vor.u32 %v16336_v19, %v12219_v62  ;;  %v16248_v40 = vld [vmem:[#allocation10 + $0x4c] sm:$0xf] }
 0x259   :  { %6008 = vmatpush.bf16.msrb.mxu1 %v13146_v59  ;;  %v13498_v47 = vor.u32 %v16660_v41, %v13497_v58  ;;  %v12729_v50 = vld [vmem:[#allocation10 + $0x708] sm:$0xf]  ;;  %5978 = vmatpush.bf16.msra.mxu3 %v12762_v44  ;;  %v16424_v58 = vld [vmem:[#allocation10 + $0x5cc] sm:$0xf]  ;;  %v5792_v45 = vpop.f32.mrf.mxu0 }
 0x25a   :  { %5997 = vmatmul.bf16.vlgmr.msrb.gmra.mxu0 %v17678_v30  ;;  %v16468_v51 = vld [vmem:[#allocation10 + $0x724] sm:$0xf0]  ;;  %v12571_v41 = vld [vmem:[#allocation10 + $0x5e8] sm:$0xf0] }
 0x25b   :  { %6016 = vmatpush.bf16.msrb.mxu2 %v13562_v26  ;;  %6041 = vmatpush.bf16.msra.mxu0 %v12062_v28  ;;  %v13465_v35 = vld [vmem:[#allocation10 + $0xcc8] sm:$0xf]  ;;  %v12730_v27 = vor.u32 %v16468_v51, %v12729_v50  ;;  %v11899_v28 = vld [vmem:[#allocation10 + $0xa8] sm:$0xf0]  ;;  %v12574_v50 = vor.u32 %v16424_v58, %v12571_v41 }
 0x25c   :  { %v16652_v53 = vld [vmem:[#allocation10 + $0xce4] sm:$0xf0]  ;;  %v11902_v61 = vor.u32 %v16256_v24, %v11899_v28  ;;  %v16312_v43 = vld [vmem:[#allocation10 + $0x24c] sm:$0xf] }
 0x25d   :  { %6009 = vmatpush.bf16.msrb.mxu1 %v13114_v18  ;;  %v13466_v63 = vor.u32 %v16652_v53, %v13465_v35  ;;  %v12697_v1 = vld [vmem:[#allocation10 + $0x6c8] sm:$0xf]  ;;  %5979 = vmatpush.bf16.msra.mxu3 %v12730_v27  ;;  %v11934_v18 = vor.u32 %v16264_v7, %v11931_v38  ;;  %v12123_v44 = vld [vmem:[#allocation10 + $0x268] sm:$0xf0] }
 0x25e   :  { %v16460_v59 = vld [vmem:[#allocation10 + $0x6e4] sm:$0xf0]  ;;  %v16416_v57 = vld [vmem:[#allocation10 + $0x58c] sm:$0xf] }
 0x25f   :  { %6017 = vmatpush.bf16.msrb.mxu2 %v13530_v39  ;;  %6042 = vmatpush.bf16.msra.mxu0 %v12030_v42  ;;  %v13433_v3 = vld [vmem:[#allocation10 + $0xc88] sm:$0xf]  ;;  %v12698_v9 = vor.u32 %v16460_v59, %v12697_v1  ;;  %v12539_v27 = vld [vmem:[#allocation10 + $0x5a8] sm:$0xf0] }
 0x260   :  { %6010 = vmatmul.bf16.vlgmr.msrb.gmra.mxu1 %v17683_v52  ;;  %v16644_v5 = vld [vmem:[#allocation10 + $0xca4] sm:$0xf0]  ;;  %v11835_v19 = vld [vmem:[#allocation10 + $0x28] sm:$0xf0] }
 0x261   :  { %6054 = vmatpush.bf16.msra.mxu1 %v12318_v29  ;;  %v13434_v12 = vor.u32 %v16644_v5, %v13433_v3  ;;  %v12665_v13 = vld [vmem:[#allocation10 + $0x688] sm:$0xf]  ;;  %5980 = vmatpush.bf16.msra.mxu3 %v12698_v9  ;;  %v16320_v29 = vld [vmem:[#allocation10 + $0x28c] sm:$0xf] }
 0x262   :  { %v16452_v26 = vld [vmem:[#allocation10 + $0x6a4] sm:$0xf0]  ;;  %v12158_v48 = vor.u32 %v16320_v29, %v12155_v31  ;;  %v16304_v62 = vld [vmem:[#allocation10 + $0x20c] sm:$0xf] }
 0x263   :  { %6018 = vmatpush.bf16.msrb.mxu2 %v13498_v47  ;;  %6043 = vmatpush.bf16.msra.mxu0 %v11998_v55  ;;  %v13401_v17 = vld [vmem:[#allocation10 + $0xc48] sm:$0xf]  ;;  %v12666_v33 = vor.u32 %v16452_v26, %v12665_v13  ;;  %v12126_v55 = vor.u32 %v16312_v43, %v12123_v44  ;;  %v16552_v59 = vld [vmem:[#allocation10 + $0x9cc] sm:$0xf]  ;;  %v5803_v13 = vpop.f32.mrf.mxu1 }
 0x264   :  { %v16636_v23 = vld [vmem:[#allocation10 + $0xc64] sm:$0xf0]  ;;  %v13083_v3 = vld [vmem:[#allocation10 + $0x9e8] sm:$0xf0]  ;;  %v17725_v24 = vadd.f32 %v5803_v13, %v17721_v16 }
 0x265   :  { %6055 = vmatpush.bf16.msra.mxu1 %v12286_v22  ;;  %v13402_v36 = vor.u32 %v16636_v23, %v13401_v17  ;;  %v12633_v14 = vld [vmem:[#allocation10 + $0x648] sm:$0xf]  ;;  %5981 = vmatpush.bf16.msra.mxu3 %v12666_v33  ;;  %v11867_v22 = vld [vmem:[#allocation10 + $0x68] sm:$0xf0] }
 0x266   :  { %v16444_v8 = vld [vmem:[#allocation10 + $0x664] sm:$0xf0]  ;;  %v11870_v53 = vor.u32 %v16248_v40, %v11867_v22  ;;  %v16616_v5 = vld [vmem:[#allocation10 + $0xbcc] sm:$0xf] }
 0x267   :  { %6019 = vmatpush.bf16.msrb.mxu2 %v13466_v63  ;;  %6044 = vmatpush.bf16.msra.mxu0 %v11966_v6  ;;  %v13369_v4 = vld [vmem:[#allocation10 + $0xc08] sm:$0xf]  ;;  %v12634_v42 = vor.u32 %v16444_v8, %v12633_v14  ;;  %v12091_v63 = vld [vmem:[#allocation10 + $0x228] sm:$0xf0]  ;;  %v12542_v6 = vor.u32 %v16416_v57, %v12539_v27 }
 0x268   :  { %v16628_v39 = vld [vmem:[#allocation10 + $0xc24] sm:$0xf0]  ;;  %v16408_v10 = vld [vmem:[#allocation10 + $0x54c] sm:$0xf]  ;;  %v12094_v11 = vor.u32 %v16304_v62, %v12091_v63 }
 0x269   :  { %6056 = vmatpush.bf16.msra.mxu1 %v12254_v32  ;;  %v13370_v46 = vor.u32 %v16628_v39, %v13369_v4  ;;  %v12601_v34 = vld [vmem:[#allocation10 + $0x608] sm:$0xf]  ;;  %v16240_v32 = vld [vmem:[#allocation10 + $0xc] sm:$0xf]  ;;  %5982 = vmatpush.bf16.msra.mxu3 %v12634_v42 }
 0x26a   :  { %v16436_v47 = vld [vmem:[#allocation10 + $0x624] sm:$0xf0]  ;;  %v11838_v38 = vor.u32 %v16240_v32, %v11835_v19  ;;  %v12507_v0 = vld [vmem:[#allocation10 + $0x568] sm:$0xf0] }
 0x26b   :  { %6020 = vmatpush.bf16.msrb.mxu2 %v13434_v12  ;;  %6045 = vmatpush.bf16.msra.mxu0 %v11934_v18  ;;  %v13849_v51 = vld [vmem:[#allocation10 + $0xfc8] sm:$0xf]  ;;  %v12602_v21 = vor.u32 %v16436_v47, %v12601_v34  ;;  %v13086_v12 = vor.u32 %v16552_v59, %v13083_v3  ;;  %v16544_v23 = vld [vmem:[#allocation10 + $0x98c] sm:$0xf]  ;;  %v12510_v33 = vor.u32 %v16408_v10, %v12507_v0  ;;  %v5805_v45 = vpop.f32.mrf.mxu1 }
 0x26c   :  { %v16748_v35 = vld [vmem:[#allocation10 + $0xfe4] sm:$0xf0]  ;;  %v13051_v18 = vld [vmem:[#allocation10 + $0x9a8] sm:$0xf0] }
 0x26d   :  { %6057 = vmatpush.bf16.msra.mxu1 %v12222_v37  ;;  %v13850_v1 = vor.u32 %v16748_v35, %v13849_v51  ;;  %v13339_v37 = vld [vmem:[#allocation10 + $0xbe8] sm:$0xf0]  ;;  %v13817_v7 = vld [vmem:[#allocation10 + $0xf88] sm:$0xf]  ;;  %5983 = vmatpush.bf16.msra.mxu3 %v12602_v21  ;;  %v13054_v8 = vor.u32 %v16544_v23, %v13051_v18  ;;  %v3154_v21 = vperm.slane %v17710_v54, 1 }
 0x26e   :  { %v16740_v9 = vld [vmem:[#allocation10 + $0xfa4] sm:$0xf0]  ;;  %v13342_v26 = vor.u32 %v16616_v5, %v13339_v37  ;;  %v13307_v28 = vld [vmem:[#allocation10 + $0xba8] sm:$0xf0] }
 0x26f   :  { %6021 = vmatpush.bf16.msrb.mxu2 %v13402_v36  ;;  %6046 = vmatpush.bf16.msra.mxu0 %v11902_v61  ;;  %v13818_v17 = vor.u32 %v16740_v9, %v13817_v7  ;;  %v13785_v29 = vld [vmem:[#allocation10 + $0xf48] sm:$0xf]  ;;  %v16400_v36 = vld [vmem:[#allocation10 + $0x50c] sm:$0xf] }
 0x270   :  { %v16732_v31 = vld [vmem:[#allocation10 + $0xf64] sm:$0xf0]  ;;  %5984 = vmatmul.bf16.vlgmr.msra.gmra.mxu3 %v17660_v60  ;;  %v12475_v14 = vld [vmem:[#allocation10 + $0x528] sm:$0xf0] }
 0x271   :  { %6058 = vmatpush.bf16.msra.mxu1 %v12190_v20  ;;  %6028 = vmatpush.bf16.msrb.mxu3 %v13850_v1  ;;  %v16608_v20 = vld [vmem:[#allocation10 + $0xb8c] sm:$0xf]  ;;  %v13786_v39 = vor.u32 %v16732_v31, %v13785_v29  ;;  %v12478_v40 = vor.u32 %v16400_v36, %v12475_v14  ;;  %v13753_v41 = vld [vmem:[#allocation10 + $0xf08] sm:$0xf]  ;;  %v5842_v5 = vpop.f32.mrf.mxu0 }
 0x272   :  { %v13310_v4 = vor.u32 %v16608_v20, %v13307_v28  ;;  %v16536_v61 = vld [vmem:[#allocation10 + $0x94c] sm:$0xf]  ;;  %v16724_v42 = vld [vmem:[#allocation10 + $0xf24] sm:$0xf0] }
 0x273   :  { %6022 = vmatpush.bf16.msrb.mxu2 %v13370_v46  ;;  %6047 = vmatpush.bf16.msra.mxu0 %v11870_v53  ;;  %v16600_v16 = vld [vmem:[#allocation10 + $0xb4c] sm:$0xf]  ;;  %v13754_v34 = vor.u32 %v16724_v42, %v13753_v41  ;;  %v16716_v32 = vld [vmem:[#allocation10 + $0xee4] sm:$0xf0] }
 0x274   :  { %v13275_v58 = vld [vmem:[#allocation10 + $0xb68] sm:$0xf0]  ;;  %v13689_v7 = vld [vmem:[#allocation10 + $0xe88] sm:$0xf] }
 0x275   :  { %6059 = vmatpush.bf16.msra.mxu1 %v12158_v48  ;;  %6029 = vmatpush.bf16.msrb.mxu3 %v13818_v17  ;;  %v13019_v48 = vld [vmem:[#allocation10 + $0x968] sm:$0xf0]  ;;  %v13278_v46 = vor.u32 %v16600_v16, %v13275_v58  ;;  %v16708_v9 = vld [vmem:[#allocation10 + $0xea4] sm:$0xf0] }
 0x276   :  { %6023 = vmatmul.bf16.vlgmr.msrb.gmra.mxu2 %v17697_v25  ;;  %v16392_v22 = vld [vmem:[#allocation10 + $0x4cc] sm:$0xf]  ;;  %v13022_v44 = vor.u32 %v16536_v61, %v13019_v48  ;;  %v16700_v28 = vld [vmem:[#allocation10 + $0xe64] sm:$0xf0] }
 0x277   :  { %6067 = vmatpush.bf16.msra.mxu2 %v12574_v50  ;;  %6048 = vmatpush.bf16.msra.mxu0 %v11838_v38  ;;  %v12443_v43 = vld [vmem:[#allocation10 + $0x4e8] sm:$0xf0]  ;;  %v5855_v23 = vpop.f32.mrf.mxu1 }
 0x278   :  { %v16528_v47 = vld [vmem:[#allocation10 + $0x90c] sm:$0xf]  ;;  %v12446_v35 = vor.u32 %v16392_v22, %v12443_v43  ;;  %v13625_v22 = vld [vmem:[#allocation10 + $0xe08] sm:$0xf] }
 0x279   :  { %6060 = vmatpush.bf16.msra.mxu1 %v12126_v55  ;;  %6030 = vmatpush.bf16.msrb.mxu3 %v13786_v39  ;;  %v12987_v50 = vld [vmem:[#allocation10 + $0x928] sm:$0xf0]  ;;  %v13721_v55 = vld [vmem:[#allocation10 + $0xec8] sm:$0xf]  ;;  %v5844_v58 = vpop.f32.mrf.mxu0 }
 0x27a   :  { %6049 = vmatmul.bf16.vlgmr.msra.gmra.mxu0 %v17653_v49  ;;  %v16592_v51 = vld [vmem:[#allocation10 + $0xb0c] sm:$0xf]  ;;  %v12990_v19 = vor.u32 %v16528_v47, %v12987_v50  ;;  %v13722_v63 = vor.u32 %v16716_v32, %v13721_v55  ;;  %v16692_v43 = vld [vmem:[#allocation10 + $0xe24] sm:$0xf0] }
 0x27b   :  { %6068 = vmatpush.bf16.msra.mxu2 %v12542_v6  ;;  %6093 = vmatpush.bf16.msrb.mxu0 %v13086_v12  ;;  %v13243_v53 = vld [vmem:[#allocation10 + $0xb28] sm:$0xf0]  ;;  %v13690_v12 = vor.u32 %v16708_v9, %v13689_v7 }
 0x27c   :  { %v16384_v57 = vld [vmem:[#allocation10 + $0x48c] sm:$0xf]  ;;  %v13246_v62 = vor.u32 %v16592_v51, %v13243_v53  ;;  %v13626_v53 = vor.u32 %v16692_v43, %v13625_v22  ;;  %v11969_v22 = vld [vmem:[#allocation10 + $0x110] sm:$0xf] }
 0x27d   :  { %6061 = vmatpush.bf16.msra.mxu1 %v12094_v11  ;;  %v12411_v27 = vld [vmem:[#allocation10 + $0x4a8] sm:$0xf0]  ;;  %6031 = vmatpush.bf16.msrb.mxu3 %v13754_v34  ;;  %v5843_v11 = vadd.f32 %v5842_v5, %v3154_v21  ;;  %v16277_v43 = vld [vmem:[#allocation10 + $0x12c] sm:$0xf0] }
 0x27e   :  { %v16520_v1 = vld [vmem:[#allocation10 + $0x8cc] sm:$0xf]  ;;  %v12414_v6 = vor.u32 %v16384_v57, %v12411_v27 }
 0x27f   :  { %6069 = vmatpush.bf16.msra.mxu2 %v12510_v33  ;;  %6094 = vmatpush.bf16.msrb.mxu0 %v13054_v8  ;;  %v12955_v59 = vld [vmem:[#allocation10 + $0x8e8] sm:$0xf0]  ;;  %v13657_v33 = vld [vmem:[#allocation10 + $0xe48] sm:$0xf]  ;;  %v17731_v29 = vadd.f32 %v5855_v23, %v5843_v11  ;;  %v5857_v27 = vpop.f32.mrf.mxu1  ;;  %v12033_v11 = vld [vmem:[#allocation10 + $0x190] sm:$0xf] }
 0x280   :  { %6062 = vmatmul.bf16.vlgmr.msra.gmra.mxu1 %v17655_v56  ;;  %v16584_v3 = vld [vmem:[#allocation10 + $0xacc] sm:$0xf]  ;;  %v12958_v0 = vor.u32 %v16520_v1, %v12955_v59  ;;  %v13658_v61 = vor.u32 %v16700_v28, %v13657_v33  ;;  %v16365_v59 = vld [vmem:[#allocation10 + $0x3ec] sm:$0xf0] }
 0x281   :  { %6106 = vmatpush.bf16.msrb.mxu1 %v13342_v26  ;;  %v13211_v37 = vld [vmem:[#allocation10 + $0xae8] sm:$0xf0]  ;;  %6032 = vmatpush.bf16.msrb.mxu3 %v13722_v63  ;;  %v12321_v63 = vld [vmem:[#allocation10 + $0x3d0] sm:$0xf] }
 0x282   :  { %v16376_v38 = vld [vmem:[#allocation10 + $0x44c] sm:$0xf]  ;;  %v13214_v54 = vor.u32 %v16584_v3, %v13211_v37  ;;  %v11937_v27 = vld [vmem:[#allocation10 + $0xd0] sm:$0xf] }
 0x283   :  { %6070 = vmatpush.bf16.msra.mxu2 %v12478_v40  ;;  %6095 = vmatpush.bf16.msrb.mxu0 %v13022_v44  ;;  %v12379_v10 = vld [vmem:[#allocation10 + $0x468] sm:$0xf0] }
 0x284   :  { %v16512_v13 = vld [vmem:[#allocation10 + $0x88c] sm:$0xf]  ;;  %v12382_v18 = vor.u32 %v16376_v38, %v12379_v10  ;;  %v12322_v10 = vor.u32 %v16365_v59, %v12321_v63 }
 0x285   :  { %6107 = vmatpush.bf16.msrb.mxu1 %v13310_v4  ;;  %v12923_v26 = vld [vmem:[#allocation10 + $0x8a8] sm:$0xf0]  ;;  %6033 = vmatpush.bf16.msrb.mxu3 %v13690_v12  ;;  %v12289_v12 = vld [vmem:[#allocation10 + $0x390] sm:$0xf] }
 0x286   :  { %v16576_v17 = vld [vmem:[#allocation10 + $0xa8c] sm:$0xf]  ;;  %v12926_v14 = vor.u32 %v16512_v13, %v12923_v26  ;;  %v16357_v26 = vld [vmem:[#allocation10 + $0x3ac] sm:$0xf0] }
 0x287   :  { %6071 = vmatpush.bf16.msra.mxu2 %v12446_v35  ;;  %6096 = vmatpush.bf16.msrb.mxu0 %v12990_v19  ;;  %v13179_v20 = vld [vmem:[#allocation10 + $0xaa8] sm:$0xf0]  ;;  %v12065_v19 = vld [vmem:[#allocation10 + $0x1d0] sm:$0xf]  ;;  %v12290_v28 = vor.u32 %v16357_v26, %v12289_v12 }
 0x288   :  { %v16368_v31 = vld [vmem:[#allocation10 + $0x40c] sm:$0xf]  ;;  %v13182_v39 = vor.u32 %v16576_v17, %v13179_v20 }
 0x289   :  { %6108 = vmatpush.bf16.msrb.mxu1 %v13278_v46  ;;  %v12347_v36 = vld [vmem:[#allocation10 + $0x428] sm:$0xf0]  ;;  %6034 = vmatpush.bf16.msrb.mxu3 %v13658_v61 }
 0x28a   :  { %v16680_v8 = vld [vmem:[#allocation10 + $0xdcc] sm:$0xf]  ;;  %v12350_v41 = vor.u32 %v16368_v31, %v12347_v36  ;;  %v12001_v36 = vld [vmem:[#allocation10 + $0x150] sm:$0xf] }
 0x28b   :  { %6072 = vmatpush.bf16.msra.mxu2 %v12414_v6  ;;  %6097 = vmatpush.bf16.msrb.mxu0 %v12958_v0  ;;  %v13595_v4 = vld [vmem:[#allocation10 + $0xde8] sm:$0xf0] }
 0x28c   :  { %v16504_v48 = vld [vmem:[#allocation10 + $0x84c] sm:$0xf]  ;;  %v13598_v44 = vor.u32 %v16680_v8, %v13595_v4  ;;  %v12257_v8 = vld [vmem:[#allocation10 + $0x350] sm:$0xf] }
 0x28d   :  { %6109 = vmatpush.bf16.msrb.mxu1 %v13246_v62  ;;  %v12891_v16 = vld [vmem:[#allocation10 + $0x868] sm:$0xf0]  ;;  %v16301_v62 = vld [vmem:[#allocation10 + $0x1ec] sm:$0xf0]  ;;  %6035 = vmatpush.bf16.msrb.mxu3 %v13626_v53 }
 0x28e   :  { %v16568_v40 = vld [vmem:[#allocation10 + $0xa4c] sm:$0xf]  ;;  %v12894_v34 = vor.u32 %v16504_v48, %v12891_v16  ;;  %v12066_v38 = vor.u32 %v16301_v62, %v12065_v19  ;;  %v12193_v19 = vld [vmem:[#allocation10 + $0x2d0] sm:$0xf] }
 0x28f   :  { %6073 = vmatpush.bf16.msra.mxu2 %v12382_v18  ;;  %v13147_v42 = vld [vmem:[#allocation10 + $0xa68] sm:$0xf0]  ;;  %6098 = vmatpush.bf16.msrb.mxu0 %v12926_v14  ;;  %v16285_v14 = vld [vmem:[#allocation10 + $0x16c] sm:$0xf0] }
 0x290   :  { %v16488_v45 = vld [vmem:[#allocation10 + $0x7cc] sm:$0xf]  ;;  %v13150_v35 = vor.u32 %v16568_v40, %v13147_v42  ;;  %6036 = vmatmul.bf16.vlgmr.msrb.gmra.mxu3 %v17704_v15  ;;  %v12002_v58 = vor.u32 %v16285_v14, %v12001_v36  ;;  %v11873_v36 = vld [vmem:[#allocation10 + $0x50] sm:$0xf] }
 0x291   :  { %6110 = vmatpush.bf16.msrb.mxu1 %v13214_v54  ;;  %v12827_v46 = vld [vmem:[#allocation10 + $0x7e8] sm:$0xf0]  ;;  %v16293_v54 = vld [vmem:[#allocation10 + $0x1ac] sm:$0xf0] }
 0x292   :  { %v16496_v47 = vld [vmem:[#allocation10 + $0x80c] sm:$0xf]  ;;  %v12830_v21 = vor.u32 %v16488_v45, %v12827_v46  ;;  %v12034_v33 = vor.u32 %v16293_v54, %v12033_v11  ;;  %v16341_v46 = vld [vmem:[#allocation10 + $0x32c] sm:$0xf0] }
 0x293   :  { %v16672_v50 = vld [vmem:[#allocation10 + $0xd8c] sm:$0xf]  ;;  %6074 = vmatpush.bf16.msra.mxu2 %v12350_v41  ;;  %6099 = vmatpush.bf16.msrb.mxu0 %v12894_v34  ;;  %v16325_v54 = vld [vmem:[#allocation10 + $0x2ac] sm:$0xf0] }
 0x294   :  { %v13563_v51 = vld [vmem:[#allocation10 + $0xda8] sm:$0xf0]  ;;  %6080 = vmatpush.bf16.msra.mxu3 %v12830_v21  ;;  %v16269_v21 = vld [vmem:[#allocation10 + $0xec] sm:$0xf0] }
 0x295   :  { %6111 = vmatpush.bf16.msrb.mxu1 %v13182_v39  ;;  %v12859_v55 = vld [vmem:[#allocation10 + $0x828] sm:$0xf0]  ;;  %v13566_v1 = vor.u32 %v16672_v50, %v13563_v51  ;;  %v16349_v39 = vld [vmem:[#allocation10 + $0x36c] sm:$0xf0]  ;;  %v5816_v50 = vpop.f32.mrf.mxu2 }
 0x296   :  { %v16560_v32 = vld [vmem:[#allocation10 + $0xa0c] sm:$0xf]  ;;  %v12862_v6 = vor.u32 %v16496_v47, %v12859_v55  ;;  %6075 = vmatmul.bf16.vlgmr.msra.gmra.mxu2 %v17657_v2  ;;  %v12258_v41 = vor.u32 %v16349_v39, %v12257_v8  ;;  %v17738_v53 = vadd.f32 %v5816_v50, %v17725_v24  ;;  %v11970_v55 = vor.u32 %v16277_v43, %v11969_v22  ;;  %v16253_v14 = vld [vmem:[#allocation10 + $0x6c] sm:$0xf0] }
 0x297   :  { %v13115_v57 = vld [vmem:[#allocation10 + $0xa28] sm:$0xf0]  ;;  %6119 = vmatpush.bf16.msrb.mxu2 %v13598_v44  ;;  %v12225_v44 = vld [vmem:[#allocation10 + $0x310] sm:$0xf]  ;;  %v17740_v62 = vpop.f32.mrf.mxu0  ;;  %v11874_v22 = vor.u32 %v16253_v14, %v11873_v36 }
 0x298   :  { %v16480_v3 = vld [vmem:[#allocation10 + $0x78c] sm:$0xf]  ;;  %v13118_v9 = vor.u32 %v16560_v32, %v13115_v57  ;;  %6100 = vmatpush.bf16.msrb.mxu0 %v12862_v6  ;;  %v12226_v32 = vor.u32 %v16341_v46, %v12225_v44  ;;  %v12129_v8 = vld [vmem:[#allocation10 + $0x250] sm:$0xf] }
 0x299   :  { %v12795_v5 = vld [vmem:[#allocation10 + $0x7a8] sm:$0xf0]  ;;  %6112 = vmatpush.bf16.msrb.mxu1 %v13150_v35  ;;  %v11841_v43 = vld [vmem:[#allocation10 + $0x10] sm:$0xf] }
 0x29a   :  { %v16664_v37 = vld [vmem:[#allocation10 + $0xd4c] sm:$0xf]  ;;  %v12798_v0 = vor.u32 %v16480_v3, %v12795_v5  ;;  %v12545_v44 = vld [vmem:[#allocation10 + $0x590] sm:$0xf] }
 0x29b   :  { %v13531_v7 = vld [vmem:[#allocation10 + $0xd68] sm:$0xf0]  ;;  %6120 = vmatpush.bf16.msrb.mxu2 %v13566_v1  ;;  %6101 = vmatmul.bf16.vlgmr.msrb.gmra.mxu0 %v17678_v30  ;;  %v16333_v1 = vld [vmem:[#allocation10 + $0x2ec] sm:$0xf0] }
 0x29c   :  { %v13534_v13 = vor.u32 %v16664_v37, %v13531_v7  ;;  %v16472_v17 = vld [vmem:[#allocation10 + $0x74c] sm:$0xf]  ;;  %6145 = vmatpush.bf16.msra.mxu0 %v12066_v38  ;;  %6081 = vmatpush.bf16.msra.mxu3 %v12798_v0  ;;  %v11938_v37 = vor.u32 %v16269_v21, %v11937_v27  ;;  %v12194_v7 = vor.u32 %v16333_v1, %v12193_v19  ;;  %v11905_v38 = vld [vmem:[#allocation10 + $0x90] sm:$0xf] }
 0x29d   :  { %v12763_v23 = vld [vmem:[#allocation10 + $0x768] sm:$0xf0]  ;;  %6113 = vmatpush.bf16.msrb.mxu1 %v13118_v9  ;;  %v17742_v5 = vpop.f32.mrf.mxu1  ;;  %v12161_v0 = vld [vmem:[#allocation10 + $0x290] sm:$0xf]  ;;  %v5818_v26 = vpop.f32.mrf.mxu2 }
 0x29e   :  { %v16656_v18 = vld [vmem:[#allocation10 + $0xd0c] sm:$0xf]  ;;  %v12766_v31 = vor.u32 %v16472_v17, %v12763_v23  ;;  %v12097_v50 = vld [vmem:[#allocation10 + $0x210] sm:$0xf] }
 0x29f   :  { %v13499_v20 = vld [vmem:[#allocation10 + $0xd28] sm:$0xf0]  ;;  %6121 = vmatpush.bf16.msrb.mxu2 %v13534_v13  ;;  %v16621_v19 = vld [vmem:[#allocation10 + $0xbec] sm:$0xf0] }
 0x2a0   :  { %v13502_v4 = vor.u32 %v16656_v18, %v13499_v20  ;;  %v16464_v61 = vld [vmem:[#allocation10 + $0x70c] sm:$0xf]  ;;  %6114 = vmatmul.bf16.vlgmr.msrb.gmra.mxu1 %v17683_v52  ;;  %6146 = vmatpush.bf16.msra.mxu0 %v12034_v33  ;;  %v12577_v20 = vld [vmem:[#allocation10 + $0x5d0] sm:$0xf] }
 0x2a1   :  { %6158 = vmatpush.bf16.msra.mxu1 %v12322_v10  ;;  %v12731_v48 = vld [vmem:[#allocation10 + $0x728] sm:$0xf0]  ;;  %6082 = vmatpush.bf16.msra.mxu3 %v12766_v31  ;;  %v16261_v10 = vld [vmem:[#allocation10 + $0xac] sm:$0xf0] }
 0x2a2   :  { %v16648_v16 = vld [vmem:[#allocation10 + $0xccc] sm:$0xf]  ;;  %v12734_v42 = vor.u32 %v16464_v61, %v12731_v48  ;;  %v11906_v18 = vor.u32 %v16261_v10, %v11905_v38  ;;  %v16429_v33 = vld [vmem:[#allocation10 + $0x5ec] sm:$0xf0] }
 0x2a3   :  { %v13467_v40 = vld [vmem:[#allocation10 + $0xce8] sm:$0xf0]  ;;  %6122 = vmatpush.bf16.msrb.mxu2 %v13502_v4  ;;  %v5896_v4 = vpop.f32.mrf.mxu0  ;;  %v16317_v61 = vld [vmem:[#allocation10 + $0x26c] sm:$0xf0] }
 0x2a4   :  { %v13470_v45 = vor.u32 %v16648_v16, %v13467_v40  ;;  %v16456_v34 = vld [vmem:[#allocation10 + $0x6cc] sm:$0xf]  ;;  %6147 = vmatpush.bf16.msra.mxu0 %v12002_v58  ;;  %v12578_v58 = vor.u32 %v16429_v33, %v12577_v20  ;;  %v12130_v46 = vor.u32 %v16317_v61, %v12129_v8  ;;  %v13057_v10 = vld [vmem:[#allocation10 + $0x990] sm:$0xf] }
 0x2a5   :  { %6159 = vmatpush.bf16.msra.mxu1 %v12290_v28  ;;  %v12699_v47 = vld [vmem:[#allocation10 + $0x6e8] sm:$0xf0]  ;;  %6083 = vmatpush.bf16.msra.mxu3 %v12734_v42  ;;  %v12162_v28 = vor.u32 %v16325_v54, %v12161_v0  ;;  %v5909_v40 = vpop.f32.mrf.mxu1  ;;  %v5868_v27 = vpop.f32.mrf.mxu2  ;;  %v16549_v0 = vld [vmem:[#allocation10 + $0x9ac] sm:$0xf0] }
 0x2a6   :  { %v16640_v51 = vld [vmem:[#allocation10 + $0xc8c] sm:$0xf]  ;;  %v12702_v57 = vor.u32 %v16456_v34, %v12699_v47  ;;  %v16245_v47 = vld [vmem:[#allocation10 + $0x2c] sm:$0xf0] }
 0x2a7   :  { %v13435_v35 = vld [vmem:[#allocation10 + $0xca8] sm:$0xf0]  ;;  %6123 = vmatpush.bf16.msrb.mxu2 %v13470_v45  ;;  %v16421_v45 = vld [vmem:[#allocation10 + $0x5ac] sm:$0xf0] }
 0x2a8   :  { %v13438_v63 = vor.u32 %v16640_v51, %v13435_v35  ;;  %v16448_v59 = vld [vmem:[#allocation10 + $0x68c] sm:$0xf]  ;;  %6148 = vmatpush.bf16.msra.mxu0 %v11970_v55  ;;  %v16309_v51 = vld [vmem:[#allocation10 + $0x22c] sm:$0xf0]  ;;  %v12546_v21 = vor.u32 %v16421_v45, %v12545_v44 }
 0x2a9   :  { %6160 = vmatpush.bf16.msra.mxu1 %v12258_v41  ;;  %v12667_v3 = vld [vmem:[#allocation10 + $0x6a8] sm:$0xf0]  ;;  %6084 = vmatpush.bf16.msra.mxu3 %v12702_v57  ;;  %v13089_v55 = vld [vmem:[#allocation10 + $0x9d0] sm:$0xf] }
 0x2aa   :  { %v16632_v6 = vld [vmem:[#allocation10 + $0xc4c] sm:$0xf]  ;;  %v12670_v9 = vor.u32 %v16448_v59, %v12667_v3  ;;  %v13345_v57 = vld [vmem:[#allocation10 + $0xbd0] sm:$0xf]  ;;  %v17745_v59 = vadd.f32 %v5868_v27, %v17731_v29  ;;  %v11842_v3 = vor.u32 %v16245_v47, %v11841_v43 }
 0x2ab   :  { %v13403_v24 = vld [vmem:[#allocation10 + $0xc68] sm:$0xf0]  ;;  %6124 = vmatpush.bf16.msrb.mxu2 %v13438_v63  ;;  %v12481_v26 = vld [vmem:[#allocation10 + $0x510] sm:$0xf] }
 0x2ac   :  { %v13406_v11 = vor.u32 %v16632_v6, %v13403_v24  ;;  %v16440_v12 = vld [vmem:[#allocation10 + $0x64c] sm:$0xf]  ;;  %6149 = vmatpush.bf16.msra.mxu0 %v11938_v37  ;;  %v12513_v6 = vld [vmem:[#allocation10 + $0x550] sm:$0xf]  ;;  %v12098_v37 = vor.u32 %v16309_v51, %v12097_v50 }
 0x2ad   :  { %6161 = vmatpush.bf16.msra.mxu1 %v12226_v32  ;;  %v12635_v13 = vld [vmem:[#allocation10 + $0x668] sm:$0xf0]  ;;  %6085 = vmatpush.bf16.msra.mxu3 %v12670_v9  ;;  %v16557_v32 = vld [vmem:[#allocation10 + $0x9ec] sm:$0xf0]  ;;  %v13346_v9 = vor.u32 %v16621_v19, %v13345_v57  ;;  %v5870_v36 = vpop.f32.mrf.mxu2 }
 0x2ae   :  { %v16624_v17 = vld [vmem:[#allocation10 + $0xc0c] sm:$0xf]  ;;  %v12638_v31 = vor.u32 %v16440_v12, %v12635_v13  ;;  %v16413_v24 = vld [vmem:[#allocation10 + $0x56c] sm:$0xf0] }
 0x2af   :  { %v13371_v23 = vld [vmem:[#allocation10 + $0xc28] sm:$0xf0]  ;;  %6125 = vmatpush.bf16.msrb.mxu2 %v13406_v11  ;;  %v13313_v11 = vld [vmem:[#allocation10 + $0xb90] sm:$0xf]  ;;  %v12514_v54 = vor.u32 %v16413_v24, %v12513_v6 }
 0x2b0   :  { %v13374_v39 = vor.u32 %v16624_v17, %v13371_v23  ;;  %v16432_v48 = vld [vmem:[#allocation10 + $0x60c] sm:$0xf]  ;;  %6150 = vmatpush.bf16.msra.mxu0 %v11906_v18  ;;  %v16613_v12 = vld [vmem:[#allocation10 + $0xbac] sm:$0xf0]  ;;  %v13058_v23 = vor.u32 %v16549_v0, %v13057_v10 }
 0x2b1   :  { %6162 = vmatpush.bf16.msra.mxu1 %v12194_v7  ;;  %v12603_v16 = vld [vmem:[#allocation10 + $0x628] sm:$0xf0]  ;;  %6086 = vmatpush.bf16.msra.mxu3 %v12638_v31  ;;  %v13090_v7 = vor.u32 %v16557_v32, %v13089_v55  ;;  %v16405_v17 = vld [vmem:[#allocation10 + $0x52c] sm:$0xf0]  ;;  %v13314_v18 = vor.u32 %v16613_v12, %v13313_v11 }
 0x2b2   :  { %v16744_v41 = vld [vmem:[#allocation10 + $0xfcc] sm:$0xf]  ;;  %v12606_v34 = vor.u32 %v16432_v48, %v12603_v16  ;;  %v13025_v33 = vld [vmem:[#allocation10 + $0x950] sm:$0xf]  ;;  %v12482_v14 = vor.u32 %v16405_v17, %v12481_v26 }
 0x2b3   :  { %v13851_v42 = vld [vmem:[#allocation10 + $0xfe8] sm:$0xf0]  ;;  %6126 = vmatpush.bf16.msrb.mxu2 %v13374_v39  ;;  %v13281_v31 = vld [vmem:[#allocation10 + $0xb50] sm:$0xf] }
 0x2b4   :  { %v13854_v35 = vor.u32 %v16744_v41, %v13851_v42  ;;  %v16736_v63 = vld [vmem:[#allocation10 + $0xf8c] sm:$0xf]  ;;  %6151 = vmatpush.bf16.msra.mxu0 %v11874_v22  ;;  %v16605_v8 = vld [vmem:[#allocation10 + $0xb6c] sm:$0xf0] }
 0x2b5   :  { %6163 = vmatpush.bf16.msra.mxu1 %v12162_v28  ;;  %v13819_v1 = vld [vmem:[#allocation10 + $0xfa8] sm:$0xf0]  ;;  %6087 = vmatpush.bf16.msra.mxu3 %v12606_v34  ;;  %v16541_v28 = vld [vmem:[#allocation10 + $0x96c] sm:$0xf0]  ;;  %v13282_v40 = vor.u32 %v16605_v8, %v13281_v31  ;;  %v17751_v34 = vld [vmem:[#allocation12] sm:$0xff] }
 0x2b6   :  { %6127 = vmatmul.bf16.vlgmr.msrb.gmra.mxu2 %v17697_v25  ;;  %v13822_v38 = vor.u32 %v16736_v63, %v13819_v1  ;;  %v16728_v29 = vld [vmem:[#allocation10 + $0xf4c] sm:$0xf]  ;;  %v12449_v61 = vld [vmem:[#allocation10 + $0x4d0] sm:$0xf]  ;;  %v13026_v16 = vor.u32 %v16541_v28, %v13025_v33  ;;  %v3155_v47 = vperm.slane %v17751_v34, 2 }
 0x2b7   :  { %6171 = vmatpush.bf16.msra.mxu2 %v12578_v58  ;;  %v13787_v13 = vld [vmem:[#allocation10 + $0xf68] sm:$0xf0]  ;;  %v16397_v48 = vld [vmem:[#allocation10 + $0x4ec] sm:$0xf0]  ;;  %v5946_v19 = vpop.f32.mrf.mxu0 }
 0x2b8   :  { %6088 = vmatmul.bf16.vlgmr.msra.gmra.mxu3 %v17660_v60  ;;  %6152 = vmatpush.bf16.msra.mxu0 %v11842_v3  ;;  %v13790_v20 = vor.u32 %v16728_v29, %v13787_v13  ;;  %v16720_v4 = vld [vmem:[#allocation10 + $0xf0c] sm:$0xf]  ;;  %v12993_v41 = vld [vmem:[#allocation10 + $0x910] sm:$0xf]  ;;  %v12450_v43 = vor.u32 %v16397_v48, %v12449_v61 }
 0x2b9   :  { %6164 = vmatpush.bf16.msra.mxu1 %v12130_v46  ;;  %6132 = vmatpush.bf16.msrb.mxu3 %v13854_v35  ;;  %v13755_v39 = vld [vmem:[#allocation10 + $0xf28] sm:$0xf0]  ;;  %v16533_v42 = vld [vmem:[#allocation10 + $0x92c] sm:$0xf0]  ;;  %v17754_v63 = vpop.f32.mrf.mxu2 }
 0x2ba   :  { %v13758_v58 = vor.u32 %v16720_v4, %v13755_v39  ;;  %v13249_v22 = vld [vmem:[#allocation10 + $0xb10] sm:$0xf]  ;;  %v16712_v45 = vld [vmem:[#allocation10 + $0xecc] sm:$0xf]  ;;  %v12994_v35 = vor.u32 %v16533_v42, %v12993_v41 }
 0x2bb   :  { %6172 = vmatpush.bf16.msra.mxu2 %v12546_v21  ;;  %6153 = vmatmul.bf16.vlgmr.msra.gmra.mxu0 %v17653_v49  ;;  %v16597_v44 = vld [vmem:[#allocation10 + $0xb2c] sm:$0xf0]  ;;  %v13723_v46 = vld [vmem:[#allocation10 + $0xee8] sm:$0xf0] }
 0x2bc   :  { %6197 = vmatpush.bf16.msrb.mxu0 %v13090_v7  ;;  %v12417_v50 = vld [vmem:[#allocation10 + $0x490] sm:$0xf]  ;;  %v13250_v55 = vor.u32 %v16597_v44, %v13249_v22  ;;  %v13726_v32 = vor.u32 %v16712_v45, %v13723_v46  ;;  %v16704_v6 = vld [vmem:[#allocation10 + $0xe8c] sm:$0xf] }
 0x2bd   :  { %6165 = vmatpush.bf16.msra.mxu1 %v12098_v37  ;;  %6133 = vmatpush.bf16.msrb.mxu3 %v13822_v38  ;;  %v16389_v51 = vld [vmem:[#allocation10 + $0x4ac] sm:$0xf0]  ;;  %v13691_v24 = vld [vmem:[#allocation10 + $0xea8] sm:$0xf0]  ;;  %v5947_v37 = vadd.f32 %v5946_v19, %v3155_v47  ;;  %v5959_v7 = vpop.f32.mrf.mxu1 }
 0x2be   :  { %v12961_v57 = vld [vmem:[#allocation10 + $0x8d0] sm:$0xf]  ;;  %v12418_v1 = vor.u32 %v16389_v51, %v12417_v50  ;;  %v13694_v29 = vor.u32 %v16704_v6, %v13691_v24  ;;  %v13659_v33 = vld [vmem:[#allocation10 + $0xe68] sm:$0xf0]  ;;  %v12067_v6 = vld [vmem:[#allocation10 + $0x1f0] sm:$0xf0] }
 0x2bf   :  { %6173 = vmatpush.bf16.msra.mxu2 %v12514_v54  ;;  %v16525_v27 = vld [vmem:[#allocation10 + $0x8ec] sm:$0xf0]  ;;  %v17759_v54 = vadd.f32 %v5959_v7, %v5947_v37  ;;  %v16688_v42 = vld [vmem:[#allocation10 + $0xe0c] sm:$0xf]  ;;  %v16361_v24 = vld [vmem:[#allocation10 + $0x3d4] sm:$0xf] }
 0x2c0   :  { %6166 = vmatmul.bf16.vlgmr.msra.gmra.mxu1 %v17655_v56  ;;  %6198 = vmatpush.bf16.msrb.mxu0 %v13058_v23  ;;  %v13217_v21 = vld [vmem:[#allocation10 + $0xad0] sm:$0xf]  ;;  %v12962_v11 = vor.u32 %v16525_v27, %v12961_v57  ;;  %v13627_v22 = vld [vmem:[#allocation10 + $0xe28] sm:$0xf0]  ;;  %v12323_v7 = vld [vmem:[#allocation10 + $0x3f0] sm:$0xf0] }
 0x2c1   :  { %6210 = vmatpush.bf16.msrb.mxu1 %v13346_v9  ;;  %6134 = vmatpush.bf16.msrb.mxu3 %v13790_v20  ;;  %v16589_v3 = vld [vmem:[#allocation10 + $0xaec] sm:$0xf0]  ;;  %v5829_v9 = vpop.f32.mrf.mxu3  ;;  %v16696_v20 = vld [vmem:[#allocation10 + $0xe4c] sm:$0xf]  ;;  %v13630_v57 = vor.u32 %v16688_v42, %v13627_v22  ;;  %v12259_v42 = vld [vmem:[#allocation10 + $0x370] sm:$0xf0] }
 0x2c2   :  { %v12385_v38 = vld [vmem:[#allocation10 + $0x450] sm:$0xf]  ;;  %v17757_v0 = vadd.f32 %v5829_v9, %v17738_v53  ;;  %v13218_v12 = vor.u32 %v16589_v3, %v13217_v21  ;;  %v13662_v4 = vor.u32 %v16696_v20, %v13659_v33  ;;  %v16297_v3 = vld [vmem:[#allocation10 + $0x1d4] sm:$0xf] }
 0x2c3   :  { %6174 = vmatpush.bf16.msra.mxu2 %v12482_v14  ;;  %v16381_v10 = vld [vmem:[#allocation10 + $0x46c] sm:$0xf0]  ;;  %v16353_v20 = vld [vmem:[#allocation10 + $0x394] sm:$0xf] }
 0x2c4   :  { %6199 = vmatpush.bf16.msrb.mxu0 %v13026_v16  ;;  %v12929_v13 = vld [vmem:[#allocation10 + $0x890] sm:$0xf]  ;;  %v12386_v23 = vor.u32 %v16381_v10, %v12385_v38  ;;  %v5948_v16 = vpop.f32.mrf.mxu0 }
 0x2c5   :  { %6211 = vmatpush.bf16.msrb.mxu1 %v13314_v18  ;;  %6135 = vmatpush.bf16.msrb.mxu3 %v13758_v58  ;;  %v16517_v26 = vld [vmem:[#allocation10 + $0x8ac] sm:$0xf0] }
 0x2c6   :  { %v13185_v17 = vld [vmem:[#allocation10 + $0xa90] sm:$0xf]  ;;  %v12930_v53 = vor.u32 %v16517_v26, %v12929_v13  ;;  %v12070_v13 = vor.u32 %v16297_v3, %v12067_v6  ;;  %v12326_v26 = vor.u32 %v16361_v24, %v12323_v7  ;;  %v16265_v7 = vld [vmem:[#allocation10 + $0xd4] sm:$0xf] }
 0x2c7   :  { %6175 = vmatpush.bf16.msra.mxu2 %v12450_v43  ;;  %v16581_v18 = vld [vmem:[#allocation10 + $0xaac] sm:$0xf0]  ;;  %v5961_v43 = vpop.f32.mrf.mxu1 }
 0x2c8   :  { %6200 = vmatpush.bf16.msrb.mxu0 %v12994_v35  ;;  %v12353_v28 = vld [vmem:[#allocation10 + $0x410] sm:$0xf]  ;;  %v13186_v8 = vor.u32 %v16581_v18, %v13185_v17  ;;  %v12035_v18 = vld [vmem:[#allocation10 + $0x1b0] sm:$0xf0] }
 0x2c9   :  { %6212 = vmatpush.bf16.msrb.mxu1 %v13282_v40  ;;  %6136 = vmatpush.bf16.msrb.mxu3 %v13726_v32  ;;  %v16373_v31 = vld [vmem:[#allocation10 + $0x42c] sm:$0xf0]  ;;  %v5922_v40 = vpop.f32.mrf.mxu2  ;;  %v5831_v44 = vpop.f32.mrf.mxu3 }
 0x2ca   :  { %v13601_v36 = vld [vmem:[#allocation10 + $0xdd0] sm:$0xf]  ;;  %v12354_v58 = vor.u32 %v16373_v31, %v12353_v28  ;;  %v12291_v31 = vld [vmem:[#allocation10 + $0x3b0] sm:$0xf0] }
 0x2cb   :  { %6176 = vmatpush.bf16.msra.mxu2 %v12418_v1  ;;  %v16685_v14 = vld [vmem:[#allocation10 + $0xdec] sm:$0xf0]  ;;  %v16281_v40 = vld [vmem:[#allocation10 + $0x154] sm:$0xf] }
 0x2cc   :  { %6201 = vmatpush.bf16.msrb.mxu0 %v12962_v11  ;;  %v12897_v39 = vld [vmem:[#allocation10 + $0x850] sm:$0xf]  ;;  %v13602_v45 = vor.u32 %v16685_v14, %v13601_v36 }
 0x2cd   :  { %6213 = vmatpush.bf16.msrb.mxu1 %v13250_v55  ;;  %6137 = vmatpush.bf16.msrb.mxu3 %v13694_v29  ;;  %v16509_v61 = vld [vmem:[#allocation10 + $0x86c] sm:$0xf0] }
 0x2ce   :  { %v13153_v48 = vld [vmem:[#allocation10 + $0xa50] sm:$0xf]  ;;  %v12898_v50 = vor.u32 %v16509_v61, %v12897_v39 }
 0x2cf   :  { %6177 = vmatpush.bf16.msra.mxu2 %v12386_v23  ;;  %v16573_v41 = vld [vmem:[#allocation10 + $0xa6c] sm:$0xf0]  ;;  %v16289_v23 = vld [vmem:[#allocation10 + $0x194] sm:$0xf] }
 0x2d0   :  { %v12833_v46 = vld [vmem:[#allocation10 + $0x7d0] sm:$0xf]  ;;  %6202 = vmatpush.bf16.msrb.mxu0 %v12930_v53  ;;  %v13154_v32 = vor.u32 %v16573_v41, %v13153_v48  ;;  %v12038_v39 = vor.u32 %v16289_v23, %v12035_v18  ;;  %v12294_v48 = vor.u32 %v16353_v20, %v12291_v31  ;;  %v16345_v41 = vld [vmem:[#allocation10 + $0x354] sm:$0xf] }
 0x2d1   :  { %6214 = vmatpush.bf16.msrb.mxu1 %v13218_v12  ;;  %v16493_v47 = vld [vmem:[#allocation10 + $0x7ec] sm:$0xf0]  ;;  %6138 = vmatpush.bf16.msrb.mxu3 %v13662_v4  ;;  %v5881_v33 = vpop.f32.mrf.mxu3  ;;  %v16257_v31 = vld [vmem:[#allocation10 + $0x94] sm:$0xf] }
 0x2d2   :  { %v12865_v51 = vld [vmem:[#allocation10 + $0x810] sm:$0xf]  ;;  %v12834_v1 = vor.u32 %v16493_v47, %v12833_v46  ;;  %v5882_v14 = vadd.f32 %v5881_v33, %v17745_v59  ;;  %v12262_v47 = vor.u32 %v16345_v41, %v12259_v42  ;;  %v12579_v41 = vld [vmem:[#allocation10 + $0x5f0] sm:$0xf0] }
 0x2d3   :  { %v13569_v35 = vld [vmem:[#allocation10 + $0xd90] sm:$0xf]  ;;  %6178 = vmatpush.bf16.msra.mxu2 %v12354_v58  ;;  %v12003_v58 = vld [vmem:[#allocation10 + $0x170] sm:$0xf0] }
 0x2d4   :  { %v16677_v55 = vld [vmem:[#allocation10 + $0xdac] sm:$0xf0]  ;;  %6203 = vmatpush.bf16.msrb.mxu0 %v12898_v50  ;;  %v5895_v61 = vadd.f32 %v17740_v62, %v5882_v14  ;;  %v12006_v46 = vor.u32 %v16281_v40, %v12003_v58  ;;  %v16425_v58 = vld [vmem:[#allocation10 + $0x5d4] sm:$0xf] }
 0x2d5   :  { %6215 = vmatpush.bf16.msrb.mxu1 %v13186_v8  ;;  %v16501_v27 = vld [vmem:[#allocation10 + $0x82c] sm:$0xf0]  ;;  %v13570_v37 = vor.u32 %v16677_v55, %v13569_v35  ;;  %6139 = vmatpush.bf16.msrb.mxu3 %v13630_v57  ;;  %v11971_v35 = vld [vmem:[#allocation10 + $0x130] sm:$0xf0] }
 0x2d6   :  { %v13121_v21 = vld [vmem:[#allocation10 + $0xa10] sm:$0xf]  ;;  %v12866_v10 = vor.u32 %v16501_v27, %v12865_v51  ;;  %6179 = vmatmul.bf16.vlgmr.msra.gmra.mxu2 %v17657_v2  ;;  %v5908_v62 = vadd.f32 %v17742_v5, %v5895_v61  ;;  %v16273_v51 = vld [vmem:[#allocation10 + $0x114] sm:$0xf] }
 0x2d7   :  { %v16565_v19 = vld [vmem:[#allocation10 + $0xa2c] sm:$0xf0]  ;;  %6223 = vmatpush.bf16.msrb.mxu2 %v13602_v45  ;;  %v16337_v55 = vld [vmem:[#allocation10 + $0x314] sm:$0xf]  ;;  %v11974_v5 = vor.u32 %v16273_v51, %v11971_v35 }
 0x2d8   :  { %v12801_v9 = vld [vmem:[#allocation10 + $0x790] sm:$0xf]  ;;  %v13122_v29 = vor.u32 %v16565_v19, %v13121_v21  ;;  %6140 = vmatmul.bf16.vlgmr.msrb.gmra.mxu3 %v17704_v15  ;;  %6204 = vmatpush.bf16.msrb.mxu0 %v12866_v10  ;;  %v12227_v21 = vld [vmem:[#allocation10 + $0x330] sm:$0xf0]  ;;  %v17769_v10 = vpop.f32.mrf.mxu0 }
 0x2d9   :  { %v16485_v38 = vld [vmem:[#allocation10 + $0x7ac] sm:$0xf0]  ;;  %6216 = vmatpush.bf16.msrb.mxu1 %v13154_v32  ;;  %6184 = vmatpush.bf16.msra.mxu3 %v12834_v1  ;;  %v5921_v32 = vadd.f32 %v17754_v63, %v5908_v62  ;;  %v5883_v57 = vpop.f32.mrf.mxu3  ;;  %v12230_v24 = vor.u32 %v16337_v55, %v12227_v21  ;;  %v12582_v55 = vor.u32 %v16425_v58, %v12579_v41  ;;  %v16241_v21 = vld [vmem:[#allocation10 + $0x14] sm:$0xf] }
 0x2da   :  { %v13537_v11 = vld [vmem:[#allocation10 + $0xd50] sm:$0xf]  ;;  %v12802_v17 = vor.u32 %v16485_v38, %v12801_v9  ;;  %v11939_v9 = vld [vmem:[#allocation10 + $0xf0] sm:$0xf0] }
 0x2db   :  { %v16669_v12 = vld [vmem:[#allocation10 + $0xd6c] sm:$0xf0]  ;;  %6224 = vmatpush.bf16.msrb.mxu2 %v13570_v37  ;;  %6205 = vmatmul.bf16.vlgmr.msrb.gmra.mxu0 %v17678_v30  ;;  %v16329_v38 = vld [vmem:[#allocation10 + $0x2d4] sm:$0xf]  ;;  %v11942_v20 = vor.u32 %v16265_v7, %v11939_v9 }
 0x2dc   :  { %v13538_v28 = vor.u32 %v16669_v12, %v13537_v11  ;;  %v12769_v53 = vld [vmem:[#allocation10 + $0x750] sm:$0xf]  ;;  %6249 = vmatpush.bf16.msra.mxu0 %v12070_v13  ;;  %v12195_v11 = vld [vmem:[#allocation10 + $0x2f0] sm:$0xf0] }
 0x2dd   :  { %v16477_v36 = vld [vmem:[#allocation10 + $0x76c] sm:$0xf0]  ;;  %6217 = vmatpush.bf16.msrb.mxu1 %v13122_v29  ;;  %6185 = vmatpush.bf16.msra.mxu3 %v12802_v17  ;;  %v17771_v13 = vpop.f32.mrf.mxu1  ;;  %v12198_v33 = vor.u32 %v16329_v38, %v12195_v11  ;;  %v16553_v38 = vld [vmem:[#allocation10 + $0x9d4] sm:$0xf] }
 0x2de   :  { %v13505_v8 = vld [vmem:[#allocation10 + $0xd10] sm:$0xf]  ;;  %v12770_v16 = vor.u32 %v16477_v36, %v12769_v53  ;;  %v11907_v53 = vld [vmem:[#allocation10 + $0xb0] sm:$0xf0] }
 0x2df   :  { %v16661_v4 = vld [vmem:[#allocation10 + $0xd2c] sm:$0xf0]  ;;  %6225 = vmatpush.bf16.msrb.mxu2 %v13538_v28  ;;  %v16321_v36 = vld [vmem:[#allocation10 + $0x294] sm:$0xf]  ;;  %v11910_v40 = vor.u32 %v16257_v31, %v11907_v53 }
 0x2e0   :  { %v13506_v59 = vor.u32 %v16661_v4, %v13505_v8  ;;  %v12737_v22 = vld [vmem:[#allocation10 + $0x710] sm:$0xf]  ;;  %6218 = vmatmul.bf16.vlgmr.msrb.gmra.mxu1 %v17683_v52  ;;  %6250 = vmatpush.bf16.msra.mxu0 %v12038_v39  ;;  %v12163_v4 = vld [vmem:[#allocation10 + $0x2b0] sm:$0xf0] }
 0x2e1   :  { %6262 = vmatpush.bf16.msra.mxu1 %v12326_v26  ;;  %v16469_v43 = vld [vmem:[#allocation10 + $0x72c] sm:$0xf0]  ;;  %6186 = vmatpush.bf16.msra.mxu3 %v12770_v16  ;;  %v5972_v26 = vpop.f32.mrf.mxu2  ;;  %v5933_v14 = vpop.f32.mrf.mxu3  ;;  %v16617_v11 = vld [vmem:[#allocation10 + $0xbd4] sm:$0xf] }
 0x2e2   :  { %v13473_v44 = vld [vmem:[#allocation10 + $0xcd0] sm:$0xf]  ;;  %v12738_v50 = vor.u32 %v16469_v43, %v12737_v22  ;;  %v17774_v18 = vadd.f32 %v5972_v26, %v17759_v54  ;;  %v16249_v22 = vld [vmem:[#allocation10 + $0x54] sm:$0xf] }
 0x2e3   :  { %v16653_v45 = vld [vmem:[#allocation10 + $0xcec] sm:$0xf0]  ;;  %6226 = vmatpush.bf16.msrb.mxu2 %v13506_v59  ;;  %v12166_v59 = vor.u32 %v16321_v36, %v12163_v4  ;;  %v11875_v43 = vld [vmem:[#allocation10 + $0x70] sm:$0xf0] }
 0x2e4   :  { %v13474_v27 = vor.u32 %v16653_v45, %v13473_v44  ;;  %v12705_v19 = vld [vmem:[#allocation10 + $0x6d0] sm:$0xf]  ;;  %6251 = vmatpush.bf16.msra.mxu0 %v12006_v46  ;;  %v16313_v44 = vld [vmem:[#allocation10 + $0x254] sm:$0xf]  ;;  %v6000_v45 = vpop.f32.mrf.mxu0 }
 0x2e5   :  { %6263 = vmatpush.bf16.msra.mxu1 %v12294_v48  ;;  %v16461_v1 = vld [vmem:[#allocation10 + $0x6ec] sm:$0xf0]  ;;  %6187 = vmatpush.bf16.msra.mxu3 %v12738_v50  ;;  %v17776_v48 = vadd.f32 %v5933_v14, %v5921_v32  ;;  %v12131_v46 = vld [vmem:[#allocation10 + $0x270] sm:$0xf0]  ;;  %v6013_v51 = vpop.f32.mrf.mxu1 }
 0x2e6   :  { %v13441_v3 = vld [vmem:[#allocation10 + $0xc90] sm:$0xf]  ;;  %v12706_v37 = vor.u32 %v16461_v1, %v12705_v19  ;;  %v16417_v19 = vld [vmem:[#allocation10 + $0x594] sm:$0xf] }
 0x2e7   :  { %v16645_v6 = vld [vmem:[#allocation10 + $0xcac] sm:$0xf0]  ;;  %6227 = vmatpush.bf16.msrb.mxu2 %v13474_v27  ;;  %v11878_v27 = vor.u32 %v16249_v22, %v11875_v43  ;;  %v12547_v1 = vld [vmem:[#allocation10 + $0x5b0] sm:$0xf0] }
 0x2e8   :  { %v13442_v63 = vor.u32 %v16645_v6, %v13441_v3  ;;  %v12673_v12 = vld [vmem:[#allocation10 + $0x690] sm:$0xf]  ;;  %6252 = vmatpush.bf16.msra.mxu0 %v11974_v5  ;;  %v12134_v3 = vor.u32 %v16313_v44, %v12131_v46  ;;  %v11843_v5 = vld [vmem:[#allocation10 + $0x30] sm:$0xf0] }
 0x2e9   :  { %6264 = vmatpush.bf16.msra.mxu1 %v12262_v47  ;;  %v16453_v29 = vld [vmem:[#allocation10 + $0x6ac] sm:$0xf0]  ;;  %6188 = vmatpush.bf16.msra.mxu3 %v12706_v37  ;;  %v5974_v35 = vpop.f32.mrf.mxu2  ;;  %v12099_v37 = vld [vmem:[#allocation10 + $0x230] sm:$0xf0]  ;;  %v5935_v7 = vpop.f32.mrf.mxu3 }
 0x2ea   :  { %v13409_v17 = vld [vmem:[#allocation10 + $0xc50] sm:$0xf]  ;;  %v12674_v28 = vor.u32 %v16453_v29, %v12673_v12  ;;  %v12550_v12 = vor.u32 %v16417_v19, %v12547_v1  ;;  %v13347_v29 = vld [vmem:[#allocation10 + $0xbf0] sm:$0xf0] }
 0x2eb   :  { %v16637_v23 = vld [vmem:[#allocation10 + $0xc6c] sm:$0xf0]  ;;  %6228 = vmatpush.bf16.msrb.mxu2 %v13442_v63  ;;  %v13091_v63 = vld [vmem:[#allocation10 + $0x9f0] sm:$0xf0]  ;;  %v13350_v53 = vor.u32 %v16617_v11, %v13347_v29 }
 0x2ec   :  { %v13410_v8 = vor.u32 %v16637_v23, %v13409_v17  ;;  %v12641_v39 = vld [vmem:[#allocation10 + $0x650] sm:$0xf]  ;;  %6253 = vmatpush.bf16.msra.mxu0 %v11942_v20  ;;  %v11846_v23 = vor.u32 %v16241_v21, %v11843_v5  ;;  %v16409_v20 = vld [vmem:[#allocation10 + $0x554] sm:$0xf]  ;;  %v13094_v31 = vor.u32 %v16553_v38, %v13091_v63 }
 0x2ed   :  { %6265 = vmatpush.bf16.msra.mxu1 %v12230_v24  ;;  %v16445_v61 = vld [vmem:[#allocation10 + $0x66c] sm:$0xf0]  ;;  %6189 = vmatpush.bf16.msra.mxu3 %v12674_v28  ;;  %v16305_v24 = vld [vmem:[#allocation10 + $0x214] sm:$0xf] }
 0x2ee   :  { %v13377_v16 = vld [vmem:[#allocation10 + $0xc10] sm:$0xf]  ;;  %v12642_v42 = vor.u32 %v16445_v61, %v12641_v39  ;;  %v12102_v28 = vor.u32 %v16305_v24, %v12099_v37  ;;  %v16545_v14 = vld [vmem:[#allocation10 + $0x994] sm:$0xf]  ;;  %v3156_v37 = vperm.slane %v17751_v34, 3 }
 0x2ef   :  { %v16629_v54 = vld [vmem:[#allocation10 + $0xc2c] sm:$0xf0]  ;;  %6229 = vmatpush.bf16.msrb.mxu2 %v13410_v8  ;;  %v13059_v8 = vld [vmem:[#allocation10 + $0x9b0] sm:$0xf0] }
 0x2f0   :  { %v13378_v62 = vor.u32 %v16629_v54, %v13377_v16  ;;  %v12609_v47 = vld [vmem:[#allocation10 + $0x610] sm:$0xf]  ;;  %6254 = vmatpush.bf16.msra.mxu0 %v11910_v40  ;;  %v16609_v4 = vld [vmem:[#allocation10 + $0xb94] sm:$0xf]  ;;  %v13062_v41 = vor.u32 %v16545_v14, %v13059_v8 }
 0x2f1   :  { %6266 = vmatpush.bf16.msra.mxu1 %v12198_v33  ;;  %v16437_v50 = vld [vmem:[#allocation10 + $0x62c] sm:$0xf0]  ;;  %6190 = vmatpush.bf16.msra.mxu3 %v12642_v42  ;;  %v12515_v33 = vld [vmem:[#allocation10 + $0x570] sm:$0xf0] }
 0x2f2   :  { %v13857_v32 = vld [vmem:[#allocation10 + $0xfd0] sm:$0xf]  ;;  %v12610_v6 = vor.u32 %v16437_v50, %v12609_v47  ;;  %v12518_v39 = vor.u32 %v16409_v20, %v12515_v33  ;;  %v13315_v61 = vld [vmem:[#allocation10 + $0xbb0] sm:$0xf0] }
 0x2f3   :  { %v16749_v57 = vld [vmem:[#allocation10 + $0xfec] sm:$0xf0]  ;;  %6230 = vmatpush.bf16.msrb.mxu2 %v13378_v62  ;;  %v16401_v40 = vld [vmem:[#allocation10 + $0x514] sm:$0xf] }
 0x2f4   :  { %v13858_v9 = vor.u32 %v16749_v57, %v13857_v32  ;;  %v13825_v26 = vld [vmem:[#allocation10 + $0xf90] sm:$0xf]  ;;  %6255 = vmatpush.bf16.msra.mxu0 %v11878_v27  ;;  %v12483_v58 = vld [vmem:[#allocation10 + $0x530] sm:$0xf0] }
 0x2f5   :  { %6267 = vmatpush.bf16.msra.mxu1 %v12166_v59  ;;  %v16741_v17 = vld [vmem:[#allocation10 + $0xfac] sm:$0xf0]  ;;  %6191 = vmatpush.bf16.msra.mxu3 %v12610_v6  ;;  %v13318_v59 = vor.u32 %v16609_v4, %v13315_v61  ;;  %v16537_v22 = vld [vmem:[#allocation10 + $0x954] sm:$0xf]  ;;  %v12486_v45 = vor.u32 %v16401_v40, %v12483_v58 }
 0x2f6   :  { %6231 = vmatmul.bf16.vlgmr.msrb.gmra.mxu2 %v17697_v25  ;;  %v13826_v36 = vor.u32 %v16741_v17, %v13825_v26  ;;  %v13793_v16 = vld [vmem:[#allocation10 + $0xf50] sm:$0xf]  ;;  %v13027_v43 = vld [vmem:[#allocation10 + $0x970] sm:$0xf0] }
 0x2f7   :  { %6275 = vmatpush.bf16.msra.mxu2 %v12582_v55  ;;  %v16733_v54 = vld [vmem:[#allocation10 + $0xf6c] sm:$0xf0]  ;;  %v16601_v44 = vld [vmem:[#allocation10 + $0xb54] sm:$0xf]  ;;  %v13030_v35 = vor.u32 %v16537_v22, %v13027_v43  ;;  %v6050_v20 = vpop.f32.mrf.mxu0 }
 0x2f8   :  { %6192 = vmatmul.bf16.vlgmr.msra.gmra.mxu3 %v17660_v60  ;;  %6256 = vmatpush.bf16.msra.mxu0 %v11846_v23  ;;  %v13794_v42 = vor.u32 %v16733_v54, %v13793_v16  ;;  %v13283_v62 = vld [vmem:[#allocation10 + $0xb70] sm:$0xf0]  ;;  %v13761_v46 = vld [vmem:[#allocation10 + $0xf10] sm:$0xf]  ;;  %v5985_v54 = vpop.f32.mrf.mxu3 }
 0x2f9   :  { %6268 = vmatpush.bf16.msra.mxu1 %v12134_v3  ;;  %6236 = vmatpush.bf16.msrb.mxu3 %v13858_v9  ;;  %v16725_v47 = vld [vmem:[#allocation10 + $0xf2c] sm:$0xf0]  ;;  %v16393_v50 = vld [vmem:[#allocation10 + $0x4d4] sm:$0xf]  ;;  %v13286_v55 = vor.u32 %v16601_v44, %v13283_v62  ;;  %v6024_v33 = vpop.f32.mrf.mxu2 }
 0x2fa   :  { %v12451_v51 = vld [vmem:[#allocation10 + $0x4f0] sm:$0xf0]  ;;  %v13762_v32 = vor.u32 %v16725_v47, %v13761_v46  ;;  %v13729_v3 = vld [vmem:[#allocation10 + $0xed0] sm:$0xf] }
 0x2fb   :  { %6276 = vmatpush.bf16.msra.mxu2 %v12550_v12  ;;  %6257 = vmatmul.bf16.vlgmr.msra.gmra.mxu0 %v17653_v49  ;;  %v16529_v57 = vld [vmem:[#allocation10 + $0x914] sm:$0xf]  ;;  %v12454_v19 = vor.u32 %v16393_v50, %v12451_v51  ;;  %v16717_v6 = vld [vmem:[#allocation10 + $0xeec] sm:$0xf0] }
 0x2fc   :  { %6301 = vmatpush.bf16.msrb.mxu0 %v13094_v31  ;;  %v12995_v27 = vld [vmem:[#allocation10 + $0x930] sm:$0xf0]  ;;  %v13730_v38 = vor.u32 %v16717_v6, %v13729_v3  ;;  %v13697_v17 = vld [vmem:[#allocation10 + $0xe90] sm:$0xf] }
 0x2fd   :  { %6269 = vmatpush.bf16.msra.mxu1 %v12102_v28  ;;  %6237 = vmatpush.bf16.msrb.mxu3 %v13826_v36  ;;  %v16593_v21 = vld [vmem:[#allocation10 + $0xb14] sm:$0xf]  ;;  %v12998_v7 = vor.u32 %v16529_v57, %v12995_v27  ;;  %v16709_v23 = vld [vmem:[#allocation10 + $0xeac] sm:$0xf0]  ;;  %v6063_v36 = vpop.f32.mrf.mxu1 }
 0x2fe   :  { %v13251_v1 = vld [vmem:[#allocation10 + $0xb30] sm:$0xf0]  ;;  %v13698_v8 = vor.u32 %v16709_v23, %v13697_v17  ;;  %v13633_v27 = vld [vmem:[#allocation10 + $0xe10] sm:$0xf] }
 0x2ff   :  { %6277 = vmatpush.bf16.msra.mxu2 %v12518_v39  ;;  %v16385_v5 = vld [vmem:[#allocation10 + $0x494] sm:$0xf]  ;;  %v13254_v9 = vor.u32 %v16593_v21, %v13251_v1  ;;  %v6052_v21 = vpop.f32.mrf.mxu0 }
 0x300   :  { %6270 = vmatmul.bf16.vlgmr.msra.gmra.mxu1 %v17655_v56  ;;  %6302 = vmatpush.bf16.msrb.mxu0 %v13062_v41  ;;  %v12419_v24 = vld [vmem:[#allocation10 + $0x4b0] sm:$0xf0]  ;;  %v13665_v41 = vld [vmem:[#allocation10 + $0xe50] sm:$0xf]  ;;  %v5987_v17 = vpop.f32.mrf.mxu3 }
 0x301   :  { %6314 = vmatpush.bf16.msrb.mxu1 %v13350_v53  ;;  %6238 = vmatpush.bf16.msrb.mxu3 %v13794_v42  ;;  %v16521_v63 = vld [vmem:[#allocation10 + $0x8d4] sm:$0xf]  ;;  %v12422_v29 = vor.u32 %v16385_v5, %v12419_v24  ;;  %v6051_v53 = vadd.f32 %v6050_v20, %v3156_v37  ;;  %v5986_v42 = vadd.f32 %v5985_v54, %v17774_v18  ;;  %v16693_v18 = vld [vmem:[#allocation10 + $0xe2c] sm:$0xf0]  ;;  %v12073_v20 = vld [vmem:[#allocation10 + $0x1d8] sm:$0xf] }
 0x302   :  { %v12963_v11 = vld [vmem:[#allocation10 + $0x8f0] sm:$0xf0]  ;;  %v11945_v17 = vld [vmem:[#allocation10 + $0xd8] sm:$0xf] }
 0x303   :  { %6278 = vmatpush.bf16.msra.mxu2 %v12486_v45  ;;  %v16585_v12 = vld [vmem:[#allocation10 + $0xad4] sm:$0xf]  ;;  %v12966_v34 = vor.u32 %v16521_v63, %v12963_v11  ;;  %v17783_v16 = vadd.f32 %v6063_v36, %v6051_v53  ;;  %v5999_v46 = vadd.f32 %v17769_v10, %v5986_v42  ;;  %v13634_v63 = vor.u32 %v16693_v18, %v13633_v27  ;;  %v16366_v53 = vld [vmem:[#allocation10 + $0x3f4] sm:$0xf0] }
 0x304   :  { %6303 = vmatpush.bf16.msrb.mxu0 %v13030_v35  ;;  %v13219_v26 = vld [vmem:[#allocation10 + $0xaf0] sm:$0xf0]  ;;  %v16358_v42 = vld [vmem:[#allocation10 + $0x3b4] sm:$0xf0] }
 0x305   :  { %6315 = vmatpush.bf16.msrb.mxu1 %v13318_v59  ;;  %6239 = vmatpush.bf16.msrb.mxu3 %v13762_v32  ;;  %v16377_v28 = vld [vmem:[#allocation10 + $0x454] sm:$0xf]  ;;  %v13222_v14 = vor.u32 %v16585_v12, %v13219_v26  ;;  %v16701_v59 = vld [vmem:[#allocation10 + $0xe6c] sm:$0xf0]  ;;  %v6012_v5 = vadd.f32 %v17771_v13, %v5999_v46  ;;  %v6065_v10 = vpop.f32.mrf.mxu1  ;;  %v16302_v13 = vld [vmem:[#allocation10 + $0x1f4] sm:$0xf0] }
 0x306   :  { %v12387_v31 = vld [vmem:[#allocation10 + $0x470] sm:$0xf0]  ;;  %v13666_v50 = vor.u32 %v16701_v59, %v13665_v41  ;;  %v12297_v41 = vld [vmem:[#allocation10 + $0x398] sm:$0xf] }
 0x307   :  { %6279 = vmatpush.bf16.msra.mxu2 %v12454_v19  ;;  %v16513_v4 = vld [vmem:[#allocation10 + $0x894] sm:$0xf]  ;;  %v12390_v40 = vor.u32 %v16377_v28, %v12387_v31  ;;  %v6026_v19 = vpop.f32.mrf.mxu2  ;;  %v17788_v26 = vadd.f32 %v6024_v33, %v6012_v5  ;;  %v12329_v28 = vld [vmem:[#allocation10 + $0x3d8] sm:$0xf]  ;;  %v12074_v33 = vor.u32 %v16302_v13, %v12073_v20  ;;  %v12298_v46 = vor.u32 %v16358_v42, %v12297_v41 }
 0x308   :  { %6304 = vmatpush.bf16.msrb.mxu0 %v12998_v7  ;;  %v12931_v39 = vld [vmem:[#allocation10 + $0x8b0] sm:$0xf0]  ;;  %v16278_v5 = vld [vmem:[#allocation10 + $0x134] sm:$0xf0] }
 0x309   :  { %6316 = vmatpush.bf16.msrb.mxu1 %v13286_v55  ;;  %6240 = vmatpush.bf16.msrb.mxu3 %v13730_v38  ;;  %v16577_v61 = vld [vmem:[#allocation10 + $0xa94] sm:$0xf]  ;;  %v12934_v44 = vor.u32 %v16513_v4, %v12931_v39  ;;  %v12233_v10 = vld [vmem:[#allocation10 + $0x318] sm:$0xf] }
 0x30a   :  { %v13187_v58 = vld [vmem:[#allocation10 + $0xab0] sm:$0xf0]  ;;  %v12201_v20 = vld [vmem:[#allocation10 + $0x2d8] sm:$0xf] }
 0x30b   :  { %6280 = vmatpush.bf16.msra.mxu2 %v12422_v29  ;;  %v16369_v22 = vld [vmem:[#allocation10 + $0x414] sm:$0xf]  ;;  %v13190_v47 = vor.u32 %v16577_v61, %v13187_v58  ;;  %v12330_v61 = vor.u32 %v16366_v53, %v12329_v28  ;;  %v16294_v58 = vld [vmem:[#allocation10 + $0x1b4] sm:$0xf0] }
 0x30c   :  { %v12355_v43 = vld [vmem:[#allocation10 + $0x430] sm:$0xf0]  ;;  %6305 = vmatpush.bf16.msrb.mxu0 %v12966_v34  ;;  %v16334_v28 = vld [vmem:[#allocation10 + $0x2f4] sm:$0xf0] }
 0x30d   :  { %6317 = vmatpush.bf16.msrb.mxu1 %v13254_v9  ;;  %v16681_v45 = vld [vmem:[#allocation10 + $0xdd4] sm:$0xf]  ;;  %6241 = vmatpush.bf16.msrb.mxu3 %v13698_v8  ;;  %v12358_v32 = vor.u32 %v16369_v22, %v12355_v43  ;;  %v12169_v41 = vld [vmem:[#allocation10 + $0x298] sm:$0xf] }
 0x30e   :  { %v13603_v62 = vld [vmem:[#allocation10 + $0xdf0] sm:$0xf0] }
 0x30f   :  { %v16505_v51 = vld [vmem:[#allocation10 + $0x854] sm:$0xf]  ;;  %6281 = vmatpush.bf16.msra.mxu2 %v12390_v40  ;;  %v13606_v1 = vor.u32 %v16681_v45, %v13603_v62  ;;  %v12041_v40 = vld [vmem:[#allocation10 + $0x198] sm:$0xf] }
 0x310   :  { %v12899_v35 = vld [vmem:[#allocation10 + $0x870] sm:$0xf0]  ;;  %6306 = vmatpush.bf16.msrb.mxu0 %v12934_v44  ;;  %v12042_v62 = vor.u32 %v16294_v58, %v12041_v40  ;;  %v11913_v40 = vld [vmem:[#allocation10 + $0x98] sm:$0xf] }
 0x311   :  { %6318 = vmatpush.bf16.msrb.mxu1 %v13222_v14  ;;  %v16569_v55 = vld [vmem:[#allocation10 + $0xa54] sm:$0xf]  ;;  %v12902_v24 = vor.u32 %v16505_v51, %v12899_v35  ;;  %6242 = vmatpush.bf16.msrb.mxu3 %v13666_v50  ;;  %v12009_v50 = vld [vmem:[#allocation10 + $0x158] sm:$0xf] }
 0x312   :  { %v13155_v57 = vld [vmem:[#allocation10 + $0xa70] sm:$0xf0]  ;;  %v16286_v51 = vld [vmem:[#allocation10 + $0x174] sm:$0xf0] }
 0x313   :  { %v16489_v3 = vld [vmem:[#allocation10 + $0x7d4] sm:$0xf]  ;;  %v13158_v38 = vor.u32 %v16569_v55, %v13155_v57  ;;  %6282 = vmatpush.bf16.msra.mxu2 %v12358_v32  ;;  %v12265_v35 = vld [vmem:[#allocation10 + $0x358] sm:$0xf]  ;;  %v12010_v19 = vor.u32 %v16286_v51, %v12009_v50 }
 0x314   :  { %v12835_v6 = vld [vmem:[#allocation10 + $0x7f0] sm:$0xf0]  ;;  %6307 = vmatpush.bf16.msrb.mxu0 %v12902_v24  ;;  %v16350_v32 = vld [vmem:[#allocation10 + $0x374] sm:$0xf0] }
 0x315   :  { %v16497_v37 = vld [vmem:[#allocation10 + $0x814] sm:$0xf]  ;;  %6319 = vmatpush.bf16.msrb.mxu1 %v13190_v47  ;;  %v12838_v23 = vor.u32 %v16489_v3, %v12835_v6  ;;  %6243 = vmatpush.bf16.msrb.mxu3 %v13634_v63  ;;  %v11977_v6 = vld [vmem:[#allocation10 + $0x118] sm:$0xf] }
 0x316   :  { %v16673_v7 = vld [vmem:[#allocation10 + $0xd94] sm:$0xf]  ;;  %6283 = vmatmul.bf16.vlgmr.msra.gmra.mxu2 %v17657_v2  ;;  %v16262_v58 = vld [vmem:[#allocation10 + $0xb4] sm:$0xf0] }
 0x317   :  { %v13571_v9 = vld [vmem:[#allocation10 + $0xdb0] sm:$0xf0]  ;;  %6327 = vmatpush.bf16.msrb.mxu2 %v13606_v1  ;;  %v12266_v1 = vor.u32 %v16350_v32, %v12265_v35  ;;  %v16430_v50 = vld [vmem:[#allocation10 + $0x5f4] sm:$0xf0] }
 0x318   :  { %v12867_v11 = vld [vmem:[#allocation10 + $0x830] sm:$0xf0]  ;;  %v13574_v31 = vor.u32 %v16673_v7, %v13571_v9  ;;  %6244 = vmatmul.bf16.vlgmr.msrb.gmra.mxu3 %v17704_v15  ;;  %v16254_v32 = vld [vmem:[#allocation10 + $0x74] sm:$0xf0] }
 0x319   :  { %v16561_v12 = vld [vmem:[#allocation10 + $0xa14] sm:$0xf]  ;;  %v12870_v14 = vor.u32 %v16497_v37, %v12867_v11  ;;  %6320 = vmatpush.bf16.msrb.mxu1 %v13158_v38  ;;  %6288 = vmatpush.bf16.msra.mxu3 %v12838_v23  ;;  %v16342_v37 = vld [vmem:[#allocation10 + $0x334] sm:$0xf0]  ;;  %v11978_v11 = vor.u32 %v16278_v5, %v11977_v6 }
 0x31a   :  { %v13123_v29 = vld [vmem:[#allocation10 + $0xa30] sm:$0xf0]  ;;  %v16270_v23 = vld [vmem:[#allocation10 + $0xf4] sm:$0xf0] }
 0x31b   :  { %v16481_v36 = vld [vmem:[#allocation10 + $0x794] sm:$0xf]  ;;  %v13126_v39 = vor.u32 %v16561_v12, %v13123_v29  ;;  %6328 = vmatpush.bf16.msrb.mxu2 %v13574_v31  ;;  %6308 = vmatpush.bf16.msrb.mxu0 %v12870_v14  ;;  %v12234_v12 = vor.u32 %v16342_v37, %v12233_v10  ;;  %v11849_v37 = vld [vmem:[#allocation10 + $0x18] sm:$0xf] }
 0x31c   :  { %v12803_v34 = vld [vmem:[#allocation10 + $0x7b0] sm:$0xf0] }
 0x31d   :  { %v16665_v8 = vld [vmem:[#allocation10 + $0xd54] sm:$0xf]  ;;  %v12806_v54 = vor.u32 %v16481_v36, %v12803_v34  ;;  %6321 = vmatpush.bf16.msrb.mxu1 %v13126_v39  ;;  %v17794_v36 = vpop.f32.mrf.mxu0  ;;  %v11946_v39 = vor.u32 %v16270_v23, %v11945_v17 }
 0x31e   :  { %v13539_v4 = vld [vmem:[#allocation10 + $0xd70] sm:$0xf0]  ;;  %6309 = vmatmul.bf16.vlgmr.msrb.gmra.mxu0 %v17678_v30 }
 0x31f   :  { %v13542_v59 = vor.u32 %v16665_v8, %v13539_v4  ;;  %v16473_v22 = vld [vmem:[#allocation10 + $0x754] sm:$0xf]  ;;  %6353 = vmatpush.bf16.msra.mxu0 %v12074_v33  ;;  %6289 = vmatpush.bf16.msra.mxu3 %v12806_v54  ;;  %v17796_v8 = vpop.f32.mrf.mxu1  ;;  %v6076_v4 = vpop.f32.mrf.mxu2 }
 0x320   :  { %v12771_v43 = vld [vmem:[#allocation10 + $0x770] sm:$0xf0]  ;;  %6322 = vmatmul.bf16.vlgmr.msrb.gmra.mxu1 %v17683_v52  ;;  %v17799_v33 = vadd.f32 %v6076_v4, %v17783_v16  ;;  %v11914_v16 = vor.u32 %v16262_v58, %v11913_v40 }
 0x321   :  { %v16657_v44 = vld [vmem:[#allocation10 + $0xd14] sm:$0xf]  ;;  %6366 = vmatpush.bf16.msra.mxu1 %v12330_v61  ;;  %v12774_v47 = vor.u32 %v16473_v22, %v12771_v43  ;;  %6329 = vmatpush.bf16.msrb.mxu2 %v13542_v59  ;;  %v12202_v61 = vor.u32 %v16334_v28, %v12201_v20  ;;  %v6037_v59 = vpop.f32.mrf.mxu3  ;;  %v16326_v22 = vld [vmem:[#allocation10 + $0x2b4] sm:$0xf0] }
 0x322   :  { %v13507_v45 = vld [vmem:[#allocation10 + $0xd30] sm:$0xf0]  ;;  %v12170_v51 = vor.u32 %v16326_v22, %v12169_v41  ;;  %v13097_v20 = vld [vmem:[#allocation10 + $0x9d8] sm:$0xf] }
 0x323   :  { %v13510_v55 = vor.u32 %v16657_v44, %v13507_v45  ;;  %v16465_v57 = vld [vmem:[#allocation10 + $0x714] sm:$0xf]  ;;  %6354 = vmatpush.bf16.msra.mxu0 %v12042_v62  ;;  %6290 = vmatpush.bf16.msra.mxu3 %v12774_v47  ;;  %v17802_v45 = vadd.f32 %v6037_v59, %v17788_v26  ;;  %v12585_v47 = vld [vmem:[#allocation10 + $0x5d8] sm:$0xf] }
 0x324   :  { %v12739_v27 = vld [vmem:[#allocation10 + $0x730] sm:$0xf0]  ;;  %v13353_v28 = vld [vmem:[#allocation10 + $0xbd8] sm:$0xf] }
 0x325   :  { %v16649_v18 = vld [vmem:[#allocation10 + $0xcd4] sm:$0xf]  ;;  %6367 = vmatpush.bf16.msra.mxu1 %v12298_v46  ;;  %v12742_v3 = vor.u32 %v16465_v57, %v12739_v27  ;;  %6330 = vmatpush.bf16.msrb.mxu2 %v13510_v55  ;;  %v11881_v55 = vld [vmem:[#allocation10 + $0x58] sm:$0xf]  ;;  %v6104_v26 = vpop.f32.mrf.mxu0 }
 0x326   :  { %v13475_v21 = vld [vmem:[#allocation10 + $0xcf0] sm:$0xf0]  ;;  %v12137_v57 = vld [vmem:[#allocation10 + $0x258] sm:$0xf] }
 0x327   :  { %v13478_v24 = vor.u32 %v16649_v18, %v13475_v21  ;;  %v16457_v7 = vld [vmem:[#allocation10 + $0x6d4] sm:$0xf]  ;;  %6355 = vmatpush.bf16.msra.mxu0 %v12010_v19  ;;  %6291 = vmatpush.bf16.msra.mxu3 %v12742_v3  ;;  %v16318_v18 = vld [vmem:[#allocation10 + $0x274] sm:$0xf0]  ;;  %v6117_v5 = vpop.f32.mrf.mxu1  ;;  %v6078_v10 = vpop.f32.mrf.mxu2 }
 0x328   :  { %v12707_v9 = vld [vmem:[#allocation10 + $0x6f0] sm:$0xf0]  ;;  %v13065_v59 = vld [vmem:[#allocation10 + $0x998] sm:$0xf] }
 0x329   :  { %v16641_v38 = vld [vmem:[#allocation10 + $0xc94] sm:$0xf]  ;;  %6368 = vmatpush.bf16.msra.mxu1 %v12266_v1  ;;  %v12710_v29 = vor.u32 %v16457_v7, %v12707_v9  ;;  %6331 = vmatpush.bf16.msrb.mxu2 %v13478_v24  ;;  %v12586_v1 = vor.u32 %v16430_v50, %v12585_v47  ;;  %v11882_v24 = vor.u32 %v16254_v32, %v11881_v55  ;;  %v12553_v7 = vld [vmem:[#allocation10 + $0x598] sm:$0xf]  ;;  %v6039_v17 = vpop.f32.mrf.mxu3 }
 0x32a   :  { %v13443_v63 = vld [vmem:[#allocation10 + $0xcb0] sm:$0xf0]  ;;  %v16422_v9 = vld [vmem:[#allocation10 + $0x5b4] sm:$0xf0] }
 0x32b   :  { %v13446_v13 = vor.u32 %v16641_v38, %v13443_v63  ;;  %v16449_v31 = vld [vmem:[#allocation10 + $0x694] sm:$0xf]  ;;  %6356 = vmatpush.bf16.msra.mxu0 %v11978_v11  ;;  %6292 = vmatpush.bf16.msra.mxu3 %v12710_v29  ;;  %v12138_v38 = vor.u32 %v16318_v18, %v12137_v57  ;;  %v16246_v11 = vld [vmem:[#allocation10 + $0x34] sm:$0xf0] }
 0x32c   :  { %v12675_v53 = vld [vmem:[#allocation10 + $0x6b0] sm:$0xf0]  ;;  %v16310_v29 = vld [vmem:[#allocation10 + $0x234] sm:$0xf0]  ;;  %v11850_v4 = vor.u32 %v16246_v11, %v11849_v37 }
 0x32d   :  { %v16633_v34 = vld [vmem:[#allocation10 + $0xc54] sm:$0xf]  ;;  %6369 = vmatpush.bf16.msra.mxu1 %v12234_v12  ;;  %v12678_v54 = vor.u32 %v16449_v31, %v12675_v53  ;;  %6332 = vmatpush.bf16.msrb.mxu2 %v13446_v13  ;;  %v12105_v12 = vld [vmem:[#allocation10 + $0x218] sm:$0xf]  ;;  %v12554_v31 = vor.u32 %v16422_v9, %v12553_v7 }
 0x32e   :  { %v13411_v14 = vld [vmem:[#allocation10 + $0xc70] sm:$0xf0]  ;;  %v16558_v13 = vld [vmem:[#allocation10 + $0x9f4] sm:$0xf0] }
 0x32f   :  { %v13414_v42 = vor.u32 %v16633_v34, %v13411_v14  ;;  %v16441_v43 = vld [vmem:[#allocation10 + $0x654] sm:$0xf]  ;;  %6357 = vmatpush.bf16.msra.mxu0 %v11946_v39  ;;  %6293 = vmatpush.bf16.msra.mxu3 %v12678_v54  ;;  %v16622_v53 = vld [vmem:[#allocation10 + $0xbf4] sm:$0xf0]  ;;  %v12106_v54 = vor.u32 %v16310_v29, %v12105_v12  ;;  %v13098_v40 = vor.u32 %v16558_v13, %v13097_v20  ;;  %v17808_v29 = vld [vmem:[#allocation12] sm:$0xff] }
 0x330   :  { %v12643_v44 = vld [vmem:[#allocation10 + $0x670] sm:$0xf0]  ;;  %v12521_v39 = vld [vmem:[#allocation10 + $0x558] sm:$0xf]  ;;  %v13354_v58 = vor.u32 %v16622_v53, %v13353_v28  ;;  %v3157_v17 = vperm.slane %v17808_v29, 4 }
 0x331   :  { %v16625_v62 = vld [vmem:[#allocation10 + $0xc14] sm:$0xf]  ;;  %6370 = vmatpush.bf16.msra.mxu1 %v12202_v61  ;;  %v12646_v35 = vor.u32 %v16441_v43, %v12643_v44  ;;  %6333 = vmatpush.bf16.msrb.mxu2 %v13414_v42  ;;  %v16414_v61 = vld [vmem:[#allocation10 + $0x574] sm:$0xf0] }
 0x332   :  { %v13379_v46 = vld [vmem:[#allocation10 + $0xc30] sm:$0xf0]  ;;  %v16550_v42 = vld [vmem:[#allocation10 + $0x9b4] sm:$0xf0]  ;;  %v12522_v43 = vor.u32 %v16414_v61, %v12521_v39 }
 0x333   :  { %v13382_v27 = vor.u32 %v16625_v62, %v13379_v46  ;;  %v16433_v21 = vld [vmem:[#allocation10 + $0x614] sm:$0xf]  ;;  %6358 = vmatpush.bf16.msra.mxu0 %v11914_v16  ;;  %6294 = vmatpush.bf16.msra.mxu3 %v12646_v35  ;;  %v13321_v22 = vld [vmem:[#allocation10 + $0xb98] sm:$0xf]  ;;  %v13066_v50 = vor.u32 %v16550_v42, %v13065_v59 }
 0x334   :  { %v12611_v19 = vld [vmem:[#allocation10 + $0x630] sm:$0xf0]  ;;  %v16614_v44 = vld [vmem:[#allocation10 + $0xbb4] sm:$0xf0] }
 0x335   :  { %v16745_v3 = vld [vmem:[#allocation10 + $0xfd4] sm:$0xf]  ;;  %6371 = vmatpush.bf16.msra.mxu1 %v12170_v51  ;;  %v12614_v63 = vor.u32 %v16433_v21, %v12611_v19  ;;  %6334 = vmatpush.bf16.msrb.mxu2 %v13382_v27  ;;  %v12489_v16 = vld [vmem:[#allocation10 + $0x518] sm:$0xf]  ;;  %v13322_v51 = vor.u32 %v16614_v44, %v13321_v22 }
 0x336   :  { %v13859_v6 = vld [vmem:[#allocation10 + $0xff0] sm:$0xf0]  ;;  %v16406_v47 = vld [vmem:[#allocation10 + $0x534] sm:$0xf0] }
 0x337   :  { %v13862_v23 = vor.u32 %v16745_v3, %v13859_v6  ;;  %v16737_v34 = vld [vmem:[#allocation10 + $0xf94] sm:$0xf]  ;;  %6359 = vmatpush.bf16.msra.mxu0 %v11882_v24  ;;  %6295 = vmatpush.bf16.msra.mxu3 %v12614_v63  ;;  %v13033_v55 = vld [vmem:[#allocation10 + $0x958] sm:$0xf]  ;;  %v12490_v27 = vor.u32 %v16406_v47, %v12489_v16 }
 0x338   :  { %v13827_v14 = vld [vmem:[#allocation10 + $0xfb0] sm:$0xf0]  ;;  %6335 = vmatmul.bf16.vlgmr.msrb.gmra.mxu2 %v17697_v25  ;;  %v16542_v32 = vld [vmem:[#allocation10 + $0x974] sm:$0xf0]  ;;  %v6154_v61 = vpop.f32.mrf.mxu0 }
 0x339   :  { %6379 = vmatpush.bf16.msra.mxu2 %v12586_v1  ;;  %6372 = vmatpush.bf16.msra.mxu1 %v12138_v38  ;;  %v13830_v41 = vor.u32 %v16737_v34, %v13827_v14  ;;  %v16729_v62 = vld [vmem:[#allocation10 + $0xf54] sm:$0xf]  ;;  %v13289_v57 = vld [vmem:[#allocation10 + $0xb58] sm:$0xf]  ;;  %v13034_v3 = vor.u32 %v16542_v32, %v13033_v55  ;;  %v6128_v59 = vpop.f32.mrf.mxu2 }
 0x33a   :  { %v13795_v46 = vld [vmem:[#allocation10 + $0xf70] sm:$0xf0]  ;;  %6296 = vmatmul.bf16.vlgmr.msra.gmra.mxu3 %v17660_v60  ;;  %v16606_v18 = vld [vmem:[#allocation10 + $0xb74] sm:$0xf0] }
 0x33b   :  { %6340 = vmatpush.bf16.msrb.mxu3 %v13862_v23  ;;  %6360 = vmatpush.bf16.msra.mxu0 %v11850_v4  ;;  %v13798_v35 = vor.u32 %v16729_v62, %v13795_v46  ;;  %v16721_v21 = vld [vmem:[#allocation10 + $0xf14] sm:$0xf]  ;;  %v12457_v26 = vld [vmem:[#allocation10 + $0x4d8] sm:$0xf]  ;;  %v13290_v6 = vor.u32 %v16606_v18, %v13289_v57  ;;  %v6089_v47 = vpop.f32.mrf.mxu3 }
 0x33c   :  { %v13763_v19 = vld [vmem:[#allocation10 + $0xf30] sm:$0xf0]  ;;  %v16398_v1 = vld [vmem:[#allocation10 + $0x4f4] sm:$0xf0]  ;;  %v6090_v32 = vadd.f32 %v6089_v47, %v17799_v33 }
 0x33d   :  { %6380 = vmatpush.bf16.msra.mxu2 %v12554_v31  ;;  %6373 = vmatpush.bf16.msra.mxu1 %v12106_v54  ;;  %v13766_v5 = vor.u32 %v16721_v21, %v13763_v19  ;;  %v13001_v10 = vld [vmem:[#allocation10 + $0x918] sm:$0xf]  ;;  %v12458_v7 = vor.u32 %v16398_v1, %v12457_v26  ;;  %v16713_v38 = vld [vmem:[#allocation10 + $0xed4] sm:$0xf] }
 0x33e   :  { %6361 = vmatmul.bf16.vlgmr.msra.gmra.mxu0 %v17653_v49  ;;  %v16534_v24 = vld [vmem:[#allocation10 + $0x934] sm:$0xf0]  ;;  %v13731_v63 = vld [vmem:[#allocation10 + $0xef0] sm:$0xf0]  ;;  %v6103_v26 = vadd.f32 %v17794_v36, %v6090_v32  ;;  %v16354_v32 = vld [vmem:[#allocation10 + $0x39c] sm:$0xf] }
 0x33f   :  { %6405 = vmatpush.bf16.msrb.mxu0 %v13098_v40  ;;  %6341 = vmatpush.bf16.msrb.mxu3 %v13830_v41  ;;  %v13257_v37 = vld [vmem:[#allocation10 + $0xb18] sm:$0xf]  ;;  %v13002_v23 = vor.u32 %v16534_v24, %v13001_v10  ;;  %v13734_v13 = vor.u32 %v16713_v38, %v13731_v63  ;;  %v16705_v4 = vld [vmem:[#allocation10 + $0xe94] sm:$0xf]  ;;  %v6167_v41 = vpop.f32.mrf.mxu1 }
 0x340   :  { %6374 = vmatmul.bf16.vlgmr.msra.gmra.mxu1 %v17655_v56  ;;  %v16598_v9 = vld [vmem:[#allocation10 + $0xb34] sm:$0xf0]  ;;  %v13699_v39 = vld [vmem:[#allocation10 + $0xeb0] sm:$0xf0] }
 0x341   :  { %6418 = vmatpush.bf16.msrb.mxu1 %v13354_v58  ;;  %6381 = vmatpush.bf16.msra.mxu2 %v12522_v43  ;;  %v12425_v11 = vld [vmem:[#allocation10 + $0x498] sm:$0xf]  ;;  %v13258_v20 = vor.u32 %v16598_v9, %v13257_v37  ;;  %v6155_v58 = vadd.f32 %v6154_v61, %v3157_v17  ;;  %v13702_v43 = vor.u32 %v16705_v4, %v13699_v39  ;;  %v13667_v55 = vld [vmem:[#allocation10 + $0xe70] sm:$0xf0]  ;;  %v6156_v9 = vpop.f32.mrf.mxu0  ;;  %v6130_v36 = vpop.f32.mrf.mxu2 }
 0x342   :  { %v16390_v12 = vld [vmem:[#allocation10 + $0x4b4] sm:$0xf0]  ;;  %v13635_v33 = vld [vmem:[#allocation10 + $0xe30] sm:$0xf0]  ;;  %v16274_v36 = vld [vmem:[#allocation10 + $0x11c] sm:$0xf] }
 0x343   :  { %6406 = vmatpush.bf16.msrb.mxu0 %v13066_v50  ;;  %6342 = vmatpush.bf16.msrb.mxu3 %v13798_v35  ;;  %v12969_v28 = vld [vmem:[#allocation10 + $0x8d8] sm:$0xf]  ;;  %v12426_v34 = vor.u32 %v16390_v12, %v12425_v11  ;;  %v17811_v16 = vadd.f32 %v6167_v41, %v6155_v58  ;;  %v16697_v35 = vld [vmem:[#allocation10 + $0xe54] sm:$0xf]  ;;  %v6116_v12 = vadd.f32 %v17796_v8, %v6103_v26  ;;  %v6091_v61 = vpop.f32.mrf.mxu3  ;;  %v16298_v8 = vld [vmem:[#allocation10 + $0x1dc] sm:$0xf] }
 0x344   :  { %v16526_v31 = vld [vmem:[#allocation10 + $0x8f4] sm:$0xf0]  ;;  %v16362_v58 = vld [vmem:[#allocation10 + $0x3dc] sm:$0xf] }
 0x345   :  { %6419 = vmatpush.bf16.msrb.mxu1 %v13322_v51  ;;  %6382 = vmatpush.bf16.msra.mxu2 %v12490_v27  ;;  %v13225_v53 = vld [vmem:[#allocation10 + $0xad8] sm:$0xf]  ;;  %v12970_v42 = vor.u32 %v16526_v31, %v12969_v28  ;;  %v17816_v39 = vadd.f32 %v6128_v59, %v6116_v12 }
 0x346   :  { %v16590_v14 = vld [vmem:[#allocation10 + $0xaf4] sm:$0xf0] }
 0x347   :  { %6407 = vmatpush.bf16.msrb.mxu0 %v13034_v3  ;;  %6343 = vmatpush.bf16.msrb.mxu3 %v13766_v5  ;;  %v12393_v54 = vld [vmem:[#allocation10 + $0x458] sm:$0xf]  ;;  %v13226_v22 = vor.u32 %v16590_v14, %v13225_v53  ;;  %v13670_v3 = vor.u32 %v16697_v35, %v13667_v55  ;;  %v6169_v17 = vpop.f32.mrf.mxu1  ;;  %v16290_v35 = vld [vmem:[#allocation10 + $0x19c] sm:$0xf] }
 0x348   :  { %v16382_v40 = vld [vmem:[#allocation10 + $0x474] sm:$0xf0]  ;;  %v12043_v55 = vld [vmem:[#allocation10 + $0x1b8] sm:$0xf0] }
 0x349   :  { %6420 = vmatpush.bf16.msrb.mxu1 %v13290_v6  ;;  %6383 = vmatpush.bf16.msra.mxu2 %v12458_v7  ;;  %v12937_v44 = vld [vmem:[#allocation10 + $0x898] sm:$0xf]  ;;  %v12394_v50 = vor.u32 %v16382_v40, %v12393_v54  ;;  %v16689_v7 = vld [vmem:[#allocation10 + $0xe14] sm:$0xf]  ;;  %v12075_v40 = vld [vmem:[#allocation10 + $0x1f8] sm:$0xf0] }
 0x34a   :  { %v16518_v62 = vld [vmem:[#allocation10 + $0x8b4] sm:$0xf0]  ;;  %v13638_v53 = vor.u32 %v16689_v7, %v13635_v33  ;;  %v12078_v59 = vor.u32 %v16298_v8, %v12075_v40  ;;  %v12267_v7 = vld [vmem:[#allocation10 + $0x378] sm:$0xf0] }
 0x34b   :  { %6408 = vmatpush.bf16.msrb.mxu0 %v13002_v23  ;;  %6344 = vmatpush.bf16.msrb.mxu3 %v13734_v13  ;;  %v13193_v46 = vld [vmem:[#allocation10 + $0xa98] sm:$0xf]  ;;  %v12938_v18 = vor.u32 %v16518_v62, %v12937_v44  ;;  %v16266_v8 = vld [vmem:[#allocation10 + $0xdc] sm:$0xf] }
 0x34c   :  { %v16582_v51 = vld [vmem:[#allocation10 + $0xab4] sm:$0xf0]  ;;  %v11947_v40 = vld [vmem:[#allocation10 + $0xf8] sm:$0xf0] }
 0x34d   :  { %6421 = vmatpush.bf16.msrb.mxu1 %v13258_v20  ;;  %6384 = vmatpush.bf16.msra.mxu2 %v12426_v34  ;;  %v12361_v57 = vld [vmem:[#allocation10 + $0x418] sm:$0xf]  ;;  %v13194_v1 = vor.u32 %v16582_v51, %v13193_v46 }
 0x34e   :  { %v16374_v27 = vld [vmem:[#allocation10 + $0x434] sm:$0xf0] }
 0x34f   :  { %6409 = vmatpush.bf16.msrb.mxu0 %v12970_v42  ;;  %v13609_v21 = vld [vmem:[#allocation10 + $0xdd8] sm:$0xf]  ;;  %6345 = vmatpush.bf16.msrb.mxu3 %v13702_v43  ;;  %v12362_v24 = vor.u32 %v16374_v27, %v12361_v57  ;;  %v12331_v42 = vld [vmem:[#allocation10 + $0x3f8] sm:$0xf0] }
 0x350   :  { %v16686_v19 = vld [vmem:[#allocation10 + $0xdf4] sm:$0xf0]  ;;  %v12299_v27 = vld [vmem:[#allocation10 + $0x3b8] sm:$0xf0] }
 0x351   :  { %6422 = vmatpush.bf16.msrb.mxu1 %v13226_v22  ;;  %v12905_v6 = vld [vmem:[#allocation10 + $0x858] sm:$0xf]  ;;  %6385 = vmatpush.bf16.msra.mxu2 %v12394_v50  ;;  %v13610_v38 = vor.u32 %v16686_v19, %v13609_v21  ;;  %v12334_v50 = vor.u32 %v16362_v58, %v12331_v42  ;;  %v16330_v58 = vld [vmem:[#allocation10 + $0x2dc] sm:$0xf] }
 0x352   :  { %v16510_v5 = vld [vmem:[#allocation10 + $0x874] sm:$0xf0]  ;;  %v12203_v42 = vld [vmem:[#allocation10 + $0x2f8] sm:$0xf0] }
 0x353   :  { %v13161_v10 = vld [vmem:[#allocation10 + $0xa58] sm:$0xf]  ;;  %6410 = vmatpush.bf16.msrb.mxu0 %v12938_v18  ;;  %v12906_v23 = vor.u32 %v16510_v5, %v12905_v6  ;;  %6346 = vmatpush.bf16.msrb.mxu3 %v13670_v3  ;;  %v12302_v3 = vor.u32 %v16354_v32, %v12299_v27  ;;  %v16282_v5 = vld [vmem:[#allocation10 + $0x15c] sm:$0xf] }
 0x354   :  { %v16574_v37 = vld [vmem:[#allocation10 + $0xa74] sm:$0xf0]  ;;  %v16258_v32 = vld [vmem:[#allocation10 + $0x9c] sm:$0xf] }
 0x355   :  { %v12841_v63 = vld [vmem:[#allocation10 + $0x7d8] sm:$0xf]  ;;  %6423 = vmatpush.bf16.msrb.mxu1 %v13194_v1  ;;  %v13162_v31 = vor.u32 %v16574_v37, %v13161_v10  ;;  %6386 = vmatpush.bf16.msra.mxu2 %v12362_v24  ;;  %v12046_v1 = vor.u32 %v16290_v35, %v12043_v55  ;;  %v12011_v10 = vld [vmem:[#allocation10 + $0x178] sm:$0xf0]  ;;  %v12206_v35 = vor.u32 %v16330_v58, %v12203_v42 }
 0x356   :  { %v16494_v11 = vld [vmem:[#allocation10 + $0x7f4] sm:$0xf0]  ;;  %v16346_v24 = vld [vmem:[#allocation10 + $0x35c] sm:$0xf] }
 0x357   :  { %v12873_v20 = vld [vmem:[#allocation10 + $0x818] sm:$0xf]  ;;  %v12842_v54 = vor.u32 %v16494_v11, %v12841_v63  ;;  %6411 = vmatpush.bf16.msrb.mxu0 %v12906_v23  ;;  %6347 = vmatpush.bf16.msrb.mxu3 %v13638_v53  ;;  %v12014_v11 = vor.u32 %v16282_v5, %v12011_v10  ;;  %v12270_v12 = vor.u32 %v16346_v24, %v12267_v7  ;;  %v11979_v23 = vld [vmem:[#allocation10 + $0x138] sm:$0xf0] }
 0x358   :  { %v13577_v13 = vld [vmem:[#allocation10 + $0xd98] sm:$0xf]  ;;  %6387 = vmatmul.bf16.vlgmr.msra.gmra.mxu2 %v17657_v2  ;;  %v16322_v27 = vld [vmem:[#allocation10 + $0x29c] sm:$0xf] }
 0x359   :  { %v16678_v28 = vld [vmem:[#allocation10 + $0xdb4] sm:$0xf0]  ;;  %6431 = vmatpush.bf16.msrb.mxu2 %v13610_v38  ;;  %6424 = vmatpush.bf16.msrb.mxu1 %v13162_v31  ;;  %v16426_v10 = vld [vmem:[#allocation10 + $0x5dc] sm:$0xf] }
 0x35a   :  { %v16502_v34 = vld [vmem:[#allocation10 + $0x834] sm:$0xf0]  ;;  %v13578_v41 = vor.u32 %v16678_v28, %v13577_v13  ;;  %6348 = vmatmul.bf16.vlgmr.msrb.gmra.mxu3 %v17704_v15  ;;  %v12235_v28 = vld [vmem:[#allocation10 + $0x338] sm:$0xf0] }
 0x35b   :  { %v13129_v14 = vld [vmem:[#allocation10 + $0xa18] sm:$0xf]  ;;  %v12874_v44 = vor.u32 %v16502_v34, %v12873_v20  ;;  %6392 = vmatpush.bf16.msra.mxu3 %v12842_v54  ;;  %v16338_v20 = vld [vmem:[#allocation10 + $0x31c] sm:$0xf] }
 0x35c   :  { %v16566_v4 = vld [vmem:[#allocation10 + $0xa34] sm:$0xf0]  ;;  %v12238_v61 = vor.u32 %v16338_v20, %v12235_v28  ;;  %v12587_v24 = vld [vmem:[#allocation10 + $0x5f8] sm:$0xf0] }
 0x35d   :  { %v12809_v22 = vld [vmem:[#allocation10 + $0x798] sm:$0xf]  ;;  %v13130_v47 = vor.u32 %v16566_v4, %v13129_v14  ;;  %6432 = vmatpush.bf16.msrb.mxu2 %v13578_v41  ;;  %6412 = vmatpush.bf16.msrb.mxu0 %v12874_v44  ;;  %v11982_v4 = vor.u32 %v16274_v36, %v11979_v23  ;;  %v17822_v44 = vpop.f32.mrf.mxu0  ;;  %v12590_v36 = vor.u32 %v16426_v10, %v12587_v24  ;;  %v16554_v42 = vld [vmem:[#allocation10 + $0x9dc] sm:$0xf] }
 0x35e   :  { %v16486_v43 = vld [vmem:[#allocation10 + $0x7b4] sm:$0xf0]  ;;  %v16402_v24 = vld [vmem:[#allocation10 + $0x51c] sm:$0xf] }
 0x35f   :  { %v13545_v62 = vld [vmem:[#allocation10 + $0xd58] sm:$0xf]  ;;  %v12810_v51 = vor.u32 %v16486_v43, %v12809_v22  ;;  %6425 = vmatpush.bf16.msrb.mxu1 %v13130_v47  ;;  %v17824_v47 = vpop.f32.mrf.mxu1 }
 0x360   :  { %v16670_v46 = vld [vmem:[#allocation10 + $0xd74] sm:$0xf0]  ;;  %6413 = vmatmul.bf16.vlgmr.msrb.gmra.mxu0 %v17678_v30 }
 0x361   :  { %v13546_v57 = vor.u32 %v16670_v46, %v13545_v62  ;;  %v12777_v18 = vld [vmem:[#allocation10 + $0x758] sm:$0xf]  ;;  %6457 = vmatpush.bf16.msra.mxu0 %v12078_v59  ;;  %6393 = vmatpush.bf16.msra.mxu3 %v12810_v51  ;;  %v6180_v59 = vpop.f32.mrf.mxu2 }
 0x362   :  { %v16478_v21 = vld [vmem:[#allocation10 + $0x774] sm:$0xf0]  ;;  %6426 = vmatmul.bf16.vlgmr.msrb.gmra.mxu1 %v17683_v52  ;;  %v17827_v51 = vadd.f32 %v6180_v59, %v17811_v16 }
 0x363   :  { %v13513_v19 = vld [vmem:[#allocation10 + $0xd18] sm:$0xf]  ;;  %6470 = vmatpush.bf16.msra.mxu1 %v12334_v50  ;;  %v12778_v6 = vor.u32 %v16478_v21, %v12777_v18  ;;  %6433 = vmatpush.bf16.msrb.mxu2 %v13546_v57  ;;  %v11950_v50 = vor.u32 %v16266_v8, %v11947_v40  ;;  %v11915_v57 = vld [vmem:[#allocation10 + $0xb8] sm:$0xf0]  ;;  %v6141_v18 = vpop.f32.mrf.mxu3 }
 0x364   :  { %v16662_v26 = vld [vmem:[#allocation10 + $0xd34] sm:$0xf0]  ;;  %v11918_v16 = vor.u32 %v16258_v32, %v11915_v57  ;;  %v16306_v8 = vld [vmem:[#allocation10 + $0x21c] sm:$0xf] }
 0x365   :  { %v13514_v37 = vor.u32 %v16662_v26, %v13513_v19  ;;  %v12745_v33 = vld [vmem:[#allocation10 + $0x718] sm:$0xf]  ;;  %6458 = vmatpush.bf16.msra.mxu0 %v12046_v1  ;;  %6394 = vmatpush.bf16.msra.mxu3 %v12778_v6  ;;  %v12171_v19 = vld [vmem:[#allocation10 + $0x2b8] sm:$0xf0] }
 0x366   :  { %v16470_v9 = vld [vmem:[#allocation10 + $0x734] sm:$0xf0]  ;;  %v12107_v40 = vld [vmem:[#allocation10 + $0x238] sm:$0xf0] }
 0x367   :  { %v13481_v38 = vld [vmem:[#allocation10 + $0xcd8] sm:$0xf]  ;;  %6471 = vmatpush.bf16.msra.mxu1 %v12302_v3  ;;  %v12746_v17 = vor.u32 %v16470_v9, %v12745_v33  ;;  %6434 = vmatpush.bf16.msrb.mxu2 %v13514_v37  ;;  %v17830_v3 = vadd.f32 %v6141_v18, %v17816_v39  ;;  %v12174_v37 = vor.u32 %v16322_v27, %v12171_v19  ;;  %v16250_v33 = vld [vmem:[#allocation10 + $0x5c] sm:$0xf]  ;;  %v6208_v39 = vpop.f32.mrf.mxu0 }
 0x368   :  { %v16654_v63 = vld [vmem:[#allocation10 + $0xcf4] sm:$0xf0]  ;;  %v11883_v9 = vld [vmem:[#allocation10 + $0x78] sm:$0xf0]  ;;  %v12110_v57 = vor.u32 %v16306_v8, %v12107_v40 }
 0x369   :  { %v13482_v13 = vor.u32 %v16654_v63, %v13481_v38  ;;  %v12713_v31 = vld [vmem:[#allocation10 + $0x6d8] sm:$0xf]  ;;  %6459 = vmatpush.bf16.msra.mxu0 %v12014_v11  ;;  %6395 = vmatpush.bf16.msra.mxu3 %v12746_v17  ;;  %v16314_v38 = vld [vmem:[#allocation10 + $0x25c] sm:$0xf]  ;;  %v6182_v28 = vpop.f32.mrf.mxu2 }
 0x36a   :  { %v16462_v53 = vld [vmem:[#allocation10 + $0x6f4] sm:$0xf0]  ;;  %v12139_v11 = vld [vmem:[#allocation10 + $0x278] sm:$0xf0] }
 0x36b   :  { %v13449_v34 = vld [vmem:[#allocation10 + $0xc98] sm:$0xf]  ;;  %6472 = vmatpush.bf16.msra.mxu1 %v12270_v12  ;;  %v12714_v54 = vor.u32 %v16462_v53, %v12713_v31  ;;  %6435 = vmatpush.bf16.msrb.mxu2 %v13482_v13  ;;  %v6221_v13 = vpop.f32.mrf.mxu1  ;;  %v11886_v31 = vor.u32 %v16250_v33, %v11883_v9  ;;  %v16242_v53 = vld [vmem:[#allocation10 + $0x1c] sm:$0xf]  ;;  %v6143_v58 = vpop.f32.mrf.mxu3 }
 0x36c   :  { %v16646_v14 = vld [vmem:[#allocation10 + $0xcb4] sm:$0xf0]  ;;  %v12523_v32 = vld [vmem:[#allocation10 + $0x578] sm:$0xf0] }
 0x36d   :  { %v13450_v41 = vor.u32 %v16646_v14, %v13449_v34  ;;  %v12681_v22 = vld [vmem:[#allocation10 + $0x698] sm:$0xf]  ;;  %6460 = vmatpush.bf16.msra.mxu0 %v11982_v4  ;;  %6396 = vmatpush.bf16.msra.mxu3 %v12714_v54  ;;  %v16418_v34 = vld [vmem:[#allocation10 + $0x59c] sm:$0xf]  ;;  %v12142_v4 = vor.u32 %v16314_v38, %v12139_v11 }
 0x36e   :  { %v16454_v43 = vld [vmem:[#allocation10 + $0x6b4] sm:$0xf0]  ;;  %v12555_v14 = vld [vmem:[#allocation10 + $0x5b8] sm:$0xf0] }
 0x36f   :  { %v13417_v62 = vld [vmem:[#allocation10 + $0xc58] sm:$0xf]  ;;  %6473 = vmatpush.bf16.msra.mxu1 %v12238_v61  ;;  %v12682_v55 = vor.u32 %v16454_v43, %v12681_v22  ;;  %6436 = vmatpush.bf16.msrb.mxu2 %v13450_v41  ;;  %v11851_v54 = vld [vmem:[#allocation10 + $0x38] sm:$0xf0] }
 0x370   :  { %v16638_v46 = vld [vmem:[#allocation10 + $0xc74] sm:$0xf0]  ;;  %v13099_v22 = vld [vmem:[#allocation10 + $0x9f8] sm:$0xf0] }
 0x371   :  { %v13418_v21 = vor.u32 %v16638_v46, %v13417_v62  ;;  %v12649_v26 = vld [vmem:[#allocation10 + $0x658] sm:$0xf]  ;;  %6461 = vmatpush.bf16.msra.mxu0 %v11950_v50  ;;  %6397 = vmatpush.bf16.msra.mxu3 %v12682_v55  ;;  %v16618_v43 = vld [vmem:[#allocation10 + $0xbdc] sm:$0xf]  ;;  %v12558_v62 = vor.u32 %v16418_v34, %v12555_v14  ;;  %v13102_v27 = vor.u32 %v16554_v42, %v13099_v22 }
 0x372   :  { %v16446_v1 = vld [vmem:[#allocation10 + $0x674] sm:$0xf0]  ;;  %v13355_v46 = vld [vmem:[#allocation10 + $0xbf8] sm:$0xf0] }
 0x373   :  { %v13385_v6 = vld [vmem:[#allocation10 + $0xc18] sm:$0xf]  ;;  %6474 = vmatpush.bf16.msra.mxu1 %v12206_v35  ;;  %v12650_v7 = vor.u32 %v16446_v1, %v12649_v26  ;;  %6437 = vmatpush.bf16.msrb.mxu2 %v13418_v21  ;;  %v11854_v35 = vor.u32 %v16242_v53, %v11851_v54  ;;  %v16410_v55 = vld [vmem:[#allocation10 + $0x55c] sm:$0xf]  ;;  %v13358_v18 = vor.u32 %v16618_v43, %v13355_v46 }
 0x374   :  { %v16630_v5 = vld [vmem:[#allocation10 + $0xc34] sm:$0xf0]  ;;  %v16546_v19 = vld [vmem:[#allocation10 + $0x99c] sm:$0xf] }
 0x375   :  { %v13386_v63 = vor.u32 %v16630_v5, %v13385_v6  ;;  %v12617_v12 = vld [vmem:[#allocation10 + $0x618] sm:$0xf]  ;;  %6462 = vmatpush.bf16.msra.mxu0 %v11918_v16  ;;  %6398 = vmatpush.bf16.msra.mxu3 %v12650_v7  ;;  %v13067_v26 = vld [vmem:[#allocation10 + $0x9b8] sm:$0xf0]  ;;  %v12526_v6 = vor.u32 %v16410_v55, %v12523_v32 }
 0x376   :  { %v16438_v17 = vld [vmem:[#allocation10 + $0x634] sm:$0xf0]  ;;  %v16610_v1 = vld [vmem:[#allocation10 + $0xb9c] sm:$0xf]  ;;  %v13070_v7 = vor.u32 %v16546_v19, %v13067_v26 }
 0x377   :  { %v13865_v23 = vld [vmem:[#allocation10 + $0xfd8] sm:$0xf]  ;;  %6475 = vmatpush.bf16.msra.mxu1 %v12174_v37  ;;  %v12618_v61 = vor.u32 %v16438_v17, %v12617_v12  ;;  %6438 = vmatpush.bf16.msrb.mxu2 %v13386_v63  ;;  %v13323_v5 = vld [vmem:[#allocation10 + $0xbb8] sm:$0xf0] }
 0x378   :  { %v16750_v20 = vld [vmem:[#allocation10 + $0xff4] sm:$0xf0]  ;;  %v12491_v37 = vld [vmem:[#allocation10 + $0x538] sm:$0xf0]  ;;  %v13326_v33 = vor.u32 %v16610_v1, %v13323_v5  ;;  %v6258_v55 = vpop.f32.mrf.mxu0 }
 0x379   :  { %v13866_v41 = vor.u32 %v16750_v20, %v13865_v23  ;;  %v13833_v59 = vld [vmem:[#allocation10 + $0xf98] sm:$0xf]  ;;  %6463 = vmatpush.bf16.msra.mxu0 %v11886_v31  ;;  %6399 = vmatpush.bf16.msra.mxu3 %v12618_v61  ;;  %v16538_v38 = vld [vmem:[#allocation10 + $0x95c] sm:$0xf]  ;;  %v12494_v12 = vor.u32 %v16402_v24, %v12491_v37 }
 0x37a   :  { %v16742_v50 = vld [vmem:[#allocation10 + $0xfb4] sm:$0xf0]  ;;  %6439 = vmatmul.bf16.vlgmr.msrb.gmra.mxu2 %v17697_v25  ;;  %v13035_v63 = vld [vmem:[#allocation10 + $0x978] sm:$0xf0] }
 0x37b   :  { %6483 = vmatpush.bf16.msra.mxu2 %v12590_v36  ;;  %6476 = vmatpush.bf16.msra.mxu1 %v12142_v4  ;;  %v13834_v21 = vor.u32 %v16742_v50, %v13833_v59  ;;  %v13801_v16 = vld [vmem:[#allocation10 + $0xf58] sm:$0xf]  ;;  %v16602_v11 = vld [vmem:[#allocation10 + $0xb5c] sm:$0xf]  ;;  %v13038_v13 = vor.u32 %v16538_v38, %v13035_v63 }
 0x37c   :  { %v16734_v10 = vld [vmem:[#allocation10 + $0xf74] sm:$0xf0]  ;;  %6400 = vmatmul.bf16.vlgmr.msra.gmra.mxu3 %v17660_v60  ;;  %v13291_v17 = vld [vmem:[#allocation10 + $0xb78] sm:$0xf0] }
 0x37d   :  { %6444 = vmatpush.bf16.msrb.mxu3 %v13866_v41  ;;  %6464 = vmatpush.bf16.msra.mxu0 %v11854_v35  ;;  %v13802_v9 = vor.u32 %v16734_v10, %v13801_v16  ;;  %v13769_v39 = vld [vmem:[#allocation10 + $0xf18] sm:$0xf]  ;;  %v16394_v23 = vld [vmem:[#allocation10 + $0x4dc] sm:$0xf]  ;;  %v13294_v28 = vor.u32 %v16602_v11, %v13291_v17  ;;  %v6193_v10 = vpop.f32.mrf.mxu3 }
 0x37e   :  { %v16726_v36 = vld [vmem:[#allocation10 + $0xf34] sm:$0xf0]  ;;  %v12459_v20 = vld [vmem:[#allocation10 + $0x4f8] sm:$0xf0] }
 0x37f   :  { %6484 = vmatpush.bf16.msra.mxu2 %v12558_v62  ;;  %6477 = vmatpush.bf16.msra.mxu1 %v12110_v57  ;;  %v13770_v31 = vor.u32 %v16726_v36, %v13769_v39  ;;  %v16530_v53 = vld [vmem:[#allocation10 + $0x91c] sm:$0xf]  ;;  %v13737_v61 = vld [vmem:[#allocation10 + $0xed8] sm:$0xf] }
 0x380   :  { %6465 = vmatmul.bf16.vlgmr.msra.gmra.mxu0 %v17653_v49  ;;  %v13003_v34 = vld [vmem:[#allocation10 + $0x938] sm:$0xf0]  ;;  %v12462_v49 = vor.u32 %v16394_v23, %v12459_v20  ;;  %v16718_v54 = vld [vmem:[#allocation10 + $0xef4] sm:$0xf0] }
 0x381   :  { %6509 = vmatpush.bf16.msrb.mxu0 %v13102_v27  ;;  %6445 = vmatpush.bf16.msrb.mxu3 %v13834_v21  ;;  %v16594_v14 = vld [vmem:[#allocation10 + $0xb1c] sm:$0xf]  ;;  %v13006_v58 = vor.u32 %v16530_v53, %v13003_v34  ;;  %v13738_v42 = vor.u32 %v16718_v54, %v13737_v61  ;;  %v13705_v50 = vld [vmem:[#allocation10 + $0xe98] sm:$0xf]  ;;  %v6232_v21 = vpop.f32.mrf.mxu2 }
 0x382   :  { %6478 = vmatmul.bf16.vlgmr.msra.gmra.mxu1 %v17655_v56  ;;  %v13259_v4 = vld [vmem:[#allocation10 + $0xb38] sm:$0xf0]  ;;  %v3158_v56 = vperm.slane %v17808_v29, 5  ;;  %v16710_v35 = vld [vmem:[#allocation10 + $0xeb4] sm:$0xf0] }
 0x383   :  { %6522 = vmatpush.bf16.msrb.mxu1 %v13358_v18  ;;  %6485 = vmatpush.bf16.msra.mxu2 %v12526_v6  ;;  %v16386_v8 = vld [vmem:[#allocation10 + $0x49c] sm:$0xf]  ;;  %v13262_v41 = vor.u32 %v16594_v14, %v13259_v4  ;;  %v6271_v18 = vpop.f32.mrf.mxu1  ;;  %v13706_v26 = vor.u32 %v16710_v35, %v13705_v50  ;;  %v13641_v34 = vld [vmem:[#allocation10 + $0xe18] sm:$0xf]  ;;  %v6260_v14 = vpop.f32.mrf.mxu0 }
 0x384   :  { %v12427_v40 = vld [vmem:[#allocation10 + $0x4b8] sm:$0xf0]  ;;  %v6259_v27 = vadd.f32 %v6258_v55, %v3158_v56  ;;  %v16811_v55 = vld [vmem:[#allocation13 + $0x1dc] sm:$0xf0] }
 0x385   :  { %6510 = vmatpush.bf16.msrb.mxu0 %v13070_v7  ;;  %6446 = vmatpush.bf16.msrb.mxu3 %v13802_v9  ;;  %v16522_v22 = vld [vmem:[#allocation10 + $0x8dc] sm:$0xf]  ;;  %v12430_v46 = vor.u32 %v16386_v8, %v12427_v40  ;;  %v13673_v7 = vld [vmem:[#allocation10 + $0xe58] sm:$0xf]  ;;  %v6194_v9 = vadd.f32 %v6193_v10, %v17827_v51  ;;  %v6195_v50 = vpop.f32.mrf.mxu3 }
 0x386   :  { %v12971_v43 = vld [vmem:[#allocation10 + $0x8f8] sm:$0xf0]  ;;  %v17837_v16 = vadd.f32 %v6271_v18, %v6259_v27  ;;  %v16694_v51 = vld [vmem:[#allocation10 + $0xe34] sm:$0xf0]  ;;  %v16875_v27 = vld [vmem:[#allocation13 + $0x3dc] sm:$0xf0] }
 0x387   :  { %6523 = vmatpush.bf16.msrb.mxu1 %v13326_v33  ;;  %6486 = vmatpush.bf16.msra.mxu2 %v12494_v12  ;;  %v16586_v62 = vld [vmem:[#allocation10 + $0xadc] sm:$0xf]  ;;  %v12974_v29 = vor.u32 %v16522_v22, %v12971_v43  ;;  %v16702_v33 = vld [vmem:[#allocation10 + $0xe74] sm:$0xf0]  ;;  %v6207_v39 = vadd.f32 %v17822_v44, %v6194_v9  ;;  %v13642_v22 = vor.u32 %v16694_v51, %v13641_v34  ;;  %v16867_v9 = vld [vmem:[#allocation13 + $0x39c] sm:$0xf0] }
 0x388   :  { %v13227_v59 = vld [vmem:[#allocation10 + $0xaf8] sm:$0xf0]  ;;  %v13674_v23 = vor.u32 %v16702_v33, %v13673_v7  ;;  %v14321_v7 = vld [vmem:[#allocation13 + $0x380] sm:$0xf] }
 0x389   :  { %6511 = vmatpush.bf16.msrb.mxu0 %v13038_v13  ;;  %6447 = vmatpush.bf16.msrb.mxu3 %v13770_v31  ;;  %v16378_v32 = vld [vmem:[#allocation10 + $0x45c] sm:$0xf]  ;;  %v13230_v19 = vor.u32 %v16586_v62, %v13227_v59  ;;  %v6220_v54 = vadd.f32 %v17824_v47, %v6207_v39  ;;  %v6234_v44 = vpop.f32.mrf.mxu2  ;;  %v14097_v47 = vld [vmem:[#allocation13 + $0x1c0] sm:$0xf] }
 0x38a   :  { %v12395_v57 = vld [vmem:[#allocation10 + $0x478] sm:$0xf0]  ;;  %v16851_v44 = vld [vmem:[#allocation13 + $0x31c] sm:$0xf0] }
 0x38b   :  { %6524 = vmatpush.bf16.msrb.mxu1 %v13294_v28  ;;  %6487 = vmatpush.bf16.msra.mxu2 %v12462_v49  ;;  %v16514_v1 = vld [vmem:[#allocation10 + $0x89c] sm:$0xf]  ;;  %v12398_v24 = vor.u32 %v16378_v32, %v12395_v57  ;;  %v6273_v8 = vpop.f32.mrf.mxu1  ;;  %v17842_v59 = vadd.f32 %v6232_v21, %v6220_v54  ;;  %v14353_v32 = vld [vmem:[#allocation13 + $0x3c0] sm:$0xf]  ;;  %v14098_v21 = vor.u32 %v16811_v55, %v14097_v47 }
 0x38c   :  { %v12939_v6 = vld [vmem:[#allocation10 + $0x8b8] sm:$0xf0]  ;;  %v16787_v54 = vld [vmem:[#allocation13 + $0x11c] sm:$0xf0] }
 0x38d   :  { %6512 = vmatpush.bf16.msrb.mxu0 %v13006_v58  ;;  %6448 = vmatpush.bf16.msrb.mxu3 %v13738_v42  ;;  %v16578_v5 = vld [vmem:[#allocation10 + $0xa9c] sm:$0xf]  ;;  %v12942_v11 = vor.u32 %v16514_v1, %v12939_v6  ;;  %v14257_v8 = vld [vmem:[#allocation13 + $0x300] sm:$0xf] }
 0x38e   :  { %v13195_v37 = vld [vmem:[#allocation10 + $0xab8] sm:$0xf0] }
 0x38f   :  { %6525 = vmatpush.bf16.msrb.mxu1 %v13262_v41  ;;  %6488 = vmatpush.bf16.msra.mxu2 %v12430_v46  ;;  %v16370_v38 = vld [vmem:[#allocation10 + $0x41c] sm:$0xf]  ;;  %v13198_v36 = vor.u32 %v16578_v5, %v13195_v37  ;;  %v14354_v5 = vor.u32 %v16875_v27, %v14353_v32  ;;  %v16803_v37 = vld [vmem:[#allocation13 + $0x19c] sm:$0xf0] }
 0x390   :  { %v12363_v63 = vld [vmem:[#allocation10 + $0x438] sm:$0xf0] }
 0x391   :  { %6513 = vmatpush.bf16.msrb.mxu0 %v12974_v29  ;;  %v16682_v12 = vld [vmem:[#allocation10 + $0xddc] sm:$0xf]  ;;  %6449 = vmatpush.bf16.msrb.mxu3 %v13706_v26  ;;  %v12366_v31 = vor.u32 %v16370_v38, %v12363_v63 }
 0x392   :  { %v13611_v17 = vld [vmem:[#allocation10 + $0xdf8] sm:$0xf0] }
 0x393   :  { %6526 = vmatpush.bf16.msrb.mxu1 %v13230_v19  ;;  %v16506_v20 = vld [vmem:[#allocation10 + $0x85c] sm:$0xf]  ;;  %6489 = vmatpush.bf16.msra.mxu2 %v12398_v24  ;;  %v13614_v49 = vor.u32 %v16682_v12, %v13611_v17  ;;  %v14065_v24 = vld [vmem:[#allocation13 + $0x180] sm:$0xf] }
 0x394   :  { %v12907_v13 = vld [vmem:[#allocation10 + $0x878] sm:$0xf0]  ;;  %v14066_v17 = vor.u32 %v16803_v37, %v14065_v24  ;;  %v16835_v37 = vld [vmem:[#allocation13 + $0x29c] sm:$0xf0] }
 0x395   :  { %v16570_v28 = vld [vmem:[#allocation10 + $0xa5c] sm:$0xf]  ;;  %6514 = vmatpush.bf16.msrb.mxu0 %v12942_v11  ;;  %v12910_v40 = vor.u32 %v16506_v20, %v12907_v13  ;;  %6450 = vmatpush.bf16.msrb.mxu3 %v13674_v23  ;;  %v16795_v23 = vld [vmem:[#allocation13 + $0x15c] sm:$0xf0] }
 0x396   :  { %v13163_v53 = vld [vmem:[#allocation10 + $0xa78] sm:$0xf0]  ;;  %v14289_v20 = vld [vmem:[#allocation13 + $0x340] sm:$0xf] }
 0x397   :  { %v16490_v4 = vld [vmem:[#allocation10 + $0x7dc] sm:$0xf]  ;;  %6527 = vmatpush.bf16.msrb.mxu1 %v13198_v36  ;;  %v13166_v42 = vor.u32 %v16570_v28, %v13163_v53  ;;  %6490 = vmatpush.bf16.msra.mxu2 %v12366_v31  ;;  %v14033_v36 = vld [vmem:[#allocation13 + $0x140] sm:$0xf] }
 0x398   :  { %v12843_v61 = vld [vmem:[#allocation10 + $0x7f8] sm:$0xf0]  ;;  %v16859_v28 = vld [vmem:[#allocation13 + $0x35c] sm:$0xf0]  ;;  %v14034_v14 = vor.u32 %v16795_v23, %v14033_v36 }
 0x399   :  { %v16498_v56 = vld [vmem:[#allocation10 + $0x81c] sm:$0xf]  ;;  %v12846_v35 = vor.u32 %v16490_v4, %v12843_v61  ;;  %6515 = vmatpush.bf16.msrb.mxu0 %v12910_v40  ;;  %6451 = vmatpush.bf16.msrb.mxu3 %v13642_v22  ;;  %v14001_v61 = vld [vmem:[#allocation13 + $0x100] sm:$0xf] }
 0x39a   :  { %v16674_v58 = vld [vmem:[#allocation10 + $0xd9c] sm:$0xf]  ;;  %6491 = vmatmul.bf16.vlgmr.msra.gmra.mxu2 %v17657_v2  ;;  %v14322_v2 = vor.u32 %v16867_v9, %v14321_v7  ;;  %v16763_v36 = vld [vmem:[#allocation13 + $0x5c] sm:$0xf0] }
 0x39b   :  { %v13579_v41 = vld [vmem:[#allocation10 + $0xdb8] sm:$0xf0]  ;;  %6535 = vmatpush.bf16.msrb.mxu2 %v13614_v49  ;;  %6528 = vmatpush.bf16.msrb.mxu1 %v13166_v42  ;;  %v14290_v49 = vor.u32 %v16859_v28, %v14289_v20  ;;  %v14258_v42 = vor.u32 %v16851_v44, %v14257_v8  ;;  %v17848_v32 = vpop.f32.mrf.mxu0  ;;  %v14161_v23 = vld [vmem:[#allocation13 + $0x240] sm:$0xf] }
 0x39c   :  { %v12875_v43 = vld [vmem:[#allocation10 + $0x838] sm:$0xf0]  ;;  %v13582_v57 = vor.u32 %v16674_v58, %v13579_v41  ;;  %6452 = vmatmul.bf16.vlgmr.msrb.gmra.mxu3 %v17704_v15  ;;  %v14577_v8 = vld [vmem:[#allocation13 + $0x580] sm:$0xf] }
 0x39d   :  { %v16562_v62 = vld [vmem:[#allocation10 + $0xa1c] sm:$0xf]  ;;  %v12878_v19 = vor.u32 %v16498_v56, %v12875_v43  ;;  %6496 = vmatpush.bf16.msra.mxu3 %v12846_v35  ;;  %v13969_v43 = vld [vmem:[#allocation13 + $0xc0] sm:$0xf] }
 0x39e   :  { %v13131_v46 = vld [vmem:[#allocation10 + $0xa38] sm:$0xf0]  ;;  %v16843_v35 = vld [vmem:[#allocation13 + $0x2dc] sm:$0xf0] }
 0x39f   :  { %v16482_v18 = vld [vmem:[#allocation10 + $0x79c] sm:$0xf]  ;;  %v13134_v6 = vor.u32 %v16562_v62, %v13131_v46  ;;  %6536 = vmatpush.bf16.msrb.mxu2 %v13582_v57  ;;  %6516 = vmatpush.bf16.msrb.mxu0 %v12878_v19  ;;  %v16779_v62 = vld [vmem:[#allocation13 + $0xdc] sm:$0xf0] }
 0x3a0   :  { %v12811_v29 = vld [vmem:[#allocation10 + $0x7b8] sm:$0xf0]  ;;  %v14225_v46 = vld [vmem:[#allocation13 + $0x2c0] sm:$0xf]  ;;  %v13970_v19 = vor.u32 %v16779_v62, %v13969_v43 }
 0x3a1   :  { %v16666_v26 = vld [vmem:[#allocation10 + $0xd5c] sm:$0xf]  ;;  %v12814_v10 = vor.u32 %v16482_v18, %v12811_v29  ;;  %6529 = vmatpush.bf16.msrb.mxu1 %v13134_v6  ;;  %v17850_v18 = vpop.f32.mrf.mxu1  ;;  %v17852_v29 = vpop.f32.mrf.mxu2  ;;  %v13937_v6 = vld [vmem:[#allocation13 + $0x80] sm:$0xf] }
 0x3a2   :  { %v13547_v1 = vld [vmem:[#allocation10 + $0xd78] sm:$0xf0]  ;;  %6517 = vmatmul.bf16.vlgmr.msrb.gmra.mxu0 %v17678_v30  ;;  %v17067_v43 = vld [vmem:[#allocation13 + $0x9dc] sm:$0xf0] }
 0x3a3   :  { %v13550_v33 = vor.u32 %v16666_v26, %v13547_v1  ;;  %v16474_v38 = vld [vmem:[#allocation10 + $0x75c] sm:$0xf]  ;;  %9683 = vmatpush.bf16.msra.mxu0 %v14098_v21  ;;  %6497 = vmatpush.bf16.msra.mxu3 %v12814_v10  ;;  %v14226_v26 = vor.u32 %v16843_v35, %v14225_v46  ;;  %v16771_v21 = vld [vmem:[#allocation13 + $0x9c] sm:$0xf0]  ;;  %v17854_v10 = vpop.f32.mrf.mxu3 }
 0x3a4   :  { %v12779_v63 = vld [vmem:[#allocation10 + $0x778] sm:$0xf0]  ;;  %6530 = vmatmul.bf16.vlgmr.msrb.gmra.mxu1 %v17683_v52  ;;  %v14002_v52 = vor.u32 %v16787_v54, %v14001_v61  ;;  %v13873_v54 = vld [vmem:[#allocation13] sm:$0xf] }
 0x3a5   :  { %v16658_v11 = vld [vmem:[#allocation10 + $0xd1c] sm:$0xf]  ;;  %9696 = vmatpush.bf16.msra.mxu1 %v14354_v5  ;;  %v12782_v39 = vor.u32 %v16474_v38, %v12779_v63  ;;  %6537 = vmatpush.bf16.msrb.mxu2 %v13550_v33  ;;  %v14193_v5 = vld [vmem:[#allocation13 + $0x280] sm:$0xf]  ;;  %v13938_v63 = vor.u32 %v16771_v21, %v13937_v6 }
 0x3a6   :  { %v13515_v12 = vld [vmem:[#allocation10 + $0xd38] sm:$0xf0]  ;;  %v15377_v62 = vld [vmem:[#allocation13 + $0xbc0] sm:$0xf] }
 0x3a7   :  { %v13518_v13 = vor.u32 %v16658_v11, %v13515_v12  ;;  %v16466_v31 = vld [vmem:[#allocation10 + $0x71c] sm:$0xf]  ;;  %9684 = vmatpush.bf16.msra.mxu0 %v14066_v17  ;;  %6498 = vmatpush.bf16.msra.mxu3 %v12782_v39  ;;  %v14609_v11 = vld [vmem:[#allocation13 + $0x5c0] sm:$0xf]  ;;  %v14194_v17 = vor.u32 %v16835_v37, %v14193_v5 }
 0x3a8   :  { %v12747_v53 = vld [vmem:[#allocation10 + $0x738] sm:$0xf0]  ;;  %v16939_v12 = vld [vmem:[#allocation13 + $0x5dc] sm:$0xf0] }
 0x3a9   :  { %v16650_v34 = vld [vmem:[#allocation10 + $0xcdc] sm:$0xf]  ;;  %9697 = vmatpush.bf16.msra.mxu1 %v14322_v2  ;;  %v12750_v4 = vor.u32 %v16466_v31, %v12747_v53  ;;  %6538 = vmatpush.bf16.msrb.mxu2 %v13518_v13  ;;  %v13905_v39 = vld [vmem:[#allocation13 + $0x40] sm:$0xf]  ;;  %v6312_v53 = vpop.f32.mrf.mxu0 }
 0x3aa   :  { %v13483_v51 = vld [vmem:[#allocation10 + $0xcf8] sm:$0xf0]  ;;  %v16827_v13 = vld [vmem:[#allocation13 + $0x25c] sm:$0xf0]  ;;  %v13906_v61 = vor.u32 %v16763_v36, %v13905_v39 }
 0x3ab   :  { %v13486_v30 = vor.u32 %v16650_v34, %v13483_v51  ;;  %v16458_v40 = vld [vmem:[#allocation10 + $0x6dc] sm:$0xf]  ;;  %9685 = vmatpush.bf16.msra.mxu0 %v14034_v14  ;;  %6499 = vmatpush.bf16.msra.mxu3 %v12750_v4  ;;  %v14610_v34 = vor.u32 %v16939_v12, %v14609_v11  ;;  %v6286_v4 = vpop.f32.mrf.mxu2  ;;  %v14162_v44 = vor.u32 %v16827_v13, %v14161_v23  ;;  %v17059_v37 = vld [vmem:[#allocation13 + $0x99c] sm:$0xf0] }
 0x3ac   :  { %v12715_v56 = vld [vmem:[#allocation10 + $0x6f8] sm:$0xf0]  ;;  %v15057_v39 = vld [vmem:[#allocation13 + $0x940] sm:$0xf] }
 0x3ad   :  { %v16642_v58 = vld [vmem:[#allocation10 + $0xc9c] sm:$0xf]  ;;  %9698 = vmatpush.bf16.msra.mxu1 %v14290_v49  ;;  %v12718_v22 = vor.u32 %v16458_v40, %v12715_v56  ;;  %6539 = vmatpush.bf16.msrb.mxu2 %v13486_v30  ;;  %v6325_v49 = vpop.f32.mrf.mxu1  ;;  %v16931_v30 = vld [vmem:[#allocation13 + $0x59c] sm:$0xf0] }
 0x3ae   :  { %v13451_v41 = vld [vmem:[#allocation10 + $0xcb8] sm:$0xf0]  ;;  %v16755_v56 = vld [vmem:[#allocation13 + $0x1c] sm:$0xf0]  ;;  %v14578_v46 = vor.u32 %v16931_v30, %v14577_v8 }
 0x3af   :  { %v13454_v50 = vor.u32 %v16642_v58, %v13451_v41  ;;  %v16450_v47 = vld [vmem:[#allocation10 + $0x69c] sm:$0xf]  ;;  %9686 = vmatpush.bf16.msra.mxu0 %v14002_v52  ;;  %6500 = vmatpush.bf16.msra.mxu3 %v12718_v22  ;;  %v14129_v58 = vld [vmem:[#allocation13 + $0x200] sm:$0xf]  ;;  %v6247_v52 = vpop.f32.mrf.mxu3 }
 0x3b0   :  { %v12683_v55 = vld [vmem:[#allocation10 + $0x6b8] sm:$0xf0]  ;;  %v16819_v41 = vld [vmem:[#allocation13 + $0x21c] sm:$0xf0] }
 0x3b1   :  { %v16634_v57 = vld [vmem:[#allocation10 + $0xc5c] sm:$0xf]  ;;  %9699 = vmatpush.bf16.msra.mxu1 %v14258_v42  ;;  %v12686_v1 = vor.u32 %v16450_v47, %v12683_v55  ;;  %6540 = vmatpush.bf16.msrb.mxu2 %v13454_v50  ;;  %v15121_v22 = vld [vmem:[#allocation13 + $0x9c0] sm:$0xf]  ;;  %v13874_v55 = vor.u32 %v16755_v56, %v13873_v54 }
 0x3b2   :  { %v13419_v27 = vld [vmem:[#allocation10 + $0xc78] sm:$0xf0]  ;;  %v17131_v50 = vld [vmem:[#allocation13 + $0xbdc] sm:$0xf0]  ;;  %v15122_v6 = vor.u32 %v17067_v43, %v15121_v22 }
 0x3b3   :  { %v13422_v24 = vor.u32 %v16634_v57, %v13419_v27  ;;  %v16442_v7 = vld [vmem:[#allocation10 + $0x65c] sm:$0xf]  ;;  %9687 = vmatpush.bf16.msra.mxu0 %v13970_v19  ;;  %6501 = vmatpush.bf16.msra.mxu3 %v12686_v1  ;;  %v14545_v57 = vld [vmem:[#allocation13 + $0x540] sm:$0xf]  ;;  %v6561_v19 = vmax.f32 %v17757_v0, 0.0  ;;  %v14130_v1 = vor.u32 %v16819_v41, %v14129_v58  ;;  %v15378_v21 = vor.u32 %v17131_v50, %v15377_v62  ;;  %v17866_v58 = vld [vmem:[#allocation12] sm:$0xff] }
 0x3b4   :  { %v12651_v33 = vld [vmem:[#allocation10 + $0x678] sm:$0xf0]  ;;  %v16923_v27 = vld [vmem:[#allocation13 + $0x55c] sm:$0xf0]  ;;  %v3159_v41 = vperm.slane %v17866_v58, 6 }
 0x3b5   :  { %v16626_v9 = vld [vmem:[#allocation10 + $0xc1c] sm:$0xf]  ;;  %9700 = vmatpush.bf16.msra.mxu1 %v14226_v26  ;;  %v12654_v2 = vor.u32 %v16442_v7, %v12651_v33  ;;  %6541 = vmatpush.bf16.msrb.mxu2 %v13422_v24  ;;  %v6562_v26 = vmax.f32 %v17776_v48, 0.0  ;;  %v15089_v24 = vld [vmem:[#allocation13 + $0x980] sm:$0xf]  ;;  %v14546_v33 = vor.u32 %v16923_v27, %v14545_v57  ;;  %v17860_v11 = vpack.c.bf16 %v6561_v19, %v6561_v19 }
 0x3b6   :  { %v13387_v38 = vld [vmem:[#allocation10 + $0xc38] sm:$0xf0]  ;;  %v15345_v7 = vld [vmem:[#allocation13 + $0xb80] sm:$0xf] }
 0x3b7   :  { %v13390_v20 = vor.u32 %v16626_v9, %v13387_v38  ;;  %v16434_v28 = vld [vmem:[#allocation10 + $0x61c] sm:$0xf]  ;;  %9688 = vmatpush.bf16.msra.mxu0 %v13938_v63  ;;  %6502 = vmatpush.bf16.msra.mxu3 %v12654_v2  ;;  %v17123_v9 = vld [vmem:[#allocation13 + $0xb9c] sm:$0xf0]  ;;  %v17862_v12 = vpack.c.bf16 %v6562_v26, %v6562_v26 }
 0x3b8   :  { %v12619_v31 = vld [vmem:[#allocation10 + $0x638] sm:$0xf0]  ;;  %v14513_v0 = vld [vmem:[#allocation13 + $0x500] sm:$0xf] }
 0x3b9   :  { %v16746_v51 = vld [vmem:[#allocation10 + $0xfdc] sm:$0xf]  ;;  %9701 = vmatpush.bf16.msra.mxu1 %v14194_v17  ;;  %v12622_v40 = vor.u32 %v16434_v28, %v12619_v31  ;;  %6542 = vmatpush.bf16.msrb.mxu2 %v13390_v20  ;;  %v16915_v48 = vld [vmem:[#allocation13 + $0x51c] sm:$0xf0]  ;;  %v15346_v17 = vor.u32 %v17123_v9, %v15345_v7 }
 0x3ba   :  { %v13867_v14 = vld [vmem:[#allocation10 + $0xff8] sm:$0xf0]  ;;  %v17051_v36 = vld [vmem:[#allocation13 + $0x95c] sm:$0xf0] }
 0x3bb   :  { %v13870_v42 = vor.u32 %v16746_v51, %v13867_v14  ;;  %v16738_v35 = vld [vmem:[#allocation10 + $0xf9c] sm:$0xf]  ;;  %9689 = vmatpush.bf16.msra.mxu0 %v13906_v61  ;;  %6503 = vmatpush.bf16.msra.mxu3 %v12622_v40  ;;  %v15313_v23 = vld [vmem:[#allocation13 + $0xb40] sm:$0xf]  ;;  %v6362_v57 = vpop.f32.mrf.mxu0 }
 0x3bc   :  { %v13835_v47 = vld [vmem:[#allocation10 + $0xfb8] sm:$0xf0]  ;;  %6543 = vmatmul.bf16.vlgmr.msrb.gmra.mxu2 %v17697_v25  ;;  %v15090_v25 = vor.u32 %v17059_v37, %v15089_v24  ;;  %v17115_v20 = vld [vmem:[#allocation13 + $0xb5c] sm:$0xf0]  ;;  %v6363_v26 = vadd.f32 %v6362_v57, %v3159_v41  ;;  %v16871_v57 = vld [vmem:[#allocation13 + $0x3c4] sm:$0xf] }
 0x3bd   :  { %9709 = vmatpush.bf16.msra.mxu2 %v14610_v34  ;;  %9702 = vmatpush.bf16.msra.mxu1 %v14162_v44  ;;  %v13838_v5 = vor.u32 %v16738_v35, %v13835_v47  ;;  %v16730_v38 = vld [vmem:[#allocation10 + $0xf5c] sm:$0xf]  ;;  %v14481_v31 = vld [vmem:[#allocation13 + $0x4c0] sm:$0xf]  ;;  %v15058_v34 = vor.u32 %v17051_v36, %v15057_v39  ;;  %v15314_v51 = vor.u32 %v17115_v20, %v15313_v23 }
 0x3be   :  { %v13803_v63 = vld [vmem:[#allocation10 + $0xf78] sm:$0xf0]  ;;  %6504 = vmatmul.bf16.vlgmr.msra.gmra.mxu3 %v17660_v60  ;;  %v14514_v60 = vor.u32 %v16915_v48, %v14513_v0  ;;  %v16907_v53 = vld [vmem:[#allocation13 + $0x4dc] sm:$0xf0] }
 0x3bf   :  { %6548 = vmatpush.bf16.msrb.mxu3 %v13870_v42  ;;  %9690 = vmatpush.bf16.msra.mxu0 %v13874_v55  ;;  %v13806_v2 = vor.u32 %v16730_v38, %v13803_v63  ;;  %v16722_v13 = vld [vmem:[#allocation10 + $0xf1c] sm:$0xf]  ;;  %v15025_v49 = vld [vmem:[#allocation13 + $0x900] sm:$0xf]  ;;  %v14482_v54 = vor.u32 %v16907_v53, %v14481_v31  ;;  %v17873_v38 = vpop.f32.mrf.mxu3 }
 0x3c0   :  { %v13771_v28 = vld [vmem:[#allocation10 + $0xf38] sm:$0xf0]  ;;  %v17043_v4 = vld [vmem:[#allocation13 + $0x91c] sm:$0xf0] }
 0x3c1   :  { %9710 = vmatpush.bf16.msra.mxu2 %v14578_v46  ;;  %9703 = vmatpush.bf16.msra.mxu1 %v14130_v1  ;;  %v13774_v14 = vor.u32 %v16722_v13, %v13771_v28  ;;  %v15281_v61 = vld [vmem:[#allocation13 + $0xb00] sm:$0xf]  ;;  %v16714_v30 = vld [vmem:[#allocation10 + $0xedc] sm:$0xf]  ;;  %v15026_v52 = vor.u32 %v17043_v4, %v15025_v49  ;;  %v6375_v1 = vpop.f32.mrf.mxu1  ;;  %v6563_v49 = vmax.f32 %v17802_v45, 0.0 }
 0x3c2   :  { %9691 = vmatmul.bf16.vlgmr.msra.gmra.mxu0 %v17860_v11  ;;  %v17107_v8 = vld [vmem:[#allocation13 + $0xb1c] sm:$0xf0]  ;;  %v13739_v44 = vld [vmem:[#allocation10 + $0xef8] sm:$0xf0]  ;;  %v17871_v9 = vadd.f32 %v6375_v1, %v6363_v26 }
 0x3c3   :  { %9735 = vmatpush.bf16.msrb.mxu0 %v15122_v6  ;;  %6549 = vmatpush.bf16.msrb.mxu3 %v13838_v5  ;;  %v14449_v40 = vld [vmem:[#allocation13 + $0x480] sm:$0xf]  ;;  %v15282_v42 = vor.u32 %v17107_v8, %v15281_v61  ;;  %v13742_v22 = vor.u32 %v16714_v30, %v13739_v44  ;;  %v16706_v47 = vld [vmem:[#allocation10 + $0xe9c] sm:$0xf]  ;;  %v17869_v6 = vpop.f32.mrf.mxu2  ;;  %v6364_v4 = vpop.f32.mrf.mxu0 }
 0x3c4   :  { %9704 = vmatmul.bf16.vlgmr.msra.gmra.mxu1 %v17862_v12  ;;  %v16899_v56 = vld [vmem:[#allocation13 + $0x49c] sm:$0xf0]  ;;  %v13707_v55 = vld [vmem:[#allocation10 + $0xeb8] sm:$0xf0] }
 0x3c5   :  { %9748 = vmatpush.bf16.msrb.mxu1 %v15378_v21  ;;  %9711 = vmatpush.bf16.msra.mxu2 %v14546_v33  ;;  %v14993_v43 = vld [vmem:[#allocation13 + $0x8c0] sm:$0xf]  ;;  %v14450_v50 = vor.u32 %v16899_v56, %v14449_v40  ;;  %v13710_v24 = vor.u32 %v16706_v47, %v13707_v55  ;;  %v16698_v48 = vld [vmem:[#allocation10 + $0xe5c] sm:$0xf]  ;;  %v16807_v47 = vld [vmem:[#allocation13 + $0x1c4] sm:$0xf] }
 0x3c6   :  { %v17035_v62 = vld [vmem:[#allocation13 + $0x8dc] sm:$0xf0]  ;;  %v14099_v55 = vld [vmem:[#allocation13 + $0x1e0] sm:$0xf0] }
 0x3c7   :  { %9736 = vmatpush.bf16.msrb.mxu0 %v15090_v25  ;;  %6550 = vmatpush.bf16.msrb.mxu3 %v13806_v2  ;;  %v15249_v46 = vld [vmem:[#allocation13 + $0xac0] sm:$0xf]  ;;  %v14994_v21 = vor.u32 %v17035_v62, %v14993_v43  ;;  %v13675_v25 = vld [vmem:[#allocation10 + $0xe78] sm:$0xf0] }
 0x3c8   :  { %v17099_v35 = vld [vmem:[#allocation13 + $0xadc] sm:$0xf0]  ;;  %v13678_v20 = vor.u32 %v16698_v48, %v13675_v25  ;;  %v14067_v48 = vld [vmem:[#allocation13 + $0x1a0] sm:$0xf0] }
 0x3c9   :  { %9749 = vmatpush.bf16.msrb.mxu1 %v15346_v17  ;;  %9712 = vmatpush.bf16.msra.mxu2 %v14514_v60  ;;  %v14417_v27 = vld [vmem:[#allocation13 + $0x440] sm:$0xf]  ;;  %v15250_v5 = vor.u32 %v17099_v35, %v15249_v46  ;;  %v6377_v30 = vpop.f32.mrf.mxu1  ;;  %v16863_v25 = vld [vmem:[#allocation13 + $0x384] sm:$0xf] }
 0x3ca   :  { %v16891_v19 = vld [vmem:[#allocation13 + $0x45c] sm:$0xf0] }
 0x3cb   :  { %9737 = vmatpush.bf16.msrb.mxu0 %v15058_v34  ;;  %6551 = vmatpush.bf16.msrb.mxu3 %v13774_v14  ;;  %v14961_v37 = vld [vmem:[#allocation13 + $0x880] sm:$0xf]  ;;  %v14418_v63 = vor.u32 %v16891_v19, %v14417_v27  ;;  %v13643_v14 = vld [vmem:[#allocation10 + $0xe38] sm:$0xf0]  ;;  %v6338_v44 = vpop.f32.mrf.mxu2  ;;  %v14355_v27 = vld [vmem:[#allocation13 + $0x3e0] sm:$0xf0] }
 0x3cc   :  { %v17027_v7 = vld [vmem:[#allocation13 + $0x89c] sm:$0xf0] }
 0x3cd   :  { %9750 = vmatpush.bf16.msrb.mxu1 %v15314_v51  ;;  %9713 = vmatpush.bf16.msra.mxu2 %v14482_v54  ;;  %v15217_v33 = vld [vmem:[#allocation13 + $0xa80] sm:$0xf]  ;;  %v14962_v39 = vor.u32 %v17027_v7, %v14961_v37  ;;  %v16690_v51 = vld [vmem:[#allocation10 + $0xe1c] sm:$0xf]  ;;  %v14102_v7 = vor.u32 %v16807_v47, %v14099_v55  ;;  %v16775_v47 = vld [vmem:[#allocation13 + $0xc4] sm:$0xf] }
 0x3ce   :  { %v17091_v0 = vld [vmem:[#allocation13 + $0xa9c] sm:$0xf0]  ;;  %v13646_v43 = vor.u32 %v16690_v51, %v13643_v14  ;;  %v16791_v51 = vld [vmem:[#allocation13 + $0x144] sm:$0xf] }
 0x3cf   :  { %9738 = vmatpush.bf16.msrb.mxu0 %v15026_v52  ;;  %6552 = vmatpush.bf16.msrb.mxu3 %v13742_v22  ;;  %v14385_v17 = vld [vmem:[#allocation13 + $0x400] sm:$0xf]  ;;  %v15218_v60 = vor.u32 %v17091_v0, %v15217_v33  ;;  %v14358_v33 = vor.u32 %v16871_v57, %v14355_v27  ;;  %v16799_v0 = vld [vmem:[#allocation13 + $0x184] sm:$0xf] }
 0x3d0   :  { %v16883_v2 = vld [vmem:[#allocation13 + $0x41c] sm:$0xf0]  ;;  %v14035_v14 = vld [vmem:[#allocation13 + $0x160] sm:$0xf0] }
 0x3d1   :  { %9751 = vmatpush.bf16.msrb.mxu1 %v15282_v42  ;;  %9714 = vmatpush.bf16.msra.mxu2 %v14450_v50  ;;  %v14929_v36 = vld [vmem:[#allocation13 + $0x840] sm:$0xf]  ;;  %v14386_v53 = vor.u32 %v16883_v2, %v14385_v17  ;;  %v6246_v42 = vadd.f32 %v17854_v10, %v17842_v59  ;;  %v6299_v50 = vpop.f32.mrf.mxu3  ;;  %v14323_v17 = vld [vmem:[#allocation13 + $0x3a0] sm:$0xf0] }
 0x3d2   :  { %v17019_v23 = vld [vmem:[#allocation13 + $0x85c] sm:$0xf0]  ;;  %v13971_v55 = vld [vmem:[#allocation13 + $0xe0] sm:$0xf0] }
 0x3d3   :  { %9739 = vmatpush.bf16.msrb.mxu0 %v14994_v21  ;;  %6553 = vmatpush.bf16.msrb.mxu3 %v13710_v24  ;;  %v15185_v13 = vld [vmem:[#allocation13 + $0xa40] sm:$0xf]  ;;  %v14930_v40 = vor.u32 %v17019_v23, %v14929_v36  ;;  %v17878_v21 = vpack.c.bf16 %v6563_v49, %v6563_v49  ;;  %v6565_v24 = vmax.f32 %v6246_v42, 0.0  ;;  %v6285_v23 = vadd.f32 %v17852_v29, %v17837_v16  ;;  %v16855_v49 = vld [vmem:[#allocation13 + $0x344] sm:$0xf] }
 0x3d4   :  { %v15633_v28 = vld [vmem:[#allocation13 + $0xdc0] sm:$0xf]  ;;  %v16839_v57 = vld [vmem:[#allocation13 + $0x2c4] sm:$0xf] }
 0x3d5   :  { %9752 = vmatpush.bf16.msrb.mxu1 %v15250_v5  ;;  %v17195_v31 = vld [vmem:[#allocation13 + $0xddc] sm:$0xf0]  ;;  %9715 = vmatpush.bf16.msra.mxu2 %v14418_v63  ;;  %v14227_v27 = vld [vmem:[#allocation13 + $0x2e0] sm:$0xf0] }
 0x3d6   :  { %v17083_v34 = vld [vmem:[#allocation13 + $0xa5c] sm:$0xf0]  ;;  %v15634_v8 = vor.u32 %v17195_v31, %v15633_v28  ;;  %v14070_v28 = vor.u32 %v16799_v0, %v14067_v48  ;;  %v6298_v31 = vadd.f32 %v17873_v38, %v6285_v23  ;;  %v16767_v0 = vld [vmem:[#allocation13 + $0x84] sm:$0xf] }
 0x3d7   :  { %v14865_v61 = vld [vmem:[#allocation13 + $0x7c0] sm:$0xf]  ;;  %9740 = vmatpush.bf16.msrb.mxu0 %v14962_v39  ;;  %6554 = vmatpush.bf16.msrb.mxu3 %v13678_v20  ;;  %v15186_v22 = vor.u32 %v17083_v34, %v15185_v13  ;;  %v17884_v13 = vpack.c.bf16 %v6565_v24, %v6565_v24  ;;  %v13974_v24 = vor.u32 %v16775_v47, %v13971_v55  ;;  %v13939_v48 = vld [vmem:[#allocation13 + $0xa0] sm:$0xf0] }
 0x3d8   :  { %v17003_v54 = vld [vmem:[#allocation13 + $0x7dc] sm:$0xf0]  ;;  %v6311_v38 = vadd.f32 %v17848_v32, %v6298_v31  ;;  %v13942_v31 = vor.u32 %v16767_v0, %v13939_v48  ;;  %v15123_v47 = vld [vmem:[#allocation13 + $0x9e0] sm:$0xf0] }
 0x3d9   :  { %v14897_v56 = vld [vmem:[#allocation13 + $0x800] sm:$0xf]  ;;  %9753 = vmatpush.bf16.msrb.mxu1 %v15218_v60  ;;  %9716 = vmatpush.bf16.msra.mxu2 %v14386_v53  ;;  %v14866_v35 = vor.u32 %v17003_v54, %v14865_v61  ;;  %v14326_v53 = vor.u32 %v16863_v25, %v14323_v17  ;;  %v16831_v25 = vld [vmem:[#allocation13 + $0x284] sm:$0xf] }
 0x3da   :  { %v17011_v41 = vld [vmem:[#allocation13 + $0x81c] sm:$0xf0]  ;;  %v15379_v55 = vld [vmem:[#allocation13 + $0xbe0] sm:$0xf0] }
 0x3db   :  { %v15153_v52 = vld [vmem:[#allocation13 + $0xa00] sm:$0xf]  ;;  %9741 = vmatpush.bf16.msrb.mxu0 %v14930_v40  ;;  %v14898_v59 = vor.u32 %v17011_v41, %v14897_v56  ;;  %6555 = vmatpush.bf16.msrb.mxu3 %v13646_v43  ;;  %v16783_v40 = vld [vmem:[#allocation13 + $0x104] sm:$0xf] }
 0x3dc   :  { %v17075_v62 = vld [vmem:[#allocation13 + $0xa1c] sm:$0xf0]  ;;  %9717 = vmatmul.bf16.vlgmr.msra.gmra.mxu2 %v17878_v21  ;;  %v14003_v56 = vld [vmem:[#allocation13 + $0x120] sm:$0xf0] }
 0x3dd   :  { %v15601_v45 = vld [vmem:[#allocation13 + $0xd80] sm:$0xf]  ;;  %9761 = vmatpush.bf16.msrb.mxu2 %v15634_v8  ;;  %9754 = vmatpush.bf16.msrb.mxu1 %v15186_v22  ;;  %v15154_v37 = vor.u32 %v17075_v62, %v15153_v52  ;;  %v14038_v8 = vor.u32 %v16791_v51, %v14035_v14  ;;  %v16847_v41 = vld [vmem:[#allocation13 + $0x304] sm:$0xf]  ;;  %v14006_v62 = vor.u32 %v16783_v40, %v14003_v56  ;;  %v6349_v17 = vpop.f32.mrf.mxu3 }
 0x3de   :  { %v17187_v46 = vld [vmem:[#allocation13 + $0xd9c] sm:$0xf0]  ;;  %6556 = vmatmul.bf16.vlgmr.msrb.gmra.mxu3 %v17704_v15  ;;  %v14291_v15 = vld [vmem:[#allocation13 + $0x360] sm:$0xf0] }
 0x3df   :  { %v14833_v19 = vld [vmem:[#allocation13 + $0x780] sm:$0xf]  ;;  %v15602_v1 = vor.u32 %v17187_v46, %v15601_v45  ;;  %9722 = vmatpush.bf16.msra.mxu3 %v14866_v35  ;;  %9742 = vmatpush.bf16.msrb.mxu0 %v14898_v59  ;;  %v14294_v30 = vor.u32 %v16855_v49, %v14291_v15  ;;  %v14259_v52 = vld [vmem:[#allocation13 + $0x320] sm:$0xf0]  ;;  %v6324_v35 = vadd.f32 %v17850_v18, %v6311_v38  ;;  %v17890_v59 = vpop.f32.mrf.mxu0 }
 0x3e0   :  { %v16995_v26 = vld [vmem:[#allocation13 + $0x79c] sm:$0xf0]  ;;  %v14262_v50 = vor.u32 %v16847_v41, %v14259_v52  ;;  %v14163_v15 = vld [vmem:[#allocation13 + $0x260] sm:$0xf0] }
 0x3e1   :  { %v15569_v10 = vld [vmem:[#allocation13 + $0xd40] sm:$0xf]  ;;  %v14834_v63 = vor.u32 %v16995_v26, %v14833_v19  ;;  %9762 = vmatpush.bf16.msrb.mxu2 %v15602_v1  ;;  %9755 = vmatpush.bf16.msrb.mxu1 %v15154_v37  ;;  %v6337_v18 = vadd.f32 %v17869_v6, %v6324_v35  ;;  %v16751_v52 = vld [vmem:[#allocation13 + $0x4] sm:$0xf] }
 0x3e2   :  { %v17179_v5 = vld [vmem:[#allocation13 + $0xd5c] sm:$0xf0]  ;;  %9743 = vmatmul.bf16.vlgmr.msrb.gmra.mxu0 %v17884_v13  ;;  %v17063_v35 = vld [vmem:[#allocation13 + $0x9c4] sm:$0xf] }
 0x3e3   :  { %v14801_v2 = vld [vmem:[#allocation13 + $0x740] sm:$0xf]  ;;  %v15570_v36 = vor.u32 %v17179_v5, %v15569_v10  ;;  %9787 = vmatpush.bf16.msra.mxu0 %v14102_v7  ;;  %9723 = vmatpush.bf16.msra.mxu3 %v14834_v63  ;;  %v17892_v10 = vpop.f32.mrf.mxu1  ;;  %v17894_v5 = vpop.f32.mrf.mxu2  ;;  %v15347_v0 = vld [vmem:[#allocation13 + $0xba0] sm:$0xf0] }
 0x3e4   :  { %v16987_v39 = vld [vmem:[#allocation13 + $0x75c] sm:$0xf0] }
 0x3e5   :  { %v15537_v60 = vld [vmem:[#allocation13 + $0xd00] sm:$0xf]  ;;  %9800 = vmatpush.bf16.msra.mxu1 %v14358_v33  ;;  %v14802_v34 = vor.u32 %v16987_v39, %v14801_v2  ;;  %9763 = vmatpush.bf16.msrb.mxu2 %v15570_v36  ;;  %v14230_v33 = vor.u32 %v16839_v57, %v14227_v27  ;;  %v14195_v2 = vld [vmem:[#allocation13 + $0x2a0] sm:$0xf0] }
 0x3e6   :  { %v17171_v20 = vld [vmem:[#allocation13 + $0xd1c] sm:$0xf0]  ;;  %v14198_v14 = vor.u32 %v16831_v25, %v14195_v2  ;;  %v14515_v2 = vld [vmem:[#allocation13 + $0x520] sm:$0xf0] }
 0x3e7   :  { %v14769_v16 = vld [vmem:[#allocation13 + $0x700] sm:$0xf]  ;;  %v15538_v4 = vor.u32 %v17171_v20, %v15537_v60  ;;  %9788 = vmatpush.bf16.msra.mxu0 %v14070_v28  ;;  %9724 = vmatpush.bf16.msra.mxu3 %v14802_v34  ;;  %v6350_v60 = vadd.f32 %v6349_v17, %v6337_v18  ;;  %v16759_v20 = vld [vmem:[#allocation13 + $0x44] sm:$0xf]  ;;  %v6416_v38 = vpop.f32.mrf.mxu0 }
 0x3e8   :  { %v16979_v29 = vld [vmem:[#allocation13 + $0x71c] sm:$0xf0]  ;;  %v13907_v28 = vld [vmem:[#allocation13 + $0x60] sm:$0xf0] }
 0x3e9   :  { %v15505_v61 = vld [vmem:[#allocation13 + $0xcc0] sm:$0xf]  ;;  %9801 = vmatpush.bf16.msra.mxu1 %v14326_v53  ;;  %v14770_v44 = vor.u32 %v16979_v29, %v14769_v16  ;;  %9764 = vmatpush.bf16.msrb.mxu2 %v15538_v4  ;;  %v16823_v53 = vld [vmem:[#allocation13 + $0x244] sm:$0xf]  ;;  %v6566_v6 = vmax.f32 %v6350_v60, 0.0  ;;  %v13910_v41 = vor.u32 %v16759_v20, %v13907_v28 }
 0x3ea   :  { %v17163_v54 = vld [vmem:[#allocation13 + $0xcdc] sm:$0xf0]  ;;  %v17055_v18 = vld [vmem:[#allocation13 + $0x984] sm:$0xf] }
 0x3eb   :  { %v14737_v42 = vld [vmem:[#allocation13 + $0x6c0] sm:$0xf]  ;;  %v15506_v43 = vor.u32 %v17163_v54, %v15505_v61  ;;  %9789 = vmatpush.bf16.msra.mxu0 %v14038_v8  ;;  %9725 = vmatpush.bf16.msra.mxu3 %v14770_v44  ;;  %v16935_v61 = vld [vmem:[#allocation13 + $0x5c4] sm:$0xf]  ;;  %v17897_v8 = vpack.c.bf16 %v6566_v6, %v6566_v6  ;;  %v6564_v44 = vmax.f32 %v17830_v3, 0.0  ;;  %v6429_v40 = vpop.f32.mrf.mxu1  ;;  %v6390_v56 = vpop.f32.mrf.mxu2 }
 0x3ec   :  { %v16971_v22 = vld [vmem:[#allocation13 + $0x6dc] sm:$0xf0]  ;;  %v14611_v54 = vld [vmem:[#allocation13 + $0x5e0] sm:$0xf0] }
 0x3ed   :  { %v15473_v45 = vld [vmem:[#allocation13 + $0xc80] sm:$0xf]  ;;  %9802 = vmatpush.bf16.msra.mxu1 %v14294_v30  ;;  %v14738_v32 = vor.u32 %v16971_v22, %v14737_v42  ;;  %9765 = vmatpush.bf16.msrb.mxu2 %v15506_v43  ;;  %v14614_v30 = vor.u32 %v16935_v61, %v14611_v54  ;;  %v13875_v42 = vld [vmem:[#allocation13 + $0x20] sm:$0xf0]  ;;  %v14166_v22 = vor.u32 %v16823_v53, %v14163_v15 }
 0x3ee   :  { %v17155_v46 = vld [vmem:[#allocation13 + $0xc9c] sm:$0xf0]  ;;  %9756 = vmatmul.bf16.vlgmr.msrb.gmra.mxu1 %v17897_v8  ;;  %v17127_v3 = vld [vmem:[#allocation13 + $0xbc4] sm:$0xf]  ;;  %v13878_v27 = vor.u32 %v16751_v52, %v13875_v42 }
 0x3ef   :  { %v14705_v19 = vld [vmem:[#allocation13 + $0x680] sm:$0xf]  ;;  %v15474_v1 = vor.u32 %v17155_v46, %v15473_v45  ;;  %9790 = vmatpush.bf16.msra.mxu0 %v14006_v62  ;;  %9726 = vmatpush.bf16.msra.mxu3 %v14738_v32  ;;  %v16815_v62 = vld [vmem:[#allocation13 + $0x204] sm:$0xf] }
 0x3f0   :  { %v16963_v26 = vld [vmem:[#allocation13 + $0x69c] sm:$0xf0]  ;;  %v16927_v45 = vld [vmem:[#allocation13 + $0x584] sm:$0xf] }
 0x3f1   :  { %v15441_v37 = vld [vmem:[#allocation13 + $0xc40] sm:$0xf]  ;;  %9803 = vmatpush.bf16.msra.mxu1 %v14262_v50  ;;  %v14706_v63 = vor.u32 %v16963_v26, %v14705_v19  ;;  %9766 = vmatpush.bf16.msrb.mxu2 %v15474_v1  ;;  %v14579_v46 = vld [vmem:[#allocation13 + $0x5a0] sm:$0xf0]  ;;  %v6351_v50 = vpop.f32.mrf.mxu3  ;;  %v15126_v26 = vor.u32 %v17063_v35, %v15123_v47 }
 0x3f2   :  { %v17147_v7 = vld [vmem:[#allocation13 + $0xc5c] sm:$0xf0]  ;;  %v14131_v32 = vld [vmem:[#allocation13 + $0x220] sm:$0xf0]  ;;  %v14582_v57 = vor.u32 %v16927_v45, %v14579_v46 }
 0x3f3   :  { %v14673_v39 = vld [vmem:[#allocation13 + $0x640] sm:$0xf]  ;;  %v15442_v23 = vor.u32 %v17147_v7, %v15441_v37  ;;  %9791 = vmatpush.bf16.msra.mxu0 %v13974_v24  ;;  %9727 = vmatpush.bf16.msra.mxu3 %v14706_v63  ;;  %v14134_v19 = vor.u32 %v16815_v62, %v14131_v32  ;;  %v16919_v1 = vld [vmem:[#allocation13 + $0x544] sm:$0xf]  ;;  %v17901_v37 = vpack.c.bf16 %v6564_v44, %v6564_v44 }
 0x3f4   :  { %v16955_v36 = vld [vmem:[#allocation13 + $0x65c] sm:$0xf0]  ;;  %v14547_v24 = vld [vmem:[#allocation13 + $0x560] sm:$0xf0]  ;;  %v15382_v7 = vor.u32 %v17127_v3, %v15379_v55 }
 0x3f5   :  { %v15409_v34 = vld [vmem:[#allocation13 + $0xc00] sm:$0xf]  ;;  %9804 = vmatpush.bf16.msra.mxu1 %v14230_v33  ;;  %v14674_v49 = vor.u32 %v16955_v36, %v14673_v39  ;;  %9767 = vmatpush.bf16.msrb.mxu2 %v15442_v23  ;;  %v15091_v33 = vld [vmem:[#allocation13 + $0x9a0] sm:$0xf0]  ;;  %v14550_v48 = vor.u32 %v16919_v1, %v14547_v24 }
 0x3f6   :  { %v17139_v51 = vld [vmem:[#allocation13 + $0xc1c] sm:$0xf0]  ;;  %v17119_v63 = vld [vmem:[#allocation13 + $0xb84] sm:$0xf]  ;;  %v15094_v25 = vor.u32 %v17055_v18, %v15091_v33 }
 0x3f7   :  { %v14641_v16 = vld [vmem:[#allocation13 + $0x600] sm:$0xf]  ;;  %v15410_v4 = vor.u32 %v17139_v51, %v15409_v34  ;;  %9792 = vmatpush.bf16.msra.mxu0 %v13942_v31  ;;  %9728 = vmatpush.bf16.msra.mxu3 %v14674_v49  ;;  %v16911_v17 = vld [vmem:[#allocation13 + $0x504] sm:$0xf]  ;;  %v15350_v39 = vor.u32 %v17119_v63, %v15347_v0 }
 0x3f8   :  { %v16947_v29 = vld [vmem:[#allocation13 + $0x61c] sm:$0xf0]  ;;  %v17047_v36 = vld [vmem:[#allocation13 + $0x944] sm:$0xf]  ;;  %v14518_v20 = vor.u32 %v16911_v17, %v14515_v2 }
 0x3f9   :  { %9805 = vmatpush.bf16.msra.mxu1 %v14198_v14  ;;  %v14642_v43 = vor.u32 %v16947_v29, %v14641_v16  ;;  %9768 = vmatpush.bf16.msrb.mxu2 %v15410_v4  ;;  %v15059_v23 = vld [vmem:[#allocation13 + $0x960] sm:$0xf0]  ;;  %v3160_v29 = vperm.slane %v17866_v58, 7  ;;  %v15889_v33 = vld [vmem:[#allocation13 + $0xfc0] sm:$0xf] }
 0x3fa   :  { %v17111_v60 = vld [vmem:[#allocation13 + $0xb44] sm:$0xf]  ;;  %v15062_v34 = vor.u32 %v17047_v36, %v15059_v23  ;;  %v17259_v63 = vld [vmem:[#allocation13 + $0xfdc] sm:$0xf0] }
 0x3fb   :  { %9793 = vmatpush.bf16.msra.mxu0 %v13910_v41  ;;  %9729 = vmatpush.bf16.msra.mxu3 %v14642_v43  ;;  %v15315_v28 = vld [vmem:[#allocation13 + $0xb60] sm:$0xf0]  ;;  %v15890_v17 = vor.u32 %v17259_v63, %v15889_v33  ;;  %v15729_v63 = vld [vmem:[#allocation13 + $0xe80] sm:$0xf] }
 0x3fc   :  { %v16903_v31 = vld [vmem:[#allocation13 + $0x4c4] sm:$0xf]  ;;  %v15318_v14 = vor.u32 %v17111_v60, %v15315_v28  ;;  %v17251_v28 = vld [vmem:[#allocation13 + $0xf9c] sm:$0xf0] }
 0x3fd   :  { %9813 = vmatpush.bf16.msra.mxu2 %v14614_v30  ;;  %9806 = vmatpush.bf16.msra.mxu1 %v14166_v22  ;;  %v14483_v53 = vld [vmem:[#allocation13 + $0x4e0] sm:$0xf0]  ;;  %v6466_v56 = vpop.f32.mrf.mxu0  ;;  %v17907_v43 = vpop.f32.mrf.mxu2 }
 0x3fe   :  { %9730 = vmatmul.bf16.vlgmr.msra.gmra.mxu3 %v17901_v37  ;;  %v17039_v51 = vld [vmem:[#allocation13 + $0x904] sm:$0xf]  ;;  %v14486_v49 = vor.u32 %v16903_v31, %v14483_v53  ;;  %v6467_v42 = vadd.f32 %v6466_v56, %v3160_v29  ;;  %v16876_v29 = vld [vmem:[#allocation13 + $0x3e4] sm:$0xf0] }
 0x3ff   :  { %9794 = vmatpush.bf16.msra.mxu0 %v13878_v27  ;;  %v15027_v6 = vld [vmem:[#allocation13 + $0x920] sm:$0xf0]  ;;  %v6479_v22 = vpop.f32.mrf.mxu1  ;;  %v17911_v35 = vpop.f32.mrf.mxu3  ;;  %9774 = vmatpush.bf16.msrb.mxu3 %v15890_v17  ;;  %v16780_v17 = vld [vmem:[#allocation13 + $0xe4] sm:$0xf0] }
 0x400   :  { %v17103_v15 = vld [vmem:[#allocation13 + $0xb04] sm:$0xf]  ;;  %v15030_v4 = vor.u32 %v17039_v51, %v15027_v6  ;;  %v17909_v32 = vadd.f32 %v6479_v22, %v6467_v42  ;;  %v16812_v51 = vld [vmem:[#allocation13 + $0x1e4] sm:$0xf0] }
 0x401   :  { %9814 = vmatpush.bf16.msra.mxu2 %v14582_v57  ;;  %9807 = vmatpush.bf16.msra.mxu1 %v14134_v19  ;;  %v15283_v16 = vld [vmem:[#allocation13 + $0xb20] sm:$0xf0]  ;;  %v16868_v42 = vld [vmem:[#allocation13 + $0x3a4] sm:$0xf0] }
 0x402   :  { %9795 = vmatmul.bf16.vlgmr.msra.gmra.mxu0 %v17860_v11  ;;  %v16895_v61 = vld [vmem:[#allocation13 + $0x484] sm:$0xf]  ;;  %v15286_v44 = vor.u32 %v17103_v15, %v15283_v16  ;;  %v14361_v16 = vld [vmem:[#allocation13 + $0x3c8] sm:$0xf] }
 0x403   :  { %9839 = vmatpush.bf16.msrb.mxu0 %v15126_v26  ;;  %v14451_v54 = vld [vmem:[#allocation13 + $0x4a0] sm:$0xf0]  ;;  %v14362_v56 = vor.u32 %v16876_v29, %v14361_v16  ;;  %v16836_v29 = vld [vmem:[#allocation13 + $0x2a4] sm:$0xf0] }
 0x404   :  { %9808 = vmatmul.bf16.vlgmr.msra.gmra.mxu1 %v17862_v12  ;;  %v17031_v38 = vld [vmem:[#allocation13 + $0x8c4] sm:$0xf]  ;;  %v14454_v40 = vor.u32 %v16895_v61, %v14451_v54  ;;  %v15825_v61 = vld [vmem:[#allocation13 + $0xf40] sm:$0xf] }
 0x405   :  { %9852 = vmatpush.bf16.msrb.mxu1 %v15382_v7  ;;  %9815 = vmatpush.bf16.msra.mxu2 %v14550_v48  ;;  %v14995_v30 = vld [vmem:[#allocation13 + $0x8e0] sm:$0xf0]  ;;  %v6468_v0 = vpop.f32.mrf.mxu0  ;;  %v17243_v54 = vld [vmem:[#allocation13 + $0xf5c] sm:$0xf0] }
 0x406   :  { %v17095_v41 = vld [vmem:[#allocation13 + $0xac4] sm:$0xf]  ;;  %v14998_v58 = vor.u32 %v17031_v38, %v14995_v30  ;;  %v14073_v30 = vld [vmem:[#allocation13 + $0x188] sm:$0xf]  ;;  %v17219_v0 = vld [vmem:[#allocation13 + $0xe9c] sm:$0xf0] }
 0x407   :  { %9840 = vmatpush.bf16.msrb.mxu0 %v15094_v25  ;;  %v15251_v52 = vld [vmem:[#allocation13 + $0xae0] sm:$0xf0]  ;;  %v6481_v2 = vpop.f32.mrf.mxu1  ;;  %v6403_v31 = vpop.f32.mrf.mxu3 }
 0x408   :  { %v16887_v62 = vld [vmem:[#allocation13 + $0x444] sm:$0xf]  ;;  %v15254_v47 = vor.u32 %v17095_v41, %v15251_v52  ;;  %v6389_v41 = vadd.f32 %v17894_v5, %v17871_v9  ;;  %v14329_v52 = vld [vmem:[#allocation13 + $0x388] sm:$0xf]  ;;  %v15761_v5 = vld [vmem:[#allocation13 + $0xec0] sm:$0xf]  ;;  %v15730_v2 = vor.u32 %v17219_v0, %v15729_v63 }
 0x409   :  { %9853 = vmatpush.bf16.msrb.mxu1 %v15350_v39  ;;  %9816 = vmatpush.bf16.msra.mxu2 %v14518_v20  ;;  %v14419_v45 = vld [vmem:[#allocation13 + $0x460] sm:$0xf0]  ;;  %v6442_v39 = vpop.f32.mrf.mxu2  ;;  %v15857_v20 = vld [vmem:[#allocation13 + $0xf80] sm:$0xf]  ;;  %v16860_v9 = vld [vmem:[#allocation13 + $0x364] sm:$0xf0] }
 0x40a   :  { %v17023_v46 = vld [vmem:[#allocation13 + $0x884] sm:$0xf]  ;;  %v14422_v3 = vor.u32 %v16887_v62, %v14419_v45  ;;  %v15858_v6 = vor.u32 %v17251_v28, %v15857_v20  ;;  %v17235_v62 = vld [vmem:[#allocation13 + $0xf1c] sm:$0xf0]  ;;  %v6402_v45 = vadd.f32 %v17911_v35, %v6389_v41  ;;  %v16788_v35 = vld [vmem:[#allocation13 + $0x124] sm:$0xf0] }
 0x40b   :  { %9841 = vmatpush.bf16.msrb.mxu0 %v15062_v34  ;;  %v14963_v50 = vld [vmem:[#allocation13 + $0x8a0] sm:$0xf0]  ;;  %v14105_v34 = vld [vmem:[#allocation13 + $0x1c8] sm:$0xf]  ;;  %v15697_v31 = vld [vmem:[#allocation13 + $0xe40] sm:$0xf] }
 0x40c   :  { %v17087_v55 = vld [vmem:[#allocation13 + $0xa84] sm:$0xf]  ;;  %v14966_v27 = vor.u32 %v17023_v46, %v14963_v50  ;;  %9775 = vmatpush.bf16.msrb.mxu3 %v15858_v6  ;;  %v14041_v46 = vld [vmem:[#allocation13 + $0x148] sm:$0xf] }
 0x40d   :  { %9854 = vmatpush.bf16.msrb.mxu1 %v15318_v14  ;;  %9817 = vmatpush.bf16.msra.mxu2 %v14486_v49  ;;  %v15219_v57 = vld [vmem:[#allocation13 + $0xaa0] sm:$0xf0]  ;;  %v16796_v50 = vld [vmem:[#allocation13 + $0x164] sm:$0xf0] }
 0x40e   :  { %v16879_v19 = vld [vmem:[#allocation13 + $0x404] sm:$0xf]  ;;  %v15222_v7 = vor.u32 %v17087_v55, %v15219_v57  ;;  %v14297_v55 = vld [vmem:[#allocation13 + $0x348] sm:$0xf]  ;;  %v17227_v57 = vld [vmem:[#allocation13 + $0xedc] sm:$0xf0] }
 0x40f   :  { %9842 = vmatpush.bf16.msrb.mxu0 %v15030_v4  ;;  %v14387_v26 = vld [vmem:[#allocation13 + $0x420] sm:$0xf0]  ;;  %v14106_v4 = vor.u32 %v16812_v51, %v14105_v34  ;;  %v13945_v34 = vld [vmem:[#allocation13 + $0x88] sm:$0xf] }
 0x410   :  { %v17015_v1 = vld [vmem:[#allocation13 + $0x844] sm:$0xf]  ;;  %v14390_v18 = vor.u32 %v16879_v19, %v14387_v26  ;;  %v6415_v19 = vadd.f32 %v17890_v59, %v6402_v45  ;;  %v14009_v26 = vld [vmem:[#allocation13 + $0x108] sm:$0xf] }
 0x411   :  { %9855 = vmatpush.bf16.msrb.mxu1 %v15286_v44  ;;  %9818 = vmatpush.bf16.msra.mxu2 %v14454_v40  ;;  %v14931_v24 = vld [vmem:[#allocation13 + $0x860] sm:$0xf0]  ;;  %v16804_v44 = vld [vmem:[#allocation13 + $0x1a4] sm:$0xf0]  ;;  %v15826_v40 = vor.u32 %v17243_v54, %v15825_v61  ;;  %v14010_v33 = vor.u32 %v16788_v35, %v14009_v26 }
 0x412   :  { %v17079_v48 = vld [vmem:[#allocation13 + $0xa44] sm:$0xf]  ;;  %v14934_v36 = vor.u32 %v17015_v1, %v14931_v24  ;;  %v14074_v22 = vor.u32 %v16804_v44, %v14073_v30  ;;  %v15762_v1 = vor.u32 %v17227_v57, %v15761_v5  ;;  %v14298_v24 = vor.u32 %v16860_v9, %v14297_v55  ;;  %v16772_v51 = vld [vmem:[#allocation13 + $0xa4] sm:$0xf0]  ;;  %v17203_v30 = vld [vmem:[#allocation13 + $0xe1c] sm:$0xf0] }
 0x413   :  { %9843 = vmatpush.bf16.msrb.mxu0 %v14998_v58  ;;  %v15187_v25 = vld [vmem:[#allocation13 + $0xa60] sm:$0xf0]  ;;  %9776 = vmatpush.bf16.msrb.mxu3 %v15826_v40  ;;  %v15793_v58 = vld [vmem:[#allocation13 + $0xf00] sm:$0xf]  ;;  %v13946_v54 = vor.u32 %v16772_v51, %v13945_v34  ;;  %v13913_v40 = vld [vmem:[#allocation13 + $0x48] sm:$0xf] }
 0x414   :  { %v17007_v23 = vld [vmem:[#allocation13 + $0x804] sm:$0xf]  ;;  %v15190_v53 = vor.u32 %v17079_v48, %v15187_v25  ;;  %v6428_v48 = vadd.f32 %v17892_v10, %v6415_v19  ;;  %v13977_v25 = vld [vmem:[#allocation13 + $0xc8] sm:$0xf] }
 0x415   :  { %9856 = vmatpush.bf16.msrb.mxu1 %v15254_v47  ;;  %9819 = vmatpush.bf16.msra.mxu2 %v14422_v3  ;;  %v14899_v60 = vld [vmem:[#allocation13 + $0x820] sm:$0xf0]  ;;  %v15794_v47 = vor.u32 %v17235_v62, %v15793_v58  ;;  %v14330_v3 = vor.u32 %v16868_v42, %v14329_v52  ;;  %v13978_v28 = vor.u32 %v16780_v17, %v13977_v25  ;;  %v14169_v42 = vld [vmem:[#allocation13 + $0x248] sm:$0xf] }
 0x416   :  { %v17071_v14 = vld [vmem:[#allocation13 + $0xa04] sm:$0xf]  ;;  %v14902_v15 = vor.u32 %v17007_v23, %v14899_v60  ;;  %v16844_v23 = vld [vmem:[#allocation13 + $0x2e4] sm:$0xf0]  ;;  %v6441_v10 = vadd.f32 %v17907_v43, %v6428_v48 }
 0x417   :  { %9844 = vmatpush.bf16.msrb.mxu0 %v14966_v27  ;;  %v15155_v49 = vld [vmem:[#allocation13 + $0xa20] sm:$0xf0]  ;;  %v14042_v27 = vor.u32 %v16796_v50, %v14041_v46  ;;  %9777 = vmatpush.bf16.msrb.mxu3 %v15794_v47  ;;  %v13881_v5 = vld [vmem:[#allocation13 + $0x8] sm:$0xf] }
 0x418   :  { %v15158_v38 = vor.u32 %v17071_v14, %v15155_v49  ;;  %v15635_v61 = vld [vmem:[#allocation13 + $0xde0] sm:$0xf0]  ;;  %v14137_v19 = vld [vmem:[#allocation13 + $0x208] sm:$0xf] }
 0x419   :  { %9857 = vmatpush.bf16.msrb.mxu1 %v15222_v7  ;;  %9820 = vmatpush.bf16.msra.mxu2 %v14390_v18  ;;  %v14265_v7 = vld [vmem:[#allocation13 + $0x308] sm:$0xf]  ;;  %v17183_v58 = vld [vmem:[#allocation13 + $0xd84] sm:$0xf] }
 0x41a   :  { %v16852_v18 = vld [vmem:[#allocation13 + $0x324] sm:$0xf0]  ;;  %v15603_v46 = vld [vmem:[#allocation13 + $0xda0] sm:$0xf0] }
 0x41b   :  { %9845 = vmatpush.bf16.msrb.mxu0 %v14934_v36  ;;  %9778 = vmatpush.bf16.msrb.mxu3 %v15762_v1  ;;  %v14266_v59 = vor.u32 %v16852_v18, %v14265_v7  ;;  %v14233_v36 = vld [vmem:[#allocation13 + $0x2c8] sm:$0xf]  ;;  %v16999_v50 = vld [vmem:[#allocation13 + $0x7c4] sm:$0xf] }
 0x41c   :  { %v14234_v49 = vor.u32 %v16844_v23, %v14233_v36  ;;  %v14867_v47 = vld [vmem:[#allocation13 + $0x7e0] sm:$0xf0]  ;;  %v15129_v7 = vld [vmem:[#allocation13 + $0x9c8] sm:$0xf] }
 0x41d   :  { %9858 = vmatpush.bf16.msrb.mxu1 %v15190_v53  ;;  %v17924_v20 = vpop.f32.mrf.mxu2  ;;  %v17211_v53 = vld [vmem:[#allocation13 + $0xe5c] sm:$0xf0]  ;;  %v14870_v57 = vor.u32 %v16999_v50, %v14867_v47  ;;  %v16991_v26 = vld [vmem:[#allocation13 + $0x784] sm:$0xf]  ;;  %v17068_v18 = vld [vmem:[#allocation13 + $0x9e4] sm:$0xf0] }
 0x41e   :  { %v15698_v6 = vor.u32 %v17211_v53, %v15697_v31  ;;  %v16820_v63 = vld [vmem:[#allocation13 + $0x224] sm:$0xf0]  ;;  %v17175_v0 = vld [vmem:[#allocation13 + $0xd44] sm:$0xf]  ;;  %v15130_v36 = vor.u32 %v17068_v18, %v15129_v7 }
 0x41f   :  { %9846 = vmatpush.bf16.msrb.mxu0 %v14902_v15  ;;  %v17920_v39 = vpop.f32.mrf.mxu0  ;;  %9779 = vmatpush.bf16.msrb.mxu3 %v15730_v2  ;;  %v6453_v14 = vpop.f32.mrf.mxu3  ;;  %v14201_v15 = vld [vmem:[#allocation13 + $0x288] sm:$0xf]  ;;  %v15571_v48 = vld [vmem:[#allocation13 + $0xd60] sm:$0xf0]  ;;  %v14138_v31 = vor.u32 %v16820_v63, %v14137_v19 }
 0x420   :  { %v6454_v16 = vadd.f32 %v6453_v14, %v6441_v10  ;;  %v14202_v41 = vor.u32 %v16836_v29, %v14201_v15  ;;  %v15385_v2 = vld [vmem:[#allocation13 + $0xbc8] sm:$0xf]  ;;  %v16983_v23 = vld [vmem:[#allocation13 + $0x744] sm:$0xf]  ;;  %v15574_v53 = vor.u32 %v17175_v0, %v15571_v48 }
 0x421   :  { %9859 = vmatpush.bf16.msrb.mxu1 %v15158_v38  ;;  %v17922_v60 = vpop.f32.mrf.mxu1  ;;  %v15665_v38 = vld [vmem:[#allocation13 + $0xe00] sm:$0xf]  ;;  %v15097_v10 = vld [vmem:[#allocation13 + $0x988] sm:$0xf]  ;;  %v15539_v14 = vld [vmem:[#allocation13 + $0xd20] sm:$0xf0] }
 0x422   :  { %9847 = vmatmul.bf16.vlgmr.msrb.gmra.mxu0 %v17884_v13  ;;  %v6567_v44 = vmax.f32 %v6454_v16, 0.0  ;;  %v15666_v43 = vor.u32 %v17203_v30, %v15665_v38  ;;  %v17060_v34 = vld [vmem:[#allocation13 + $0x9a4] sm:$0xf0]  ;;  %v17143_v63 = vld [vmem:[#allocation13 + $0xc44] sm:$0xf] }
 0x423   :  { %9891 = vmatpush.bf16.msra.mxu0 %v14106_v4  ;;  %v17191_v4 = vld [vmem:[#allocation13 + $0xdc4] sm:$0xf]  ;;  %9780 = vmatpush.bf16.msrb.mxu3 %v15698_v6  ;;  %v17124_v15 = vld [vmem:[#allocation13 + $0xba4] sm:$0xf0]  ;;  %v15098_v29 = vor.u32 %v17060_v34, %v15097_v10 }
 0x424   :  { %9860 = vmatmul.bf16.vlgmr.msrb.gmra.mxu1 %v17897_v8  ;;  %v15638_v52 = vor.u32 %v17191_v4, %v15635_v61  ;;  %v17927_v62 = vpack.c.bf16 %v6567_v44, %v6567_v44  ;;  %v17167_v6 = vld [vmem:[#allocation13 + $0xd04] sm:$0xf]  ;;  %v15065_v38 = vld [vmem:[#allocation13 + $0x948] sm:$0xf] }
 0x425   :  { %9904 = vmatpush.bf16.msra.mxu1 %v14362_v56  ;;  %v16764_v56 = vld [vmem:[#allocation13 + $0x64] sm:$0xf0]  ;;  %v6494_v55 = vpop.f32.mrf.mxu2  ;;  %v16975_v4 = vld [vmem:[#allocation13 + $0x704] sm:$0xf] }
 0x426   :  { %v13914_v9 = vor.u32 %v16764_v56, %v13913_v40  ;;  %9769 = vmatmul.bf16.vlgmr.msrb.gmra.mxu2 %v17927_v62  ;;  %v14771_v61 = vld [vmem:[#allocation13 + $0x720] sm:$0xf0]  ;;  %v17052_v30 = vld [vmem:[#allocation13 + $0x964] sm:$0xf0] }
 0x427   :  { %9892 = vmatpush.bf16.msra.mxu0 %v14074_v22  ;;  %v16828_v22 = vld [vmem:[#allocation13 + $0x264] sm:$0xf0]  ;;  %v6520_v45 = vpop.f32.mrf.mxu0  ;;  %9781 = vmatpush.bf16.msrb.mxu3 %v15666_v43  ;;  %v6455_v35 = vpop.f32.mrf.mxu3  ;;  %v17159_v40 = vld [vmem:[#allocation13 + $0xcc4] sm:$0xf] }
 0x428   :  { %9865 = vmatpush.bf16.msrb.mxu2 %v15638_v52  ;;  %v14170_v1 = vor.u32 %v16828_v22, %v14169_v42  ;;  %v15507_v56 = vld [vmem:[#allocation13 + $0xce0] sm:$0xf0]  ;;  %v15321_v43 = vld [vmem:[#allocation13 + $0xb48] sm:$0xf]  ;;  %v14774_v52 = vor.u32 %v16975_v4, %v14771_v61  ;;  %v15066_v42 = vor.u32 %v17052_v30, %v15065_v38 }
 0x429   :  { %9905 = vmatpush.bf16.msra.mxu1 %v14330_v3  ;;  %v6533_v3 = vpop.f32.mrf.mxu1  ;;  %v16967_v22 = vld [vmem:[#allocation13 + $0x6c4] sm:$0xf]  ;;  %v15510_v45 = vor.u32 %v17159_v40, %v15507_v56  ;;  %v15033_v50 = vld [vmem:[#allocation13 + $0x908] sm:$0xf] }
 0x42a   :  { %v17044_v47 = vld [vmem:[#allocation13 + $0x924] sm:$0xf0]  ;;  %v17151_v55 = vld [vmem:[#allocation13 + $0xc84] sm:$0xf] }
 0x42b   :  { %9893 = vmatpush.bf16.msra.mxu0 %v14042_v27  ;;  %v16756_v27 = vld [vmem:[#allocation13 + $0x24] sm:$0xf0]  ;;  %9826 = vmatpush.bf16.msra.mxu3 %v14870_v57  ;;  %v16959_v35 = vld [vmem:[#allocation13 + $0x684] sm:$0xf] }
 0x42c   :  { %v13882_v17 = vor.u32 %v16756_v27, %v13881_v5  ;;  %v15289_v5 = vld [vmem:[#allocation13 + $0xb08] sm:$0xf]  ;;  %v15443_v0 = vld [vmem:[#allocation13 + $0xc60] sm:$0xf0] }
 0x42d   :  { %9906 = vmatpush.bf16.msra.mxu1 %v14298_v24  ;;  %v15606_v24 = vor.u32 %v17183_v58, %v15603_v46  ;;  %v14739_v58 = vld [vmem:[#allocation13 + $0x6e0] sm:$0xf0]  ;;  %v17108_v57 = vld [vmem:[#allocation13 + $0xb24] sm:$0xf0]  ;;  %v15446_v10 = vor.u32 %v17143_v63, %v15443_v0 }
 0x42e   :  { %v17932_v46 = vld [vmem:[#allocation15] sm:$0xff]  ;;  %v14742_v27 = vor.u32 %v16967_v22, %v14739_v58  ;;  %v15001_v7 = vld [vmem:[#allocation13 + $0x8c8] sm:$0xf] }
 0x42f   :  { %9894 = vmatpush.bf16.msra.mxu0 %v14010_v33  ;;  %v14835_v33 = vld [vmem:[#allocation13 + $0x7a0] sm:$0xf0]  ;;  %9866 = vmatpush.bf16.msrb.mxu2 %v15606_v24  ;;  %v7107_v19 = vperm.slane %v17932_v46, 0  ;;  %v17036_v18 = vld [vmem:[#allocation13 + $0x8e4] sm:$0xf0] }
 0x430   :  { %v14838_v25 = vor.u32 %v16991_v26, %v14835_v33  ;;  %v15034_v26 = vor.u32 %v17044_v47, %v15033_v50  ;;  %v15290_v33 = vor.u32 %v17108_v57, %v15289_v5  ;;  %v14969_v34 = vld [vmem:[#allocation13 + $0x888] sm:$0xf]  ;;  %v14643_v40 = vld [vmem:[#allocation13 + $0x620] sm:$0xf0] }
 0x431   :  { %9907 = vmatpush.bf16.msra.mxu1 %v14266_v59  ;;  %v17132_v59 = vld [vmem:[#allocation13 + $0xbe4] sm:$0xf0] }
 0x432   :  { %v15386_v51 = vor.u32 %v17132_v59, %v15385_v2  ;;  %9827 = vmatpush.bf16.msra.mxu3 %v14838_v25  ;;  %v15257_v25 = vld [vmem:[#allocation13 + $0xac8] sm:$0xf] }
 0x433   :  { %9895 = vmatpush.bf16.msra.mxu0 %v13978_v28  ;;  %v14803_v28 = vld [vmem:[#allocation13 + $0x760] sm:$0xf0]  ;;  %9867 = vmatpush.bf16.msrb.mxu2 %v15574_v53  ;;  %v17092_v4 = vld [vmem:[#allocation13 + $0xaa4] sm:$0xf0] }
 0x434   :  { %v14806_v16 = vor.u32 %v16983_v23, %v14803_v28  ;;  %v15002_v28 = vor.u32 %v17036_v18, %v15001_v7  ;;  %v14675_v53 = vld [vmem:[#allocation13 + $0x660] sm:$0xf0]  ;;  %v14617_v61 = vld [vmem:[#allocation13 + $0x5c8] sm:$0xf]  ;;  %v14107_v7 = vld [vmem:[#allocation13 + $0x1e8] sm:$0xf0] }
 0x435   :  { %9908 = vmatpush.bf16.msra.mxu1 %v14234_v49  ;;  %v15353_v49 = vld [vmem:[#allocation13 + $0xb88] sm:$0xf] }
 0x436   :  { %v15354_v44 = vor.u32 %v17124_v15, %v15353_v49  ;;  %9828 = vmatpush.bf16.msra.mxu3 %v14806_v16  ;;  %9821 = vmatmul.bf16.vlgmr.msra.gmra.mxu2 %v17878_v21  ;;  %v17135_v15 = vld [vmem:[#allocation13 + $0xc04] sm:$0xf]  ;;  %v15193_v22 = vld [vmem:[#allocation13 + $0xa48] sm:$0xf] }
 0x437   :  { %9896 = vmatpush.bf16.msra.mxu0 %v13946_v54  ;;  %v15542_v54 = vor.u32 %v17167_v6, %v15539_v14  ;;  %v15411_v16 = vld [vmem:[#allocation13 + $0xc20] sm:$0xf0]  ;;  %v14585_v50 = vld [vmem:[#allocation13 + $0x588] sm:$0xf] }
 0x438   :  { %v15414_v56 = vor.u32 %v17135_v15, %v15411_v16  ;;  %v16932_v47 = vld [vmem:[#allocation13 + $0x5a4] sm:$0xf0] }
 0x439   :  { %9909 = vmatpush.bf16.msra.mxu1 %v14202_v41  ;;  %v17116_v41 = vld [vmem:[#allocation13 + $0xb64] sm:$0xf0]  ;;  %9868 = vmatpush.bf16.msrb.mxu2 %v15542_v54 }
 0x43a   :  { %v15322_v3 = vor.u32 %v17116_v41, %v15321_v43  ;;  %9829 = vmatpush.bf16.msra.mxu3 %v14774_v52  ;;  %v16940_v54 = vld [vmem:[#allocation13 + $0x5e4] sm:$0xf0] }
 0x43b   :  { %9897 = vmatpush.bf16.msra.mxu0 %v13914_v9  ;;  %v15475_v9 = vld [vmem:[#allocation13 + $0xca0] sm:$0xf0]  ;;  %v14937_v43 = vld [vmem:[#allocation13 + $0x848] sm:$0xf] }
 0x43c   :  { %v15478_v24 = vor.u32 %v17151_v55, %v15475_v9  ;;  %v17020_v41 = vld [vmem:[#allocation13 + $0x864] sm:$0xf0] }
 0x43d   :  { %9910 = vmatpush.bf16.msra.mxu1 %v14170_v1  ;;  %v14707_v1 = vld [vmem:[#allocation13 + $0x6a0] sm:$0xf0]  ;;  %9869 = vmatpush.bf16.msrb.mxu2 %v15510_v45  ;;  %v17084_v45 = vld [vmem:[#allocation13 + $0xa64] sm:$0xf0]  ;;  %v14938_v5 = vor.u32 %v17020_v41, %v14937_v43  ;;  %v14011_v43 = vld [vmem:[#allocation13 + $0x128] sm:$0xf0] }
 0x43e   :  { %9830 = vmatpush.bf16.msra.mxu3 %v14742_v27  ;;  %v14710_v2 = vor.u32 %v16959_v35, %v14707_v1  ;;  %v14905_v57 = vld [vmem:[#allocation13 + $0x808] sm:$0xf]  ;;  %v14586_v35 = vor.u32 %v16932_v47, %v14585_v50 }
 0x43f   :  { %9898 = vmatpush.bf16.msra.mxu0 %v13882_v17  ;;  %v9692_v48 = vpop.f32.mrf.mxu0  ;;  %v17100_v17 = vld [vmem:[#allocation13 + $0xae4] sm:$0xf0]  ;;  %v17936_v23 = vpop.f32.mrf.mxu2 }
 0x440   :  { %v9693_v59 = vadd.f32 %v9692_v48, %v7107_v19  ;;  %v15258_v49 = vor.u32 %v17100_v17, %v15257_v25  ;;  %v17012_v27 = vld [vmem:[#allocation13 + $0x824] sm:$0xf0]  ;;  %v16872_v48 = vld [vmem:[#allocation13 + $0x3cc] sm:$0xf] }
 0x441   :  { %9911 = vmatpush.bf16.msra.mxu1 %v14138_v31  ;;  %v16951_v31 = vld [vmem:[#allocation13 + $0x644] sm:$0xf]  ;;  %9870 = vmatpush.bf16.msrb.mxu2 %v15478_v24  ;;  %v17940_v14 = vpop.f32.mrf.mxu3  ;;  %v15161_v1 = vld [vmem:[#allocation13 + $0xa08] sm:$0xf]  ;;  %v16808_v24 = vld [vmem:[#allocation13 + $0x1cc] sm:$0xf]  ;;  %v14906_v0 = vor.u32 %v17012_v27, %v14905_v57 }
 0x442   :  { %9899 = vmatmul.bf16.vlgmr.msra.gmra.mxu0 %v17860_v11  ;;  %9831 = vmatpush.bf16.msra.mxu3 %v14710_v2  ;;  %v14678_v38 = vor.u32 %v16951_v31, %v14675_v53  ;;  %v17076_v18 = vld [vmem:[#allocation13 + $0xa24] sm:$0xf0]  ;;  %v14363_v25 = vld [vmem:[#allocation13 + $0x3e8] sm:$0xf0]  ;;  %v14110_v17 = vor.u32 %v16808_v24, %v14107_v7 }
 0x443   :  { %9943 = vmatpush.bf16.msrb.mxu0 %v15130_v36  ;;  %v9705_v36 = vpop.f32.mrf.mxu1  ;;  %v16924_v63 = vld [vmem:[#allocation13 + $0x564] sm:$0xf0]  ;;  %v15162_v2 = vor.u32 %v17076_v18, %v15161_v1  ;;  %v14366_v31 = vor.u32 %v16872_v48, %v14363_v25  ;;  %v16840_v27 = vld [vmem:[#allocation13 + $0x2cc] sm:$0xf] }
 0x444   :  { %9912 = vmatmul.bf16.vlgmr.msra.gmra.mxu1 %v17862_v12  ;;  %v17938_v6 = vadd.f32 %v9705_v36, %v9693_v59  ;;  %v16800_v36 = vld [vmem:[#allocation13 + $0x18c] sm:$0xf]  ;;  %v14521_v53 = vld [vmem:[#allocation13 + $0x508] sm:$0xf] }
 0x445   :  { %9956 = vmatpush.bf16.msrb.mxu1 %v15386_v51  ;;  %v17028_v51 = vld [vmem:[#allocation13 + $0x8a4] sm:$0xf0]  ;;  %9871 = vmatpush.bf16.msrb.mxu2 %v15446_v10  ;;  %v16768_v7 = vld [vmem:[#allocation13 + $0x8c] sm:$0xf] }
 0x446   :  { %v14970_v30 = vor.u32 %v17028_v51, %v14969_v34  ;;  %9832 = vmatpush.bf16.msra.mxu3 %v14678_v38  ;;  %v16916_v10 = vld [vmem:[#allocation13 + $0x524] sm:$0xf0]  ;;  %v6493_v34 = vadd.f32 %v17924_v20, %v17909_v32  ;;  %v16864_v51 = vld [vmem:[#allocation13 + $0x38c] sm:$0xf] }
 0x447   :  { %9944 = vmatpush.bf16.msrb.mxu0 %v15098_v29  ;;  %v15225_v29 = vld [vmem:[#allocation13 + $0xa88] sm:$0xf]  ;;  %v9694_v58 = vpop.f32.mrf.mxu0  ;;  %v6546_v9 = vpop.f32.mrf.mxu2  ;;  %v14299_v32 = vld [vmem:[#allocation13 + $0x368] sm:$0xf0] }
 0x448   :  { %v15226_v52 = vor.u32 %v17092_v4, %v15225_v29  ;;  %v6506_v16 = vadd.f32 %v17940_v14, %v6493_v34  ;;  %v14522_v29 = vor.u32 %v16916_v10, %v14521_v53  ;;  %v16792_v4 = vld [vmem:[#allocation13 + $0x14c] sm:$0xf]  ;;  %v14489_v38 = vld [vmem:[#allocation13 + $0x4c8] sm:$0xf] }
 0x449   :  { %9957 = vmatpush.bf16.msrb.mxu1 %v15354_v44  ;;  %v16943_v44 = vld [vmem:[#allocation13 + $0x604] sm:$0xf]  ;;  %9872 = vmatpush.bf16.msrb.mxu2 %v15414_v56  ;;  %v6507_v19 = vpop.f32.mrf.mxu3  ;;  %v16784_v56 = vld [vmem:[#allocation13 + $0x10c] sm:$0xf]  ;;  %v14425_v9 = vld [vmem:[#allocation13 + $0x448] sm:$0xf] }
 0x44a   :  { %v14267_v58 = vld [vmem:[#allocation13 + $0x328] sm:$0xf0]  ;;  %v16884_v48 = vld [vmem:[#allocation13 + $0x424] sm:$0xf0] }
 0x44b   :  { %9945 = vmatpush.bf16.msrb.mxu0 %v15066_v42  ;;  %v14618_v42 = vor.u32 %v16940_v54, %v14617_v61  ;;  %v9707_v55 = vpop.f32.mrf.mxu1  ;;  %v14043_v61 = vld [vmem:[#allocation13 + $0x168] sm:$0xf0] }
 0x44c   :  { %9873 = vmatmul.bf16.vlgmr.msrb.gmra.mxu2 %v17927_v62  ;;  %v14046_v20 = vor.u32 %v16792_v4, %v14043_v61  ;;  %v13979_v55 = vld [vmem:[#allocation13 + $0xe8] sm:$0xf0] }
 0x44d   :  { %9958 = vmatpush.bf16.msrb.mxu1 %v15322_v3  ;;  %v14646_v3 = vor.u32 %v16943_v44, %v14643_v40  ;;  %9917 = vmatpush.bf16.msra.mxu2 %v14618_v42  ;;  %v16856_v44 = vld [vmem:[#allocation13 + $0x34c] sm:$0xf]  ;;  %v6519_v40 = vadd.f32 %v17920_v39, %v6506_v16  ;;  %v16900_v42 = vld [vmem:[#allocation13 + $0x4a4] sm:$0xf0] }
 0x44e   :  { %v14302_v41 = vor.u32 %v16856_v44, %v14299_v32  ;;  %v14235_v19 = vld [vmem:[#allocation13 + $0x2e8] sm:$0xf0]  ;;  %v15609_v32 = vld [vmem:[#allocation13 + $0xd88] sm:$0xf] }
 0x44f   :  { %9946 = vmatpush.bf16.msrb.mxu0 %v15034_v26  ;;  %v15194_v26 = vor.u32 %v17084_v45, %v15193_v22  ;;  %9833 = vmatpush.bf16.msra.mxu3 %v14646_v3  ;;  %v16848_v22 = vld [vmem:[#allocation13 + $0x30c] sm:$0xf]  ;;  %v14014_v45 = vor.u32 %v16784_v56, %v14011_v43  ;;  %v6532_v47 = vadd.f32 %v17922_v60, %v6519_v40 }
 0x450   :  { %v16776_v3 = vld [vmem:[#allocation13 + $0xcc] sm:$0xf]  ;;  %v14270_v39 = vor.u32 %v16848_v22, %v14267_v58 }
 0x451   :  { %9959 = vmatpush.bf16.msrb.mxu1 %v15290_v33  ;;  %v14553_v33 = vld [vmem:[#allocation13 + $0x548] sm:$0xf]  ;;  %9918 = vmatpush.bf16.msra.mxu2 %v14586_v35  ;;  %v13982_v35 = vor.u32 %v16776_v3, %v13979_v55  ;;  %v6545_v24 = vadd.f32 %v17936_v23, %v6532_v47  ;;  %v13947_v18 = vld [vmem:[#allocation13 + $0xa8] sm:$0xf0]  ;;  %v15827_v47 = vld [vmem:[#allocation13 + $0xf60] sm:$0xf0] }
 0x452   :  { %v14554_v59 = vor.u32 %v16924_v63, %v14553_v33  ;;  %v14238_v63 = vor.u32 %v16840_v27, %v14235_v19  ;;  %v16832_v25 = vld [vmem:[#allocation13 + $0x28c] sm:$0xf]  ;;  %v15577_v3 = vld [vmem:[#allocation13 + $0xd48] sm:$0xf] }
 0x453   :  { %9947 = vmatpush.bf16.msrb.mxu0 %v15002_v28  ;;  %v14075_v28 = vld [vmem:[#allocation13 + $0x1a8] sm:$0xf0] }
 0x454   :  { %v14078_v15 = vor.u32 %v16800_v36, %v14075_v28  ;;  %v15891_v36 = vld [vmem:[#allocation13 + $0xfe0] sm:$0xf0]  ;;  %v13950_v28 = vor.u32 %v16768_v7, %v13947_v18  ;;  %v16760_v10 = vld [vmem:[#allocation13 + $0x4c] sm:$0xf] }
 0x455   :  { %9960 = vmatpush.bf16.msrb.mxu1 %v15258_v49  ;;  %v14331_v49 = vld [vmem:[#allocation13 + $0x3a8] sm:$0xf0]  ;;  %9919 = vmatpush.bf16.msra.mxu2 %v14554_v59  ;;  %v17255_v59 = vld [vmem:[#allocation13 + $0xfc4] sm:$0xf] }
 0x456   :  { %v14334_v54 = vor.u32 %v16864_v51, %v14331_v49  ;;  %v13915_v34 = vld [vmem:[#allocation13 + $0x68] sm:$0xf0]  ;;  %v15894_v49 = vor.u32 %v17255_v59, %v15891_v36  ;;  %v17231_v18 = vld [vmem:[#allocation13 + $0xf04] sm:$0xf] }
 0x457   :  { %9948 = vmatpush.bf16.msrb.mxu0 %v14970_v30  ;;  %v16908_v30 = vld [vmem:[#allocation13 + $0x4e4] sm:$0xf0]  ;;  %v14171_v61 = vld [vmem:[#allocation13 + $0x268] sm:$0xf0]  ;;  %v13918_v44 = vor.u32 %v16760_v10, %v13915_v34 }
 0x458   :  { %v14490_v14 = vor.u32 %v16908_v30, %v14489_v38  ;;  %v15859_v38 = vld [vmem:[#allocation13 + $0xfa0] sm:$0xf0]  ;;  %v16752_v40 = vld [vmem:[#allocation13 + $0xc] sm:$0xf]  ;;  %v15513_v10 = vld [vmem:[#allocation13 + $0xcc8] sm:$0xf] }
 0x459   :  { %9961 = vmatpush.bf16.msrb.mxu1 %v15226_v52  ;;  %9920 = vmatpush.bf16.msra.mxu2 %v14522_v29  ;;  %v14457_v52 = vld [vmem:[#allocation13 + $0x488] sm:$0xf]  ;;  %v16816_v56 = vld [vmem:[#allocation13 + $0x20c] sm:$0xf] }
 0x45a   :  { %v14458_v50 = vor.u32 %v16900_v42, %v14457_v52  ;;  %v14139_v42 = vld [vmem:[#allocation13 + $0x228] sm:$0xf0]  ;;  %v17164_v34 = vld [vmem:[#allocation13 + $0xce4] sm:$0xf0] }
 0x45b   :  { %9949 = vmatpush.bf16.msrb.mxu0 %v14938_v5  ;;  %v16892_v5 = vld [vmem:[#allocation13 + $0x464] sm:$0xf0]  ;;  %v17064_v22 = vld [vmem:[#allocation13 + $0x9cc] sm:$0xf]  ;;  %v14142_v19 = vor.u32 %v16816_v56, %v14139_v42 }
 0x45c   :  { %v14426_v60 = vor.u32 %v16892_v5, %v14425_v9  ;;  %v15131_v58 = vld [vmem:[#allocation13 + $0x9e8] sm:$0xf0] }
 0x45d   :  { %9962 = vmatpush.bf16.msrb.mxu1 %v15194_v26  ;;  %9921 = vmatpush.bf16.msra.mxu2 %v14490_v14  ;;  %v13883_v14 = vld [vmem:[#allocation13 + $0x28] sm:$0xf0]  ;;  %v15134_v27 = vor.u32 %v17064_v22, %v15131_v58 }
 0x45e   :  { %v13886_v55 = vor.u32 %v16752_v40, %v13883_v14  ;;  %v17128_v9 = vld [vmem:[#allocation13 + $0xbcc] sm:$0xf] }
 0x45f   :  { %9950 = vmatpush.bf16.msrb.mxu0 %v14906_v0  ;;  %v17950_v57 = vpop.f32.mrf.mxu0  ;;  %v9718_v26 = vpop.f32.mrf.mxu2  ;;  %v14393_v0 = vld [vmem:[#allocation13 + $0x408] sm:$0xf]  ;;  %v15387_v5 = vld [vmem:[#allocation13 + $0xbe8] sm:$0xf0] }
 0x460   :  { %v17953_v1 = vadd.f32 %v9718_v26, %v17938_v6  ;;  %v15641_v6 = vld [vmem:[#allocation13 + $0xdc8] sm:$0xf]  ;;  %v14394_v23 = vor.u32 %v16884_v48, %v14393_v0  ;;  %v15390_v7 = vor.u32 %v17128_v9, %v15387_v5  ;;  %v17120_v48 = vld [vmem:[#allocation13 + $0xb8c] sm:$0xf]  ;;  %v7108_v5 = vperm.slane %v17932_v46, 1 }
 0x461   :  { %9963 = vmatpush.bf16.msrb.mxu1 %v15162_v2  ;;  %9922 = vmatpush.bf16.msra.mxu2 %v14458_v50  ;;  %v6557_v33 = vpop.f32.mrf.mxu3  ;;  %v14203_v2 = vld [vmem:[#allocation13 + $0x2a8] sm:$0xf0]  ;;  %v17239_v50 = vld [vmem:[#allocation13 + $0xf44] sm:$0xf]  ;;  %v17172_v0 = vld [vmem:[#allocation13 + $0xd24] sm:$0xf0] }
 0x462   :  { %9951 = vmatmul.bf16.vlgmr.msrb.gmra.mxu0 %v17884_v13  ;;  %v14206_v51 = vor.u32 %v16832_v25, %v14203_v2  ;;  %v15830_v26 = vor.u32 %v17239_v50, %v15827_v47  ;;  %v15355_v25 = vld [vmem:[#allocation13 + $0xba8] sm:$0xf0]  ;;  %v15699_v50 = vld [vmem:[#allocation13 + $0xe60] sm:$0xf0]  ;;  %v15449_v47 = vld [vmem:[#allocation13 + $0xc48] sm:$0xf] }
 0x463   :  { %9995 = vmatpush.bf16.msra.mxu0 %v14110_v17  ;;  %v6558_v17 = vadd.f32 %v6557_v33, %v6545_v24  ;;  %v15099_v24 = vld [vmem:[#allocation13 + $0x9a8] sm:$0xf0]  ;;  %v15795_v33 = vld [vmem:[#allocation13 + $0xf20] sm:$0xf0]  ;;  %v14873_v46 = vld [vmem:[#allocation13 + $0x7c8] sm:$0xf] }
 0x464   :  { %9964 = vmatmul.bf16.vlgmr.msrb.gmra.mxu1 %v17897_v8  ;;  %v15798_v2 = vor.u32 %v17231_v18, %v15795_v33  ;;  %v17048_v59 = vld [vmem:[#allocation13 + $0x94c] sm:$0xf]  ;;  %v15667_v33 = vld [vmem:[#allocation13 + $0xe20] sm:$0xf0] }
 0x465   :  { %10008 = vmatpush.bf16.msra.mxu1 %v14366_v31  ;;  %v17196_v31 = vld [vmem:[#allocation13 + $0xde4] sm:$0xf0]  ;;  %v6568_v53 = vmax.f32 %v6558_v17, 0.0  ;;  %9923 = vmatpush.bf16.msra.mxu2 %v14426_v60  ;;  %v15067_v36 = vld [vmem:[#allocation13 + $0x968] sm:$0xf0] }
 0x466   :  { %v15642_v4 = vor.u32 %v17196_v31, %v15641_v6  ;;  %v15358_v31 = vor.u32 %v17120_v48, %v15355_v25  ;;  %v17104_v40 = vld [vmem:[#allocation13 + $0xb0c] sm:$0xf] }
 0x467   :  { %9996 = vmatpush.bf16.msra.mxu0 %v14078_v15  ;;  %v16824_v15 = vld [vmem:[#allocation13 + $0x24c] sm:$0xf]  ;;  %v17956_v16 = vpack.c.bf16 %v6568_v53, %v6568_v53  ;;  %v9746_v29 = vpop.f32.mrf.mxu0  ;;  %v9720_v30 = vpop.f32.mrf.mxu2  ;;  %v17223_v53 = vld [vmem:[#allocation13 + $0xec4] sm:$0xf] }
 0x468   :  { %v17215_v30 = vld [vmem:[#allocation13 + $0xe84] sm:$0xf]  ;;  %v15291_v14 = vld [vmem:[#allocation13 + $0xb28] sm:$0xf0] }
 0x469   :  { %10009 = vmatpush.bf16.msra.mxu1 %v14334_v54  ;;  %v17247_v54 = vld [vmem:[#allocation13 + $0xf84] sm:$0xf]  ;;  %9924 = vmatpush.bf16.msra.mxu2 %v14394_v23  ;;  %v6559_v43 = vpop.f32.mrf.mxu3  ;;  %v15294_v58 = vor.u32 %v17104_v40, %v15291_v14  ;;  %v15259_v9 = vld [vmem:[#allocation13 + $0xae8] sm:$0xf0] }
 0x46a   :  { %9782 = vmatmul.bf16.vlgmr.msrb.gmra.mxu3 %v17956_v16  ;;  %v15862_v52 = vor.u32 %v17247_v54, %v15859_v38  ;;  %v15763_v23 = vld [vmem:[#allocation13 + $0xee0] sm:$0xf0]  ;;  %v15514_v54 = vor.u32 %v17164_v34, %v15513_v10  ;;  %v17088_v25 = vld [vmem:[#allocation13 + $0xa8c] sm:$0xf] }
 0x46b   :  { %9997 = vmatpush.bf16.msra.mxu0 %v14046_v20  ;;  %v17188_v20 = vld [vmem:[#allocation13 + $0xda4] sm:$0xf0]  ;;  %9878 = vmatpush.bf16.msrb.mxu3 %v15894_v49  ;;  %v15323_v49 = vld [vmem:[#allocation13 + $0xb68] sm:$0xf0]  ;;  %v15766_v29 = vor.u32 %v17223_v53, %v15763_v23 }
 0x46c   :  { %9925 = vmatmul.bf16.vlgmr.msra.gmra.mxu2 %v17878_v21  ;;  %v17016_v10 = vld [vmem:[#allocation13 + $0x84c] sm:$0xf] }
 0x46d   :  { %10010 = vmatpush.bf16.msra.mxu1 %v14302_v41  ;;  %v14174_v41 = vor.u32 %v16824_v15, %v14171_v61  ;;  %9969 = vmatpush.bf16.msrb.mxu2 %v15642_v4  ;;  %v15070_v15 = vor.u32 %v17048_v59, %v15067_v36  ;;  %v17040_v4 = vld [vmem:[#allocation13 + $0x90c] sm:$0xf]  ;;  %v17004_v59 = vld [vmem:[#allocation13 + $0x7e4] sm:$0xf0] }
 0x46e   :  { %v15035_v61 = vld [vmem:[#allocation13 + $0x928] sm:$0xf0] }
 0x46f   :  { %9998 = vmatpush.bf16.msra.mxu0 %v14014_v45  ;;  %v15610_v45 = vor.u32 %v17188_v20, %v15609_v32  ;;  %9879 = vmatpush.bf16.msrb.mxu3 %v15862_v52  ;;  %v15481_v32 = vld [vmem:[#allocation13 + $0xc88] sm:$0xf]  ;;  %v15038_v56 = vor.u32 %v17040_v4, %v15035_v61  ;;  %v15003_v52 = vld [vmem:[#allocation13 + $0x8e8] sm:$0xf0]  ;;  %v14874_v4 = vor.u32 %v17004_v59, %v14873_v46  ;;  %v16869_v46 = vld [vmem:[#allocation13 + $0x3ac] sm:$0xf0] }
 0x470   :  { %v17156_v20 = vld [vmem:[#allocation13 + $0xca4] sm:$0xf0]  ;;  %v16936_v36 = vld [vmem:[#allocation13 + $0x5cc] sm:$0xf]  ;;  %v16797_v59 = vld [vmem:[#allocation13 + $0x16c] sm:$0xf0] }
 0x471   :  { %10011 = vmatpush.bf16.msra.mxu1 %v14270_v39  ;;  %v17180_v39 = vld [vmem:[#allocation13 + $0xd64] sm:$0xf0]  ;;  %9970 = vmatpush.bf16.msrb.mxu2 %v15610_v45  ;;  %v15482_v22 = vor.u32 %v17156_v20, %v15481_v32  ;;  %v17207_v45 = vld [vmem:[#allocation13 + $0xe44] sm:$0xf]  ;;  %v14939_v34 = vld [vmem:[#allocation13 + $0x868] sm:$0xf0] }
 0x472   :  { %v15578_v60 = vor.u32 %v17180_v39, %v15577_v3  ;;  %v17096_v39 = vld [vmem:[#allocation13 + $0xacc] sm:$0xf]  ;;  %v16996_v32 = vld [vmem:[#allocation13 + $0x7a4] sm:$0xf0] }
 0x473   :  { %9999 = vmatpush.bf16.msra.mxu0 %v13982_v35  ;;  %v17056_v35 = vld [vmem:[#allocation13 + $0x98c] sm:$0xf]  ;;  %9880 = vmatpush.bf16.msrb.mxu3 %v15830_v26  ;;  %v17199_v26 = vld [vmem:[#allocation13 + $0xe04] sm:$0xf]  ;;  %v15262_v18 = vor.u32 %v17096_v39, %v15259_v9 }
 0x474   :  { %v15102_v17 = vor.u32 %v17056_v35, %v15099_v24  ;;  %v17024_v35 = vld [vmem:[#allocation13 + $0x88c] sm:$0xf]  ;;  %v15670_v23 = vor.u32 %v17199_v26, %v15667_v33 }
 0x475   :  { %10012 = vmatpush.bf16.msra.mxu1 %v14238_v63  ;;  %v15545_v63 = vld [vmem:[#allocation13 + $0xd08] sm:$0xf]  ;;  %9971 = vmatpush.bf16.msrb.mxu2 %v15578_v60  ;;  %v14971_v24 = vld [vmem:[#allocation13 + $0x8a8] sm:$0xf0] }
 0x476   :  { %v15546_v6 = vor.u32 %v17172_v0, %v15545_v63  ;;  %v15417_v63 = vld [vmem:[#allocation13 + $0xc08] sm:$0xf]  ;;  %v16928_v20 = vld [vmem:[#allocation13 + $0x58c] sm:$0xf] }
 0x477   :  { %10000 = vmatpush.bf16.msra.mxu0 %v13950_v28  ;;  %v17960_v28 = vpop.f32.mrf.mxu1  ;;  %9881 = vmatpush.bf16.msrb.mxu3 %v15798_v2  ;;  %v17140_v0 = vld [vmem:[#allocation13 + $0xc24] sm:$0xf0]  ;;  %v14974_v2 = vor.u32 %v17024_v35, %v14971_v24  ;;  %v14587_v40 = vld [vmem:[#allocation13 + $0x5a8] sm:$0xf0]  ;;  %v14081_v35 = vld [vmem:[#allocation13 + $0x190] sm:$0xf] }
 0x478   :  { %v17008_v14 = vld [vmem:[#allocation13 + $0x80c] sm:$0xf]  ;;  %v16805_v24 = vld [vmem:[#allocation13 + $0x1ac] sm:$0xf0] }
 0x479   :  { %10013 = vmatpush.bf16.msra.mxu1 %v14206_v51  ;;  %v17112_v51 = vld [vmem:[#allocation13 + $0xb4c] sm:$0xf]  ;;  %9972 = vmatpush.bf16.msrb.mxu2 %v15546_v6 }
 0x47a   :  { %v15326_v38 = vor.u32 %v17112_v51, %v15323_v49  ;;  %9834 = vmatmul.bf16.vlgmr.msra.gmra.mxu3 %v17901_v37  ;;  %v14619_v6 = vld [vmem:[#allocation13 + $0x5e8] sm:$0xf0]  ;;  %v15418_v49 = vor.u32 %v17140_v0, %v15417_v63  ;;  %v16980_v63 = vld [vmem:[#allocation13 + $0x724] sm:$0xf0] }
 0x47b   :  { %10001 = vmatpush.bf16.msra.mxu0 %v13918_v44  ;;  %v15731_v44 = vld [vmem:[#allocation13 + $0xea0] sm:$0xf0]  ;;  %9882 = vmatpush.bf16.msrb.mxu3 %v15766_v29  ;;  %v14622_v61 = vor.u32 %v16936_v36, %v14619_v6  ;;  %v14555_v39 = vld [vmem:[#allocation13 + $0x568] sm:$0xf0] }
 0x47c   :  { %v15734_v43 = vor.u32 %v17215_v30, %v15731_v44  ;;  %v14841_v30 = vld [vmem:[#allocation13 + $0x788] sm:$0xf]  ;;  %v16912_v0 = vld [vmem:[#allocation13 + $0x50c] sm:$0xf] }
 0x47d   :  { %10014 = vmatpush.bf16.msra.mxu1 %v14174_v41  ;;  %v17032_v41 = vld [vmem:[#allocation13 + $0x8cc] sm:$0xf]  ;;  %9973 = vmatpush.bf16.msrb.mxu2 %v15514_v54 }
 0x47e   :  { %v17080_v54 = vld [vmem:[#allocation13 + $0xa4c] sm:$0xf] }
 0x47f   :  { %10002 = vmatpush.bf16.msra.mxu0 %v13886_v55  ;;  %v9759_v42 = vpop.f32.mrf.mxu1  ;;  %v9796_v3 = vpop.f32.mrf.mxu0  ;;  %v17148_v55 = vld [vmem:[#allocation13 + $0xc64] sm:$0xf0]  ;;  %9883 = vmatpush.bf16.msrb.mxu3 %v15734_v43 }
 0x480   :  { %v16813_v42 = vld [vmem:[#allocation13 + $0x1ec] sm:$0xf0] }
 0x481   :  { %10015 = vmatpush.bf16.msra.mxu1 %v14142_v19  ;;  %v15702_v19 = vor.u32 %v17207_v45, %v15699_v50  ;;  %9974 = vmatpush.bf16.msrb.mxu2 %v15482_v22  ;;  %v9731_v60 = vpop.f32.mrf.mxu3  ;;  %v14842_v22 = vor.u32 %v16996_v32, %v14841_v30  ;;  %v15163_v45 = vld [vmem:[#allocation13 + $0xa28] sm:$0xf0]  ;;  %v14809_v50 = vld [vmem:[#allocation13 + $0x748] sm:$0xf] }
 0x482   :  { %10003 = vmatmul.bf16.vlgmr.msra.gmra.mxu0 %v17860_v11  ;;  %v9732_v48 = vadd.f32 %v9731_v60, %v17953_v1  ;;  %v16896_v32 = vld [vmem:[#allocation13 + $0x48c] sm:$0xf] }
 0x483   :  { %10047 = vmatpush.bf16.msrb.mxu0 %v15134_v27  ;;  %v15006_v27 = vor.u32 %v17032_v41, %v15003_v52  ;;  %9884 = vmatpush.bf16.msrb.mxu3 %v15702_v19  ;;  %v14113_v52 = vld [vmem:[#allocation13 + $0x1d0] sm:$0xf] }
 0x484   :  { %10016 = vmatmul.bf16.vlgmr.msra.gmra.mxu1 %v17862_v12  ;;  %v9745_v53 = vadd.f32 %v17950_v57, %v9732_v48  ;;  %v14942_v57 = vor.u32 %v17016_v10, %v14939_v34  ;;  %v14114_v9 = vor.u32 %v16813_v42, %v14113_v52  ;;  %v14523_v48 = vld [vmem:[#allocation13 + $0x528] sm:$0xf0] }
 0x485   :  { %10060 = vmatpush.bf16.msrb.mxu1 %v15390_v7  ;;  %v15450_v7 = vor.u32 %v17148_v55, %v15449_v47  ;;  %v16920_v55 = vld [vmem:[#allocation13 + $0x54c] sm:$0xf]  ;;  %v14526_v6 = vor.u32 %v16912_v0, %v14523_v48  ;;  %v15897_v48 = vld [vmem:[#allocation13 + $0xfc8] sm:$0xf] }
 0x486   :  { %v17971_v44 = vadd.f32 %v17960_v28, %v9745_v53  ;;  %v17072_v28 = vld [vmem:[#allocation13 + $0xa0c] sm:$0xf] }
 0x487   :  { %10048 = vmatpush.bf16.msrb.mxu0 %v15102_v17  ;;  %v15227_v17 = vld [vmem:[#allocation13 + $0xaa8] sm:$0xf0]  ;;  %9975 = vmatpush.bf16.msrb.mxu2 %v15450_v7  ;;  %v9809_v51 = vpop.f32.mrf.mxu1  ;;  %v9798_v29 = vpop.f32.mrf.mxu0  ;;  %v15166_v26 = vor.u32 %v17072_v28, %v15163_v45  ;;  %v14558_v7 = vor.u32 %v16920_v55, %v14555_v39  ;;  %v16956_v45 = vld [vmem:[#allocation13 + $0x664] sm:$0xf0]  ;;  %v14241_v55 = vld [vmem:[#allocation13 + $0x2d0] sm:$0xf] }
 0x488   :  { %v15230_v1 = vor.u32 %v17088_v25, %v15227_v17  ;;  %9885 = vmatpush.bf16.msrb.mxu3 %v15670_v23  ;;  %v14082_v25 = vor.u32 %v16805_v24, %v14081_v35  ;;  %v14337_v17 = vld [vmem:[#allocation13 + $0x390] sm:$0xf]  ;;  %v16972_v23 = vld [vmem:[#allocation13 + $0x6e4] sm:$0xf0]  ;;  %v16904_v10 = vld [vmem:[#allocation13 + $0x4cc] sm:$0xf] }
 0x489   :  { %10061 = vmatpush.bf16.msrb.mxu1 %v15358_v31  ;;  %v9797_v31 = vadd.f32 %v9796_v3, %v7108_v5  ;;  %v9733_v43 = vpop.f32.mrf.mxu3  ;;  %v16988_v3 = vld [vmem:[#allocation13 + $0x764] sm:$0xf0]  ;;  %v14369_v5 = vld [vmem:[#allocation13 + $0x3d0] sm:$0xf]  ;;  %v14338_v53 = vor.u32 %v16869_v46, %v14337_v17  ;;  %v14491_v34 = vld [vmem:[#allocation13 + $0x4e8] sm:$0xf0] }
 0x48a   :  { %v14810_v60 = vor.u32 %v16988_v3, %v14809_v50  ;;  %v14017_v29 = vld [vmem:[#allocation13 + $0x110] sm:$0xf]  ;;  %v16888_v50 = vld [vmem:[#allocation13 + $0x44c] sm:$0xf]  ;;  %v14649_v35 = vld [vmem:[#allocation13 + $0x608] sm:$0xf] }
 0x48b   :  { %10049 = vmatpush.bf16.msrb.mxu0 %v15070_v15  ;;  %v17968_v15 = vadd.f32 %v9809_v51, %v9797_v31  ;;  %9976 = vmatpush.bf16.msrb.mxu2 %v15418_v49  ;;  %v14745_v31 = vld [vmem:[#allocation13 + $0x6c8] sm:$0xf]  ;;  %v14305_v49 = vld [vmem:[#allocation13 + $0x350] sm:$0xf]  ;;  %v17192_v17 = vld [vmem:[#allocation13 + $0xdcc] sm:$0xf] }
 0x48c   :  { %9930 = vmatpush.bf16.msra.mxu3 %v14874_v4  ;;  %v16789_v4 = vld [vmem:[#allocation13 + $0x12c] sm:$0xf0]  ;;  %v16948_v24 = vld [vmem:[#allocation13 + $0x624] sm:$0xf0]  ;;  %v15643_v46 = vld [vmem:[#allocation13 + $0xde8] sm:$0xf0] }
 0x48d   :  { %10062 = vmatpush.bf16.msrb.mxu1 %v15326_v38  ;;  %v15195_v38 = vld [vmem:[#allocation13 + $0xa68] sm:$0xf0]  ;;  %9886 = vmatmul.bf16.vlgmr.msrb.gmra.mxu3 %v17956_v16  ;;  %v13985_v43 = vld [vmem:[#allocation13 + $0xd0] sm:$0xf] }
 0x48e   :  { %v15198_v41 = vor.u32 %v17080_v54, %v15195_v38  ;;  %9977 = vmatmul.bf16.vlgmr.msrb.gmra.mxu2 %v17927_v62  ;;  %v14494_v54 = vor.u32 %v16904_v10, %v14491_v34  ;;  %v14713_v38 = vld [vmem:[#allocation13 + $0x688] sm:$0xf]  ;;  %v16845_v39 = vld [vmem:[#allocation13 + $0x2ec] sm:$0xf0] }
 0x48f   :  { %10050 = vmatpush.bf16.msrb.mxu0 %v15038_v56  ;;  %v14907_v56 = vld [vmem:[#allocation13 + $0x828] sm:$0xf0]  ;;  %10021 = vmatpush.bf16.msra.mxu2 %v14622_v61  ;;  %v9811_v19 = vpop.f32.mrf.mxu1  ;;  %v14746_v61 = vor.u32 %v16972_v23, %v14745_v31  ;;  %v14177_v10 = vld [vmem:[#allocation13 + $0x250] sm:$0xf] }
 0x490   :  { %v14910_v47 = vor.u32 %v17008_v14, %v14907_v56  ;;  %9931 = vmatpush.bf16.msra.mxu3 %v14842_v22  ;;  %v14273_v14 = vld [vmem:[#allocation13 + $0x310] sm:$0xf]  ;;  %v14681_v22 = vld [vmem:[#allocation13 + $0x648] sm:$0xf] }
 0x491   :  { %10063 = vmatpush.bf16.msrb.mxu1 %v15294_v58  ;;  %v14590_v58 = vor.u32 %v16928_v20, %v14587_v40  ;;  %v14459_v20 = vld [vmem:[#allocation13 + $0x4a8] sm:$0xf0]  ;;  %v14018_v40 = vor.u32 %v16789_v4, %v14017_v29  ;;  %v16853_v56 = vld [vmem:[#allocation13 + $0x32c] sm:$0xf0]  ;;  %v14682_v19 = vor.u32 %v16956_v45, %v14681_v22  ;;  %v17252_v29 = vld [vmem:[#allocation13 + $0xfa4] sm:$0xf0] }
 0x492   :  { %v14462_v42 = vor.u32 %v16896_v32, %v14459_v20  ;;  %v14274_v28 = vor.u32 %v16853_v56, %v14273_v14  ;;  %v16829_v34 = vld [vmem:[#allocation13 + $0x26c] sm:$0xf0]  ;;  %v17184_v4 = vld [vmem:[#allocation13 + $0xd8c] sm:$0xf] }
 0x493   :  { %10051 = vmatpush.bf16.msrb.mxu0 %v15006_v27  ;;  %v16877_v27 = vld [vmem:[#allocation13 + $0x3ec] sm:$0xf0]  ;;  %10022 = vmatpush.bf16.msra.mxu2 %v14590_v58  ;;  %v14178_v20 = vor.u32 %v16829_v34, %v14177_v10  ;;  %v17176_v22 = vld [vmem:[#allocation13 + $0xd4c] sm:$0xf]  ;;  %v17985_v10 = vld [vmem:[#allocation15] sm:$0xff] }
 0x494   :  { %v14370_v33 = vor.u32 %v16877_v27, %v14369_v5  ;;  %9932 = vmatpush.bf16.msra.mxu3 %v14810_v60  ;;  %v13953_v5 = vld [vmem:[#allocation13 + $0x90] sm:$0xf]  ;;  %v16880_v60 = vld [vmem:[#allocation13 + $0x40c] sm:$0xf]  ;;  %v7109_v34 = vperm.slane %v17985_v10, 2 }
 0x495   :  { %10064 = vmatpush.bf16.msrb.mxu1 %v15262_v18  ;;  %v14777_v18 = vld [vmem:[#allocation13 + $0x708] sm:$0xf]  ;;  %v16773_v27 = vld [vmem:[#allocation13 + $0xac] sm:$0xf0] }
 0x496   :  { %v14778_v36 = vor.u32 %v16980_v63, %v14777_v18  ;;  %v14395_v18 = vld [vmem:[#allocation13 + $0x428] sm:$0xf0]  ;;  %v16837_v63 = vld [vmem:[#allocation13 + $0x2ac] sm:$0xf0]  ;;  %v13954_v0 = vor.u32 %v16773_v27, %v13953_v5 }
 0x497   :  { %10052 = vmatpush.bf16.msrb.mxu0 %v14974_v2  ;;  %v14049_v2 = vld [vmem:[#allocation13 + $0x150] sm:$0xf]  ;;  %10023 = vmatpush.bf16.msra.mxu2 %v14558_v7  ;;  %v14242_v7 = vor.u32 %v16845_v39, %v14241_v55 }
 0x498   :  { %v14050_v51 = vor.u32 %v16797_v59, %v14049_v2  ;;  %9933 = vmatpush.bf16.msra.mxu3 %v14778_v36  ;;  %v13921_v2 = vld [vmem:[#allocation13 + $0x50] sm:$0xf]  ;;  %v14650_v36 = vor.u32 %v16948_v24, %v14649_v35  ;;  %v17236_v35 = vld [vmem:[#allocation13 + $0xf24] sm:$0xf0]  ;;  %v17168_v24 = vld [vmem:[#allocation13 + $0xd0c] sm:$0xf] }
 0x499   :  { %10065 = vmatpush.bf16.msrb.mxu1 %v15230_v1  ;;  %v16861_v1 = vld [vmem:[#allocation13 + $0x36c] sm:$0xf0] }
 0x49a   :  { %v14306_v30 = vor.u32 %v16861_v1, %v14305_v49  ;;  %v16765_v59 = vld [vmem:[#allocation13 + $0x6c] sm:$0xf0]  ;;  %v15865_v1 = vld [vmem:[#allocation13 + $0xf88] sm:$0xf] }
 0x49b   :  { %10053 = vmatpush.bf16.msrb.mxu0 %v14942_v57  ;;  %10024 = vmatpush.bf16.msra.mxu2 %v14526_v6  ;;  %v16964_v57 = vld [vmem:[#allocation13 + $0x6a4] sm:$0xf0]  ;;  %v14398_v6 = vor.u32 %v16880_v60, %v14395_v18  ;;  %v13922_v49 = vor.u32 %v16765_v59, %v13921_v2  ;;  %v17069_v32 = vld [vmem:[#allocation13 + $0x9ec] sm:$0xf0]  ;;  %v15547_v60 = vld [vmem:[#allocation13 + $0xd28] sm:$0xf0] }
 0x49c   :  { %9934 = vmatpush.bf16.msra.mxu3 %v14746_v61  ;;  %v14714_v52 = vor.u32 %v16964_v57, %v14713_v38  ;;  %v13889_v38 = vld [vmem:[#allocation13 + $0x10] sm:$0xf]  ;;  %v17228_v2 = vld [vmem:[#allocation13 + $0xee4] sm:$0xf0]  ;;  %v17160_v59 = vld [vmem:[#allocation13 + $0xccc] sm:$0xf] }
 0x49d   :  { %10066 = vmatpush.bf16.msrb.mxu1 %v15198_v41  ;;  %v16781_v41 = vld [vmem:[#allocation13 + $0xec] sm:$0xf0] }
 0x49e   :  { %v13986_v3 = vor.u32 %v16781_v41, %v13985_v43  ;;  %v15137_v57 = vld [vmem:[#allocation13 + $0x9d0] sm:$0xf] }
 0x49f   :  { %10054 = vmatpush.bf16.msrb.mxu0 %v14910_v47  ;;  %10025 = vmatpush.bf16.msra.mxu2 %v14494_v54  ;;  %v17977_v58 = vpop.f32.mrf.mxu0  ;;  %v14427_v47 = vld [vmem:[#allocation13 + $0x468] sm:$0xf0]  ;;  %v14145_v14 = vld [vmem:[#allocation13 + $0x210] sm:$0xf]  ;;  %v15138_v45 = vor.u32 %v17069_v32, %v15137_v57 }
 0x4a0   :  { %9935 = vmatpush.bf16.msra.mxu3 %v14714_v52  ;;  %v15611_v54 = vld [vmem:[#allocation13 + $0xda8] sm:$0xf0]  ;;  %v16821_v56 = vld [vmem:[#allocation13 + $0x22c] sm:$0xf0]  ;;  %v15833_v52 = vld [vmem:[#allocation13 + $0xf48] sm:$0xf] }
 0x4a1   :  { %10067 = vmatpush.bf16.msrb.mxu1 %v15166_v26  ;;  %v14430_v26 = vor.u32 %v16888_v50, %v14427_v47  ;;  %v15614_v43 = vor.u32 %v17184_v4, %v15611_v54  ;;  %v15393_v50 = vld [vmem:[#allocation13 + $0xbd0] sm:$0xf]  ;;  %v17220_v54 = vld [vmem:[#allocation13 + $0xea4] sm:$0xf0] }
 0x4a2   :  { %10055 = vmatmul.bf16.vlgmr.msrb.gmra.mxu0 %v17884_v13  ;;  %v17133_v47 = vld [vmem:[#allocation13 + $0xbec] sm:$0xf0] }
 0x4a3   :  { %10099 = vmatpush.bf16.msra.mxu0 %v14114_v9  ;;  %v17979_v9 = vpop.f32.mrf.mxu1  ;;  %10026 = vmatpush.bf16.msra.mxu2 %v14462_v42  ;;  %v17244_v42 = vld [vmem:[#allocation13 + $0xf64] sm:$0xf0]  ;;  %v15105_v39 = vld [vmem:[#allocation13 + $0x990] sm:$0xf] }
 0x4a4   :  { %10068 = vmatmul.bf16.vlgmr.msrb.gmra.mxu1 %v17897_v8  ;;  %9936 = vmatpush.bf16.msra.mxu3 %v14682_v19  ;;  %v15834_v55 = vor.u32 %v17244_v42, %v15833_v52  ;;  %v17061_v5 = vld [vmem:[#allocation13 + $0x9ac] sm:$0xf0]  ;;  %v15394_v19 = vor.u32 %v17133_v47, %v15393_v50  ;;  %v15705_v42 = vld [vmem:[#allocation13 + $0xe48] sm:$0xf]  ;;  %v15451_v50 = vld [vmem:[#allocation13 + $0xc68] sm:$0xf0] }
 0x4a5   :  { %10112 = vmatpush.bf16.msra.mxu1 %v14370_v33  ;;  %v14209_v33 = vld [vmem:[#allocation13 + $0x290] sm:$0xf] }
 0x4a6   :  { %v17125_v18 = vld [vmem:[#allocation13 + $0xbac] sm:$0xf0] }
 0x4a7   :  { %10100 = vmatpush.bf16.msra.mxu0 %v14082_v25  ;;  %v17260_v25 = vld [vmem:[#allocation13 + $0xfe4] sm:$0xf0]  ;;  %10027 = vmatpush.bf16.msra.mxu2 %v14430_v26  ;;  %v9850_v31 = vpop.f32.mrf.mxu0  ;;  %v15297_v57 = vld [vmem:[#allocation13 + $0xb10] sm:$0xf] }
 0x4a8   :  { %v15898_v23 = vor.u32 %v17260_v25, %v15897_v48  ;;  %9937 = vmatpush.bf16.msra.mxu3 %v14650_v36  ;;  %v15801_v26 = vld [vmem:[#allocation13 + $0xf08] sm:$0xf]  ;;  %v17053_v48 = vld [vmem:[#allocation13 + $0x96c] sm:$0xf0]  ;;  %v15550_v25 = vor.u32 %v17168_v24, %v15547_v60  ;;  %v15515_v36 = vld [vmem:[#allocation13 + $0xce8] sm:$0xf0] }
 0x4a9   :  { %10113 = vmatpush.bf16.msra.mxu1 %v14338_v53  ;;  %v14210_v53 = vor.u32 %v16837_v63, %v14209_v33  ;;  %v15106_v33 = vor.u32 %v17061_v5, %v15105_v39  ;;  %v15802_v63 = vor.u32 %v17236_v35, %v15801_v26  ;;  %v17117_v31 = vld [vmem:[#allocation13 + $0xb6c] sm:$0xf0] }
 0x4aa   :  { %v17109_v32 = vld [vmem:[#allocation13 + $0xb2c] sm:$0xf0] }
 0x4ab   :  { %10101 = vmatpush.bf16.msra.mxu0 %v14050_v51  ;;  %v15646_v51 = vor.u32 %v17192_v17, %v15643_v46  ;;  %v9863_v61 = vpop.f32.mrf.mxu1  ;;  %10028 = vmatpush.bf16.msra.mxu2 %v14398_v6  ;;  %v15769_v46 = vld [vmem:[#allocation13 + $0xec8] sm:$0xf]  ;;  %v15329_v6 = vld [vmem:[#allocation13 + $0xb50] sm:$0xf]  ;;  %v15298_v52 = vor.u32 %v17109_v32, %v15297_v57 }
 0x4ac   :  { %9982 = vmatpush.bf16.msrb.mxu3 %v15898_v23  ;;  %v15770_v23 = vor.u32 %v17228_v2, %v15769_v46  ;;  %v15330_v4 = vor.u32 %v17117_v31, %v15329_v6  ;;  %v15737_v61 = vld [vmem:[#allocation13 + $0xe88] sm:$0xf]  ;;  %v15265_v47 = vld [vmem:[#allocation13 + $0xad0] sm:$0xf]  ;;  %v14875_v46 = vld [vmem:[#allocation13 + $0x7e8] sm:$0xf0] }
 0x4ad   :  { %10114 = vmatpush.bf16.msra.mxu1 %v14306_v30  ;;  %v16757_v30 = vld [vmem:[#allocation13 + $0x2c] sm:$0xf0]  ;;  %9938 = vmatmul.bf16.vlgmr.msra.gmra.mxu3 %v17901_v37 }
 0x4ae   :  { %v13890_v41 = vor.u32 %v16757_v30, %v13889_v38  ;;  %10029 = vmatmul.bf16.vlgmr.msra.gmra.mxu2 %v17878_v21  ;;  %v17152_v38 = vld [vmem:[#allocation13 + $0xc8c] sm:$0xf]  ;;  %v14977_v26 = vld [vmem:[#allocation13 + $0x890] sm:$0xf] }
 0x4af   :  { %10102 = vmatpush.bf16.msra.mxu0 %v14018_v40  ;;  %v15866_v40 = vor.u32 %v17252_v29, %v15865_v1  ;;  %10073 = vmatpush.bf16.msrb.mxu2 %v15646_v51  ;;  %v15041_v51 = vld [vmem:[#allocation13 + $0x910] sm:$0xf]  ;;  %v17988_v1 = vpop.f32.mrf.mxu2  ;;  %v15518_v29 = vor.u32 %v17160_v59, %v15515_v36  ;;  %v15483_v30 = vld [vmem:[#allocation13 + $0xca8] sm:$0xf0] }
 0x4b0   :  { %v17029_v35 = vld [vmem:[#allocation13 + $0x8ac] sm:$0xf0] }
 0x4b1   :  { %10115 = vmatpush.bf16.msra.mxu1 %v14274_v28  ;;  %v15579_v28 = vld [vmem:[#allocation13 + $0xd68] sm:$0xf0]  ;;  %9983 = vmatpush.bf16.msrb.mxu3 %v15866_v40  ;;  %v15738_v40 = vor.u32 %v17220_v54, %v15737_v61  ;;  %v14625_v2 = vld [vmem:[#allocation13 + $0x5d0] sm:$0xf] }
 0x4b2   :  { %v15582_v27 = vor.u32 %v17176_v22, %v15579_v28  ;;  %v17212_v22 = vld [vmem:[#allocation13 + $0xe64] sm:$0xf0]  ;;  %v17144_v28 = vld [vmem:[#allocation13 + $0xc4c] sm:$0xf]  ;;  %v16941_v59 = vld [vmem:[#allocation13 + $0x5ec] sm:$0xf0] }
 0x4b3   :  { %10103 = vmatpush.bf16.msra.mxu0 %v13986_v3  ;;  %v14146_v3 = vor.u32 %v16821_v56, %v14145_v14  ;;  %10074 = vmatpush.bf16.msrb.mxu2 %v15614_v43  ;;  %v15009_v14 = vld [vmem:[#allocation13 + $0x8d0] sm:$0xf]  ;;  %v15454_v60 = vor.u32 %v17144_v28, %v15451_v50  ;;  %v16992_v61 = vld [vmem:[#allocation13 + $0x78c] sm:$0xf] }
 0x4b4   :  { %v17037_v56 = vld [vmem:[#allocation13 + $0x8ec] sm:$0xf0]  ;;  %v16984_v50 = vld [vmem:[#allocation13 + $0x74c] sm:$0xf] }
 0x4b5   :  { %10116 = vmatpush.bf16.msra.mxu1 %v14242_v7  ;;  %v15361_v7 = vld [vmem:[#allocation13 + $0xb90] sm:$0xf]  ;;  %9984 = vmatpush.bf16.msrb.mxu3 %v15834_v55  ;;  %v15010_v39 = vor.u32 %v17037_v56, %v15009_v14 }
 0x4b6   :  { %v15362_v17 = vor.u32 %v17125_v18, %v15361_v7  ;;  %v17204_v18 = vld [vmem:[#allocation13 + $0xe24] sm:$0xf0]  ;;  %v14945_v6 = vld [vmem:[#allocation13 + $0x850] sm:$0xf] }
 0x4b7   :  { %10104 = vmatpush.bf16.msra.mxu0 %v13954_v0  ;;  %v15073_v0 = vld [vmem:[#allocation13 + $0x950] sm:$0xf]  ;;  %10075 = vmatpush.bf16.msrb.mxu2 %v15582_v27  ;;  %v15706_v27 = vor.u32 %v17212_v22, %v15705_v42  ;;  %v9772_v24 = vpop.f32.mrf.mxu2 }
 0x4b8   :  { %v17021_v31 = vld [vmem:[#allocation13 + $0x86c] sm:$0xf0]  ;;  %v14083_v24 = vld [vmem:[#allocation13 + $0x1b0] sm:$0xf0] }
 0x4b9   :  { %10117 = vmatpush.bf16.msra.mxu1 %v14210_v53  ;;  %v15074_v53 = vor.u32 %v17053_v48, %v15073_v0  ;;  %9985 = vmatpush.bf16.msrb.mxu3 %v15802_v63  ;;  %v15419_v63 = vld [vmem:[#allocation13 + $0xc28] sm:$0xf0]  ;;  %v15233_v0 = vld [vmem:[#allocation13 + $0xa90] sm:$0xf] }
 0x4ba   :  { %v17093_v48 = vld [vmem:[#allocation13 + $0xaac] sm:$0xf0] }
 0x4bb   :  { %10105 = vmatpush.bf16.msra.mxu0 %v13922_v49  ;;  %v17045_v49 = vld [vmem:[#allocation13 + $0x92c] sm:$0xf0]  ;;  %10076 = vmatpush.bf16.msrb.mxu2 %v15550_v25  ;;  %v17000_v25 = vld [vmem:[#allocation13 + $0x7cc] sm:$0xf] }
 0x4bc   :  { %v14593_v57 = vld [vmem:[#allocation13 + $0x590] sm:$0xf] }
 0x4bd   :  { %10118 = vmatpush.bf16.msra.mxu1 %v14178_v20  ;;  %v15042_v20 = vor.u32 %v17045_v49, %v15041_v51  ;;  %9986 = vmatpush.bf16.msrb.mxu3 %v15770_v23  ;;  %v14878_v51 = vor.u32 %v17000_v25, %v14875_v46  ;;  %v14626_v49 = vor.u32 %v16941_v59, %v14625_v2  ;;  %v16933_v32 = vld [vmem:[#allocation13 + $0x5ac] sm:$0xf0]  ;;  %v14339_v46 = vld [vmem:[#allocation13 + $0x3b0] sm:$0xf0] }
 0x4be   :  { %v14594_v22 = vor.u32 %v16933_v32, %v14593_v57  ;;  %v15169_v28 = vld [vmem:[#allocation13 + $0xa10] sm:$0xf]  ;;  %v16793_v59 = vld [vmem:[#allocation13 + $0x154] sm:$0xf]  ;;  %v16960_v32 = vld [vmem:[#allocation13 + $0x68c] sm:$0xf] }
 0x4bf   :  { %10106 = vmatpush.bf16.msra.mxu0 %v13890_v41  ;;  %10077 = vmatpush.bf16.msrb.mxu2 %v15518_v29  ;;  %v9900_v43 = vpop.f32.mrf.mxu0  ;;  %v15486_v41 = vor.u32 %v17152_v38, %v15483_v30  ;;  %v15201_v29 = vld [vmem:[#allocation13 + $0xa50] sm:$0xf]  ;;  %v14946_v38 = vor.u32 %v17021_v31, %v14945_v6  ;;  %v14843_v30 = vld [vmem:[#allocation13 + $0x7a8] sm:$0xf0]  ;;  %v9822_v14 = vpop.f32.mrf.mxu2 }
 0x4c0   :  { %v14846_v42 = vor.u32 %v16992_v61, %v14843_v30  ;;  %v14307_v61 = vld [vmem:[#allocation13 + $0x370] sm:$0xf0] }
 0x4c1   :  { %10119 = vmatpush.bf16.msra.mxu1 %v14146_v3  ;;  %v17101_v3 = vld [vmem:[#allocation13 + $0xaec] sm:$0xf0]  ;;  %v9913_v55 = vpop.f32.mrf.mxu1  ;;  %9987 = vmatpush.bf16.msrb.mxu3 %v15738_v40 }
 0x4c2   :  { %10107 = vmatmul.bf16.vlgmr.msra.gmra.mxu0 %v17860_v11  ;;  %v15266_v7 = vor.u32 %v17101_v3, %v15265_v47  ;;  %v17013_v40 = vld [vmem:[#allocation13 + $0x82c] sm:$0xf0]  ;;  %v14811_v3 = vld [vmem:[#allocation13 + $0x768] sm:$0xf0] }
 0x4c3   :  { %10151 = vmatpush.bf16.msrb.mxu0 %v15138_v45  ;;  %v9901_v45 = vadd.f32 %v9900_v43, %v7109_v34  ;;  %10078 = vmatpush.bf16.msrb.mxu2 %v15486_v41  ;;  %v15234_v34 = vor.u32 %v17093_v48, %v15233_v0  ;;  %v16809_v43 = vld [vmem:[#allocation13 + $0x1d4] sm:$0xf]  ;;  %v14529_v0 = vld [vmem:[#allocation13 + $0x510] sm:$0xf] }
 0x4c4   :  { %10120 = vmatmul.bf16.vlgmr.msra.gmra.mxu1 %v17862_v12  ;;  %v14115_v41 = vld [vmem:[#allocation13 + $0x1f0] sm:$0xf0]  ;;  %v16917_v48 = vld [vmem:[#allocation13 + $0x52c] sm:$0xf0] }
 0x4c5   :  { %10164 = vmatpush.bf16.msrb.mxu1 %v15394_v19  ;;  %v17990_v5 = vadd.f32 %v9913_v55, %v9901_v45  ;;  %v15673_v19 = vld [vmem:[#allocation13 + $0xe08] sm:$0xf]  ;;  %9988 = vmatpush.bf16.msrb.mxu3 %v15706_v27  ;;  %v17077_v45 = vld [vmem:[#allocation13 + $0xa2c] sm:$0xf0]  ;;  %v14118_v27 = vor.u32 %v16809_v43, %v14115_v41  ;;  %v14530_v31 = vor.u32 %v16917_v48, %v14529_v0  ;;  %v16849_v41 = vld [vmem:[#allocation13 + $0x314] sm:$0xf] }
 0x4c6   :  { %v15674_v36 = vor.u32 %v17204_v18, %v15673_v19  ;;  %v14561_v55 = vld [vmem:[#allocation13 + $0x550] sm:$0xf]  ;;  %v16873_v19 = vld [vmem:[#allocation13 + $0x3d4] sm:$0xf]  ;;  %v16976_v18 = vld [vmem:[#allocation13 + $0x70c] sm:$0xf] }
 0x4c7   :  { %10152 = vmatpush.bf16.msrb.mxu0 %v15106_v33  ;;  %v17136_v33 = vld [vmem:[#allocation13 + $0xc0c] sm:$0xf]  ;;  %10079 = vmatpush.bf16.msrb.mxu2 %v15454_v60  ;;  %v14814_v60 = vor.u32 %v16984_v50, %v14811_v3  ;;  %v9824_v2 = vpop.f32.mrf.mxu2 }
 0x4c8   :  { %v15422_v23 = vor.u32 %v17136_v33, %v15419_v63  ;;  %v14779_v63 = vld [vmem:[#allocation13 + $0x728] sm:$0xf0]  ;;  %v16833_v2 = vld [vmem:[#allocation13 + $0x294] sm:$0xf] }
 0x4c9   :  { %10165 = vmatpush.bf16.msrb.mxu1 %v15362_v17  ;;  %v14978_v17 = vor.u32 %v17029_v35, %v14977_v26  ;;  %v9915_v54 = vpop.f32.mrf.mxu1  ;;  %9989 = vmatpush.bf16.msrb.mxu3 %v15674_v36  ;;  %v14371_v26 = vld [vmem:[#allocation13 + $0x3f0] sm:$0xf0]  ;;  %v14782_v6 = vor.u32 %v16976_v18, %v14779_v63  ;;  %v16944_v0 = vld [vmem:[#allocation13 + $0x60c] sm:$0xf] }
 0x4ca   :  { %v16801_v35 = vld [vmem:[#allocation13 + $0x194] sm:$0xf]  ;;  %v14374_v33 = vor.u32 %v16873_v19, %v14371_v26  ;;  %v14433_v19 = vld [vmem:[#allocation13 + $0x450] sm:$0xf]  ;;  %v14651_v48 = vld [vmem:[#allocation13 + $0x628] sm:$0xf0] }
 0x4cb   :  { %10153 = vmatpush.bf16.msrb.mxu0 %v15074_v53  ;;  %v9902_v53 = vpop.f32.mrf.mxu0  ;;  %10080 = vmatpush.bf16.msrb.mxu2 %v15422_v23  ;;  %v14086_v25 = vor.u32 %v16801_v35, %v14083_v24  ;;  %v14051_v36 = vld [vmem:[#allocation13 + $0x170] sm:$0xf0]  ;;  %v16893_v26 = vld [vmem:[#allocation13 + $0x46c] sm:$0xf0] }
 0x4cc   :  { %9990 = vmatmul.bf16.vlgmr.msrb.gmra.mxu3 %v17956_v16  ;;  %v16968_v53 = vld [vmem:[#allocation13 + $0x6cc] sm:$0xf]  ;;  %v16785_v54 = vld [vmem:[#allocation13 + $0x114] sm:$0xf]  ;;  %v14434_v63 = vor.u32 %v16893_v26, %v14433_v19 }
 0x4cd   :  { %10166 = vmatpush.bf16.msrb.mxu1 %v15330_v4  ;;  %v17085_v4 = vld [vmem:[#allocation13 + $0xa6c] sm:$0xf0]  ;;  %10034 = vmatpush.bf16.msra.mxu3 %v14878_v51  ;;  %v16841_v24 = vld [vmem:[#allocation13 + $0x2d4] sm:$0xf] }
 0x4ce   :  { %v15202_v56 = vor.u32 %v17085_v4, %v15201_v29  ;;  %10081 = vmatmul.bf16.vlgmr.msrb.gmra.mxu2 %v17927_v62  ;;  %v14497_v51 = vld [vmem:[#allocation13 + $0x4d0] sm:$0xf]  ;;  %v14054_v29 = vor.u32 %v16793_v59, %v14051_v36  ;;  %v16857_v4 = vld [vmem:[#allocation13 + $0x354] sm:$0xf] }
 0x4cf   :  { %10154 = vmatpush.bf16.msrb.mxu0 %v15042_v20  ;;  %v14913_v20 = vld [vmem:[#allocation13 + $0x810] sm:$0xf]  ;;  %10125 = vmatpush.bf16.msra.mxu2 %v14626_v49  ;;  %v13955_v18 = vld [vmem:[#allocation13 + $0xb0] sm:$0xf0] }
 0x4d0   :  { %v14914_v47 = vor.u32 %v17013_v40, %v14913_v20  ;;  %v16909_v49 = vld [vmem:[#allocation13 + $0x4ec] sm:$0xf0]  ;;  %v14310_v20 = vor.u32 %v16857_v4, %v14307_v61  ;;  %v14715_v40 = vld [vmem:[#allocation13 + $0x6a8] sm:$0xf0]  ;;  %v14211_v59 = vld [vmem:[#allocation13 + $0x2b0] sm:$0xf0]  ;;  %v14654_v4 = vor.u32 %v16944_v0, %v14651_v48 }
 0x4d1   :  { %10167 = vmatpush.bf16.msrb.mxu1 %v15298_v52  ;;  %v17993_v52 = vadd.f32 %v9822_v14, %v17968_v15  ;;  %v15170_v15 = vor.u32 %v17077_v45, %v15169_v28  ;;  %10035 = vmatpush.bf16.msra.mxu3 %v14846_v42  ;;  %v14498_v57 = vor.u32 %v16909_v49, %v14497_v51  ;;  %v14465_v14 = vld [vmem:[#allocation13 + $0x490] sm:$0xf]  ;;  %v14275_v42 = vld [vmem:[#allocation13 + $0x330] sm:$0xf0] }
 0x4d2   :  { %v16777_v28 = vld [vmem:[#allocation13 + $0xd4] sm:$0xf] }
 0x4d3   :  { %10155 = vmatpush.bf16.msrb.mxu0 %v15010_v39  ;;  %v16925_v39 = vld [vmem:[#allocation13 + $0x56c] sm:$0xf0]  ;;  %10126 = vmatpush.bf16.msra.mxu2 %v14594_v22  ;;  %v17999_v22 = vpop.f32.mrf.mxu2  ;;  %v13987_v45 = vld [vmem:[#allocation13 + $0xf0] sm:$0xf0] }
 0x4d4   :  { %v13990_v35 = vor.u32 %v16777_v28, %v13987_v45  ;;  %v16761_v51 = vld [vmem:[#allocation13 + $0x54] sm:$0xf] }
 0x4d5   :  { %10168 = vmatpush.bf16.msrb.mxu1 %v15266_v7  ;;  %v14562_v7 = vor.u32 %v16925_v39, %v14561_v55  ;;  %10036 = vmatpush.bf16.msra.mxu3 %v14814_v60  ;;  %v16952_v55 = vld [vmem:[#allocation13 + $0x64c] sm:$0xf]  ;;  %v14278_v39 = vor.u32 %v16849_v41, %v14275_v42  ;;  %v14243_v60 = vld [vmem:[#allocation13 + $0x2f0] sm:$0xf0]  ;;  %v17189_v41 = vld [vmem:[#allocation13 + $0xdac] sm:$0xf0] }
 0x4d6   :  { %v13923_v49 = vld [vmem:[#allocation13 + $0x70] sm:$0xf0] }
 0x4d7   :  { %10156 = vmatpush.bf16.msrb.mxu0 %v14978_v17  ;;  %v16865_v17 = vld [vmem:[#allocation13 + $0x394] sm:$0xf]  ;;  %10127 = vmatpush.bf16.msra.mxu2 %v14562_v7 }
 0x4d8   :  { %v14342_v23 = vor.u32 %v16865_v17, %v14339_v46  ;;  %v16769_v7 = vld [vmem:[#allocation13 + $0x94] sm:$0xf]  ;;  %v14246_v17 = vor.u32 %v16841_v24, %v14243_v60  ;;  %v16885_v46 = vld [vmem:[#allocation13 + $0x42c] sm:$0xf0]  ;;  %v15835_v24 = vld [vmem:[#allocation13 + $0xf68] sm:$0xf0] }
 0x4d9   :  { %10169 = vmatpush.bf16.msrb.mxu1 %v15234_v34  ;;  %v14747_v34 = vld [vmem:[#allocation13 + $0x6e8] sm:$0xf0]  ;;  %10037 = vmatpush.bf16.msra.mxu3 %v14782_v6  ;;  %v13958_v36 = vor.u32 %v16769_v7, %v13955_v18  ;;  %v16753_v42 = vld [vmem:[#allocation13 + $0x14] sm:$0xf]  ;;  %v15585_v60 = vld [vmem:[#allocation13 + $0xd50] sm:$0xf] }
 0x4da   :  { %v14750_v30 = vor.u32 %v16968_v53, %v14747_v34  ;;  %v17256_v6 = vld [vmem:[#allocation13 + $0xfcc] sm:$0xf]  ;;  %v15649_v53 = vld [vmem:[#allocation13 + $0xdd0] sm:$0xf]  ;;  %v13891_v28 = vld [vmem:[#allocation13 + $0x30] sm:$0xf0] }
 0x4db   :  { %10157 = vmatpush.bf16.msrb.mxu0 %v14946_v38  ;;  %v14019_v38 = vld [vmem:[#allocation13 + $0x130] sm:$0xf0]  ;;  %10128 = vmatpush.bf16.msra.mxu2 %v14530_v31  ;;  %v15899_v31 = vld [vmem:[#allocation13 + $0xfe8] sm:$0xf0]  ;;  %v17197_v34 = vld [vmem:[#allocation13 + $0xdec] sm:$0xf0]  ;;  %v13894_v26 = vor.u32 %v16753_v42, %v13891_v28 }
 0x4dc   :  { %v14022_v43 = vor.u32 %v16785_v54, %v14019_v38  ;;  %v14214_v54 = vor.u32 %v16833_v2, %v14211_v59  ;;  %v15902_v38 = vor.u32 %v17256_v6, %v15899_v31  ;;  %v17065_v45 = vld [vmem:[#allocation13 + $0x9d4] sm:$0xf]  ;;  %v17181_v7 = vld [vmem:[#allocation13 + $0xd6c] sm:$0xf0]  ;;  %v17232_v59 = vld [vmem:[#allocation13 + $0xf0c] sm:$0xf] }
 0x4dd   :  { %10170 = vmatpush.bf16.msrb.mxu1 %v15202_v56  ;;  %v16901_v56 = vld [vmem:[#allocation13 + $0x4ac] sm:$0xf0]  ;;  %10038 = vmatpush.bf16.msra.mxu3 %v14750_v30  ;;  %v16825_v30 = vld [vmem:[#allocation13 + $0x254] sm:$0xf] }
 0x4de   :  { %v14466_v3 = vor.u32 %v16901_v56, %v14465_v14  ;;  %v17248_v14 = vld [vmem:[#allocation13 + $0xf8c] sm:$0xf]  ;;  %v15553_v6 = vld [vmem:[#allocation13 + $0xd10] sm:$0xf]  ;;  %v17041_v42 = vld [vmem:[#allocation13 + $0x914] sm:$0xf] }
 0x4df   :  { %10158 = vmatpush.bf16.msrb.mxu0 %v14914_v47  ;;  %10129 = vmatpush.bf16.msra.mxu2 %v14498_v57  ;;  %v18001_v50 = vpop.f32.mrf.mxu0  ;;  %v14718_v47 = vor.u32 %v16960_v32, %v14715_v40  ;;  %v14179_v57 = vld [vmem:[#allocation13 + $0x270] sm:$0xf0]  ;;  %v13926_v40 = vor.u32 %v16761_v51, %v13923_v49  ;;  %v15867_v56 = vld [vmem:[#allocation13 + $0xfa8] sm:$0xf0]  ;;  %v17173_v31 = vld [vmem:[#allocation13 + $0xd2c] sm:$0xf0] }
 0x4e0   :  { %v17049_v49 = vld [vmem:[#allocation13 + $0x954] sm:$0xf] }
 0x4e1   :  { %10171 = vmatpush.bf16.msrb.mxu1 %v15170_v15  ;;  %v18003_v15 = vpop.f32.mrf.mxu1  ;;  %10039 = vmatpush.bf16.msra.mxu3 %v14718_v47  ;;  %v15139_v47 = vld [vmem:[#allocation13 + $0x9f0] sm:$0xf0] }
 0x4e2   :  { %10159 = vmatmul.bf16.vlgmr.msrb.gmra.mxu0 %v17884_v13  ;;  %v15142_v18 = vor.u32 %v17065_v45, %v15139_v47  ;;  %v15043_v28 = vld [vmem:[#allocation13 + $0x930] sm:$0xf0] }
 0x4e3   :  { %10203 = vmatpush.bf16.msra.mxu0 %v14118_v27  ;;  %v14683_v27 = vld [vmem:[#allocation13 + $0x668] sm:$0xf0]  ;;  %10130 = vmatpush.bf16.msra.mxu2 %v14466_v3  ;;  %v14182_v3 = vor.u32 %v16825_v30, %v14179_v57  ;;  %v15521_v30 = vld [vmem:[#allocation13 + $0xcd0] sm:$0xf] }
 0x4e4   :  { %10172 = vmatmul.bf16.vlgmr.msrb.gmra.mxu1 %v17897_v8  ;;  %v17165_v57 = vld [vmem:[#allocation13 + $0xcec] sm:$0xf0] }
 0x4e5   :  { %10216 = vmatpush.bf16.msra.mxu1 %v14374_v33  ;;  %v14686_v33 = vor.u32 %v16952_v55, %v14683_v27  ;;  %v15870_v55 = vor.u32 %v17248_v14, %v15867_v56  ;;  %v14147_v27 = vld [vmem:[#allocation13 + $0x230] sm:$0xf0]  ;;  %v15522_v47 = vor.u32 %v17165_v57, %v15521_v30  ;;  %v14881_v57 = vld [vmem:[#allocation13 + $0x7d0] sm:$0xf] }
 0x4e6   :  { %v15235_v30 = vld [vmem:[#allocation13 + $0xab0] sm:$0xf0] }
 0x4e7   :  { %10204 = vmatpush.bf16.msra.mxu0 %v14086_v25  ;;  %v14401_v25 = vld [vmem:[#allocation13 + $0x410] sm:$0xf]  ;;  %10040 = vmatpush.bf16.msra.mxu3 %v14686_v33  ;;  %v17129_v33 = vld [vmem:[#allocation13 + $0xbd4] sm:$0xf] }
 0x4e8   :  { %10131 = vmatpush.bf16.msra.mxu2 %v14434_v63  ;;  %v14402_v61 = vor.u32 %v16885_v46, %v14401_v25  ;;  %v15395_v63 = vld [vmem:[#allocation13 + $0xbf0] sm:$0xf0]  ;;  %v15586_v46 = vor.u32 %v17181_v7, %v15585_v60 }
 0x4e9   :  { %10217 = vmatpush.bf16.msra.mxu1 %v14342_v23  ;;  %v9876_v23 = vpop.f32.mrf.mxu2  ;;  %v9967_v32 = vpop.f32.mrf.mxu1  ;;  %v17057_v25 = vld [vmem:[#allocation13 + $0x994] sm:$0xf]  ;;  %v15398_v2 = vor.u32 %v17129_v33, %v15395_v63 }
 0x4ea   :  { %v15363_v23 = vld [vmem:[#allocation13 + $0xbb0] sm:$0xf0] }
 0x4eb   :  { %10205 = vmatpush.bf16.msra.mxu0 %v14054_v29  ;;  %v9954_v29 = vpop.f32.mrf.mxu0  ;;  %10041 = vmatpush.bf16.msra.mxu3 %v14654_v4  ;;  %v15554_v4 = vor.u32 %v17173_v31, %v15553_v6  ;;  %v17113_v32 = vld [vmem:[#allocation13 + $0xb54] sm:$0xf] }
 0x4ec   :  { %10132 = vmatpush.bf16.msra.mxu2 %v14402_v61  ;;  %v15075_v29 = vld [vmem:[#allocation13 + $0x970] sm:$0xf0] }
 0x4ed   :  { %10218 = vmatpush.bf16.msra.mxu1 %v14310_v20  ;;  %v15650_v20 = vor.u32 %v17197_v34, %v15649_v53  ;;  %v17121_v53 = vld [vmem:[#allocation13 + $0xb94] sm:$0xf]  ;;  %v15078_v14 = vor.u32 %v17049_v49, %v15075_v29  ;;  %v9783_v56 = vpop.f32.mrf.mxu3 }
 0x4ee   :  { %10042 = vmatmul.bf16.vlgmr.msra.gmra.mxu3 %v17901_v37  ;;  %v15366_v61 = vor.u32 %v17121_v53, %v15363_v23  ;;  %v17033_v60 = vld [vmem:[#allocation13 + $0x8d4] sm:$0xf]  ;;  %v17200_v23 = vld [vmem:[#allocation13 + $0xe0c] sm:$0xf] }
 0x4ef   :  { %10206 = vmatpush.bf16.msra.mxu0 %v14022_v43  ;;  %v15617_v43 = vld [vmem:[#allocation13 + $0xd90] sm:$0xf]  ;;  %10086 = vmatpush.bf16.msrb.mxu3 %v15902_v38  ;;  %v15771_v38 = vld [vmem:[#allocation13 + $0xee8] sm:$0xf0]  ;;  %v15011_v7 = vld [vmem:[#allocation13 + $0x8f0] sm:$0xf0] }
 0x4f0   :  { %10177 = vmatpush.bf16.msrb.mxu2 %v15650_v20  ;;  %v15618_v19 = vor.u32 %v17189_v41, %v15617_v43  ;;  %v15331_v20 = vld [vmem:[#allocation13 + $0xb70] sm:$0xf0]  ;;  %v7110_v41 = vperm.slane %v17985_v10, 3  ;;  %v15014_v6 = vor.u32 %v17033_v60, %v15011_v7 }
 0x4f1   :  { %10219 = vmatpush.bf16.msra.mxu1 %v14278_v39  ;;  %v16817_v39 = vld [vmem:[#allocation13 + $0x214] sm:$0xf]  ;;  %10133 = vmatmul.bf16.vlgmr.msra.gmra.mxu2 %v17878_v21 }
 0x4f2   :  { %v14150_v0 = vor.u32 %v16817_v39, %v14147_v27  ;;  %v15739_v39 = vld [vmem:[#allocation13 + $0xea8] sm:$0xf0]  ;;  %v15489_v27 = vld [vmem:[#allocation13 + $0xc90] sm:$0xf]  ;;  %v17009_v7 = vld [vmem:[#allocation13 + $0x814] sm:$0xf] }
 0x4f3   :  { %10207 = vmatpush.bf16.msra.mxu0 %v13990_v35  ;;  %v17240_v35 = vld [vmem:[#allocation13 + $0xf4c] sm:$0xf]  ;;  %10087 = vmatpush.bf16.msrb.mxu3 %v15870_v55 }
 0x4f4   :  { %v15838_v48 = vor.u32 %v17240_v35, %v15835_v24  ;;  %10178 = vmatpush.bf16.msrb.mxu2 %v15618_v19  ;;  %v17216_v55 = vld [vmem:[#allocation13 + $0xe8c] sm:$0xf]  ;;  %v15299_v19 = vld [vmem:[#allocation13 + $0xb30] sm:$0xf0]  ;;  %v15046_v35 = vor.u32 %v17041_v42, %v15043_v28 }
 0x4f5   :  { %10220 = vmatpush.bf16.msra.mxu1 %v14246_v17  ;;  %v15107_v17 = vld [vmem:[#allocation13 + $0x9b0] sm:$0xf0]  ;;  %v15742_v24 = vor.u32 %v17216_v55, %v15739_v39  ;;  %v9785_v31 = vpop.f32.mrf.mxu3 }
 0x4f6   :  { %v15110_v34 = vor.u32 %v17057_v25, %v15107_v17  ;;  %v15457_v25 = vld [vmem:[#allocation13 + $0xc50] sm:$0xf]  ;;  %v14947_v42 = vld [vmem:[#allocation13 + $0x870] sm:$0xf0] }
 0x4f7   :  { %10208 = vmatpush.bf16.msra.mxu0 %v13958_v36  ;;  %v15803_v36 = vld [vmem:[#allocation13 + $0xf28] sm:$0xf0]  ;;  %10088 = vmatpush.bf16.msrb.mxu3 %v15838_v48  ;;  %v16921_v31 = vld [vmem:[#allocation13 + $0x554] sm:$0xf] }
 0x4f8   :  { %v15806_v51 = vor.u32 %v17232_v59, %v15803_v36  ;;  %10179 = vmatpush.bf16.msrb.mxu2 %v15586_v46  ;;  %v15707_v48 = vld [vmem:[#allocation13 + $0xe68] sm:$0xf0]  ;;  %v17097_v59 = vld [vmem:[#allocation13 + $0xad4] sm:$0xf] }
 0x4f9   :  { %10221 = vmatpush.bf16.msra.mxu1 %v14214_v54  ;;  %v17224_v54 = vld [vmem:[#allocation13 + $0xecc] sm:$0xf]  ;;  %v15267_v36 = vld [vmem:[#allocation13 + $0xaf0] sm:$0xf0] }
 0x4fa   :  { %v15774_v43 = vor.u32 %v17224_v54, %v15771_v38  ;;  %v15270_v29 = vor.u32 %v17097_v59, %v15267_v36  ;;  %v17141_v54 = vld [vmem:[#allocation13 + $0xc2c] sm:$0xf0]  ;;  %v17089_v38 = vld [vmem:[#allocation13 + $0xa94] sm:$0xf] }
 0x4fb   :  { %10209 = vmatpush.bf16.msra.mxu0 %v13926_v40  ;;  %v9771_v40 = vadd.f32 %v17988_v1, %v17971_v44  ;;  %10089 = vmatpush.bf16.msrb.mxu3 %v15806_v51  ;;  %v17157_v44 = vld [vmem:[#allocation13 + $0xcac] sm:$0xf0]  ;;  %v17105_v1 = vld [vmem:[#allocation13 + $0xb14] sm:$0xf] }
 0x4fc   :  { %10180 = vmatpush.bf16.msrb.mxu2 %v15554_v4  ;;  %v15490_v33 = vor.u32 %v17157_v44, %v15489_v27  ;;  %v15302_v63 = vor.u32 %v17105_v1, %v15299_v19  ;;  %v14979_v51 = vld [vmem:[#allocation13 + $0x8b0] sm:$0xf0]  ;;  %v15675_v4 = vld [vmem:[#allocation13 + $0xe28] sm:$0xf0]  ;;  %v14849_v1 = vld [vmem:[#allocation13 + $0x790] sm:$0xf] }
 0x4fd   :  { %10222 = vmatpush.bf16.msra.mxu1 %v14182_v3  ;;  %v9784_v45 = vadd.f32 %v9783_v56, %v9771_v40  ;;  %v15334_v3 = vor.u32 %v17113_v32, %v15331_v20  ;;  %v17005_v40 = vld [vmem:[#allocation13 + $0x7ec] sm:$0xf0]  ;;  %v14627_v56 = vld [vmem:[#allocation13 + $0x5f0] sm:$0xf0]  ;;  %v9835_v60 = vpop.f32.mrf.mxu3 }
 0x4fe   :  { %v14882_v55 = vor.u32 %v17005_v40, %v14881_v57  ;;  %v17081_v27 = vld [vmem:[#allocation13 + $0xa54] sm:$0xf]  ;;  %v9836_v59 = vadd.f32 %v9835_v60, %v17993_v52  ;;  %v16981_v57 = vld [vmem:[#allocation13 + $0x72c] sm:$0xf0] }
 0x4ff   :  { %10210 = vmatpush.bf16.msra.mxu0 %v13894_v26  ;;  %10515 = vst [vmem:[#allocation16] sm:$0xff] %v9784_v45  ;;  %v9926_v26 = vpop.f32.mrf.mxu2  ;;  %10090 = vmatpush.bf16.msrb.mxu3 %v15774_v43  ;;  %v15678_v43 = vor.u32 %v17200_v23, %v15675_v4  ;;  %v15203_v44 = vld [vmem:[#allocation13 + $0xa70] sm:$0xf0]  ;;  %v16806_v4 = vld [vmem:[#allocation13 + $0x1b4] sm:$0xf0] }
 0x500   :  { %v18013_v10 = vadd.f32 %v9926_v26, %v17990_v5  ;;  %10181 = vmatpush.bf16.msrb.mxu2 %v15522_v47  ;;  %v15238_v47 = vor.u32 %v17089_v38, %v15235_v30  ;;  %v16997_v26 = vld [vmem:[#allocation13 + $0x7ac] sm:$0xf0]  ;;  %v9849_v38 = vadd.f32 %v17977_v58, %v9836_v59 }
 0x501   :  { %10223 = vmatpush.bf16.msra.mxu1 %v14150_v0  ;;  %v17208_v0 = vld [vmem:[#allocation13 + $0xe4c] sm:$0xf]  ;;  %v10017_v46 = vpop.f32.mrf.mxu1 }
 0x502   :  { %10211 = vmatmul.bf16.vlgmr.msra.gmra.mxu0 %v17860_v11  ;;  %v15710_v53 = vor.u32 %v17208_v0, %v15707_v48  ;;  %v16814_v0 = vld [vmem:[#allocation13 + $0x1f4] sm:$0xf0]  ;;  %v14850_v48 = vor.u32 %v16997_v26, %v14849_v1 }
 0x503   :  { %10255 = vmatpush.bf16.msrb.mxu0 %v15142_v18  ;;  %v10004_v18 = vpop.f32.mrf.mxu0  ;;  %10091 = vmatpush.bf16.msrb.mxu3 %v15742_v24  ;;  %v14595_v24 = vld [vmem:[#allocation13 + $0x5b0] sm:$0xf0]  ;;  %v14313_v1 = vld [vmem:[#allocation13 + $0x358] sm:$0xf] }
 0x504   :  { %10224 = vmatmul.bf16.vlgmr.msra.gmra.mxu1 %v17862_v12  ;;  %v10005_v17 = vadd.f32 %v10004_v18, %v7110_v41  ;;  %10182 = vmatpush.bf16.msrb.mxu2 %v15490_v33  ;;  %v17017_v41 = vld [vmem:[#allocation13 + $0x854] sm:$0xf]  ;;  %v15206_v33 = vor.u32 %v17081_v27, %v15203_v44  ;;  %v9862_v27 = vadd.f32 %v17979_v9, %v9849_v38  ;;  %v14025_v26 = vld [vmem:[#allocation13 + $0x118] sm:$0xf] }
 0x505   :  { %10268 = vmatpush.bf16.msrb.mxu1 %v15398_v2  ;;  %v17149_v2 = vld [vmem:[#allocation13 + $0xc6c] sm:$0xf0]  ;;  %v14950_v19 = vor.u32 %v17017_v41, %v14947_v42  ;;  %v14915_v18 = vld [vmem:[#allocation13 + $0x830] sm:$0xf0]  ;;  %v9837_v40 = vpop.f32.mrf.mxu3  ;;  %v14057_v41 = vld [vmem:[#allocation13 + $0x158] sm:$0xf] }
 0x506   :  { %v18015_v5 = vadd.f32 %v10017_v46, %v10005_v17  ;;  %v15458_v49 = vor.u32 %v17149_v2, %v15457_v25  ;;  %v17073_v17 = vld [vmem:[#allocation13 + $0xa14] sm:$0xf]  ;;  %v14817_v2 = vld [vmem:[#allocation13 + $0x750] sm:$0xf]  ;;  %v14918_v36 = vor.u32 %v17009_v7, %v14915_v18  ;;  %v16798_v42 = vld [vmem:[#allocation13 + $0x174] sm:$0xf0] }
 0x507   :  { %10256 = vmatpush.bf16.msrb.mxu0 %v15110_v34  ;;  %v17025_v34 = vld [vmem:[#allocation13 + $0x894] sm:$0xf]  ;;  %v9928_v32 = vpop.f32.mrf.mxu2  ;;  %10092 = vmatpush.bf16.msrb.mxu3 %v15710_v53  ;;  %v14058_v44 = vor.u32 %v16798_v42, %v14057_v41  ;;  %v14721_v7 = vld [vmem:[#allocation13 + $0x690] sm:$0xf]  ;;  %v13961_v38 = vld [vmem:[#allocation13 + $0x98] sm:$0xf] }
 0x508   :  { %v14982_v20 = vor.u32 %v17025_v34, %v14979_v51  ;;  %10183 = vmatpush.bf16.msrb.mxu2 %v15458_v49  ;;  %v15171_v46 = vld [vmem:[#allocation13 + $0xa30] sm:$0xf0]  ;;  %v14377_v34 = vld [vmem:[#allocation13 + $0x3d8] sm:$0xf]  ;;  %v16949_v40 = vld [vmem:[#allocation13 + $0x62c] sm:$0xf0] }
 0x509   :  { %10269 = vmatpush.bf16.msrb.mxu1 %v15366_v61  ;;  %v15425_v61 = vld [vmem:[#allocation13 + $0xc10] sm:$0xf]  ;;  %v14563_v53 = vld [vmem:[#allocation13 + $0x570] sm:$0xf0]  ;;  %v16878_v51 = vld [vmem:[#allocation13 + $0x3f4] sm:$0xf0]  ;;  %v15174_v49 = vor.u32 %v17073_v17, %v15171_v46 }
 0x50a   :  { %v15426_v45 = vor.u32 %v17141_v54, %v15425_v61  ;;  %v14566_v52 = vor.u32 %v16921_v31, %v14563_v53  ;;  %v14785_v54 = vld [vmem:[#allocation13 + $0x710] sm:$0xf]  ;;  %v14378_v30 = vor.u32 %v16878_v51, %v14377_v34  ;;  %v16913_v32 = vld [vmem:[#allocation13 + $0x514] sm:$0xf]  ;;  %v14281_v17 = vld [vmem:[#allocation13 + $0x318] sm:$0xf] }
 0x50b   :  { %10257 = vmatpush.bf16.msrb.mxu0 %v15078_v14  ;;  %v16937_v14 = vld [vmem:[#allocation13 + $0x5d4] sm:$0xf]  ;;  %v10006_v28 = vpop.f32.mrf.mxu0  ;;  %10093 = vmatpush.bf16.msrb.mxu3 %v15678_v43  ;;  %v16870_v43 = vld [vmem:[#allocation13 + $0x3b4] sm:$0xf0]  ;;  %v16957_v34 = vld [vmem:[#allocation13 + $0x66c] sm:$0xf0] }
 0x50c   :  { %v14630_v39 = vor.u32 %v16937_v14, %v14627_v56  ;;  %10184 = vmatpush.bf16.msrb.mxu2 %v15426_v45  ;;  %v14345_v56 = vld [vmem:[#allocation13 + $0x398] sm:$0xf]  ;;  %v14786_v28 = vor.u32 %v16981_v57, %v14785_v54  ;;  %v14467_v9 = vld [vmem:[#allocation13 + $0x4b0] sm:$0xf0] }
 0x50d   :  { %10270 = vmatpush.bf16.msrb.mxu1 %v15334_v3  ;;  %v10019_v3 = vpop.f32.mrf.mxu1  ;;  %v14346_v58 = vor.u32 %v16870_v43, %v14345_v56  ;;  %v16854_v46 = vld [vmem:[#allocation13 + $0x334] sm:$0xf0]  ;;  %v14403_v43 = vld [vmem:[#allocation13 + $0x430] sm:$0xf0] }
 0x50e   :  { %10094 = vmatmul.bf16.vlgmr.msrb.gmra.mxu3 %v17956_v16  ;;  %v16973_v3 = vld [vmem:[#allocation13 + $0x6ec] sm:$0xf0]  ;;  %v16846_v54 = vld [vmem:[#allocation13 + $0x2f4] sm:$0xf0] }
 0x50f   :  { %10258 = vmatpush.bf16.msrb.mxu0 %v15046_v35  ;;  %v16929_v35 = vld [vmem:[#allocation13 + $0x594] sm:$0xf]  ;;  %10138 = vmatpush.bf16.msra.mxu3 %v14882_v55  ;;  %v14217_v41 = vld [vmem:[#allocation13 + $0x298] sm:$0xf] }
 0x510   :  { %10229 = vmatpush.bf16.msra.mxu2 %v14630_v39  ;;  %v14598_v25 = vor.u32 %v16929_v35, %v14595_v24  ;;  %v16905_v55 = vld [vmem:[#allocation13 + $0x4d4] sm:$0xf]  ;;  %v16790_v35 = vld [vmem:[#allocation13 + $0x134] sm:$0xf0] }
 0x511   :  { %10271 = vmatpush.bf16.msrb.mxu1 %v15302_v63  ;;  %v14121_v63 = vld [vmem:[#allocation13 + $0x1d8] sm:$0xf]  ;;  %10185 = vmatmul.bf16.vlgmr.msrb.gmra.mxu2 %v17927_v62  ;;  %v14499_v39 = vld [vmem:[#allocation13 + $0x4f0] sm:$0xf0] }
 0x512   :  { %v14122_v23 = vor.u32 %v16814_v0, %v14121_v63  ;;  %v14502_v60 = vor.u32 %v16905_v55, %v14499_v39  ;;  %v16965_v63 = vld [vmem:[#allocation13 + $0x6ac] sm:$0xf0]  ;;  %v16897_v0 = vld [vmem:[#allocation13 + $0x494] sm:$0xf]  ;;  %v16838_v42 = vld [vmem:[#allocation13 + $0x2b4] sm:$0xf0] }
 0x513   :  { %10259 = vmatpush.bf16.msrb.mxu0 %v15014_v6  ;;  %v16989_v6 = vld [vmem:[#allocation13 + $0x76c] sm:$0xf0]  ;;  %10139 = vmatpush.bf16.msra.mxu3 %v14850_v48  ;;  %v9887_v48 = vpop.f32.mrf.mxu3  ;;  %v14722_v53 = vor.u32 %v16965_v63, %v14721_v7  ;;  %v15651_v39 = vld [vmem:[#allocation13 + $0xdf0] sm:$0xf0]  ;;  %v14185_v7 = vld [vmem:[#allocation13 + $0x258] sm:$0xf] }
 0x514   :  { %10230 = vmatpush.bf16.msra.mxu2 %v14598_v25  ;;  %v14818_v61 = vor.u32 %v16989_v6, %v14817_v2  ;;  %v14026_v25 = vor.u32 %v16790_v35, %v14025_v26  ;;  %v18025_v2 = vpop.f32.mrf.mxu2  ;;  %v16782_v6 = vld [vmem:[#allocation13 + $0xf4] sm:$0xf0] }
 0x515   :  { %10272 = vmatpush.bf16.msrb.mxu1 %v15270_v29  ;;  %v14089_v29 = vld [vmem:[#allocation13 + $0x198] sm:$0xf] }
 0x516   :  { %v14090_v14 = vor.u32 %v16806_v4, %v14089_v29  ;;  %v16889_v29 = vld [vmem:[#allocation13 + $0x454] sm:$0xf] }
 0x517   :  { %10260 = vmatpush.bf16.msrb.mxu0 %v14982_v20  ;;  %v14531_v20 = vld [vmem:[#allocation13 + $0x530] sm:$0xf0]  ;;  %10140 = vmatpush.bf16.msra.mxu3 %v14818_v61 }
 0x518   :  { %10231 = vmatpush.bf16.msra.mxu2 %v14566_v52  ;;  %v14534_v45 = vor.u32 %v16913_v32, %v14531_v20  ;;  %v14435_v4 = vld [vmem:[#allocation13 + $0x470] sm:$0xf0]  ;;  %v14249_v52 = vld [vmem:[#allocation13 + $0x2d8] sm:$0xf]  ;;  %v14657_v20 = vld [vmem:[#allocation13 + $0x610] sm:$0xf] }
 0x519   :  { %10273 = vmatpush.bf16.msrb.mxu1 %v15238_v47  ;;  %v14753_v47 = vld [vmem:[#allocation13 + $0x6d0] sm:$0xf]  ;;  %v14438_v32 = vor.u32 %v16889_v29, %v14435_v4  ;;  %v14250_v56 = vor.u32 %v16846_v54, %v14249_v52  ;;  %v15587_v52 = vld [vmem:[#allocation13 + $0xd70] sm:$0xf0] }
 0x51a   :  { %v14754_v24 = vor.u32 %v16973_v3, %v14753_v47  ;;  %v15905_v47 = vld [vmem:[#allocation13 + $0xfd0] sm:$0xf]  ;;  %v17193_v3 = vld [vmem:[#allocation13 + $0xdd4] sm:$0xf] }
 0x51b   :  { %10261 = vmatpush.bf16.msrb.mxu0 %v14950_v19  ;;  %v16862_v19 = vld [vmem:[#allocation13 + $0x374] sm:$0xf0]  ;;  %10141 = vmatpush.bf16.msra.mxu3 %v14786_v28  ;;  %v9889_v28 = vpop.f32.mrf.mxu3  ;;  %v15841_v29 = vld [vmem:[#allocation13 + $0xf50] sm:$0xf] }
 0x51c   :  { %10232 = vmatpush.bf16.msra.mxu2 %v14534_v45  ;;  %v14314_v18 = vor.u32 %v16862_v19, %v14313_v1  ;;  %v9980_v55 = vpop.f32.mrf.mxu2  ;;  %v14658_v19 = vor.u32 %v16949_v40, %v14657_v20  ;;  %v17245_v4 = vld [vmem:[#allocation13 + $0xf6c] sm:$0xf0]  ;;  %v15113_v20 = vld [vmem:[#allocation13 + $0x998] sm:$0xf]  ;;  %v15555_v28 = vld [vmem:[#allocation13 + $0xd30] sm:$0xf0] }
 0x51d   :  { %10274 = vmatpush.bf16.msrb.mxu1 %v15206_v33  ;;  %v9875_v33 = vadd.f32 %v17999_v22, %v9862_v27  ;;  %v14689_v22 = vld [vmem:[#allocation13 + $0x650] sm:$0xf]  ;;  %v13929_v27 = vld [vmem:[#allocation13 + $0x58] sm:$0xf] }
 0x51e   :  { %v14690_v57 = vor.u32 %v16957_v34, %v14689_v22  ;;  %v16822_v22 = vld [vmem:[#allocation13 + $0x234] sm:$0xf0] }
 0x51f   :  { %10262 = vmatpush.bf16.msrb.mxu0 %v14918_v36  ;;  %v9888_v59 = vadd.f32 %v9887_v48, %v9875_v33  ;;  %v13993_v36 = vld [vmem:[#allocation13 + $0xd8] sm:$0xf]  ;;  %10142 = vmatpush.bf16.msra.mxu3 %v14754_v24  ;;  %v18027_v31 = vpop.f32.mrf.mxu0  ;;  %v14218_v24 = vor.u32 %v16838_v42, %v14217_v41  ;;  %v15654_v33 = vor.u32 %v17193_v3, %v15651_v39  ;;  %v17185_v48 = vld [vmem:[#allocation13 + $0xd94] sm:$0xf]  ;;  %v17237_v41 = vld [vmem:[#allocation13 + $0xf2c] sm:$0xf0] }
 0x520   :  { %10233 = vmatpush.bf16.msra.mxu2 %v14502_v60  ;;  %v13994_v61 = vor.u32 %v16782_v6, %v13993_v36  ;;  %v17070_v36 = vld [vmem:[#allocation13 + $0x9f4] sm:$0xf0]  ;;  %v17169_v42 = vld [vmem:[#allocation13 + $0xd14] sm:$0xf] }
 0x521   :  { %10275 = vmatpush.bf16.msrb.mxu1 %v15174_v49  ;;  %10516 = vst [vmem:[#allocation16 + $0x8] sm:$0xff] %v9888_v59  ;;  %v18029_v51 = vpop.f32.mrf.mxu1  ;;  %v14282_v49 = vor.u32 %v16854_v46, %v14281_v17  ;;  %v13897_v17 = vld [vmem:[#allocation13 + $0x18] sm:$0xf] }
 0x522   :  { %10263 = vmatmul.bf16.vlgmr.msrb.gmra.mxu0 %v17884_v13  ;;  %v16758_v46 = vld [vmem:[#allocation13 + $0x34] sm:$0xf0] }
 0x523   :  { %10307 = vmatpush.bf16.msra.mxu0 %v14122_v23  ;;  %v14470_v23 = vor.u32 %v16897_v0, %v14467_v9  ;;  %10143 = vmatpush.bf16.msra.mxu3 %v14722_v53  ;;  %v15873_v0 = vld [vmem:[#allocation13 + $0xf90] sm:$0xf]  ;;  %v15145_v59 = vld [vmem:[#allocation13 + $0x9d8] sm:$0xf] }
 0x524   :  { %10276 = vmatmul.bf16.vlgmr.msrb.gmra.mxu1 %v17897_v8  ;;  %v17253_v9 = vld [vmem:[#allocation13 + $0xfac] sm:$0xf0]  ;;  %v15146_v54 = vor.u32 %v17070_v36, %v15145_v59  ;;  %v17062_v40 = vld [vmem:[#allocation13 + $0x9b4] sm:$0xf0]  ;;  %v17153_v59 = vld [vmem:[#allocation13 + $0xc94] sm:$0xf] }
 0x525   :  { %10320 = vmatpush.bf16.msra.mxu1 %v14378_v30  ;;  %v16774_v30 = vld [vmem:[#allocation13 + $0xb4] sm:$0xf0]  ;;  %10234 = vmatpush.bf16.msra.mxu2 %v14470_v23  ;;  %v15874_v53 = vor.u32 %v17253_v9, %v15873_v0  ;;  %v15491_v36 = vld [vmem:[#allocation13 + $0xcb0] sm:$0xf0] }
 0x526   :  { %v13962_v45 = vor.u32 %v16774_v30, %v13961_v38  ;;  %v14153_v23 = vld [vmem:[#allocation13 + $0x218] sm:$0xf] }
 0x527   :  { %10308 = vmatpush.bf16.msra.mxu0 %v14090_v14  ;;  %v16881_v14 = vld [vmem:[#allocation13 + $0x414] sm:$0xf]  ;;  %10144 = vmatpush.bf16.msra.mxu3 %v14690_v57  ;;  %v10058_v1 = vpop.f32.mrf.mxu0  ;;  %v15401_v38 = vld [vmem:[#allocation13 + $0xbd8] sm:$0xf]  ;;  %v14154_v57 = vor.u32 %v16822_v22, %v14153_v23 }
 0x528   :  { %v14406_v26 = vor.u32 %v16881_v14, %v14403_v43  ;;  %v17134_v30 = vld [vmem:[#allocation13 + $0xbf4] sm:$0xf0]  ;;  %v15809_v43 = vld [vmem:[#allocation13 + $0xf10] sm:$0xf] }
 0x529   :  { %10321 = vmatpush.bf16.msra.mxu1 %v14346_v58  ;;  %v17261_v58 = vld [vmem:[#allocation13 + $0xfec] sm:$0xf0]  ;;  %10235 = vmatpush.bf16.msra.mxu2 %v14438_v32  ;;  %v10071_v35 = vpop.f32.mrf.mxu1  ;;  %v15842_v32 = vor.u32 %v17245_v4, %v15841_v29  ;;  %v15810_v3 = vor.u32 %v17237_v41, %v15809_v43  ;;  %v15081_v55 = vld [vmem:[#allocation13 + $0x958] sm:$0xf] }
 0x52a   :  { %v15906_v60 = vor.u32 %v17261_v58, %v15905_v47  ;;  %v17126_v47 = vld [vmem:[#allocation13 + $0xbb4] sm:$0xf0]  ;;  %v15114_v58 = vor.u32 %v17062_v40, %v15113_v20  ;;  %v15777_v1 = vld [vmem:[#allocation13 + $0xed0] sm:$0xf]  ;;  %v15523_v35 = vld [vmem:[#allocation13 + $0xcf0] sm:$0xf0] }
 0x52b   :  { %10309 = vmatpush.bf16.msra.mxu0 %v14058_v44  ;;  %v16766_v44 = vld [vmem:[#allocation13 + $0x74] sm:$0xf0]  ;;  %10145 = vmatpush.bf16.msra.mxu3 %v14658_v19  ;;  %v17229_v19 = vld [vmem:[#allocation13 + $0xeec] sm:$0xf0] }
 0x52c   :  { %v13930_v63 = vor.u32 %v16766_v44, %v13929_v27  ;;  %v17054_v39 = vld [vmem:[#allocation13 + $0x974] sm:$0xf0]  ;;  %v15558_v27 = vor.u32 %v17169_v42, %v15555_v28  ;;  %v15681_v28 = vld [vmem:[#allocation13 + $0xe10] sm:$0xf] }
 0x52d   :  { %10322 = vmatpush.bf16.msra.mxu1 %v14314_v18  ;;  %v16830_v18 = vld [vmem:[#allocation13 + $0x274] sm:$0xf0]  ;;  %10236 = vmatpush.bf16.msra.mxu2 %v14406_v26  ;;  %v17161_v26 = vld [vmem:[#allocation13 + $0xcd4] sm:$0xf] }
 0x52e   :  { %v14186_v6 = vor.u32 %v16830_v18, %v14185_v7  ;;  %10146 = vmatmul.bf16.vlgmr.msra.gmra.mxu3 %v17901_v37  ;;  %v15082_v7 = vor.u32 %v17054_v39, %v15081_v55  ;;  %v15778_v18 = vor.u32 %v17229_v19, %v15777_v1  ;;  %v15049_v0 = vld [vmem:[#allocation13 + $0x918] sm:$0xf]  ;;  %v17205_v55 = vld [vmem:[#allocation13 + $0xe2c] sm:$0xf0]  ;;  %v17137_v39 = vld [vmem:[#allocation13 + $0xc14] sm:$0xf] }
 0x52f   :  { %10310 = vmatpush.bf16.msra.mxu0 %v14026_v25  ;;  %v15619_v25 = vld [vmem:[#allocation13 + $0xdb0] sm:$0xf0]  ;;  %10190 = vmatpush.bf16.msrb.mxu3 %v15906_v60  ;;  %v17118_v60 = vld [vmem:[#allocation13 + $0xb74] sm:$0xf0] }
 0x530   :  { %v15622_v34 = vor.u32 %v17185_v48, %v15619_v25  ;;  %10237 = vmatmul.bf16.vlgmr.msra.gmra.mxu2 %v17878_v21  ;;  %v17046_v9 = vld [vmem:[#allocation13 + $0x934] sm:$0xf0]  ;;  %v15526_v48 = vor.u32 %v17161_v26, %v15523_v35  ;;  %v18038_v23 = vpop.f32.mrf.mxu3  ;;  %v17001_v19 = vld [vmem:[#allocation13 + $0x7d4] sm:$0xf] }
 0x531   :  { %10323 = vmatpush.bf16.msra.mxu1 %v14282_v49  ;;  %10281 = vmatpush.bf16.msrb.mxu2 %v15654_v33  ;;  %v13898_v49 = vor.u32 %v16758_v46, %v13897_v17  ;;  %v18035_v33 = vld [vmem:[#allocation15] sm:$0xff]  ;;  %v15745_v17 = vld [vmem:[#allocation13 + $0xe90] sm:$0xf]  ;;  %v10030_v22 = vpop.f32.mrf.mxu2  ;;  %v15017_v4 = vld [vmem:[#allocation13 + $0x8d8] sm:$0xf] }
 0x532   :  { %v17221_v46 = vld [vmem:[#allocation13 + $0xeac] sm:$0xf0]  ;;  %v17102_v43 = vld [vmem:[#allocation13 + $0xaf4] sm:$0xf0] }
 0x533   :  { %10311 = vmatpush.bf16.msra.mxu0 %v13994_v61  ;;  %v17177_v61 = vld [vmem:[#allocation13 + $0xd54] sm:$0xf]  ;;  %10191 = vmatpush.bf16.msrb.mxu3 %v15874_v53  ;;  %v17110_v53 = vld [vmem:[#allocation13 + $0xb34] sm:$0xf0]  ;;  %v15746_v29 = vor.u32 %v17221_v46, %v15745_v17 }
 0x534   :  { %v15590_v14 = vor.u32 %v17177_v61, %v15587_v52  ;;  %v17038_v61 = vld [vmem:[#allocation13 + $0x8f4] sm:$0xf0] }
 0x535   :  { %10324 = vmatpush.bf16.msra.mxu1 %v14250_v56  ;;  %10282 = vmatpush.bf16.msrb.mxu2 %v15622_v34  ;;  %v15402_v56 = vor.u32 %v17134_v30, %v15401_v38  ;;  %v15050_v34 = vor.u32 %v17046_v9, %v15049_v0  ;;  %v15713_v30 = vld [vmem:[#allocation13 + $0xe50] sm:$0xf]  ;;  %v15018_v41 = vor.u32 %v17038_v61, %v15017_v4  ;;  %v17094_v1 = vld [vmem:[#allocation13 + $0xab4] sm:$0xf0] }
 0x536   :  { %v14953_v0 = vld [vmem:[#allocation13 + $0x858] sm:$0xf] }
 0x537   :  { %10312 = vmatpush.bf16.msra.mxu0 %v13962_v45  ;;  %v15369_v45 = vld [vmem:[#allocation13 + $0xb98] sm:$0xf]  ;;  %10192 = vmatpush.bf16.msrb.mxu3 %v15842_v32  ;;  %v17145_v32 = vld [vmem:[#allocation13 + $0xc54] sm:$0xf] }
 0x538   :  { %v15370_v44 = vor.u32 %v17126_v47, %v15369_v45  ;;  %v14985_v45 = vld [vmem:[#allocation13 + $0x898] sm:$0xf]  ;;  %v9941_v26 = vpop.f32.mrf.mxu3 }
 0x539   :  { %10325 = vmatpush.bf16.msra.mxu1 %v14218_v24  ;;  %10283 = vmatpush.bf16.msrb.mxu2 %v15590_v14  ;;  %v15337_v24 = vld [vmem:[#allocation13 + $0xb58] sm:$0xf]  ;;  %v15459_v14 = vld [vmem:[#allocation13 + $0xc70] sm:$0xf0]  ;;  %v10032_v35 = vpop.f32.mrf.mxu2 }
 0x53a   :  { %v15338_v25 = vor.u32 %v17118_v60, %v15337_v24  ;;  %v17030_v47 = vld [vmem:[#allocation13 + $0x8b4] sm:$0xf0]  ;;  %v14883_v60 = vld [vmem:[#allocation13 + $0x7f0] sm:$0xf0] }
 0x53b   :  { %10313 = vmatpush.bf16.msra.mxu0 %v13930_v63  ;;  %10193 = vmatpush.bf16.msrb.mxu3 %v15810_v3  ;;  %v7111_v63 = vperm.slane %v18035_v33, 4  ;;  %v14986_v24 = vor.u32 %v17030_v47, %v14985_v45  ;;  %v17022_v9 = vld [vmem:[#allocation13 + $0x874] sm:$0xf0]  ;;  %v14787_v26 = vld [vmem:[#allocation13 + $0x730] sm:$0xf0] }
 0x53c   :  { %v14601_v4 = vld [vmem:[#allocation13 + $0x598] sm:$0xf] }
 0x53d   :  { %10326 = vmatpush.bf16.msra.mxu1 %v14186_v6  ;;  %10284 = vmatpush.bf16.msrb.mxu2 %v15558_v27  ;;  %v15305_v6 = vld [vmem:[#allocation13 + $0xb18] sm:$0xf]  ;;  %v15427_v27 = vld [vmem:[#allocation13 + $0xc30] sm:$0xf0] }
 0x53e   :  { %v15306_v38 = vor.u32 %v17110_v53, %v15305_v6  ;;  %v15209_v6 = vld [vmem:[#allocation13 + $0xa58] sm:$0xf] }
 0x53f   :  { %10314 = vmatpush.bf16.msra.mxu0 %v13898_v49  ;;  %10194 = vmatpush.bf16.msrb.mxu3 %v15778_v18  ;;  %v18041_v49 = vadd.f32 %v10030_v22, %v18015_v5  ;;  %v10108_v52 = vpop.f32.mrf.mxu0  ;;  %v16942_v18 = vld [vmem:[#allocation13 + $0x5f4] sm:$0xf0]  ;;  %v16993_v22 = vld [vmem:[#allocation13 + $0x794] sm:$0xf] }
 0x540   :  { %v10109_v20 = vadd.f32 %v10108_v52, %v7111_v63  ;;  %v15682_v63 = vor.u32 %v17205_v55, %v15681_v28  ;;  %v17086_v53 = vld [vmem:[#allocation13 + $0xa74] sm:$0xf0] }
 0x541   :  { %10327 = vmatpush.bf16.msra.mxu1 %v14154_v57  ;;  %10285 = vmatpush.bf16.msrb.mxu2 %v15526_v48  ;;  %v17213_v57 = vld [vmem:[#allocation13 + $0xe6c] sm:$0xf0]  ;;  %v10121_v40 = vpop.f32.mrf.mxu1  ;;  %v16934_v61 = vld [vmem:[#allocation13 + $0x5b4] sm:$0xf0] }
 0x542   :  { %10315 = vmatmul.bf16.vlgmr.msra.gmra.mxu0 %v17860_v11  ;;  %v18043_v5 = vadd.f32 %v10121_v40, %v10109_v20  ;;  %v15714_v42 = vor.u32 %v17213_v57, %v15713_v30  ;;  %v14921_v52 = vld [vmem:[#allocation13 + $0x818] sm:$0xf]  ;;  %v16810_v30 = vld [vmem:[#allocation13 + $0x1dc] sm:$0xf]  ;;  %v14602_v20 = vor.u32 %v16934_v61, %v14601_v4 }
 0x543   :  { %10359 = vmatpush.bf16.msrb.mxu0 %v15146_v54  ;;  %v15494_v54 = vor.u32 %v17153_v59, %v15491_v36  ;;  %10195 = vmatpush.bf16.msrb.mxu3 %v15746_v29  ;;  %v14886_v59 = vor.u32 %v17001_v19, %v14883_v60  ;;  %v14851_v29 = vld [vmem:[#allocation13 + $0x7b0] sm:$0xf0]  ;;  %v14123_v57 = vld [vmem:[#allocation13 + $0x1f8] sm:$0xf0]  ;;  %v15177_v40 = vld [vmem:[#allocation13 + $0xa18] sm:$0xf] }
 0x544   :  { %10328 = vmatmul.bf16.vlgmr.msra.gmra.mxu1 %v17862_v12  ;;  %v14569_v28 = vld [vmem:[#allocation13 + $0x558] sm:$0xf]  ;;  %v14126_v47 = vor.u32 %v16810_v30, %v14123_v57  ;;  %v14723_v30 = vld [vmem:[#allocation13 + $0x6b0] sm:$0xf0] }
 0x545   :  { %10372 = vmatpush.bf16.msrb.mxu1 %v15402_v56  ;;  %v15273_v56 = vld [vmem:[#allocation13 + $0xad8] sm:$0xf]  ;;  %10286 = vmatpush.bf16.msrb.mxu2 %v15494_v54 }
 0x546   :  { %v15274_v3 = vor.u32 %v17102_v43, %v15273_v56  ;;  %v17014_v54 = vld [vmem:[#allocation13 + $0x834] sm:$0xf0]  ;;  %v16985_v56 = vld [vmem:[#allocation13 + $0x754] sm:$0xf]  ;;  %v9940_v43 = vadd.f32 %v18038_v23, %v18013_v10 }
 0x547   :  { %10360 = vmatpush.bf16.msrb.mxu0 %v15114_v58  ;;  %v15462_v58 = vor.u32 %v17145_v32, %v15459_v14  ;;  %10196 = vmatpush.bf16.msrb.mxu3 %v15714_v42  ;;  %v10110_v48 = vpop.f32.mrf.mxu0  ;;  %v14854_v32 = vor.u32 %v16993_v22, %v14851_v29  ;;  %v17078_v14 = vld [vmem:[#allocation13 + $0xa34] sm:$0xf0]  ;;  %v14819_v42 = vld [vmem:[#allocation13 + $0x770] sm:$0xf0]  ;;  %v14315_v22 = vld [vmem:[#allocation13 + $0x378] sm:$0xf0] }
 0x548   :  { %v16926_v45 = vld [vmem:[#allocation13 + $0x574] sm:$0xf0]  ;;  %v15178_v55 = vor.u32 %v17078_v14, %v15177_v40  ;;  %v16977_v23 = vld [vmem:[#allocation13 + $0x714] sm:$0xf]  ;;  %v14027_v29 = vld [vmem:[#allocation13 + $0x138] sm:$0xf0] }
 0x549   :  { %10373 = vmatpush.bf16.msrb.mxu1 %v15370_v44  ;;  %v15241_v44 = vld [vmem:[#allocation13 + $0xa98] sm:$0xf]  ;;  %10287 = vmatpush.bf16.msrb.mxu2 %v15462_v58  ;;  %v10123_v46 = vpop.f32.mrf.mxu1  ;;  %v16874_v58 = vld [vmem:[#allocation13 + $0x3dc] sm:$0xf]  ;;  %v14570_v10 = vor.u32 %v16926_v45, %v14569_v28 }
 0x54a   :  { %v15242_v17 = vor.u32 %v17094_v1, %v15241_v44  ;;  %v14822_v44 = vor.u32 %v16985_v56, %v14819_v42  ;;  %v9953_v1 = vadd.f32 %v18001_v50, %v9940_v43  ;;  %v14537_v35 = vld [vmem:[#allocation13 + $0x518] sm:$0xf]  ;;  %v16850_v40 = vld [vmem:[#allocation13 + $0x31c] sm:$0xf] }
 0x54b   :  { %10361 = vmatpush.bf16.msrb.mxu0 %v15082_v7  ;;  %v14633_v7 = vld [vmem:[#allocation13 + $0x5d8] sm:$0xf]  ;;  %10197 = vmatpush.bf16.msrb.mxu3 %v15682_v63  ;;  %v16794_v63 = vld [vmem:[#allocation13 + $0x15c] sm:$0xf] }
 0x54c   :  { %v14634_v36 = vor.u32 %v16942_v18, %v14633_v7  ;;  %v16866_v7 = vld [vmem:[#allocation13 + $0x39c] sm:$0xf]  ;;  %v14505_v46 = vld [vmem:[#allocation13 + $0x4d8] sm:$0xf] }
 0x54d   :  { %10374 = vmatpush.bf16.msrb.mxu1 %v15338_v25  ;;  %v15430_v25 = vor.u32 %v17137_v39, %v15427_v27  ;;  %v16802_v39 = vld [vmem:[#allocation13 + $0x19c] sm:$0xf]  ;;  %v14473_v57 = vld [vmem:[#allocation13 + $0x498] sm:$0xf] }
 0x54e   :  { %10198 = vmatmul.bf16.vlgmr.msrb.gmra.mxu3 %v17956_v16  ;;  %v14091_v27 = vld [vmem:[#allocation13 + $0x1b8] sm:$0xf0] }
 0x54f   :  { %10362 = vmatpush.bf16.msrb.mxu0 %v15050_v34  ;;  %v14954_v34 = vor.u32 %v17022_v9, %v14953_v0  ;;  %10288 = vmatpush.bf16.msrb.mxu2 %v15430_v25  ;;  %v14094_v60 = vor.u32 %v16802_v39, %v14091_v27  ;;  %v14347_v18 = vld [vmem:[#allocation13 + $0x3b8] sm:$0xf0]  ;;  %v14790_v9 = vor.u32 %v16977_v23, %v14787_v26  ;;  %v16969_v25 = vld [vmem:[#allocation13 + $0x6d4] sm:$0xf]  ;;  %v14441_v39 = vld [vmem:[#allocation13 + $0x458] sm:$0xf] }
 0x550   :  { %10242 = vmatpush.bf16.msra.mxu3 %v14886_v59  ;;  %v14059_v0 = vld [vmem:[#allocation13 + $0x178] sm:$0xf0]  ;;  %v14350_v50 = vor.u32 %v16866_v7, %v14347_v18  ;;  %v16910_v59 = vld [vmem:[#allocation13 + $0x4f4] sm:$0xf0] }
 0x551   :  { %10375 = vmatpush.bf16.msrb.mxu1 %v15306_v38  ;;  %v15210_v38 = vor.u32 %v17086_v53, %v15209_v6  ;;  %v14062_v6 = vor.u32 %v16794_v63, %v14059_v0  ;;  %v16858_v53 = vld [vmem:[#allocation13 + $0x35c] sm:$0xf]  ;;  %v14506_v61 = vor.u32 %v16910_v59, %v14505_v46  ;;  %v18054_v43 = vpop.f32.mrf.mxu2  ;;  %v16894_v27 = vld [vmem:[#allocation13 + $0x474] sm:$0xf0] }
 0x552   :  { %10289 = vmatmul.bf16.vlgmr.msrb.gmra.mxu2 %v17927_v62  ;;  %v14283_v14 = vld [vmem:[#allocation13 + $0x338] sm:$0xf0]  ;;  %v14409_v7 = vld [vmem:[#allocation13 + $0x418] sm:$0xf] }
 0x553   :  { %10363 = vmatpush.bf16.msrb.mxu0 %v15018_v41  ;;  %10333 = vmatpush.bf16.msra.mxu2 %v14634_v36  ;;  %v14922_v41 = vor.u32 %v17014_v54, %v14921_v52  ;;  %v9966_v36 = vadd.f32 %v18003_v15, %v9953_v1  ;;  %v16961_v52 = vld [vmem:[#allocation13 + $0x694] sm:$0xf]  ;;  %v14318_v54 = vor.u32 %v16858_v53, %v14315_v22  ;;  %v16902_v15 = vld [vmem:[#allocation13 + $0x4b4] sm:$0xf0]  ;;  %v13995_v42 = vld [vmem:[#allocation13 + $0xf8] sm:$0xf0] }
 0x554   :  { %10243 = vmatpush.bf16.msra.mxu3 %v14854_v32  ;;  %v9991_v32 = vpop.f32.mrf.mxu3  ;;  %v14726_v45 = vor.u32 %v16961_v52, %v14723_v30  ;;  %v14251_v23 = vld [vmem:[#allocation13 + $0x2f8] sm:$0xf0]  ;;  %v16886_v63 = vld [vmem:[#allocation13 + $0x434] sm:$0xf0] }
 0x555   :  { %10376 = vmatpush.bf16.msrb.mxu1 %v15274_v3  ;;  %v14379_v3 = vld [vmem:[#allocation13 + $0x3f8] sm:$0xf0]  ;;  %v15657_v46 = vld [vmem:[#allocation13 + $0xdd8] sm:$0xf] }
 0x556   :  { %v14382_v19 = vor.u32 %v16874_v58, %v14379_v3  ;;  %v14691_v58 = vld [vmem:[#allocation13 + $0x670] sm:$0xf0]  ;;  %v16770_v1 = vld [vmem:[#allocation13 + $0x9c] sm:$0xf] }
 0x557   :  { %10364 = vmatpush.bf16.msrb.mxu0 %v14986_v24  ;;  %10334 = vmatpush.bf16.msra.mxu2 %v14602_v20  ;;  %v16918_v24 = vld [vmem:[#allocation13 + $0x534] sm:$0xf0]  ;;  %v16834_v0 = vld [vmem:[#allocation13 + $0x29c] sm:$0xf] }
 0x558   :  { %10244 = vmatpush.bf16.msra.mxu3 %v14822_v44  ;;  %v14538_v48 = vor.u32 %v16918_v24, %v14537_v35  ;;  %v14442_v35 = vor.u32 %v16894_v27, %v14441_v39  ;;  %v16945_v24 = vld [vmem:[#allocation13 + $0x614] sm:$0xf]  ;;  %v13931_v53 = vld [vmem:[#allocation13 + $0x78] sm:$0xf0] }
 0x559   :  { %10377 = vmatpush.bf16.msrb.mxu1 %v15242_v17  ;;  %v14755_v17 = vld [vmem:[#allocation13 + $0x6f0] sm:$0xf0]  ;;  %v10084_v59 = vpop.f32.mrf.mxu2 }
 0x55a   :  { %v14758_v4 = vor.u32 %v16969_v25, %v14755_v17  ;;  %v15907_v17 = vld [vmem:[#allocation13 + $0xff0] sm:$0xf0] }
 0x55b   :  { %10365 = vmatpush.bf16.msrb.mxu0 %v14954_v34  ;;  %10335 = vmatpush.bf16.msra.mxu2 %v14570_v10  ;;  %v16786_v34 = vld [vmem:[#allocation13 + $0x11c] sm:$0xf]  ;;  %v17241_v27 = vld [vmem:[#allocation13 + $0xf54] sm:$0xf] }
 0x55c   :  { %10245 = vmatpush.bf16.msra.mxu3 %v14790_v9  ;;  %v14030_v20 = vor.u32 %v16786_v34, %v14027_v29  ;;  %v16842_v10 = vld [vmem:[#allocation13 + $0x2dc] sm:$0xf]  ;;  %v14410_v29 = vor.u32 %v16886_v63, %v14409_v7 }
 0x55d   :  { %10378 = vmatpush.bf16.msrb.mxu1 %v15210_v38  ;;  %v9979_v38 = vadd.f32 %v18025_v2, %v9966_v36  ;;  %v16953_v2 = vld [vmem:[#allocation13 + $0x654] sm:$0xf]  ;;  %v14254_v18 = vor.u32 %v16842_v10, %v14251_v23  ;;  %v14219_v9 = vld [vmem:[#allocation13 + $0x2b8] sm:$0xf0]  ;;  %v17198_v36 = vld [vmem:[#allocation13 + $0xdf4] sm:$0xf0] }
 0x55e   :  { %v14694_v26 = vor.u32 %v16953_v2, %v14691_v58  ;;  %v15658_v30 = vor.u32 %v17198_v36, %v15657_v46  ;;  %v16818_v2 = vld [vmem:[#allocation13 + $0x21c] sm:$0xf]  ;;  %v15593_v10 = vld [vmem:[#allocation13 + $0xd58] sm:$0xf] }
 0x55f   :  { %10366 = vmatpush.bf16.msrb.mxu0 %v14922_v41  ;;  %10336 = vmatpush.bf16.msra.mxu2 %v14538_v48  ;;  %v9992_v56 = vadd.f32 %v9991_v32, %v9979_v38  ;;  %v16778_v41 = vld [vmem:[#allocation13 + $0xdc] sm:$0xf]  ;;  %v18056_v28 = vpop.f32.mrf.mxu0  ;;  %v9993_v48 = vpop.f32.mrf.mxu3  ;;  %v15875_v32 = vld [vmem:[#allocation13 + $0xfb0] sm:$0xf0]  ;;  %v17182_v23 = vld [vmem:[#allocation13 + $0xd74] sm:$0xf0] }
 0x560   :  { %10246 = vmatpush.bf16.msra.mxu3 %v14758_v4  ;;  %v13998_v44 = vor.u32 %v16778_v41, %v13995_v42  ;;  %v14187_v38 = vld [vmem:[#allocation13 + $0x278] sm:$0xf0]  ;;  %v15561_v48 = vld [vmem:[#allocation13 + $0xd18] sm:$0xf] }
 0x561   :  { %10379 = vmatpush.bf16.msrb.mxu1 %v15178_v55  ;;  %10517 = vst [vmem:[#allocation16 + $0x10] sm:$0xff] %v9992_v56  ;;  %v18058_v3 = vpop.f32.mrf.mxu1  ;;  %v14286_v55 = vor.u32 %v16850_v40, %v14283_v14  ;;  %v17190_v40 = vld [vmem:[#allocation13 + $0xdb4] sm:$0xf0]  ;;  %v16754_v14 = vld [vmem:[#allocation13 + $0x1c] sm:$0xf] }
 0x562   :  { %10367 = vmatmul.bf16.vlgmr.msrb.gmra.mxu0 %v17884_v13  ;;  %v13899_v56 = vld [vmem:[#allocation13 + $0x38] sm:$0xf0] }
 0x563   :  { %10411 = vmatpush.bf16.msra.mxu0 %v14126_v47  ;;  %10337 = vmatpush.bf16.msra.mxu2 %v14506_v61  ;;  %v14474_v47 = vor.u32 %v16902_v15, %v14473_v57  ;;  %v14222_v61 = vor.u32 %v16834_v0, %v14219_v9  ;;  %v17249_v15 = vld [vmem:[#allocation13 + $0xf94] sm:$0xf]  ;;  %v17066_v41 = vld [vmem:[#allocation13 + $0x9dc] sm:$0xf]  ;;  %v13902_v39 = vor.u32 %v16754_v14, %v13899_v56 }
 0x564   :  { %10380 = vmatmul.bf16.vlgmr.msrb.gmra.mxu1 %v17897_v8  ;;  %10247 = vmatpush.bf16.msra.mxu3 %v14726_v45  ;;  %v15147_v42 = vld [vmem:[#allocation13 + $0x9f8] sm:$0xf0]  ;;  %v17233_v0 = vld [vmem:[#allocation13 + $0xf14] sm:$0xf] }
 0x565   :  { %10424 = vmatpush.bf16.msra.mxu1 %v14382_v19  ;;  %v13963_v19 = vld [vmem:[#allocation13 + $0xb8] sm:$0xf0]  ;;  %v15811_v9 = vld [vmem:[#allocation13 + $0xf30] sm:$0xf0] }
 0x566   :  { %v13966_v25 = vor.u32 %v16770_v1, %v13963_v19  ;;  %v14155_v58 = vld [vmem:[#allocation13 + $0x238] sm:$0xf0]  ;;  %v15150_v1 = vor.u32 %v17066_v41, %v15147_v42  ;;  %v15814_v59 = vor.u32 %v17233_v0, %v15811_v9  ;;  %v17217_v14 = vld [vmem:[#allocation13 + $0xe94] sm:$0xf]  ;;  %v17158_v41 = vld [vmem:[#allocation13 + $0xcb4] sm:$0xf0] }
 0x567   :  { %10412 = vmatpush.bf16.msra.mxu0 %v14094_v60  ;;  %10338 = vmatpush.bf16.msra.mxu2 %v14474_v47  ;;  %v14659_v60 = vld [vmem:[#allocation13 + $0x630] sm:$0xf0]  ;;  %v10162_v22 = vpop.f32.mrf.mxu0  ;;  %v15878_v47 = vor.u32 %v17249_v15, %v15875_v32  ;;  %v17130_v19 = vld [vmem:[#allocation13 + $0xbdc] sm:$0xf] }
 0x568   :  { %10248 = vmatpush.bf16.msra.mxu3 %v14694_v26  ;;  %v14662_v34 = vor.u32 %v16945_v24, %v14659_v60  ;;  %v15403_v26 = vld [vmem:[#allocation13 + $0xbf8] sm:$0xf0]  ;;  %v15747_v56 = vld [vmem:[#allocation13 + $0xeb0] sm:$0xf0] }
 0x569   :  { %10425 = vmatpush.bf16.msra.mxu1 %v14350_v50  ;;  %v17257_v50 = vld [vmem:[#allocation13 + $0xfd4] sm:$0xf]  ;;  %v10175_v4 = vpop.f32.mrf.mxu1  ;;  %v17058_v60 = vld [vmem:[#allocation13 + $0x99c] sm:$0xf]  ;;  %v15406_v63 = vor.u32 %v17130_v19, %v15403_v26  ;;  %v15465_v26 = vld [vmem:[#allocation13 + $0xc58] sm:$0xf] }
 0x56a   :  { %v15910_v52 = vor.u32 %v17257_v50, %v15907_v17  ;;  %v15115_v7 = vld [vmem:[#allocation13 + $0x9b8] sm:$0xf0]  ;;  %v15529_v4 = vld [vmem:[#allocation13 + $0xcd8] sm:$0xf]  ;;  %v15715_v19 = vld [vmem:[#allocation13 + $0xe70] sm:$0xf0] }
 0x56b   :  { %10413 = vmatpush.bf16.msra.mxu0 %v14062_v6  ;;  %v16762_v6 = vld [vmem:[#allocation13 + $0x5c] sm:$0xf]  ;;  %10339 = vmatpush.bf16.msra.mxu2 %v14442_v35  ;;  %v14158_v35 = vor.u32 %v16818_v2, %v14155_v58  ;;  %v15118_v46 = vor.u32 %v17058_v60, %v15115_v7  ;;  %v17150_v60 = vld [vmem:[#allocation13 + $0xc74] sm:$0xf0]  ;;  %v17201_v9 = vld [vmem:[#allocation13 + $0xe14] sm:$0xf] }
 0x56c   :  { %v13934_v57 = vor.u32 %v16762_v6, %v13931_v53  ;;  %10249 = vmatpush.bf16.msra.mxu3 %v14662_v34  ;;  %v17122_v50 = vld [vmem:[#allocation13 + $0xb9c] sm:$0xf]  ;;  %v17225_v34 = vld [vmem:[#allocation13 + $0xed4] sm:$0xf] }
 0x56d   :  { %10426 = vmatpush.bf16.msra.mxu1 %v14318_v54  ;;  %v16826_v54 = vld [vmem:[#allocation13 + $0x25c] sm:$0xf] }
 0x56e   :  { %v14190_v45 = vor.u32 %v16826_v54, %v14187_v38  ;;  %v15371_v17 = vld [vmem:[#allocation13 + $0xbb8] sm:$0xf0] }
 0x56f   :  { %10414 = vmatpush.bf16.msra.mxu0 %v14030_v20  ;;  %v15625_v20 = vld [vmem:[#allocation13 + $0xd98] sm:$0xf]  ;;  %10340 = vmatpush.bf16.msra.mxu2 %v14410_v29  ;;  %v17050_v36 = vld [vmem:[#allocation13 + $0x95c] sm:$0xf]  ;;  %v15374_v22 = vor.u32 %v17122_v50, %v15371_v17  ;;  %v15779_v29 = vld [vmem:[#allocation13 + $0xef0] sm:$0xf0]  ;;  %v15466_v50 = vor.u32 %v17150_v60, %v15465_v26 }
 0x570   :  { %10294 = vmatpush.bf16.msrb.mxu3 %v15910_v52  ;;  %v15083_v6 = vld [vmem:[#allocation13 + $0x978] sm:$0xf0]  ;;  %v14825_v26 = vld [vmem:[#allocation13 + $0x758] sm:$0xf] }
 0x571   :  { %10427 = vmatpush.bf16.msra.mxu1 %v14286_v55  ;;  %v15626_v55 = vor.u32 %v17190_v40, %v15625_v20  ;;  %10250 = vmatmul.bf16.vlgmr.msra.gmra.mxu3 %v17901_v37  ;;  %v17114_v52 = vld [vmem:[#allocation13 + $0xb5c] sm:$0xf]  ;;  %v15086_v38 = vor.u32 %v17050_v36, %v15083_v6  ;;  %v17142_v36 = vld [vmem:[#allocation13 + $0xc34] sm:$0xf0] }
 0x572   :  { %10341 = vmatmul.bf16.vlgmr.msra.gmra.mxu2 %v17878_v21  ;;  %v15339_v54 = vld [vmem:[#allocation13 + $0xb78] sm:$0xf0]  ;;  %v16990_v60 = vld [vmem:[#allocation13 + $0x774] sm:$0xf0] }
 0x573   :  { %10415 = vmatpush.bf16.msra.mxu0 %v13998_v44  ;;  %10385 = vmatpush.bf16.msrb.mxu2 %v15658_v30  ;;  %v15843_v44 = vld [vmem:[#allocation13 + $0xf70] sm:$0xf0]  ;;  %v15782_v30 = vor.u32 %v17225_v34, %v15779_v29  ;;  %v17042_v15 = vld [vmem:[#allocation13 + $0x91c] sm:$0xf]  ;;  %v15342_v40 = vor.u32 %v17114_v52, %v15339_v54 }
 0x574   :  { %10295 = vmatpush.bf16.msrb.mxu3 %v15878_v47  ;;  %v15846_v24 = vor.u32 %v17241_v27, %v15843_v44  ;;  %v15051_v32 = vld [vmem:[#allocation13 + $0x938] sm:$0xf0]  ;;  %v10134_v47 = vpop.f32.mrf.mxu2 }
 0x575   :  { %10428 = vmatpush.bf16.msra.mxu1 %v14254_v18  ;;  %v15594_v18 = vor.u32 %v17182_v23, %v15593_v10  ;;  %v17106_v42 = vld [vmem:[#allocation13 + $0xb1c] sm:$0xf]  ;;  %v15054_v2 = vor.u32 %v17042_v15, %v15051_v32  ;;  %v18068_v58 = vadd.f32 %v10134_v47, %v18043_v5  ;;  %v16998_v47 = vld [vmem:[#allocation13 + $0x7b4] sm:$0xf0] }
 0x576   :  { %v15019_v27 = vld [vmem:[#allocation13 + $0x8f8] sm:$0xf0] }
 0x577   :  { %10416 = vmatpush.bf16.msra.mxu0 %v13966_v25  ;;  %10386 = vmatpush.bf16.msrb.mxu2 %v15626_v55  ;;  %v17174_v25 = vld [vmem:[#allocation13 + $0xd34] sm:$0xf0]  ;;  %v15750_v55 = vor.u32 %v17217_v14, %v15747_v56  ;;  %v17098_v7 = vld [vmem:[#allocation13 + $0xadc] sm:$0xf] }
 0x578   :  { %10296 = vmatpush.bf16.msrb.mxu3 %v15846_v24  ;;  %v15562_v53 = vor.u32 %v17174_v25, %v15561_v48  ;;  %v17026_v48 = vld [vmem:[#allocation13 + $0x89c] sm:$0xf] }
 0x579   :  { %10429 = vmatpush.bf16.msra.mxu1 %v14222_v61  ;;  %v17166_v61 = vld [vmem:[#allocation13 + $0xcf4] sm:$0xf0]  ;;  %v14987_v25 = vld [vmem:[#allocation13 + $0x8b8] sm:$0xf0] }
 0x57a   :  { %v15530_v20 = vor.u32 %v17166_v61, %v15529_v4  ;;  %v17090_v6 = vld [vmem:[#allocation13 + $0xa9c] sm:$0xf]  ;;  %v14990_v4 = vor.u32 %v17026_v48, %v14987_v25  ;;  %v17006_v61 = vld [vmem:[#allocation13 + $0x7f4] sm:$0xf0] }
 0x57b   :  { %10417 = vmatpush.bf16.msra.mxu0 %v13934_v57  ;;  %10387 = vmatpush.bf16.msrb.mxu2 %v15594_v18  ;;  %v7112_v57 = vperm.slane %v18035_v33, 5  ;;  %v15275_v18 = vld [vmem:[#allocation13 + $0xaf8] sm:$0xf0]  ;;  %v14793_v48 = vld [vmem:[#allocation13 + $0x718] sm:$0xf] }
 0x57c   :  { %10297 = vmatpush.bf16.msrb.mxu3 %v15814_v59  ;;  %v15278_v17 = vor.u32 %v17098_v7, %v15275_v18  ;;  %v15433_v59 = vld [vmem:[#allocation13 + $0xc18] sm:$0xf]  ;;  %v10136_v29 = vpop.f32.mrf.mxu2  ;;  %v16938_v52 = vld [vmem:[#allocation13 + $0x5dc] sm:$0xf] }
 0x57d   :  { %10430 = vmatpush.bf16.msra.mxu1 %v14190_v45  ;;  %v15307_v45 = vld [vmem:[#allocation13 + $0xb38] sm:$0xf0]  ;;  %v15434_v32 = vor.u32 %v17142_v36, %v15433_v59  ;;  %v14761_v59 = vld [vmem:[#allocation13 + $0x6d8] sm:$0xf] }
 0x57e   :  { %v15310_v23 = vor.u32 %v17106_v42, %v15307_v45  ;;  %v14635_v54 = vld [vmem:[#allocation13 + $0x5f8] sm:$0xf0]  ;;  %v14857_v42 = vld [vmem:[#allocation13 + $0x798] sm:$0xf] }
 0x57f   :  { %10418 = vmatpush.bf16.msra.mxu0 %v13902_v39  ;;  %10388 = vmatpush.bf16.msrb.mxu2 %v15562_v53  ;;  %v17034_v39 = vld [vmem:[#allocation13 + $0x8dc] sm:$0xf]  ;;  %v10212_v44 = vpop.f32.mrf.mxu0  ;;  %v14638_v56 = vor.u32 %v16938_v52, %v14635_v54  ;;  %v16974_v36 = vld [vmem:[#allocation13 + $0x6f4] sm:$0xf0] }
 0x580   :  { %10298 = vmatpush.bf16.msrb.mxu3 %v15782_v30  ;;  %v15243_v53 = vld [vmem:[#allocation13 + $0xab8] sm:$0xf0]  ;;  %v14729_v29 = vld [vmem:[#allocation13 + $0x698] sm:$0xf] }
 0x581   :  { %10431 = vmatpush.bf16.msra.mxu1 %v14158_v35  ;;  %v10213_v35 = vadd.f32 %v10212_v44, %v7112_v57  ;;  %v10225_v24 = vpop.f32.mrf.mxu1  ;;  %v17018_v30 = vld [vmem:[#allocation13 + $0x85c] sm:$0xf] }
 0x582   :  { %10419 = vmatmul.bf16.vlgmr.msra.gmra.mxu0 %v17860_v11  ;;  %v15497_v11 = vld [vmem:[#allocation13 + $0xc98] sm:$0xf]  ;;  %v14955_v57 = vld [vmem:[#allocation13 + $0x878] sm:$0xf0] }
 0x583   :  { %10463 = vmatpush.bf16.msrb.mxu0 %v15150_v1  ;;  %10389 = vmatpush.bf16.msrb.mxu2 %v15530_v20  ;;  %v15498_v10 = vor.u32 %v17158_v41, %v15497_v11  ;;  %v17209_v1 = vld [vmem:[#allocation13 + $0xe54] sm:$0xf]  ;;  %v18070_v5 = vadd.f32 %v10225_v24, %v10213_v35  ;;  %v15246_v20 = vor.u32 %v17090_v6, %v15243_v53  ;;  %v17082_v11 = vld [vmem:[#allocation13 + $0xa5c] sm:$0xf] }
 0x584   :  { %10432 = vmatmul.bf16.vlgmr.msra.gmra.mxu1 %v17862_v12  ;;  %v18065_v12 = vpop.f32.mrf.mxu3  ;;  %10299 = vmatpush.bf16.msrb.mxu3 %v15750_v55  ;;  %v15718_v0 = vor.u32 %v17209_v1, %v15715_v19  ;;  %v15211_v41 = vld [vmem:[#allocation13 + $0xa78] sm:$0xf0]  ;;  %v14958_v45 = vor.u32 %v17018_v30, %v14955_v57 }
 0x585   :  { %10476 = vmatpush.bf16.msrb.mxu1 %v15406_v63  ;;  %v15022_v63 = vor.u32 %v17034_v39, %v15019_v27  ;;  %v14603_v55 = vld [vmem:[#allocation13 + $0x5b8] sm:$0xf0]  ;;  %v15214_v44 = vor.u32 %v17082_v11, %v15211_v41  ;;  %v10044_v35 = vadd.f32 %v18065_v12, %v18041_v49  ;;  %v16982_v49 = vld [vmem:[#allocation13 + $0x734] sm:$0xf0] }
 0x586   :  { %v17010_v39 = vld [vmem:[#allocation13 + $0x81c] sm:$0xf]  ;;  %v14665_v11 = vld [vmem:[#allocation13 + $0x618] sm:$0xf] }
 0x587   :  { %10464 = vmatpush.bf16.msrb.mxu0 %v15118_v46  ;;  %10390 = vmatpush.bf16.msrb.mxu2 %v15498_v10  ;;  %v15683_v46 = vld [vmem:[#allocation13 + $0xe30] sm:$0xf0]  ;;  %v10214_v15 = vpop.f32.mrf.mxu0  ;;  %v14923_v27 = vld [vmem:[#allocation13 + $0x838] sm:$0xf0]  ;;  %v14858_v10 = vor.u32 %v16998_v47, %v14857_v42  ;;  %v10057_v25 = vadd.f32 %v18027_v31, %v10044_v35  ;;  %v14762_v31 = vor.u32 %v16974_v36, %v14761_v59  ;;  %v16950_v41 = vld [vmem:[#allocation13 + $0x634] sm:$0xf0] }
 0x588   :  { %10300 = vmatpush.bf16.msrb.mxu3 %v15718_v0  ;;  %v17074_v1 = vld [vmem:[#allocation13 + $0xa1c] sm:$0xf]  ;;  %v14926_v24 = vor.u32 %v17010_v39, %v14923_v27  ;;  %v14826_v0 = vor.u32 %v16990_v60, %v14825_v26  ;;  %v14697_v15 = vld [vmem:[#allocation13 + $0x658] sm:$0xf] }
 0x589   :  { %10477 = vmatpush.bf16.msrb.mxu1 %v15374_v22  ;;  %v14889_v22 = vld [vmem:[#allocation13 + $0x7d8] sm:$0xf]  ;;  %v15179_v19 = vld [vmem:[#allocation13 + $0xa38] sm:$0xf0] }
 0x58a   :  { %v14890_v14 = vor.u32 %v17006_v61, %v14889_v22  ;;  %v16922_v7 = vld [vmem:[#allocation13 + $0x55c] sm:$0xf]  ;;  %v10070_v22 = vadd.f32 %v18029_v51, %v10057_v25  ;;  %v16966_v61 = vld [vmem:[#allocation13 + $0x6b4] sm:$0xf0] }
 0x58b   :  { %10465 = vmatpush.bf16.msrb.mxu0 %v15086_v38  ;;  %v15686_v38 = vor.u32 %v17201_v9, %v15683_v46  ;;  %10391 = vmatpush.bf16.msrb.mxu2 %v15466_v50  ;;  %v14571_v18 = vld [vmem:[#allocation13 + $0x578] sm:$0xf0]  ;;  %v14730_v51 = vor.u32 %v16966_v61, %v14729_v29  ;;  %v15913_v47 = vld [vmem:[#allocation13 + $0xfd8] sm:$0xf] }
 0x58c   :  { %v10045_v34 = vpop.f32.mrf.mxu3  ;;  %v14574_v9 = vor.u32 %v16922_v7, %v14571_v18  ;;  %v16914_v12 = vld [vmem:[#allocation13 + $0x51c] sm:$0xf]  ;;  %v17254_v60 = vld [vmem:[#allocation13 + $0xfb4] sm:$0xf0] }
 0x58d   :  { %10478 = vmatpush.bf16.msrb.mxu1 %v15342_v40  ;;  %v10227_v40 = vpop.f32.mrf.mxu1  ;;  %10301 = vmatpush.bf16.msrb.mxu3 %v15686_v38  ;;  %v14539_v50 = vld [vmem:[#allocation13 + $0x538] sm:$0xf0]  ;;  %v15753_v61 = vld [vmem:[#allocation13 + $0xe98] sm:$0xf] }
 0x58e   :  { %v14542_v46 = vor.u32 %v16914_v12, %v14539_v50  ;;  %v16906_v6 = vld [vmem:[#allocation13 + $0x4dc] sm:$0xf] }
 0x58f   :  { %10466 = vmatpush.bf16.msrb.mxu0 %v15054_v2  ;;  %v16930_v2 = vld [vmem:[#allocation13 + $0x59c] sm:$0xf]  ;;  %10392 = vmatpush.bf16.msrb.mxu2 %v15434_v32  ;;  %v16958_v32 = vld [vmem:[#allocation13 + $0x674] sm:$0xf0] }
 0x590   :  { %10302 = vmatmul.bf16.vlgmr.msrb.gmra.mxu3 %v17956_v16  ;;  %v14507_v53 = vld [vmem:[#allocation13 + $0x4f8] sm:$0xf0] }
 0x591   :  { %10479 = vmatpush.bf16.msrb.mxu1 %v15310_v23  ;;  %10346 = vmatpush.bf16.msra.mxu3 %v14890_v14  ;;  %v14606_v23 = vor.u32 %v16930_v2, %v14603_v55  ;;  %v14510_v34 = vor.u32 %v16906_v6, %v14507_v53  ;;  %v16898_v52 = vld [vmem:[#allocation13 + $0x49c] sm:$0xf]  ;;  %v14698_v14 = vor.u32 %v16958_v32, %v14697_v15  ;;  %v17262_v55 = vld [vmem:[#allocation13 + $0xff4] sm:$0xf0] }
 0x592   :  { %10393 = vmatmul.bf16.vlgmr.msrb.gmra.mxu2 %v17927_v62  ;;  %v14475_v54 = vld [vmem:[#allocation13 + $0x4b8] sm:$0xf0]  ;;  %v15914_v26 = vor.u32 %v17262_v55, %v15913_v47  ;;  %v15689_v55 = vld [vmem:[#allocation13 + $0xe18] sm:$0xf] }
 0x593   :  { %10467 = vmatpush.bf16.msrb.mxu0 %v15022_v63  ;;  %10437 = vmatpush.bf16.msra.mxu2 %v14638_v56  ;;  %v15182_v63 = vor.u32 %v17074_v1, %v15179_v19  ;;  %v16890_v40 = vld [vmem:[#allocation13 + $0x45c] sm:$0xf] }
 0x594   :  { %v10095_v38 = vpop.f32.mrf.mxu3  ;;  %v16882_v42 = vld [vmem:[#allocation13 + $0x41c] sm:$0xf] }
 0x595   :  { %10480 = vmatpush.bf16.msrb.mxu1 %v15278_v17  ;;  %10347 = vmatpush.bf16.msra.mxu3 %v14858_v10  ;;  %v14794_v17 = vor.u32 %v16982_v49, %v14793_v48  ;;  %v17194_v39 = vld [vmem:[#allocation13 + $0xddc] sm:$0xf]  ;;  %v17246_v48 = vld [vmem:[#allocation13 + $0xf74] sm:$0xf0] }
 0x596   :  { %v15659_v27 = vld [vmem:[#allocation13 + $0xdf8] sm:$0xf0] }
 0x597   :  { %10468 = vmatpush.bf16.msrb.mxu0 %v14990_v4  ;;  %10438 = vmatpush.bf16.msra.mxu2 %v14606_v23  ;;  %v10083_v4 = vadd.f32 %v18054_v43, %v10070_v22  ;;  %v14443_v43 = vld [vmem:[#allocation13 + $0x478] sm:$0xf0]  ;;  %v14666_v23 = vor.u32 %v16950_v41, %v14665_v11  ;;  %v15662_v35 = vor.u32 %v17194_v39, %v15659_v27  ;;  %v15785_v22 = vld [vmem:[#allocation13 + $0xed8] sm:$0xf] }
 0x598   :  { %v14446_v56 = vor.u32 %v16890_v40, %v14443_v43  ;;  %v17186_v7 = vld [vmem:[#allocation13 + $0xd9c] sm:$0xf]  ;;  %v15721_v43 = vld [vmem:[#allocation13 + $0xe58] sm:$0xf] }
 0x599   :  { %10481 = vmatpush.bf16.msrb.mxu1 %v15246_v20  ;;  %10348 = vmatpush.bf16.msra.mxu3 %v14826_v0  ;;  %v10096_v30 = vadd.f32 %v10095_v38, %v10083_v4  ;;  %v15627_v18 = vld [vmem:[#allocation13 + $0xdb8] sm:$0xf0]  ;;  %v17206_v39 = vld [vmem:[#allocation13 + $0xe34] sm:$0xf0] }
 0x59a   :  { %v15630_v0 = vor.u32 %v17186_v7, %v15627_v18  ;;  %v17178_v25 = vld [vmem:[#allocation13 + $0xd5c] sm:$0xf] }
 0x59b   :  { %10469 = vmatpush.bf16.msrb.mxu0 %v14958_v45  ;;  %10439 = vmatpush.bf16.msra.mxu2 %v14574_v9  ;;  %10518 = vst [vmem:[#allocation16 + $0x18] sm:$0xff] %v10096_v30  ;;  %v14411_v45 = vld [vmem:[#allocation13 + $0x438] sm:$0xf0]  ;;  %v15849_v9 = vld [vmem:[#allocation13 + $0xf58] sm:$0xf]  ;;  %v7113_v30 = vperm.slane %v18035_v33, 6 }
 0x59c   :  { %v10097_v2 = vpop.f32.mrf.mxu3  ;;  %v14414_v1 = vor.u32 %v16882_v42, %v14411_v45  ;;  %v15595_v49 = vld [vmem:[#allocation13 + $0xd78] sm:$0xf0]  ;;  %v15850_v12 = vor.u32 %v17246_v48, %v15849_v9 }
 0x59d   :  { %10482 = vmatpush.bf16.msrb.mxu1 %v15214_v44  ;;  %10349 = vmatpush.bf16.msra.mxu3 %v14794_v17  ;;  %v15598_v50 = vor.u32 %v17178_v25, %v15595_v49  ;;  %v15817_v17 = vld [vmem:[#allocation13 + $0xf18] sm:$0xf]  ;;  %v17170_v59 = vld [vmem:[#allocation13 + $0xd1c] sm:$0xf] }
 0x59e   :  { %v15563_v36 = vld [vmem:[#allocation13 + $0xd38] sm:$0xf0] }
 0x59f   :  { %10470 = vmatpush.bf16.msrb.mxu0 %v14926_v24  ;;  %10440 = vmatpush.bf16.msra.mxu2 %v14542_v46  ;;  %v18083_v57 = vpop.f32.mrf.mxu0  ;;  %v15881_v24 = vld [vmem:[#allocation13 + $0xf98] sm:$0xf]  ;;  %v15566_v53 = vor.u32 %v17170_v59, %v15563_v36  ;;  %v15531_v29 = vld [vmem:[#allocation13 + $0xcf8] sm:$0xf0] }
 0x5a0   :  { %v17238_v46 = vld [vmem:[#allocation13 + $0xf34] sm:$0xf0]  ;;  %v15499_v38 = vld [vmem:[#allocation13 + $0xcb8] sm:$0xf0] }
 0x5a1   :  { %10483 = vmatpush.bf16.msrb.mxu1 %v15182_v63  ;;  %10350 = vmatpush.bf16.msra.mxu3 %v14762_v31  ;;  %v18085_v20 = vpop.f32.mrf.mxu1  ;;  %v15882_v63 = vor.u32 %v17254_v60, %v15881_v24  ;;  %v15818_v6 = vor.u32 %v17238_v46, %v15817_v17  ;;  %v17230_v31 = vld [vmem:[#allocation13 + $0xef4] sm:$0xf0]  ;;  %v17146_v11 = vld [vmem:[#allocation13 + $0xc5c] sm:$0xf] }
 0x5a2   :  { %10471 = vmatmul.bf16.vlgmr.msrb.gmra.mxu0 %v17884_v13  ;;  %v18081_v13 = vpop.f32.mrf.mxu2  ;;  %v15786_v4 = vor.u32 %v17230_v31, %v15785_v22  ;;  %v15467_v41 = vld [vmem:[#allocation13 + $0xc78] sm:$0xf0] }
 0x5a3   :  { %10441 = vmatpush.bf16.msra.mxu2 %v14510_v34  ;;  %v17162_v34 = vld [vmem:[#allocation13 + $0xcdc] sm:$0xf]  ;;  %v15470_v2 = vor.u32 %v17146_v11, %v15467_v41 }
 0x5a4   :  { %10484 = vmatmul.bf16.vlgmr.msrb.gmra.mxu1 %v17897_v8  ;;  %v14478_v8 = vor.u32 %v16898_v52, %v14475_v54  ;;  %v17222_v52 = vld [vmem:[#allocation13 + $0xeb4] sm:$0xf0]  ;;  %v17154_v54 = vld [vmem:[#allocation13 + $0xc9c] sm:$0xf] }
 0x5a5   :  { %10351 = vmatpush.bf16.msra.mxu3 %v14730_v51  ;;  %v15754_v32 = vor.u32 %v17222_v52, %v15753_v61  ;;  %v15502_v40 = vor.u32 %v17154_v54, %v15499_v38  ;;  %v17138_v27 = vld [vmem:[#allocation13 + $0xc1c] sm:$0xf] }
 0x5a6   :  { %v16994_v7 = vld [vmem:[#allocation13 + $0x79c] sm:$0xf] }
 0x5a7   :  { %10442 = vmatpush.bf16.msra.mxu2 %v14478_v8  ;;  %v10266_v10 = vpop.f32.mrf.mxu0  ;;  %v14859_v18 = vld [vmem:[#allocation13 + $0x7b8] sm:$0xf0] }
 0x5a8   :  { %v14891_v10 = vld [vmem:[#allocation13 + $0x7f8] sm:$0xf0] }
 0x5a9   :  { %10352 = vmatpush.bf16.msra.mxu3 %v14698_v14  ;;  %v10279_v19 = vpop.f32.mrf.mxu1  ;;  %v14827_v9 = vld [vmem:[#allocation13 + $0x778] sm:$0xf0] }
 0x5aa   :  { %v10188_v44 = vpop.f32.mrf.mxu2  ;;  %v15690_v19 = vor.u32 %v17206_v39, %v15689_v55  ;;  %v16978_v49 = vld [vmem:[#allocation13 + $0x71c] sm:$0xf] }
 0x5ab   :  { %10443 = vmatpush.bf16.msra.mxu2 %v14446_v56  ;;  %v17214_v56 = vld [vmem:[#allocation13 + $0xe74] sm:$0xf0]  ;;  %v17002_v44 = vld [vmem:[#allocation13 + $0x7dc] sm:$0xf] }
 0x5ac   :  { %v15722_v33 = vor.u32 %v17214_v56, %v15721_v43  ;;  %v14894_v24 = vor.u32 %v17002_v44, %v14891_v10  ;;  %v16970_v46 = vld [vmem:[#allocation13 + $0x6dc] sm:$0xf] }
 0x5ad   :  { %10353 = vmatpush.bf16.msra.mxu3 %v14666_v23  ;;  %v14763_v59 = vld [vmem:[#allocation13 + $0x6f8] sm:$0xf0] }
 0x5ae   :  { %v16946_v52 = vld [vmem:[#allocation13 + $0x61c] sm:$0xf] }
 0x5af   :  { %10444 = vmatpush.bf16.msra.mxu2 %v14414_v1  ;;  %v14667_v54 = vld [vmem:[#allocation13 + $0x638] sm:$0xf0] }
 0x5b0   :  { %10354 = vmatmul.bf16.vlgmr.msra.gmra.mxu3 %v17901_v37  ;;  %v17258_v38 = vld [vmem:[#allocation13 + $0xfdc] sm:$0xf] }
 0x5b1   :  { %10398 = vmatpush.bf16.msrb.mxu3 %v15914_v26  ;;  %v10147_v51 = vpop.f32.mrf.mxu3  ;;  %v15883_v56 = vld [vmem:[#allocation13 + $0xfb8] sm:$0xf0] }
 0x5b2   :  { %10445 = vmatmul.bf16.vlgmr.msra.gmra.mxu2 %v17878_v21  ;;  %v15534_v21 = vor.u32 %v17162_v34, %v15531_v29  ;;  %v10148_v48 = vadd.f32 %v10147_v51, %v18068_v58  ;;  %v14731_v58 = vld [vmem:[#allocation13 + $0x6b8] sm:$0xf0] }
 0x5b3   :  { %10489 = vmatpush.bf16.msrb.mxu2 %v15662_v35  ;;  %v10238_v8 = vpop.f32.mrf.mxu2  ;;  %v17242_v41 = vld [vmem:[#allocation13 + $0xf5c] sm:$0xf] }
 0x5b4   :  { %v18091_v15 = vadd.f32 %v10238_v8, %v18070_v5  ;;  %v15435_v5 = vld [vmem:[#allocation13 + $0xc38] sm:$0xf0]  ;;  %v14670_v8 = vor.u32 %v16946_v52, %v14667_v54 }
 0x5b5   :  { %10399 = vmatpush.bf16.msrb.mxu3 %v15882_v63  ;;  %v15438_v26 = vor.u32 %v17138_v27, %v15435_v5  ;;  %v14862_v63 = vor.u32 %v16994_v7, %v14859_v18  ;;  %v17226_v39 = vld [vmem:[#allocation13 + $0xedc] sm:$0xf] }
 0x5b6   :  { %v15787_v27 = vld [vmem:[#allocation13 + $0xef8] sm:$0xf0] }
 0x5b7   :  { %10490 = vmatpush.bf16.msrb.mxu2 %v15630_v0  ;;  %v16986_v0 = vld [vmem:[#allocation13 + $0x75c] sm:$0xf]  ;;  %v15790_v5 = vor.u32 %v17226_v39, %v15787_v27 }
 0x5b8   :  { %v14830_v25 = vor.u32 %v16986_v0, %v14827_v9  ;;  %v17218_v44 = vld [vmem:[#allocation13 + $0xe9c] sm:$0xf] }
 0x5b9   :  { %10400 = vmatpush.bf16.msrb.mxu3 %v15850_v12  ;;  %v10149_v23 = vpop.f32.mrf.mxu3  ;;  %v14795_v12 = vld [vmem:[#allocation13 + $0x738] sm:$0xf0] }
 0x5ba   :  { %v14798_v17 = vor.u32 %v16978_v49, %v14795_v12  ;;  %v15755_v10 = vld [vmem:[#allocation13 + $0xeb8] sm:$0xf0]  ;;  %v17280_v23 = vld [vmem:[#allocation15] sm:$0xff] }
 0x5bb   :  { %10491 = vmatpush.bf16.msrb.mxu2 %v15598_v50  ;;  %v10240_v1 = vpop.f32.mrf.mxu2  ;;  %v10161_v50 = vadd.f32 %v18056_v28, %v10148_v48  ;;  %v16954_v28 = vld [vmem:[#allocation13 + $0x65c] sm:$0xf] }
 0x5bc   :  { %v7114_v1 = vperm.slane %v17280_v23, 7  ;;  %v17202_v48 = vld [vmem:[#allocation13 + $0xe1c] sm:$0xf] }
 0x5bd   :  { %10401 = vmatpush.bf16.msrb.mxu3 %v15818_v6  ;;  %v10174_v36 = vadd.f32 %v18058_v3, %v10161_v50  ;;  %v14766_v6 = vor.u32 %v16970_v46, %v14763_v59 }
 0x5bf   :  { %10492 = vmatpush.bf16.msrb.mxu2 %v15566_v53  ;;  %v10316_v14 = vpop.f32.mrf.mxu0  ;;  %v16962_v53 = vld [vmem:[#allocation13 + $0x69c] sm:$0xf]  ;;  %v10187_v22 = vadd.f32 %v18081_v13, %v10174_v36 }
 0x5c0   :  { %v10317_v42 = vadd.f32 %v10316_v14, %v7113_v30  ;;  %v14734_v29 = vor.u32 %v16962_v53, %v14731_v58  ;;  %v15915_v30 = vld [vmem:[#allocation13 + $0xff8] sm:$0xf0] }
 0x5c1   :  { %10402 = vmatpush.bf16.msrb.mxu3 %v15786_v4  ;;  %v10329_v45 = vpop.f32.mrf.mxu1  ;;  %v17250_v14 = vld [vmem:[#allocation13 + $0xf9c] sm:$0xf] }
 0x5c2   :  { %v18093_v47 = vadd.f32 %v10329_v45, %v10317_v42  ;;  %v15886_v11 = vor.u32 %v17250_v14, %v15883_v56  ;;  %v15851_v42 = vld [vmem:[#allocation13 + $0xf78] sm:$0xf0] }
 0x5c3   :  { %10493 = vmatpush.bf16.msrb.mxu2 %v15534_v21  ;;  %v14699_v21 = vld [vmem:[#allocation13 + $0x678] sm:$0xf0]  ;;  %v15854_v45 = vor.u32 %v17242_v41, %v15851_v42 }
 0x5c4   :  { %v14702_v3 = vor.u32 %v16954_v28, %v14699_v21 }
 0x5c5   :  { %10403 = vmatpush.bf16.msrb.mxu3 %v15754_v32 }
 0x5c7   :  { %10494 = vmatpush.bf16.msrb.mxu2 %v15502_v40  ;;  %v10318_v35 = vpop.f32.mrf.mxu0  ;;  %v15918_v40 = vor.u32 %v17258_v38, %v15915_v30 }
 0x5c8   :  { %v15758_v35 = vor.u32 %v17218_v44, %v15755_v10 }
 0x5c9   :  { %10404 = vmatpush.bf16.msrb.mxu3 %v15722_v33  ;;  %v10331_v60 = vpop.f32.mrf.mxu1  ;;  %v17234_v33 = vld [vmem:[#allocation13 + $0xf1c] sm:$0xf] }
 0x5ca   :  { %v15723_v60 = vld [vmem:[#allocation13 + $0xe78] sm:$0xf0] }
 0x5cb   :  { %10495 = vmatpush.bf16.msrb.mxu2 %v15470_v2  ;;  %v15819_v2 = vld [vmem:[#allocation13 + $0xf38] sm:$0xf0] }
 0x5cc   :  { %v15822_v55 = vor.u32 %v17234_v33, %v15819_v2 }
 0x5cd   :  { %10405 = vmatpush.bf16.msrb.mxu3 %v15690_v19 }
 0x5cf   :  { %10496 = vmatpush.bf16.msrb.mxu2 %v15438_v26 }
 0x5d0   :  { %10406 = vmatmul.bf16.vlgmr.msrb.gmra.mxu3 %v17956_v16 }
 0x5d1   :  { %10450 = vmatpush.bf16.msra.mxu3 %v14894_v24  ;;  %v10199_v31 = vpop.f32.mrf.mxu3  ;;  %v17210_v24 = vld [vmem:[#allocation13 + $0xe5c] sm:$0xf] }
 0x5d2   :  { %10497 = vmatmul.bf16.vlgmr.msrb.gmra.mxu2 %v17927_v62  ;;  %v10200_v62 = vadd.f32 %v10199_v31, %v10187_v22  ;;  %v15726_v0 = vor.u32 %v17210_v24, %v15723_v60 }
 0x5d4   :  { %10519 = vst [vmem:[#allocation16 + $0x20] sm:$0xff] %v10200_v62 }
 0x5d5   :  { %10451 = vmatpush.bf16.msra.mxu3 %v14862_v63  ;;  %v18101_v34 = vpop.f32.mrf.mxu2 }
 0x5d9   :  { %10452 = vmatpush.bf16.msra.mxu3 %v14830_v25  ;;  %v10201_v13 = vpop.f32.mrf.mxu3  ;;  %v15691_v25 = vld [vmem:[#allocation13 + $0xe38] sm:$0xf0] }
 0x5da   :  { %v15694_v50 = vor.u32 %v17202_v48, %v15691_v25 }
 0x5dd   :  { %10453 = vmatpush.bf16.msra.mxu3 %v14798_v17  ;;  %v10292_v51 = vpop.f32.mrf.mxu2 }
 0x5df   :  { %v18103_v4 = vpop.f32.mrf.mxu0 }
 0x5e1   :  { %10454 = vmatpush.bf16.msra.mxu3 %v14766_v6  ;;  %v18105_v61 = vpop.f32.mrf.mxu1 }
 0x5e5   :  { %10455 = vmatpush.bf16.msra.mxu3 %v14734_v29 }
 0x5e7   :  { %v10370_v32 = vpop.f32.mrf.mxu0 }
 0x5e9   :  { %10456 = vmatpush.bf16.msra.mxu3 %v14702_v3  ;;  %v10383_v43 = vpop.f32.mrf.mxu1 }
 0x5ed   :  { %10457 = vmatpush.bf16.msra.mxu3 %v14670_v8 }
 0x5f0   :  { %10458 = vmatmul.bf16.vlgmr.msra.gmra.mxu3 %v17901_v37 }
 0x5f1   :  { %10502 = vmatpush.bf16.msrb.mxu3 %v15918_v40 }
 0x5f4   :  { %v10251_v19 = vpop.f32.mrf.mxu3 }
 0x5f5   :  { %10503 = vmatpush.bf16.msrb.mxu3 %v15886_v11  ;;  %v10342_v26 = vpop.f32.mrf.mxu2 }
 0x5f6   :  { %v10343_v37 = vadd.f32 %v10342_v26, %v18093_v47  ;;  %v10252_v47 = vadd.f32 %v10251_v19, %v18091_v15 }
 0x5f8   :  { %v10265_v59 = vadd.f32 %v18083_v57, %v10252_v47 }
 0x5f9   :  { %10504 = vmatpush.bf16.msrb.mxu3 %v15854_v45 }
 0x5fa   :  { %v10278_v36 = vadd.f32 %v18085_v20, %v10265_v59 }
 0x5fc   :  { %v10253_v49 = vpop.f32.mrf.mxu3  ;;  %v10291_v6 = vadd.f32 %v18101_v34, %v10278_v36 }
 0x5fd   :  { %10505 = vmatpush.bf16.msrb.mxu3 %v15822_v55  ;;  %v10344_v12 = vpop.f32.mrf.mxu2 }
 0x5ff   :  { %v10420_v7 = vpop.f32.mrf.mxu0 }
 0x600   :  { %v10421_v18 = vadd.f32 %v10420_v7, %v7114_v1 }
 0x601   :  { %10506 = vmatpush.bf16.msrb.mxu3 %v15790_v5  ;;  %v10433_v63 = vpop.f32.mrf.mxu1 }
 0x602   :  { %v10434_v9 = vadd.f32 %v10433_v63, %v10421_v18 }
 0x605   :  { %10507 = vmatpush.bf16.msrb.mxu3 %v15758_v35 }
 0x607   :  { %v10422_v17 = vpop.f32.mrf.mxu0 }
 0x609   :  { %10508 = vmatpush.bf16.msrb.mxu3 %v15726_v0  ;;  %v10435_v46 = vpop.f32.mrf.mxu1 }
 0x60d   :  { %10509 = vmatpush.bf16.msrb.mxu3 %v15694_v50 }
 0x610   :  { %10510 = vmatmul.bf16.vlgmr.msrb.gmra.mxu3 %v17956_v16 }
 0x613   :  { %v10303_v53 = vpop.f32.mrf.mxu3 }
 0x614   :  { %v10304_v58 = vadd.f32 %v10303_v53, %v10291_v6 }
 0x615   :  { %v10394_v22 = vpop.f32.mrf.mxu2 }
 0x616   :  { %10520 = vst [vmem:[#allocation16 + $0x28] sm:$0xff] %v10304_v58 }
 0x61b   :  { %v10305_v29 = vpop.f32.mrf.mxu3 }
 0x61d   :  { %v10396_v28 = vpop.f32.mrf.mxu2 }
 0x61f   :  { %v10472_v31 = vpop.f32.mrf.mxu0 }
 0x621   :  { %v10485_v62 = vpop.f32.mrf.mxu1 }
 0x627   :  { %v10474_v21 = vpop.f32.mrf.mxu0 }
 0x629   :  { %v10487_v3 = vpop.f32.mrf.mxu1 }
 0x633   :  { %v10355_v52 = vpop.f32.mrf.mxu3 }
 0x634   :  { %v10356_v57 = vadd.f32 %v10355_v52, %v10343_v37 }
 0x635   :  { %v10446_v16 = vpop.f32.mrf.mxu2 }
 0x636   :  { %v10447_v54 = vadd.f32 %v10446_v16, %v10434_v9  ;;  %v10369_v20 = vadd.f32 %v18103_v4, %v10356_v57 }
 0x638   :  { %v10382_v34 = vadd.f32 %v18105_v61, %v10369_v20 }
 0x63a   :  { %v10395_v30 = vadd.f32 %v10394_v22, %v10382_v34 }
 0x63b   :  { %v10357_v15 = vpop.f32.mrf.mxu3 }
 0x63d   :  { %v10448_v38 = vpop.f32.mrf.mxu2 }
 0x653   :  { %v10407_v13 = vpop.f32.mrf.mxu3 }
 0x654   :  { %v10408_v8 = vadd.f32 %v10407_v13, %v10395_v30 }
 0x655   :  { %v10498_v51 = vpop.f32.mrf.mxu2 }
 0x656   :  { %10521 = vst [vmem:[#allocation16 + $0x30] sm:$0xff] %v10408_v8 }
 0x65b   :  { %v10409_v32 = vpop.f32.mrf.mxu3 }
 0x65d   :  { %v10500_v40 = vpop.f32.mrf.mxu2 }
 0x673   :  { %v10459_v43 = vpop.f32.mrf.mxu3 }
 0x674   :  { %v10460_v56 = vadd.f32 %v10459_v43, %v10447_v54 }
 0x676   :  { %v10473_v11 = vadd.f32 %v10472_v31, %v10460_v56 }
 0x678   :  { %v10486_v41 = vadd.f32 %v10485_v62, %v10473_v11 }
 0x67a   :  { %v10499_v4 = vadd.f32 %v10498_v51, %v10486_v41 }
 0x67b   :  { %v10461_v14 = vpop.f32.mrf.mxu3 }
 0x693   :  { %v10511_v61 = vpop.f32.mrf.mxu3 }
 0x694   :  { %v10512_v42 = vadd.f32 %v10511_v61, %v10499_v4 }
 0x696   :  { %10522 = vst [vmem:[#allocation16 + $0x38] sm:$0xff] %v10512_v42 }
 0x697   :  { %10533 = dma.vmem_to_hbm [thread:$0]  %s10529_s6, 1024, %s10531_s12, [#allocation6]  }
 0x69b   :  { %v10513_v45 = vpop.f32.mrf.mxu3 }
 0x69c   :  { %17481 = dma.done.wait [#allocation6], 1024  }
 0x69d   :  { %17482 = vsyncadd [#allocation6], 4294966272 }
 0x69e   :  { %10538 = vsyncpa [#allocation5], 1 }
 0x69f   :  { %10539 = vsyncpa [#allocation8], 1 }
 0x6a0   :  { %10540 = vsyncpa [#allocation11], 1 }
 0x6a1   :  { %10541 = vsyncpa [#allocation14], 1 }
 0x6a2   :  { %10542 = vsyncpa [#allocation6], 1 }

</bundles_post_ra>
